<compile_context>
chip_gen: v7x
topology: tpu7x:2x2x1
jax: 0.10.0
libtpu: 0.0.40
codegen_flags: <defaults>
</compile_context>

<pallas_src>
import math
import numpy as np
import jax
import jax.numpy as jnp
from jax import lax
from jax.experimental import pallas as pl
from jax.experimental.pallas import tpu as pltpu

EPS = 1e-5
_PARALLEL_B = pltpu.CompilerParams(dimension_semantics=("parallel",))


# -----------------------------------------------------------------------------
# BlockSpec helpers (full per-batch tiles, grid over batch only)
# -----------------------------------------------------------------------------

def _bspec_full(shape):
    zeros = (0,) * len(shape)
    return pl.BlockSpec(shape, lambda b: zeros)


def _bspec_batch(shape):
    zeros = (0,) * len(shape)
    return pl.BlockSpec((None,) + shape, lambda b: (b,) + zeros)


# -----------------------------------------------------------------------------
# Pallas kernels
# -----------------------------------------------------------------------------

def _conv_bn_relu_kernel(p_ref, w_ref, b_ref, o_ref):
    # p: (K, S) im2col patches, w: (Cout, K) BN-folded conv weight, b: (Cout, 1)
    y = jnp.dot(w_ref[...], p_ref[...], preferred_element_type=jnp.float32) + b_ref[...]
    o_ref[...] = jnp.maximum(y, 0.0)


def _conv_bn_relu_add_id_kernel(p_ref, w_ref, b_ref, x_ref, o_ref):
    # relu(bn2(conv2(.))) + identity shortcut
    y = jnp.dot(w_ref[...], p_ref[...], preferred_element_type=jnp.float32) + b_ref[...]
    o_ref[...] = jnp.maximum(y, 0.0) + x_ref[...]


def _conv_bn_relu_add_proj_kernel(p_ref, w_ref, b_ref, x_ref, wsc_ref, bsc_ref, o_ref):
    # relu(bn2(conv2(.))) + relu(bn_sc(conv1x1_sc(x)))  (projection shortcut)
    y = jnp.dot(w_ref[...], p_ref[...], preferred_element_type=jnp.float32) + b_ref[...]
    sc = jnp.dot(wsc_ref[...], x_ref[...], preferred_element_type=jnp.float32) + bsc_ref[...]
    o_ref[...] = jnp.maximum(y, 0.0) + jnp.maximum(sc, 0.0)


def _make_attn_qkv_kernel(heads, dim_head):
    inner = heads * dim_head

    def kernel(p_ref, wdw_ref, wpw_ref, rt_ref, o_ref):
        # p  : (9, C, S)        depthwise tap patches of (bn1(x) + pos-enc)
        # wdw: (9, C, 1)        to_qkv depthwise 3x3 weights (tap-major)
        # wpw: (3*inner, C)     to_qkv pointwise weights, head-grouped, q pre-scaled
        # rt : (S, rS)          bilinear (align_corners=True) k/v reduction matrix
        # o  : (inner, S)       attention output, head-grouped channel order
        dw = p_ref[0] * wdw_ref[0]
        for t in range(1, 9):
            dw = dw + p_ref[t] * wdw_ref[t]
        qkv = jnp.dot(wpw_ref[...], dw, preferred_element_type=jnp.float32)  # (3I, S)
        rt = rt_ref[...]
        k = qkv[inner:2 * inner]
        v = qkv[2 * inner:3 * inner]
        kr = jnp.dot(k, rt, preferred_element_type=jnp.float32)             # (I, rS)
        vr = jnp.dot(v, rt, preferred_element_type=jnp.float32)             # (I, rS)
        outs = []
        for h in range(heads):
            sl = slice(h * dim_head, (h + 1) * dim_head)
            qh, kh, vh = qkv[sl], kr[sl], vr[sl]                              # (dh, S/rS)
            s = lax.dot_general(qh, kh, (((0,), (0,)), ((), ())),
                                preferred_element_type=jnp.float32)          # (S, rS)
            m = jnp.max(s, axis=-1, keepdims=True)
            e = jnp.exp(s - m)
            p = e * pl.reciprocal(jnp.sum(e, axis=-1, keepdims=True), approx=True)
            outs.append(lax.dot_general(vh, p, (((1,), (1,)), ((), ())),
                                        preferred_element_type=jnp.float32))  # (dh, S)
        o_ref[...] = jnp.concatenate(outs, axis=0)

    return kernel


def _attn_out_mlp_kernel(p_ref, wdw_ref, wpw_ref, x_ref, s2_ref, b2_ref, wmlp_ref, o_ref):
    # Fused: to_out (depthwise 3x3 + pointwise) -> +x residual -> bn2 -> mlp -> relu -> +residue
    dw = p_ref[0] * wdw_ref[0]
    for t in range(1, 9):
        dw = dw + p_ref[t] * wdw_ref[t]
    o = jnp.dot(wpw_ref[...], dw, preferred_element_type=jnp.float32)    # (dim, S)
    out1 = o + x_ref[...]                                                # attn(out) + x
    xn = out1 * s2_ref[...] + b2_ref[...]                                # bn2 (eval)
    y = jnp.dot(wmlp_ref[...], xn, preferred_element_type=jnp.float32)   # 1x1 mlp
    o_ref[...] = jnp.maximum(y, 0.0) + out1


# -----------------------------------------------------------------------------
# XLA-side layout plumbing (im2col taps, maxpool)
# -----------------------------------------------------------------------------

def _dw_tap_patches(x):
    # x: (B, C, H, W) -> (B, 9, C, H*W): 9 zero-padded shifted copies (3x3 taps)
    B, C, H, W = x.shape
    xp = jnp.pad(x, ((0, 0), (0, 0), (1, 1), (1, 1)))
    taps = [xp[:, :, ki:ki + H, kj:kj + W].reshape(B, C, H * W)
            for ki in range(3) for kj in range(3)]
    return jnp.stack(taps, axis=1)


def _conv_im2col(x):
    # (B, C, H, W) -> (B, 9*C, H*W), tap-major / channel-minor row order
    B, C, H, W = x.shape
    return _dw_tap_patches(x).reshape(B, 9 * C, H * W)


def maxpool2x2(x):
    B, C, H, W = x.shape
    return x.reshape(B, C, H // 2, 2, W // 2, 2).max(axis=(3, 5))


# -----------------------------------------------------------------------------
# Module wrappers
# -----------------------------------------------------------------------------

def conv3x3_bn_relu(x, w_folded, b_folded):
    B, Cin, H, W = x.shape
    S = H * W
    Cout, K = w_folded.shape
    patches = _conv_im2col(x)
    out = pl.pallas_call(
        _conv_bn_relu_kernel,
        out_shape=jax.ShapeDtypeStruct((B, Cout, S), jnp.float32),
        grid=(B,),
        in_specs=[_bspec_batch((K, S)), _bspec_full((Cout, K)), _bspec_full((Cout, 1))],
        out_specs=_bspec_batch((Cout, S)),
        compiler_params=_PARALLEL_B,
    )(patches, w_folded, b_folded)
    return out.reshape(B, Cout, H, W)


def residual_basic_block(x, bp):
    B, Cin, H, W = x.shape
    S = H * W
    Cout = bp["w1"].shape[0]
    y1 = conv3x3_bn_relu(x, bp["w1"], bp["b1"])
    patches2 = _conv_im2col(y1)
    xflat = x.reshape(B, Cin, S)
    K2 = 9 * Cout
    if bp.get("wsc") is not None:
        out = pl.pallas_call(
            _conv_bn_relu_add_proj_kernel,
            out_shape=jax.ShapeDtypeStruct((B, Cout, S), jnp.float32),
            grid=(B,),
            in_specs=[_bspec_batch((K2, S)), _bspec_full((Cout, K2)), _bspec_full((Cout, 1)),
                      _bspec_batch((Cin, S)), _bspec_full((Cout, Cin)), _bspec_full((Cout, 1))],
            out_specs=_bspec_batch((Cout, S)),
            compiler_params=_PARALLEL_B,
        )(patches2, bp["w2"], bp["b2"], xflat, bp["wsc"], bp["bsc"])
    else:
        out = pl.pallas_call(
            _conv_bn_relu_add_id_kernel,
            out_shape=jax.ShapeDtypeStruct((B, Cout, S), jnp.float32),
            grid=(B,),
            in_specs=[_bspec_batch((K2, S)), _bspec_full((Cout, K2)), _bspec_full((Cout, 1)),
                      _bspec_batch((Cin, S))],
            out_specs=_bspec_batch((Cout, S)),
            compiler_params=_PARALLEL_B,
        )(patches2, bp["w2"], bp["b2"], xflat)
    return out.reshape(B, Cout, H, W)


def trans_basic_block(x, tp, *, heads, dim_head):
    B, C, H, W = x.shape
    S = H * W
    inner = heads * dim_head
    rS = tp["rt"].shape[1]

    # bn1 (eval) + positional encoding folded into one affine: x*s + (shift + pe)
    xin = x * tp["bn1_s"][None, :, None, None] + tp["bn1_addend"][None]
    patches_q = _dw_tap_patches(xin)                                       # (B, 9, C, S)

    attn = pl.pallas_call(
        _make_attn_qkv_kernel(heads, dim_head),
        out_shape=jax.ShapeDtypeStruct((B, inner, S), jnp.float32),
        grid=(B,),
        in_specs=[_bspec_batch((9, C, S)), _bspec_full((9, C, 1)),
                  _bspec_full((3 * inner, C)), _bspec_full((S, rS))],
        out_specs=_bspec_batch((inner, S)),
        compiler_params=_PARALLEL_B,
    )(patches_q, tp["wdw_qkv"], tp["wpw_qkv"], tp["rt"])

    patches_o = _dw_tap_patches(attn.reshape(B, inner, H, W))              # (B, 9, I, S)
    out = pl.pallas_call(
        _attn_out_mlp_kernel,
        out_shape=jax.ShapeDtypeStruct((B, C, S), jnp.float32),
        grid=(B,),
        in_specs=[_bspec_batch((9, inner, S)), _bspec_full((9, inner, 1)),
                  _bspec_full((C, inner)), _bspec_batch((C, S)),
                  _bspec_full((C, 1)), _bspec_full((C, 1)), _bspec_full((C, C))],
        out_specs=_bspec_batch((C, S)),
        compiler_params=_PARALLEL_B,
    )(patches_o, tp["wdw_out"], tp["wpw_out"], x.reshape(B, C, S),
      tp["bn2_s"], tp["bn2_b"], tp["w_mlp"])
    return out.reshape(B, C, H, W)


def encode_transformer_forward(x, params, *, heads, dim_head):
    feats = []
    x1 = residual_basic_block(x, params["rb1_1"])
    x1 = residual_basic_block(x1, params["rb1_2"])
    feats.append(x1)
    x2 = residual_basic_block(maxpool2x2(x1), params["rb2"]); feats.append(x2)
    x3 = residual_basic_block(maxpool2x2(x2), params["rb3"]); feats.append(x3)
    x4 = residual_basic_block(maxpool2x2(x3), params["rb4"]); feats.append(x4)
    x5 = residual_basic_block(maxpool2x2(x4), params["rb5"])
    x5 = trans_basic_block(x5, params["trans"], heads=heads, dim_head=dim_head)
    feats.append(x5)
    return tuple(feats)


# -----------------------------------------------------------------------------
# Host-side constants: positional encoding, bilinear (align_corners=True) matrices
# -----------------------------------------------------------------------------

def positional_encoding_nchw(channels_param, H, W, orig_ch):
    c = int(np.ceil(channels_param / 2))
    inv_freq = 1.0 / (10000.0 ** (np.arange(0, c, 2, dtype=np.float32) / c))
    pos_x = np.arange(H, dtype=np.float32)
    pos_y = np.arange(W, dtype=np.float32)
    sin_x = np.einsum("i,j->ij", pos_x, inv_freq)
    sin_y = np.einsum("i,j->ij", pos_y, inv_freq)
    emb_x = np.concatenate([np.sin(sin_x), np.cos(sin_x)], -1)[:, None, :]
    emb_y = np.concatenate([np.sin(sin_y), np.cos(sin_y)], -1)
    emb = np.zeros((H, W, 2 * c), np.float32)
    emb[:, :, :c] = emb_x
    emb[:, :, c:2 * c] = emb_y
    emb = emb[:, :, :orig_ch]
    return np.transpose(emb, (2, 0, 1)).astype(np.float32)   # (orig_ch, H, W)


def _bilinear_matrix(in_size, out_size):
    M = np.zeros((out_size, in_size), np.float32)
    if out_size == 1:
        M[0, 0] = 1.0
        return M
    src = np.arange(out_size, dtype=np.float64) * (in_size - 1) / (out_size - 1)
    lo = np.clip(np.floor(src).astype(np.int64), 0, in_size - 1)
    hi = np.minimum(lo + 1, in_size - 1)
    w_hi = (src - lo).astype(np.float32)
    w_lo = 1.0 - w_hi
    for i in range(out_size):
        M[i, lo[i]] += w_lo[i]
        M[i, hi[i]] += w_hi[i]
    return M


# -----------------------------------------------------------------------------
# Deterministic parameter construction + one-time kernel-layout preparation
# -----------------------------------------------------------------------------

def init_params(key, in_chan, base_chan, heads, dim_head):
    ks = iter(jax.random.split(key, 128))

    def conv3x3(cin, cout):
        w = jax.random.normal(next(ks), (cout, cin, 3, 3), jnp.float32) / math.sqrt(9 * cin)
        b = 0.1 * jax.random.normal(next(ks), (cout,), jnp.float32)
        return w, b

    def conv1x1(cin, cout):
        w = jax.random.normal(next(ks), (cout, cin), jnp.float32) / math.sqrt(cin)
        b = 0.1 * jax.random.normal(next(ks), (cout,), jnp.float32)
        return w, b

    def bn(c):
        gamma = 1.0 + 0.1 * jax.random.normal(next(ks), (c,), jnp.float32)
        beta = 0.1 * jax.random.normal(next(ks), (c,), jnp.float32)
        return gamma, beta, jnp.zeros((c,), jnp.float32), jnp.ones((c,), jnp.float32)

    def resblock(cin, cout):
        blk = {"conv1": conv3x3(cin, cout), "bn1": bn(cout),
               "conv2": conv3x3(cout, cout), "bn2": bn(cout)}
        if cin != cout:
            blk["sc_conv"] = conv1x1(cin, cout)
            blk["sc_bn"] = bn(cout)
        return blk

    dim = 16 * base_chan
    inner = heads * dim_head
    return {
        "rb1_1": resblock(in_chan, base_chan),
        "rb1_2": resblock(base_chan, base_chan),
        "rb2": resblock(base_chan, 2 * base_chan),
        "rb3": resblock(2 * base_chan, 4 * base_chan),
        "rb4": resblock(4 * base_chan, 8 * base_chan),
        "rb5": resblock(8 * base_chan, 16 * base_chan),
        "trans": {
            "bn1": bn(dim),
            "to_qkv_dw": jax.random.normal(next(ks), (dim, 3, 3), jnp.float32) / 3.0,
            "to_qkv_pw": jax.random.normal(next(ks), (3 * inner, dim), jnp.float32) / math.sqrt(dim),
            "to_out_dw": jax.random.normal(next(ks), (inner, 3, 3), jnp.float32) / 3.0,
            "to_out_pw": jax.random.normal(next(ks), (dim, inner), jnp.float32) / math.sqrt(inner),
            "bn2": bn(dim),
            "mlp": jax.random.normal(next(ks), (dim, dim), jnp.float32) / math.sqrt(dim),
        },
    }


def _fold_bn(w_flat, b, bn):
    # bn_eval(conv(x)) = (s*W) x + (s*b + beta - mean*s)
    gamma, beta, mean, var = bn
    s = gamma / jnp.sqrt(var + EPS)
    wf = w_flat * s[:, None]
    bias = b if b is not None else jnp.zeros_like(beta)
    return wf, (s * bias + beta - mean * s)[:, None]


def _flatten_conv3x3(w):
    # (Cout, Cin, 3, 3) -> (Cout, 9*Cin) tap-major / channel-minor (matches im2col)
    cout, cin = w.shape[0], w.shape[1]
    return jnp.transpose(w, (0, 2, 3, 1)).reshape(cout, 9 * cin)


def prepare_params(raw, *, base_chan, heads, dim_head, input_hw, reduce_size):
    def prep_resblock(blk):
        w1, b1 = _fold_bn(_flatten_conv3x3(blk["conv1"][0]), blk["conv1"][1], blk["bn1"])
        w2, b2 = _fold_bn(_flatten_conv3x3(blk["conv2"][0]), blk["conv2"][1], blk["bn2"])
        out = {"w1": w1, "b1": b1, "w2": w2, "b2": b2, "wsc": None, "bsc": None}
        if "sc_conv" in blk:
            out["wsc"], out["bsc"] = _fold_bn(blk["sc_conv"][0], blk["sc_conv"][1], blk["sc_bn"])
        return out

    p = {k: prep_resblock(raw[k]) for k in ("rb1_1", "rb1_2", "rb2", "rb3", "rb4", "rb5")}

    dim = 16 * base_chan
    inner = heads * dim_head
    H5, W5 = input_hw[0] // 16, input_hw[1] // 16
    t = raw["trans"]

    gamma1, beta1, mean1, var1 = t["bn1"]
    s1 = gamma1 / jnp.sqrt(var1 + EPS)
    shift1 = beta1 - mean1 * s1
    pe = jnp.asarray(positional_encoding_nchw(dim, H5, W5, dim))            # (dim, H5, W5)
    addend = shift1[:, None, None] + pe

    # head-grouped channel permutation: new index h*dh+d  <-  old index d*heads+h
    perm = np.array([d * heads + h for h in range(heads) for d in range(dim_head)])
    scale = float(dim_head) ** (-0.5)

    wpw = t["to_qkv_pw"]                                                    # (3*inner, dim)
    wpw_g = jnp.concatenate([wpw[i * inner + perm] for i in range(3)], axis=0)
    wpw_g = wpw_g.at[:inner].multiply(scale)      # fold softmax scale into q rows

    wdw_qkv = jnp.transpose(t["to_qkv_dw"], (1, 2, 0)).reshape(9, dim)[:, :, None]
    wdw_out = jnp.transpose(t["to_out_dw"][perm], (1, 2, 0)).reshape(9, inner)[:, :, None]
    wpw_out = t["to_out_pw"][:, perm]                                       # (dim, inner)

    My = _bilinear_matrix(H5, reduce_size[0])
    Mx = _bilinear_matrix(W5, reduce_size[1])
    rt = jnp.asarray(np.kron(My, Mx).T)                                     # (S, rS)

    gamma2, beta2, mean2, var2 = t["bn2"]
    s2 = gamma2 / jnp.sqrt(var2 + EPS)
    b2 = beta2 - mean2 * s2

    p["trans"] = {
        "bn1_s": s1, "bn1_addend": addend,
        "wdw_qkv": wdw_qkv, "wpw_qkv": wpw_g, "rt": rt,
        "wdw_out": wdw_out, "wpw_out": wpw_out,
        "bn2_s": s2[:, None], "bn2_b": b2[:, None],
        "w_mlp": t["mlp"],
    }
    return p


# -----------------------------------------------------------------------------
# Driver
# -----------------------------------------------------------------------------

if __name__ == "__main__":
    B, in_chan, base_chan = 2, 3, 4
    H = W = 64                              # level-5 spatial = 4x4
    heads = 4
    dim_head = int(16 * base_chan / 4)      # TransBasicBlock: dim_head = 16*base_chan/4
    reduce_size = (2, 2)                    # config.reduce_size

    key = jax.random.PRNGKey(0)
    kx, kp = jax.random.split(key)
    x = jax.random.normal(kx, (B, in_chan, H, W), jnp.float32)

    raw = init_params(kp, in_chan, base_chan, heads, dim_head)
    params = prepare_params(raw, base_chan=base_chan, heads=heads, dim_head=dim_head,
                            input_hw=(H, W), reduce_size=reduce_size)

    fwd = jax.jit(lambda xi: encode_transformer_forward(
        xi, params, heads=heads, dim_head=dim_head))

    feats = jax.block_until_ready(fwd(x))

    expected = [
        (B, base_chan, H, W),
        (B, 2 * base_chan, H // 2, W // 2),
        (B, 4 * base_chan, H // 4, W // 4),
        (B, 8 * base_chan, H // 8, W // 8),
        (B, 16 * base_chan, H // 16, W // 16),
    ]
    assert len(feats) == 5
    for f, shp in zip(feats, expected):
        assert f.shape == shp, (f.shape, shp)
        assert bool(jnp.all(jnp.isfinite(f)))
    print("KERNEL_OK")
</pallas_src>

<mosaic_0001>
module attributes {stable_mosaic.version = 11 : i64} {
  func.func @_conv_bn_relu_kernel(%arg0: i32, %arg1: memref<1x27x4096xf32, #tpu.memory_space<vmem>>, %arg2: memref<4x27xf32, #tpu.memory_space<vmem>>, %arg3: memref<4x1xf32, #tpu.memory_space<vmem>>, %arg4: memref<1x4x4096xf32, #tpu.memory_space<vmem>>) attributes {dimension_semantics = [#tpu.dimension_semantics<parallel>], iteration_bounds = array<i64: 2>, scalar_prefetch = 0 : i64, scratch_operands = 0 : i64, tpu.core_type = #tpu.core_type<tc>, window_params = [{transform_indices = @transform_0, window_bounds = array<i64: 1, 27, 4096>}, {pipeline_mode = #tpu.pipeline_mode<synchronous>, transform_indices = @transform_1, window_bounds = array<i64: 4, 27>}, {pipeline_mode = #tpu.pipeline_mode<synchronous>, transform_indices = @transform_2, window_bounds = array<i64: 4, 1>}, {transform_indices = @transform_3, window_bounds = array<i64: 1, 4, 4096>}]} {
    %c0 = arith.constant 0 : index
    %c0_0 = arith.constant 0 : index
    %0 = vector.load %arg2[%c0, %c0_0] : memref<4x27xf32, #tpu.memory_space<vmem>>, vector<4x27xf32>
    %c0_1 = arith.constant 0 : index
    %c0_2 = arith.constant 0 : index
    %c0_3 = arith.constant 0 : index
    %1 = vector.load %arg1[%c0_1, %c0_2, %c0_3] : memref<1x27x4096xf32, #tpu.memory_space<vmem>>, vector<1x27x4096xf32>
    %2 = vector.shape_cast %1 : vector<1x27x4096xf32> to vector<27x4096xf32>
    %cst = arith.constant dense<0.000000e+00> : vector<4x4096xf32>
    %3 = tpu.matmul %0, %2, %cst {dimension_numbers = #tpu.dot_dimension_numbers<[1], [0], [0], [1], [0, 0, 1, 1], [], []>} : vector<4x27xf32>, vector<27x4096xf32>, vector<4x4096xf32> -> vector<4x4096xf32>
    %c0_4 = arith.constant 0 : index
    %c0_5 = arith.constant 0 : index
    %4 = vector.load %arg3[%c0_4, %c0_5] : memref<4x1xf32, #tpu.memory_space<vmem>>, vector<4x1xf32>
    %5 = vector.broadcast %4 : vector<4x1xf32> to vector<4x4096xf32>
    %6 = arith.addf %3, %5 : vector<4x4096xf32>
    %cst_6 = arith.constant 0.000000e+00 : f32
    %7 = vector.broadcast %cst_6 : f32 to vector<4x4096xf32>
    %8 = arith.maximumf %6, %7 : vector<4x4096xf32>
    %c0_7 = arith.constant 0 : index
    %c0_8 = arith.constant 0 : index
    %c0_9 = arith.constant 0 : index
    %9 = vector.load %arg4[%c0_7, %c0_8, %c0_9] : memref<1x4x4096xf32, #tpu.memory_space<vmem>>, vector<1x4x4096xf32>
    %10 = vector.shape_cast %9 : vector<1x4x4096xf32> to vector<4x4096xf32>
    %11 = vector.shape_cast %8 : vector<4x4096xf32> to vector<1x4x4096xf32>
    tpu.vector_store %arg4[%c0_7, %c0_8, %c0_9], %11 {strides = array<i32>} : memref<1x4x4096xf32, #tpu.memory_space<vmem>>, vector<1x4x4096xf32>,
    return
  }
  func.func @transform_0(%arg0: i32) -> (i32, i32, i32) {
    %c0_i32 = arith.constant 0 : i32
    %c0_i32_0 = arith.constant 0 : i32
    %c0_i32_1 = arith.constant 0 : i32
    return %arg0, %c0_i32, %c0_i32_0 : i32, i32, i32
  }
  func.func @transform_1(%arg0: i32) -> (i32, i32) {
    %c0_i32 = arith.constant 0 : i32
    %c0_i32_0 = arith.constant 0 : i32
    %c0_i32_1 = arith.constant 0 : i32
    return %c0_i32, %c0_i32_0 : i32, i32
  }
  func.func @transform_2(%arg0: i32) -> (i32, i32) {
    %c0_i32 = arith.constant 0 : i32
    %c0_i32_0 = arith.constant 0 : i32
    %c0_i32_1 = arith.constant 0 : i32
    return %c0_i32, %c0_i32_0 : i32, i32
  }
  func.func @transform_3(%arg0: i32) -> (i32, i32, i32) {
    %c0_i32 = arith.constant 0 : i32
    %c0_i32_0 = arith.constant 0 : i32
    %c0_i32_1 = arith.constant 0 : i32
    return %arg0, %c0_i32, %c0_i32_0 : i32, i32, i32
  }
}

module attributes {stable_mosaic.version = 11 : i64} {
  func.func @_conv_bn_relu_add_proj_kernel(%arg0: i32, %arg1: memref<1x36x4096xf32, #tpu.memory_space<vmem>>, %arg2: memref<4x36xf32, #tpu.memory_space<vmem>>, %arg3: memref<4x1xf32, #tpu.memory_space<vmem>>, %arg4: memref<1x3x4096xf32, #tpu.memory_space<vmem>>, %arg5: memref<4x3xf32, #tpu.memory_space<vmem>>, %arg6: memref<4x1xf32, #tpu.memory_space<vmem>>, %arg7: memref<1x4x4096xf32, #tpu.memory_space<vmem>>) attributes {dimension_semantics = [#tpu.dimension_semantics<parallel>], iteration_bounds = array<i64: 2>, scalar_prefetch = 0 : i64, scratch_operands = 0 : i64, tpu.core_type = #tpu.core_type<tc>, window_params = [{transform_indices = @transform_0, window_bounds = array<i64: 1, 36, 4096>}, {pipeline_mode = #tpu.pipeline_mode<synchronous>, transform_indices = @transform_1, window_bounds = array<i64: 4, 36>}, {pipeline_mode = #tpu.pipeline_mode<synchronous>, transform_indices = @transform_2, window_bounds = array<i64: 4, 1>}, {transform_indices = @transform_3, window_bounds = array<i64: 1, 3, 4096>}, {pipeline_mode = #tpu.pipeline_mode<synchronous>, transform_indices = @transform_4, window_bounds = array<i64: 4, 3>}, {pipeline_mode = #tpu.pipeline_mode<synchronous>, transform_indices = @transform_5, window_bounds = array<i64: 4, 1>}, {transform_indices = @transform_6, window_bounds = array<i64: 1, 4, 4096>}]} {
    %c0 = arith.constant 0 : index
    %c0_0 = arith.constant 0 : index
    %0 = vector.load %arg2[%c0, %c0_0] : memref<4x36xf32, #tpu.memory_space<vmem>>, vector<4x36xf32>
    %c0_1 = arith.constant 0 : index
    %c0_2 = arith.constant 0 : index
    %c0_3 = arith.constant 0 : index
    %1 = vector.load %arg1[%c0_1, %c0_2, %c0_3] : memref<1x36x4096xf32, #tpu.memory_space<vmem>>, vector<1x36x4096xf32>
    %2 = vector.shape_cast %1 : vector<1x36x4096xf32> to vector<36x4096xf32>
    %cst = arith.constant dense<0.000000e+00> : vector<4x4096xf32>
    %3 = tpu.matmul %0, %2, %cst {dimension_numbers = #tpu.dot_dimension_numbers<[1], [0], [0], [1], [0, 0, 1, 1], [], []>} : vector<4x36xf32>, vector<36x4096xf32>, vector<4x4096xf32> -> vector<4x4096xf32>
    %c0_4 = arith.constant 0 : index
    %c0_5 = arith.constant 0 : index
    %4 = vector.load %arg3[%c0_4, %c0_5] : memref<4x1xf32, #tpu.memory_space<vmem>>, vector<4x1xf32>
    %5 = vector.broadcast %4 : vector<4x1xf32> to vector<4x4096xf32>
    %6 = arith.addf %3, %5 : vector<4x4096xf32>
    %c0_6 = arith.constant 0 : index
    %c0_7 = arith.constant 0 : index
    %7 = vector.load %arg5[%c0_6, %c0_7] : memref<4x3xf32, #tpu.memory_space<vmem>>, vector<4x3xf32>
    %c0_8 = arith.constant 0 : index
    %c0_9 = arith.constant 0 : index
    %c0_10 = arith.constant 0 : index
    %8 = vector.load %arg4[%c0_8, %c0_9, %c0_10] : memref<1x3x4096xf32, #tpu.memory_space<vmem>>, vector<1x3x4096xf32>
    %9 = vector.shape_cast %8 : vector<1x3x4096xf32> to vector<3x4096xf32>
    %cst_11 = arith.constant dense<0.000000e+00> : vector<4x4096xf32>
    %10 = tpu.matmul %7, %9, %cst_11 {dimension_numbers = #tpu.dot_dimension_numbers<[1], [0], [0], [1], [0, 0, 1, 1], [], []>} : vector<4x3xf32>, vector<3x4096xf32>, vector<4x4096xf32> -> vector<4x4096xf32>
    %c0_12 = arith.constant 0 : index
    %c0_13 = arith.constant 0 : index
    %11 = vector.load %arg6[%c0_12, %c0_13] : memref<4x1xf32, #tpu.memory_space<vmem>>, vector<4x1xf32>
    %12 = vector.broadcast %11 : vector<4x1xf32> to vector<4x4096xf32>
    %13 = arith.addf %10, %12 : vector<4x4096xf32>
    %cst_14 = arith.constant 0.000000e+00 : f32
    %14 = vector.broadcast %cst_14 : f32 to vector<4x4096xf32>
    %15 = arith.maximumf %6, %14 : vector<4x4096xf32>
    %cst_15 = arith.constant 0.000000e+00 : f32
    %16 = vector.broadcast %cst_15 : f32 to vector<4x4096xf32>
    %17 = arith.maximumf %13, %16 : vector<4x4096xf32>
    %18 = arith.addf %15, %17 : vector<4x4096xf32>
    %c0_16 = arith.constant 0 : index
    %c0_17 = arith.constant 0 : index
    %c0_18 = arith.constant 0 : index
    %19 = vector.load %arg7[%c0_16, %c0_17, %c0_18] : memref<1x4x4096xf32, #tpu.memory_space<vmem>>, vector<1x4x4096xf32>
    %20 = vector.shape_cast %19 : vector<1x4x4096xf32> to vector<4x4096xf32>
    %21 = vector.shape_cast %18 : vector<4x4096xf32> to vector<1x4x4096xf32>
    tpu.vector_store %arg7[%c0_16, %c0_17, %c0_18], %21 {strides = array<i32>} : memref<1x4x4096xf32, #tpu.memory_space<vmem>>, vector<1x4x4096xf32>,
    return
  }
  func.func @transform_0(%arg0: i32) -> (i32, i32, i32) {
    %c0_i32 = arith.constant 0 : i32
    %c0_i32_0 = arith.constant 0 : i32
    %c0_i32_1 = arith.constant 0 : i32
    return %arg0, %c0_i32, %c0_i32_0 : i32, i32, i32
  }
  func.func @transform_1(%arg0: i32) -> (i32, i32) {
    %c0_i32 = arith.constant 0 : i32
    %c0_i32_0 = arith.constant 0 : i32
    %c0_i32_1 = arith.constant 0 : i32
    return %c0_i32, %c0_i32_0 : i32, i32
  }
  func.func @transform_2(%arg0: i32) -> (i32, i32) {
    %c0_i32 = arith.constant 0 : i32
    %c0_i32_0 = arith.constant 0 : i32
    %c0_i32_1 = arith.constant 0 : i32
    return %c0_i32, %c0_i32_0 : i32, i32
  }
  func.func @transform_3(%arg0: i32) -> (i32, i32, i32) {
    %c0_i32 = arith.constant 0 : i32
    %c0_i32_0 = arith.constant 0 : i32
    %c0_i32_1 = arith.constant 0 : i32
    return %arg0, %c0_i32, %c0_i32_0 : i32, i32, i32
  }
  func.func @transform_4(%arg0: i32) -> (i32, i32) {
    %c0_i32 = arith.constant 0 : i32
    %c0_i32_0 = arith.constant 0 : i32
    %c0_i32_1 = arith.constant 0 : i32
    return %c0_i32, %c0_i32_0 : i32, i32
  }
  func.func @transform_5(%arg0: i32) -> (i32, i32) {
    %c0_i32 = arith.constant 0 : i32
    %c0_i32_0 = arith.constant 0 : i32
    %c0_i32_1 = arith.constant 0 : i32
    return %c0_i32, %c0_i32_0 : i32, i32
  }
  func.func @transform_6(%arg0: i32) -> (i32, i32, i32) {
    %c0_i32 = arith.constant 0 : i32
    %c0_i32_0 = arith.constant 0 : i32
    %c0_i32_1 = arith.constant 0 : i32
    return %arg0, %c0_i32, %c0_i32_0 : i32, i32, i32
  }
}

module attributes {stable_mosaic.version = 11 : i64} {
  func.func @_conv_bn_relu_kernel(%arg0: i32, %arg1: memref<1x36x4096xf32, #tpu.memory_space<vmem>>, %arg2: memref<4x36xf32, #tpu.memory_space<vmem>>, %arg3: memref<4x1xf32, #tpu.memory_space<vmem>>, %arg4: memref<1x4x4096xf32, #tpu.memory_space<vmem>>) attributes {dimension_semantics = [#tpu.dimension_semantics<parallel>], iteration_bounds = array<i64: 2>, scalar_prefetch = 0 : i64, scratch_operands = 0 : i64, tpu.core_type = #tpu.core_type<tc>, window_params = [{transform_indices = @transform_0, window_bounds = array<i64: 1, 36, 4096>}, {pipeline_mode = #tpu.pipeline_mode<synchronous>, transform_indices = @transform_1, window_bounds = array<i64: 4, 36>}, {pipeline_mode = #tpu.pipeline_mode<synchronous>, transform_indices = @transform_2, window_bounds = array<i64: 4, 1>}, {transform_indices = @transform_3, window_bounds = array<i64: 1, 4, 4096>}]} {
    %c0 = arith.constant 0 : index
    %c0_0 = arith.constant 0 : index
    %0 = vector.load %arg2[%c0, %c0_0] : memref<4x36xf32, #tpu.memory_space<vmem>>, vector<4x36xf32>
    %c0_1 = arith.constant 0 : index
    %c0_2 = arith.constant 0 : index
    %c0_3 = arith.constant 0 : index
    %1 = vector.load %arg1[%c0_1, %c0_2, %c0_3] : memref<1x36x4096xf32, #tpu.memory_space<vmem>>, vector<1x36x4096xf32>
    %2 = vector.shape_cast %1 : vector<1x36x4096xf32> to vector<36x4096xf32>
    %cst = arith.constant dense<0.000000e+00> : vector<4x4096xf32>
    %3 = tpu.matmul %0, %2, %cst {dimension_numbers = #tpu.dot_dimension_numbers<[1], [0], [0], [1], [0, 0, 1, 1], [], []>} : vector<4x36xf32>, vector<36x4096xf32>, vector<4x4096xf32> -> vector<4x4096xf32>
    %c0_4 = arith.constant 0 : index
    %c0_5 = arith.constant 0 : index
    %4 = vector.load %arg3[%c0_4, %c0_5] : memref<4x1xf32, #tpu.memory_space<vmem>>, vector<4x1xf32>
    %5 = vector.broadcast %4 : vector<4x1xf32> to vector<4x4096xf32>
    %6 = arith.addf %3, %5 : vector<4x4096xf32>
    %cst_6 = arith.constant 0.000000e+00 : f32
    %7 = vector.broadcast %cst_6 : f32 to vector<4x4096xf32>
    %8 = arith.maximumf %6, %7 : vector<4x4096xf32>
    %c0_7 = arith.constant 0 : index
    %c0_8 = arith.constant 0 : index
    %c0_9 = arith.constant 0 : index
    %9 = vector.load %arg4[%c0_7, %c0_8, %c0_9] : memref<1x4x4096xf32, #tpu.memory_space<vmem>>, vector<1x4x4096xf32>
    %10 = vector.shape_cast %9 : vector<1x4x4096xf32> to vector<4x4096xf32>
    %11 = vector.shape_cast %8 : vector<4x4096xf32> to vector<1x4x4096xf32>
    tpu.vector_store %arg4[%c0_7, %c0_8, %c0_9], %11 {strides = array<i32>} : memref<1x4x4096xf32, #tpu.memory_space<vmem>>, vector<1x4x4096xf32>,
    return
  }
  func.func @transform_0(%arg0: i32) -> (i32, i32, i32) {
    %c0_i32 = arith.constant 0 : i32
    %c0_i32_0 = arith.constant 0 : i32
    %c0_i32_1 = arith.constant 0 : i32
    return %arg0, %c0_i32, %c0_i32_0 : i32, i32, i32
  }
  func.func @transform_1(%arg0: i32) -> (i32, i32) {
    %c0_i32 = arith.constant 0 : i32
    %c0_i32_0 = arith.constant 0 : i32
    %c0_i32_1 = arith.constant 0 : i32
    return %c0_i32, %c0_i32_0 : i32, i32
  }
  func.func @transform_2(%arg0: i32) -> (i32, i32) {
    %c0_i32 = arith.constant 0 : i32
    %c0_i32_0 = arith.constant 0 : i32
    %c0_i32_1 = arith.constant 0 : i32
    return %c0_i32, %c0_i32_0 : i32, i32
  }
  func.func @transform_3(%arg0: i32) -> (i32, i32, i32) {
    %c0_i32 = arith.constant 0 : i32
    %c0_i32_0 = arith.constant 0 : i32
    %c0_i32_1 = arith.constant 0 : i32
    return %arg0, %c0_i32, %c0_i32_0 : i32, i32, i32
  }
}

module attributes {stable_mosaic.version = 11 : i64} {
  func.func @_conv_bn_relu_add_id_kernel(%arg0: i32, %arg1: memref<1x36x4096xf32, #tpu.memory_space<vmem>>, %arg2: memref<4x36xf32, #tpu.memory_space<vmem>>, %arg3: memref<4x1xf32, #tpu.memory_space<vmem>>, %arg4: memref<1x4x4096xf32, #tpu.memory_space<vmem>>, %arg5: memref<1x4x4096xf32, #tpu.memory_space<vmem>>) attributes {dimension_semantics = [#tpu.dimension_semantics<parallel>], iteration_bounds = array<i64: 2>, scalar_prefetch = 0 : i64, scratch_operands = 0 : i64, tpu.core_type = #tpu.core_type<tc>, window_params = [{transform_indices = @transform_0, window_bounds = array<i64: 1, 36, 4096>}, {pipeline_mode = #tpu.pipeline_mode<synchronous>, transform_indices = @transform_1, window_bounds = array<i64: 4, 36>}, {pipeline_mode = #tpu.pipeline_mode<synchronous>, transform_indices = @transform_2, window_bounds = array<i64: 4, 1>}, {transform_indices = @transform_3, window_bounds = array<i64: 1, 4, 4096>}, {transform_indices = @transform_4, window_bounds = array<i64: 1, 4, 4096>}]} {
    %c0 = arith.constant 0 : index
    %c0_0 = arith.constant 0 : index
    %0 = vector.load %arg2[%c0, %c0_0] : memref<4x36xf32, #tpu.memory_space<vmem>>, vector<4x36xf32>
    %c0_1 = arith.constant 0 : index
    %c0_2 = arith.constant 0 : index
    %c0_3 = arith.constant 0 : index
    %1 = vector.load %arg1[%c0_1, %c0_2, %c0_3] : memref<1x36x4096xf32, #tpu.memory_space<vmem>>, vector<1x36x4096xf32>
    %2 = vector.shape_cast %1 : vector<1x36x4096xf32> to vector<36x4096xf32>
    %cst = arith.constant dense<0.000000e+00> : vector<4x4096xf32>
    %3 = tpu.matmul %0, %2, %cst {dimension_numbers = #tpu.dot_dimension_numbers<[1], [0], [0], [1], [0, 0, 1, 1], [], []>} : vector<4x36xf32>, vector<36x4096xf32>, vector<4x4096xf32> -> vector<4x4096xf32>
    %c0_4 = arith.constant 0 : index
    %c0_5 = arith.constant 0 : index
    %4 = vector.load %arg3[%c0_4, %c0_5] : memref<4x1xf32, #tpu.memory_space<vmem>>, vector<4x1xf32>
    %5 = vector.broadcast %4 : vector<4x1xf32> to vector<4x4096xf32>
    %6 = arith.addf %3, %5 : vector<4x4096xf32>
    %cst_6 = arith.constant 0.000000e+00 : f32
    %7 = vector.broadcast %cst_6 : f32 to vector<4x4096xf32>
    %8 = arith.maximumf %6, %7 : vector<4x4096xf32>
    %c0_7 = arith.constant 0 : index
    %c0_8 = arith.constant 0 : index
    %c0_9 = arith.constant 0 : index
    %9 = vector.load %arg4[%c0_7, %c0_8, %c0_9] : memref<1x4x4096xf32, #tpu.memory_space<vmem>>, vector<1x4x4096xf32>
    %10 = vector.shape_cast %9 : vector<1x4x4096xf32> to vector<4x4096xf32>
    %11 = arith.addf %8, %10 : vector<4x4096xf32>
    %c0_10 = arith.constant 0 : index
    %c0_11 = arith.constant 0 : index
    %c0_12 = arith.constant 0 : index
    %12 = vector.load %arg5[%c0_10, %c0_11, %c0_12] : memref<1x4x4096xf32, #tpu.memory_space<vmem>>, vector<1x4x4096xf32>
    %13 = vector.shape_cast %12 : vector<1x4x4096xf32> to vector<4x4096xf32>
    %14 = vector.shape_cast %11 : vector<4x4096xf32> to vector<1x4x4096xf32>
    tpu.vector_store %arg5[%c0_10, %c0_11, %c0_12], %14 {strides = array<i32>} : memref<1x4x4096xf32, #tpu.memory_space<vmem>>, vector<1x4x4096xf32>,
    return
  }
  func.func @transform_0(%arg0: i32) -> (i32, i32, i32) {
    %c0_i32 = arith.constant 0 : i32
    %c0_i32_0 = arith.constant 0 : i32
    %c0_i32_1 = arith.constant 0 : i32
    return %arg0, %c0_i32, %c0_i32_0 : i32, i32, i32
  }
  func.func @transform_1(%arg0: i32) -> (i32, i32) {
    %c0_i32 = arith.constant 0 : i32
    %c0_i32_0 = arith.constant 0 : i32
    %c0_i32_1 = arith.constant 0 : i32
    return %c0_i32, %c0_i32_0 : i32, i32
  }
  func.func @transform_2(%arg0: i32) -> (i32, i32) {
    %c0_i32 = arith.constant 0 : i32
    %c0_i32_0 = arith.constant 0 : i32
    %c0_i32_1 = arith.constant 0 : i32
    return %c0_i32, %c0_i32_0 : i32, i32
  }
  func.func @transform_3(%arg0: i32) -> (i32, i32, i32) {
    %c0_i32 = arith.constant 0 : i32
    %c0_i32_0 = arith.constant 0 : i32
    %c0_i32_1 = arith.constant 0 : i32
    return %arg0, %c0_i32, %c0_i32_0 : i32, i32, i32
  }
  func.func @transform_4(%arg0: i32) -> (i32, i32, i32) {
    %c0_i32 = arith.constant 0 : i32
    %c0_i32_0 = arith.constant 0 : i32
    %c0_i32_1 = arith.constant 0 : i32
    return %arg0, %c0_i32, %c0_i32_0 : i32, i32, i32
  }
}

module attributes {stable_mosaic.version = 11 : i64} {
  func.func @_conv_bn_relu_kernel(%arg0: i32, %arg1: memref<1x36x1024xf32, #tpu.memory_space<vmem>>, %arg2: memref<8x36xf32, #tpu.memory_space<vmem>>, %arg3: memref<8x1xf32, #tpu.memory_space<vmem>>, %arg4: memref<1x8x1024xf32, #tpu.memory_space<vmem>>) attributes {dimension_semantics = [#tpu.dimension_semantics<parallel>], iteration_bounds = array<i64: 2>, scalar_prefetch = 0 : i64, scratch_operands = 0 : i64, tpu.core_type = #tpu.core_type<tc>, window_params = [{transform_indices = @transform_0, window_bounds = array<i64: 1, 36, 1024>}, {pipeline_mode = #tpu.pipeline_mode<synchronous>, transform_indices = @transform_1, window_bounds = array<i64: 8, 36>}, {pipeline_mode = #tpu.pipeline_mode<synchronous>, transform_indices = @transform_2, window_bounds = array<i64: 8, 1>}, {transform_indices = @transform_3, window_bounds = array<i64: 1, 8, 1024>}]} {
    %c0 = arith.constant 0 : index
    %c0_0 = arith.constant 0 : index
    %0 = vector.load %arg2[%c0, %c0_0] : memref<8x36xf32, #tpu.memory_space<vmem>>, vector<8x36xf32>
    %c0_1 = arith.constant 0 : index
    %c0_2 = arith.constant 0 : index
    %c0_3 = arith.constant 0 : index
    %1 = vector.load %arg1[%c0_1, %c0_2, %c0_3] : memref<1x36x1024xf32, #tpu.memory_space<vmem>>, vector<1x36x1024xf32>
    %2 = vector.shape_cast %1 : vector<1x36x1024xf32> to vector<36x1024xf32>
    %cst = arith.constant dense<0.000000e+00> : vector<8x1024xf32>
    %3 = tpu.matmul %0, %2, %cst {dimension_numbers = #tpu.dot_dimension_numbers<[1], [0], [0], [1], [0, 0, 1, 1], [], []>} : vector<8x36xf32>, vector<36x1024xf32>, vector<8x1024xf32> -> vector<8x1024xf32>
    %c0_4 = arith.constant 0 : index
    %c0_5 = arith.constant 0 : index
    %4 = vector.load %arg3[%c0_4, %c0_5] : memref<8x1xf32, #tpu.memory_space<vmem>>, vector<8x1xf32>
    %5 = vector.broadcast %4 : vector<8x1xf32> to vector<8x1024xf32>
    %6 = arith.addf %3, %5 : vector<8x1024xf32>
    %cst_6 = arith.constant 0.000000e+00 : f32
    %7 = vector.broadcast %cst_6 : f32 to vector<8x1024xf32>
    %8 = arith.maximumf %6, %7 : vector<8x1024xf32>
    %c0_7 = arith.constant 0 : index
    %c0_8 = arith.constant 0 : index
    %c0_9 = arith.constant 0 : index
    %9 = vector.load %arg4[%c0_7, %c0_8, %c0_9] : memref<1x8x1024xf32, #tpu.memory_space<vmem>>, vector<1x8x1024xf32>
    %10 = vector.shape_cast %9 : vector<1x8x1024xf32> to vector<8x1024xf32>
    %11 = vector.shape_cast %8 : vector<8x1024xf32> to vector<1x8x1024xf32>
    tpu.vector_store %arg4[%c0_7, %c0_8, %c0_9], %11 {strides = array<i32>} : memref<1x8x1024xf32, #tpu.memory_space<vmem>>, vector<1x8x1024xf32>,
    return
  }
  func.func @transform_0(%arg0: i32) -> (i32, i32, i32) {
    %c0_i32 = arith.constant 0 : i32
    %c0_i32_0 = arith.constant 0 : i32
    %c0_i32_1 = arith.constant 0 : i32
    return %arg0, %c0_i32, %c0_i32_0 : i32, i32, i32
  }
  func.func @transform_1(%arg0: i32) -> (i32, i32) {
    %c0_i32 = arith.constant 0 : i32
    %c0_i32_0 = arith.constant 0 : i32
    %c0_i32_1 = arith.constant 0 : i32
    return %c0_i32, %c0_i32_0 : i32, i32
  }
  func.func @transform_2(%arg0: i32) -> (i32, i32) {
    %c0_i32 = arith.constant 0 : i32
    %c0_i32_0 = arith.constant 0 : i32
    %c0_i32_1 = arith.constant 0 : i32
    return %c0_i32, %c0_i32_0 : i32, i32
  }
  func.func @transform_3(%arg0: i32) -> (i32, i32, i32) {
    %c0_i32 = arith.constant 0 : i32
    %c0_i32_0 = arith.constant 0 : i32
    %c0_i32_1 = arith.constant 0 : i32
    return %arg0, %c0_i32, %c0_i32_0 : i32, i32, i32
  }
}

module attributes {stable_mosaic.version = 11 : i64} {
  func.func @_conv_bn_relu_add_proj_kernel(%arg0: i32, %arg1: memref<1x72x1024xf32, #tpu.memory_space<vmem>>, %arg2: memref<8x72xf32, #tpu.memory_space<vmem>>, %arg3: memref<8x1xf32, #tpu.memory_space<vmem>>, %arg4: memref<1x4x1024xf32, #tpu.memory_space<vmem>>, %arg5: memref<8x4xf32, #tpu.memory_space<vmem>>, %arg6: memref<8x1xf32, #tpu.memory_space<vmem>>, %arg7: memref<1x8x1024xf32, #tpu.memory_space<vmem>>) attributes {dimension_semantics = [#tpu.dimension_semantics<parallel>], iteration_bounds = array<i64: 2>, scalar_prefetch = 0 : i64, scratch_operands = 0 : i64, tpu.core_type = #tpu.core_type<tc>, window_params = [{transform_indices = @transform_0, window_bounds = array<i64: 1, 72, 1024>}, {pipeline_mode = #tpu.pipeline_mode<synchronous>, transform_indices = @transform_1, window_bounds = array<i64: 8, 72>}, {pipeline_mode = #tpu.pipeline_mode<synchronous>, transform_indices = @transform_2, window_bounds = array<i64: 8, 1>}, {transform_indices = @transform_3, window_bounds = array<i64: 1, 4, 1024>}, {pipeline_mode = #tpu.pipeline_mode<synchronous>, transform_indices = @transform_4, window_bounds = array<i64: 8, 4>}, {pipeline_mode = #tpu.pipeline_mode<synchronous>, transform_indices = @transform_5, window_bounds = array<i64: 8, 1>}, {transform_indices = @transform_6, window_bounds = array<i64: 1, 8, 1024>}]} {
    %c0 = arith.constant 0 : index
    %c0_0 = arith.constant 0 : index
    %0 = vector.load %arg2[%c0, %c0_0] : memref<8x72xf32, #tpu.memory_space<vmem>>, vector<8x72xf32>
    %c0_1 = arith.constant 0 : index
    %c0_2 = arith.constant 0 : index
    %c0_3 = arith.constant 0 : index
    %1 = vector.load %arg1[%c0_1, %c0_2, %c0_3] : memref<1x72x1024xf32, #tpu.memory_space<vmem>>, vector<1x72x1024xf32>
    %2 = vector.shape_cast %1 : vector<1x72x1024xf32> to vector<72x1024xf32>
    %cst = arith.constant dense<0.000000e+00> : vector<8x1024xf32>
    %3 = tpu.matmul %0, %2, %cst {dimension_numbers = #tpu.dot_dimension_numbers<[1], [0], [0], [1], [0, 0, 1, 1], [], []>} : vector<8x72xf32>, vector<72x1024xf32>, vector<8x1024xf32> -> vector<8x1024xf32>
    %c0_4 = arith.constant 0 : index
    %c0_5 = arith.constant 0 : index
    %4 = vector.load %arg3[%c0_4, %c0_5] : memref<8x1xf32, #tpu.memory_space<vmem>>, vector<8x1xf32>
    %5 = vector.broadcast %4 : vector<8x1xf32> to vector<8x1024xf32>
    %6 = arith.addf %3, %5 : vector<8x1024xf32>
    %c0_6 = arith.constant 0 : index
    %c0_7 = arith.constant 0 : index
    %7 = vector.load %arg5[%c0_6, %c0_7] : memref<8x4xf32, #tpu.memory_space<vmem>>, vector<8x4xf32>
    %c0_8 = arith.constant 0 : index
    %c0_9 = arith.constant 0 : index
    %c0_10 = arith.constant 0 : index
    %8 = vector.load %arg4[%c0_8, %c0_9, %c0_10] : memref<1x4x1024xf32, #tpu.memory_space<vmem>>, vector<1x4x1024xf32>
    %9 = vector.shape_cast %8 : vector<1x4x1024xf32> to vector<4x1024xf32>
    %cst_11 = arith.constant dense<0.000000e+00> : vector<8x1024xf32>
    %10 = tpu.matmul %7, %9, %cst_11 {dimension_numbers = #tpu.dot_dimension_numbers<[1], [0], [0], [1], [0, 0, 1, 1], [], []>} : vector<8x4xf32>, vector<4x1024xf32>, vector<8x1024xf32> -> vector<8x1024xf32>
    %c0_12 = arith.constant 0 : index
    %c0_13 = arith.constant 0 : index
    %11 = vector.load %arg6[%c0_12, %c0_13] : memref<8x1xf32, #tpu.memory_space<vmem>>, vector<8x1xf32>
    %12 = vector.broadcast %11 : vector<8x1xf32> to vector<8x1024xf32>
    %13 = arith.addf %10, %12 : vector<8x1024xf32>
    %cst_14 = arith.constant 0.000000e+00 : f32
    %14 = vector.broadcast %cst_14 : f32 to vector<8x1024xf32>
    %15 = arith.maximumf %6, %14 : vector<8x1024xf32>
    %cst_15 = arith.constant 0.000000e+00 : f32
    %16 = vector.broadcast %cst_15 : f32 to vector<8x1024xf32>
    %17 = arith.maximumf %13, %16 : vector<8x1024xf32>
    %18 = arith.addf %15, %17 : vector<8x1024xf32>
    %c0_16 = arith.constant 0 : index
    %c0_17 = arith.constant 0 : index
    %c0_18 = arith.constant 0 : index
    %19 = vector.load %arg7[%c0_16, %c0_17, %c0_18] : memref<1x8x1024xf32, #tpu.memory_space<vmem>>, vector<1x8x1024xf32>
    %20 = vector.shape_cast %19 : vector<1x8x1024xf32> to vector<8x1024xf32>
    %21 = vector.shape_cast %18 : vector<8x1024xf32> to vector<1x8x1024xf32>
    tpu.vector_store %arg7[%c0_16, %c0_17, %c0_18], %21 {strides = array<i32>} : memref<1x8x1024xf32, #tpu.memory_space<vmem>>, vector<1x8x1024xf32>,
    return
  }
  func.func @transform_0(%arg0: i32) -> (i32, i32, i32) {
    %c0_i32 = arith.constant 0 : i32
    %c0_i32_0 = arith.constant 0 : i32
    %c0_i32_1 = arith.constant 0 : i32
    return %arg0, %c0_i32, %c0_i32_0 : i32, i32, i32
  }
  func.func @transform_1(%arg0: i32) -> (i32, i32) {
    %c0_i32 = arith.constant 0 : i32
    %c0_i32_0 = arith.constant 0 : i32
    %c0_i32_1 = arith.constant 0 : i32
    return %c0_i32, %c0_i32_0 : i32, i32
  }
  func.func @transform_2(%arg0: i32) -> (i32, i32) {
    %c0_i32 = arith.constant 0 : i32
    %c0_i32_0 = arith.constant 0 : i32
    %c0_i32_1 = arith.constant 0 : i32
    return %c0_i32, %c0_i32_0 : i32, i32
  }
  func.func @transform_3(%arg0: i32) -> (i32, i32, i32) {
    %c0_i32 = arith.constant 0 : i32
    %c0_i32_0 = arith.constant 0 : i32
    %c0_i32_1 = arith.constant 0 : i32
    return %arg0, %c0_i32, %c0_i32_0 : i32, i32, i32
  }
  func.func @transform_4(%arg0: i32) -> (i32, i32) {
    %c0_i32 = arith.constant 0 : i32
    %c0_i32_0 = arith.constant 0 : i32
    %c0_i32_1 = arith.constant 0 : i32
    return %c0_i32, %c0_i32_0 : i32, i32
  }
  func.func @transform_5(%arg0: i32) -> (i32, i32) {
    %c0_i32 = arith.constant 0 : i32
    %c0_i32_0 = arith.constant 0 : i32
    %c0_i32_1 = arith.constant 0 : i32
    return %c0_i32, %c0_i32_0 : i32, i32
  }
  func.func @transform_6(%arg0: i32) -> (i32, i32, i32) {
    %c0_i32 = arith.constant 0 : i32
    %c0_i32_0 = arith.constant 0 : i32
    %c0_i32_1 = arith.constant 0 : i32
    return %arg0, %c0_i32, %c0_i32_0 : i32, i32, i32
  }
}

module attributes {stable_mosaic.version = 11 : i64} {
  func.func @_conv_bn_relu_kernel(%arg0: i32, %arg1: memref<1x72x256xf32, #tpu.memory_space<vmem>>, %arg2: memref<16x72xf32, #tpu.memory_space<vmem>>, %arg3: memref<16x1xf32, #tpu.memory_space<vmem>>, %arg4: memref<1x16x256xf32, #tpu.memory_space<vmem>>) attributes {dimension_semantics = [#tpu.dimension_semantics<parallel>], iteration_bounds = array<i64: 2>, scalar_prefetch = 0 : i64, scratch_operands = 0 : i64, tpu.core_type = #tpu.core_type<tc>, window_params = [{transform_indices = @transform_0, window_bounds = array<i64: 1, 72, 256>}, {pipeline_mode = #tpu.pipeline_mode<synchronous>, transform_indices = @transform_1, window_bounds = array<i64: 16, 72>}, {pipeline_mode = #tpu.pipeline_mode<synchronous>, transform_indices = @transform_2, window_bounds = array<i64: 16, 1>}, {transform_indices = @transform_3, window_bounds = array<i64: 1, 16, 256>}]} {
    %c0 = arith.constant 0 : index
    %c0_0 = arith.constant 0 : index
    %0 = vector.load %arg2[%c0, %c0_0] : memref<16x72xf32, #tpu.memory_space<vmem>>, vector<16x72xf32>
    %c0_1 = arith.constant 0 : index
    %c0_2 = arith.constant 0 : index
    %c0_3 = arith.constant 0 : index
    %1 = vector.load %arg1[%c0_1, %c0_2, %c0_3] : memref<1x72x256xf32, #tpu.memory_space<vmem>>, vector<1x72x256xf32>
    %2 = vector.shape_cast %1 : vector<1x72x256xf32> to vector<72x256xf32>
    %cst = arith.constant dense<0.000000e+00> : vector<16x256xf32>
    %3 = tpu.matmul %0, %2, %cst {dimension_numbers = #tpu.dot_dimension_numbers<[1], [0], [0], [1], [0, 0, 1, 1], [], []>} : vector<16x72xf32>, vector<72x256xf32>, vector<16x256xf32> -> vector<16x256xf32>
    %c0_4 = arith.constant 0 : index
    %c0_5 = arith.constant 0 : index
    %4 = vector.load %arg3[%c0_4, %c0_5] : memref<16x1xf32, #tpu.memory_space<vmem>>, vector<16x1xf32>
    %5 = vector.broadcast %4 : vector<16x1xf32> to vector<16x256xf32>
    %6 = arith.addf %3, %5 : vector<16x256xf32>
    %cst_6 = arith.constant 0.000000e+00 : f32
    %7 = vector.broadcast %cst_6 : f32 to vector<16x256xf32>
    %8 = arith.maximumf %6, %7 : vector<16x256xf32>
    %c0_7 = arith.constant 0 : index
    %c0_8 = arith.constant 0 : index
    %c0_9 = arith.constant 0 : index
    %9 = vector.load %arg4[%c0_7, %c0_8, %c0_9] : memref<1x16x256xf32, #tpu.memory_space<vmem>>, vector<1x16x256xf32>
    %10 = vector.shape_cast %9 : vector<1x16x256xf32> to vector<16x256xf32>
    %11 = vector.shape_cast %8 : vector<16x256xf32> to vector<1x16x256xf32>
    tpu.vector_store %arg4[%c0_7, %c0_8, %c0_9], %11 {strides = array<i32>} : memref<1x16x256xf32, #tpu.memory_space<vmem>>, vector<1x16x256xf32>,
    return
  }
  func.func @transform_0(%arg0: i32) -> (i32, i32, i32) {
    %c0_i32 = arith.constant 0 : i32
    %c0_i32_0 = arith.constant 0 : i32
    %c0_i32_1 = arith.constant 0 : i32
    return %arg0, %c0_i32, %c0_i32_0 : i32, i32, i32
  }
  func.func @transform_1(%arg0: i32) -> (i32, i32) {
    %c0_i32 = arith.constant 0 : i32
    %c0_i32_0 = arith.constant 0 : i32
    %c0_i32_1 = arith.constant 0 : i32
    return %c0_i32, %c0_i32_0 : i32, i32
  }
  func.func @transform_2(%arg0: i32) -> (i32, i32) {
    %c0_i32 = arith.constant 0 : i32
    %c0_i32_0 = arith.constant 0 : i32
    %c0_i32_1 = arith.constant 0 : i32
    return %c0_i32, %c0_i32_0 : i32, i32
  }
  func.func @transform_3(%arg0: i32) -> (i32, i32, i32) {
    %c0_i32 = arith.constant 0 : i32
    %c0_i32_0 = arith.constant 0 : i32
    %c0_i32_1 = arith.constant 0 : i32
    return %arg0, %c0_i32, %c0_i32_0 : i32, i32, i32
  }
}

module attributes {stable_mosaic.version = 11 : i64} {
  func.func @_conv_bn_relu_add_proj_kernel(%arg0: i32, %arg1: memref<1x144x256xf32, #tpu.memory_space<vmem>>, %arg2: memref<16x144xf32, #tpu.memory_space<vmem>>, %arg3: memref<16x1xf32, #tpu.memory_space<vmem>>, %arg4: memref<1x8x256xf32, #tpu.memory_space<vmem>>, %arg5: memref<16x8xf32, #tpu.memory_space<vmem>>, %arg6: memref<16x1xf32, #tpu.memory_space<vmem>>, %arg7: memref<1x16x256xf32, #tpu.memory_space<vmem>>) attributes {dimension_semantics = [#tpu.dimension_semantics<parallel>], iteration_bounds = array<i64: 2>, scalar_prefetch = 0 : i64, scratch_operands = 0 : i64, tpu.core_type = #tpu.core_type<tc>, window_params = [{transform_indices = @transform_0, window_bounds = array<i64: 1, 144, 256>}, {pipeline_mode = #tpu.pipeline_mode<synchronous>, transform_indices = @transform_1, window_bounds = array<i64: 16, 144>}, {pipeline_mode = #tpu.pipeline_mode<synchronous>, transform_indices = @transform_2, window_bounds = array<i64: 16, 1>}, {transform_indices = @transform_3, window_bounds = array<i64: 1, 8, 256>}, {pipeline_mode = #tpu.pipeline_mode<synchronous>, transform_indices = @transform_4, window_bounds = array<i64: 16, 8>}, {pipeline_mode = #tpu.pipeline_mode<synchronous>, transform_indices = @transform_5, window_bounds = array<i64: 16, 1>}, {transform_indices = @transform_6, window_bounds = array<i64: 1, 16, 256>}]} {
    %c0 = arith.constant 0 : index
    %c0_0 = arith.constant 0 : index
    %0 = vector.load %arg2[%c0, %c0_0] : memref<16x144xf32, #tpu.memory_space<vmem>>, vector<16x144xf32>
    %c0_1 = arith.constant 0 : index
    %c0_2 = arith.constant 0 : index
    %c0_3 = arith.constant 0 : index
    %1 = vector.load %arg1[%c0_1, %c0_2, %c0_3] : memref<1x144x256xf32, #tpu.memory_space<vmem>>, vector<1x144x256xf32>
    %2 = vector.shape_cast %1 : vector<1x144x256xf32> to vector<144x256xf32>
    %cst = arith.constant dense<0.000000e+00> : vector<16x256xf32>
    %3 = tpu.matmul %0, %2, %cst {dimension_numbers = #tpu.dot_dimension_numbers<[1], [0], [0], [1], [0, 0, 1, 1], [], []>} : vector<16x144xf32>, vector<144x256xf32>, vector<16x256xf32> -> vector<16x256xf32>
    %c0_4 = arith.constant 0 : index
    %c0_5 = arith.constant 0 : index
    %4 = vector.load %arg3[%c0_4, %c0_5] : memref<16x1xf32, #tpu.memory_space<vmem>>, vector<16x1xf32>
    %5 = vector.broadcast %4 : vector<16x1xf32> to vector<16x256xf32>
    %6 = arith.addf %3, %5 : vector<16x256xf32>
    %c0_6 = arith.constant 0 : index
    %c0_7 = arith.constant 0 : index
    %7 = vector.load %arg5[%c0_6, %c0_7] : memref<16x8xf32, #tpu.memory_space<vmem>>, vector<16x8xf32>
    %c0_8 = arith.constant 0 : index
    %c0_9 = arith.constant 0 : index
    %c0_10 = arith.constant 0 : index
    %8 = vector.load %arg4[%c0_8, %c0_9, %c0_10] : memref<1x8x256xf32, #tpu.memory_space<vmem>>, vector<1x8x256xf32>
    %9 = vector.shape_cast %8 : vector<1x8x256xf32> to vector<8x256xf32>
    %cst_11 = arith.constant dense<0.000000e+00> : vector<16x256xf32>
    %10 = tpu.matmul %7, %9, %cst_11 {dimension_numbers = #tpu.dot_dimension_numbers<[1], [0], [0], [1], [0, 0, 1, 1], [], []>} : vector<16x8xf32>, vector<8x256xf32>, vector<16x256xf32> -> vector<16x256xf32>
    %c0_12 = arith.constant 0 : index
    %c0_13 = arith.constant 0 : index
    %11 = vector.load %arg6[%c0_12, %c0_13] : memref<16x1xf32, #tpu.memory_space<vmem>>, vector<16x1xf32>
    %12 = vector.broadcast %11 : vector<16x1xf32> to vector<16x256xf32>
    %13 = arith.addf %10, %12 : vector<16x256xf32>
    %cst_14 = arith.constant 0.000000e+00 : f32
    %14 = vector.broadcast %cst_14 : f32 to vector<16x256xf32>
    %15 = arith.maximumf %6, %14 : vector<16x256xf32>
    %cst_15 = arith.constant 0.000000e+00 : f32
    %16 = vector.broadcast %cst_15 : f32 to vector<16x256xf32>
    %17 = arith.maximumf %13, %16 : vector<16x256xf32>
    %18 = arith.addf %15, %17 : vector<16x256xf32>
    %c0_16 = arith.constant 0 : index
    %c0_17 = arith.constant 0 : index
    %c0_18 = arith.constant 0 : index
    %19 = vector.load %arg7[%c0_16, %c0_17, %c0_18] : memref<1x16x256xf32, #tpu.memory_space<vmem>>, vector<1x16x256xf32>
    %20 = vector.shape_cast %19 : vector<1x16x256xf32> to vector<16x256xf32>
    %21 = vector.shape_cast %18 : vector<16x256xf32> to vector<1x16x256xf32>
    tpu.vector_store %arg7[%c0_16, %c0_17, %c0_18], %21 {strides = array<i32>} : memref<1x16x256xf32, #tpu.memory_space<vmem>>, vector<1x16x256xf32>,
    return
  }
  func.func @transform_0(%arg0: i32) -> (i32, i32, i32) {
    %c0_i32 = arith.constant 0 : i32
    %c0_i32_0 = arith.constant 0 : i32
    %c0_i32_1 = arith.constant 0 : i32
    return %arg0, %c0_i32, %c0_i32_0 : i32, i32, i32
  }
  func.func @transform_1(%arg0: i32) -> (i32, i32) {
    %c0_i32 = arith.constant 0 : i32
    %c0_i32_0 = arith.constant 0 : i32
    %c0_i32_1 = arith.constant 0 : i32
    return %c0_i32, %c0_i32_0 : i32, i32
  }
  func.func @transform_2(%arg0: i32) -> (i32, i32) {
    %c0_i32 = arith.constant 0 : i32
    %c0_i32_0 = arith.constant 0 : i32
    %c0_i32_1 = arith.constant 0 : i32
    return %c0_i32, %c0_i32_0 : i32, i32
  }
  func.func @transform_3(%arg0: i32) -> (i32, i32, i32) {
    %c0_i32 = arith.constant 0 : i32
    %c0_i32_0 = arith.constant 0 : i32
    %c0_i32_1 = arith.constant 0 : i32
    return %arg0, %c0_i32, %c0_i32_0 : i32, i32, i32
  }
  func.func @transform_4(%arg0: i32) -> (i32, i32) {
    %c0_i32 = arith.constant 0 : i32
    %c0_i32_0 = arith.constant 0 : i32
    %c0_i32_1 = arith.constant 0 : i32
    return %c0_i32, %c0_i32_0 : i32, i32
  }
  func.func @transform_5(%arg0: i32) -> (i32, i32) {
    %c0_i32 = arith.constant 0 : i32
    %c0_i32_0 = arith.constant 0 : i32
    %c0_i32_1 = arith.constant 0 : i32
    return %c0_i32, %c0_i32_0 : i32, i32
  }
  func.func @transform_6(%arg0: i32) -> (i32, i32, i32) {
    %c0_i32 = arith.constant 0 : i32
    %c0_i32_0 = arith.constant 0 : i32
    %c0_i32_1 = arith.constant 0 : i32
    return %arg0, %c0_i32, %c0_i32_0 : i32, i32, i32
  }
}

module attributes {stable_mosaic.version = 11 : i64} {
  func.func @_conv_bn_relu_kernel(%arg0: i32, %arg1: memref<1x144x64xf32, #tpu.memory_space<vmem>>, %arg2: memref<32x144xf32, #tpu.memory_space<vmem>>, %arg3: memref<32x1xf32, #tpu.memory_space<vmem>>, %arg4: memref<1x32x64xf32, #tpu.memory_space<vmem>>) attributes {dimension_semantics = [#tpu.dimension_semantics<parallel>], iteration_bounds = array<i64: 2>, scalar_prefetch = 0 : i64, scratch_operands = 0 : i64, tpu.core_type = #tpu.core_type<tc>, window_params = [{transform_indices = @transform_0, window_bounds = array<i64: 1, 144, 64>}, {pipeline_mode = #tpu.pipeline_mode<synchronous>, transform_indices = @transform_1, window_bounds = array<i64: 32, 144>}, {pipeline_mode = #tpu.pipeline_mode<synchronous>, transform_indices = @transform_2, window_bounds = array<i64: 32, 1>}, {transform_indices = @transform_3, window_bounds = array<i64: 1, 32, 64>}]} {
    %c0 = arith.constant 0 : index
    %c0_0 = arith.constant 0 : index
    %0 = vector.load %arg2[%c0, %c0_0] : memref<32x144xf32, #tpu.memory_space<vmem>>, vector<32x144xf32>
    %c0_1 = arith.constant 0 : index
    %c0_2 = arith.constant 0 : index
    %c0_3 = arith.constant 0 : index
    %1 = vector.load %arg1[%c0_1, %c0_2, %c0_3] : memref<1x144x64xf32, #tpu.memory_space<vmem>>, vector<1x144x64xf32>
    %2 = vector.shape_cast %1 : vector<1x144x64xf32> to vector<144x64xf32>
    %cst = arith.constant dense<0.000000e+00> : vector<32x64xf32>
    %3 = tpu.matmul %0, %2, %cst {dimension_numbers = #tpu.dot_dimension_numbers<[1], [0], [0], [1], [0, 0, 1, 1], [], []>} : vector<32x144xf32>, vector<144x64xf32>, vector<32x64xf32> -> vector<32x64xf32>
    %c0_4 = arith.constant 0 : index
    %c0_5 = arith.constant 0 : index
    %4 = vector.load %arg3[%c0_4, %c0_5] : memref<32x1xf32, #tpu.memory_space<vmem>>, vector<32x1xf32>
    %5 = vector.broadcast %4 : vector<32x1xf32> to vector<32x64xf32>
    %6 = arith.addf %3, %5 : vector<32x64xf32>
    %cst_6 = arith.constant 0.000000e+00 : f32
    %7 = vector.broadcast %cst_6 : f32 to vector<32x64xf32>
    %8 = arith.maximumf %6, %7 : vector<32x64xf32>
    %c0_7 = arith.constant 0 : index
    %c0_8 = arith.constant 0 : index
    %c0_9 = arith.constant 0 : index
    %9 = vector.load %arg4[%c0_7, %c0_8, %c0_9] : memref<1x32x64xf32, #tpu.memory_space<vmem>>, vector<1x32x64xf32>
    %10 = vector.shape_cast %9 : vector<1x32x64xf32> to vector<32x64xf32>
    %11 = vector.shape_cast %8 : vector<32x64xf32> to vector<1x32x64xf32>
    tpu.vector_store %arg4[%c0_7, %c0_8, %c0_9], %11 {strides = array<i32>} : memref<1x32x64xf32, #tpu.memory_space<vmem>>, vector<1x32x64xf32>,
    return
  }
  func.func @transform_0(%arg0: i32) -> (i32, i32, i32) {
    %c0_i32 = arith.constant 0 : i32
    %c0_i32_0 = arith.constant 0 : i32
    %c0_i32_1 = arith.constant 0 : i32
    return %arg0, %c0_i32, %c0_i32_0 : i32, i32, i32
  }
  func.func @transform_1(%arg0: i32) -> (i32, i32) {
    %c0_i32 = arith.constant 0 : i32
    %c0_i32_0 = arith.constant 0 : i32
    %c0_i32_1 = arith.constant 0 : i32
    return %c0_i32, %c0_i32_0 : i32, i32
  }
  func.func @transform_2(%arg0: i32) -> (i32, i32) {
    %c0_i32 = arith.constant 0 : i32
    %c0_i32_0 = arith.constant 0 : i32
    %c0_i32_1 = arith.constant 0 : i32
    return %c0_i32, %c0_i32_0 : i32, i32
  }
  func.func @transform_3(%arg0: i32) -> (i32, i32, i32) {
    %c0_i32 = arith.constant 0 : i32
    %c0_i32_0 = arith.constant 0 : i32
    %c0_i32_1 = arith.constant 0 : i32
    return %arg0, %c0_i32, %c0_i32_0 : i32, i32, i32
  }
}

module attributes {stable_mosaic.version = 11 : i64} {
  func.func @_conv_bn_relu_add_proj_kernel(%arg0: i32, %arg1: memref<1x288x64xf32, #tpu.memory_space<vmem>>, %arg2: memref<32x288xf32, #tpu.memory_space<vmem>>, %arg3: memref<32x1xf32, #tpu.memory_space<vmem>>, %arg4: memref<1x16x64xf32, #tpu.memory_space<vmem>>, %arg5: memref<32x16xf32, #tpu.memory_space<vmem>>, %arg6: memref<32x1xf32, #tpu.memory_space<vmem>>, %arg7: memref<1x32x64xf32, #tpu.memory_space<vmem>>) attributes {dimension_semantics = [#tpu.dimension_semantics<parallel>], iteration_bounds = array<i64: 2>, scalar_prefetch = 0 : i64, scratch_operands = 0 : i64, tpu.core_type = #tpu.core_type<tc>, window_params = [{transform_indices = @transform_0, window_bounds = array<i64: 1, 288, 64>}, {pipeline_mode = #tpu.pipeline_mode<synchronous>, transform_indices = @transform_1, window_bounds = array<i64: 32, 288>}, {pipeline_mode = #tpu.pipeline_mode<synchronous>, transform_indices = @transform_2, window_bounds = array<i64: 32, 1>}, {transform_indices = @transform_3, window_bounds = array<i64: 1, 16, 64>}, {pipeline_mode = #tpu.pipeline_mode<synchronous>, transform_indices = @transform_4, window_bounds = array<i64: 32, 16>}, {pipeline_mode = #tpu.pipeline_mode<synchronous>, transform_indices = @transform_5, window_bounds = array<i64: 32, 1>}, {transform_indices = @transform_6, window_bounds = array<i64: 1, 32, 64>}]} {
    %c0 = arith.constant 0 : index
    %c0_0 = arith.constant 0 : index
    %0 = vector.load %arg2[%c0, %c0_0] : memref<32x288xf32, #tpu.memory_space<vmem>>, vector<32x288xf32>
    %c0_1 = arith.constant 0 : index
    %c0_2 = arith.constant 0 : index
    %c0_3 = arith.constant 0 : index
    %1 = vector.load %arg1[%c0_1, %c0_2, %c0_3] : memref<1x288x64xf32, #tpu.memory_space<vmem>>, vector<1x288x64xf32>
    %2 = vector.shape_cast %1 : vector<1x288x64xf32> to vector<288x64xf32>
    %cst = arith.constant dense<0.000000e+00> : vector<32x64xf32>
    %3 = tpu.matmul %0, %2, %cst {dimension_numbers = #tpu.dot_dimension_numbers<[1], [0], [0], [1], [0, 0, 1, 1], [], []>} : vector<32x288xf32>, vector<288x64xf32>, vector<32x64xf32> -> vector<32x64xf32>
    %c0_4 = arith.constant 0 : index
    %c0_5 = arith.constant 0 : index
    %4 = vector.load %arg3[%c0_4, %c0_5] : memref<32x1xf32, #tpu.memory_space<vmem>>, vector<32x1xf32>
    %5 = vector.broadcast %4 : vector<32x1xf32> to vector<32x64xf32>
    %6 = arith.addf %3, %5 : vector<32x64xf32>
    %c0_6 = arith.constant 0 : index
    %c0_7 = arith.constant 0 : index
    %7 = vector.load %arg5[%c0_6, %c0_7] : memref<32x16xf32, #tpu.memory_space<vmem>>, vector<32x16xf32>
    %c0_8 = arith.constant 0 : index
    %c0_9 = arith.constant 0 : index
    %c0_10 = arith.constant 0 : index
    %8 = vector.load %arg4[%c0_8, %c0_9, %c0_10] : memref<1x16x64xf32, #tpu.memory_space<vmem>>, vector<1x16x64xf32>
    %9 = vector.shape_cast %8 : vector<1x16x64xf32> to vector<16x64xf32>
    %cst_11 = arith.constant dense<0.000000e+00> : vector<32x64xf32>
    %10 = tpu.matmul %7, %9, %cst_11 {dimension_numbers = #tpu.dot_dimension_numbers<[1], [0], [0], [1], [0, 0, 1, 1], [], []>} : vector<32x16xf32>, vector<16x64xf32>, vector<32x64xf32> -> vector<32x64xf32>
    %c0_12 = arith.constant 0 : index
    %c0_13 = arith.constant 0 : index
    %11 = vector.load %arg6[%c0_12, %c0_13] : memref<32x1xf32, #tpu.memory_space<vmem>>, vector<32x1xf32>
    %12 = vector.broadcast %11 : vector<32x1xf32> to vector<32x64xf32>
    %13 = arith.addf %10, %12 : vector<32x64xf32>
    %cst_14 = arith.constant 0.000000e+00 : f32
    %14 = vector.broadcast %cst_14 : f32 to vector<32x64xf32>
    %15 = arith.maximumf %6, %14 : vector<32x64xf32>
    %cst_15 = arith.constant 0.000000e+00 : f32
    %16 = vector.broadcast %cst_15 : f32 to vector<32x64xf32>
    %17 = arith.maximumf %13, %16 : vector<32x64xf32>
    %18 = arith.addf %15, %17 : vector<32x64xf32>
    %c0_16 = arith.constant 0 : index
    %c0_17 = arith.constant 0 : index
    %c0_18 = arith.constant 0 : index
    %19 = vector.load %arg7[%c0_16, %c0_17, %c0_18] : memref<1x32x64xf32, #tpu.memory_space<vmem>>, vector<1x32x64xf32>
    %20 = vector.shape_cast %19 : vector<1x32x64xf32> to vector<32x64xf32>
    %21 = vector.shape_cast %18 : vector<32x64xf32> to vector<1x32x64xf32>
    tpu.vector_store %arg7[%c0_16, %c0_17, %c0_18], %21 {strides = array<i32>} : memref<1x32x64xf32, #tpu.memory_space<vmem>>, vector<1x32x64xf32>,
    return
  }
  func.func @transform_0(%arg0: i32) -> (i32, i32, i32) {
    %c0_i32 = arith.constant 0 : i32
    %c0_i32_0 = arith.constant 0 : i32
    %c0_i32_1 = arith.constant 0 : i32
    return %arg0, %c0_i32, %c0_i32_0 : i32, i32, i32
  }
  func.func @transform_1(%arg0: i32) -> (i32, i32) {
    %c0_i32 = arith.constant 0 : i32
    %c0_i32_0 = arith.constant 0 : i32
    %c0_i32_1 = arith.constant 0 : i32
    return %c0_i32, %c0_i32_0 : i32, i32
  }
  func.func @transform_2(%arg0: i32) -> (i32, i32) {
    %c0_i32 = arith.constant 0 : i32
    %c0_i32_0 = arith.constant 0 : i32
    %c0_i32_1 = arith.constant 0 : i32
    return %c0_i32, %c0_i32_0 : i32, i32
  }
  func.func @transform_3(%arg0: i32) -> (i32, i32, i32) {
    %c0_i32 = arith.constant 0 : i32
    %c0_i32_0 = arith.constant 0 : i32
    %c0_i32_1 = arith.constant 0 : i32
    return %arg0, %c0_i32, %c0_i32_0 : i32, i32, i32
  }
  func.func @transform_4(%arg0: i32) -> (i32, i32) {
    %c0_i32 = arith.constant 0 : i32
    %c0_i32_0 = arith.constant 0 : i32
    %c0_i32_1 = arith.constant 0 : i32
    return %c0_i32, %c0_i32_0 : i32, i32
  }
  func.func @transform_5(%arg0: i32) -> (i32, i32) {
    %c0_i32 = arith.constant 0 : i32
    %c0_i32_0 = arith.constant 0 : i32
    %c0_i32_1 = arith.constant 0 : i32
    return %c0_i32, %c0_i32_0 : i32, i32
  }
  func.func @transform_6(%arg0: i32) -> (i32, i32, i32) {
    %c0_i32 = arith.constant 0 : i32
    %c0_i32_0 = arith.constant 0 : i32
    %c0_i32_1 = arith.constant 0 : i32
    return %arg0, %c0_i32, %c0_i32_0 : i32, i32, i32
  }
}

module attributes {stable_mosaic.version = 11 : i64} {
  func.func @_conv_bn_relu_kernel(%arg0: i32, %arg1: memref<1x288x16xf32, #tpu.memory_space<vmem>>, %arg2: memref<64x288xf32, #tpu.memory_space<vmem>>, %arg3: memref<64x1xf32, #tpu.memory_space<vmem>>, %arg4: memref<1x64x16xf32, #tpu.memory_space<vmem>>) attributes {dimension_semantics = [#tpu.dimension_semantics<parallel>], iteration_bounds = array<i64: 2>, scalar_prefetch = 0 : i64, scratch_operands = 0 : i64, tpu.core_type = #tpu.core_type<tc>, window_params = [{transform_indices = @transform_0, window_bounds = array<i64: 1, 288, 16>}, {pipeline_mode = #tpu.pipeline_mode<synchronous>, transform_indices = @transform_1, window_bounds = array<i64: 64, 288>}, {pipeline_mode = #tpu.pipeline_mode<synchronous>, transform_indices = @transform_2, window_bounds = array<i64: 64, 1>}, {transform_indices = @transform_3, window_bounds = array<i64: 1, 64, 16>}]} {
    %c0 = arith.constant 0 : index
    %c0_0 = arith.constant 0 : index
    %0 = vector.load %arg2[%c0, %c0_0] : memref<64x288xf32, #tpu.memory_space<vmem>>, vector<64x288xf32>
    %c0_1 = arith.constant 0 : index
    %c0_2 = arith.constant 0 : index
    %c0_3 = arith.constant 0 : index
    %1 = vector.load %arg1[%c0_1, %c0_2, %c0_3] : memref<1x288x16xf32, #tpu.memory_space<vmem>>, vector<1x288x16xf32>
    %2 = vector.shape_cast %1 : vector<1x288x16xf32> to vector<288x16xf32>
    %cst = arith.constant dense<0.000000e+00> : vector<64x16xf32>
    %3 = tpu.matmul %0, %2, %cst {dimension_numbers = #tpu.dot_dimension_numbers<[1], [0], [0], [1], [0, 0, 1, 1], [], []>} : vector<64x288xf32>, vector<288x16xf32>, vector<64x16xf32> -> vector<64x16xf32>
    %c0_4 = arith.constant 0 : index
    %c0_5 = arith.constant 0 : index
    %4 = vector.load %arg3[%c0_4, %c0_5] : memref<64x1xf32, #tpu.memory_space<vmem>>, vector<64x1xf32>
    %5 = vector.broadcast %4 : vector<64x1xf32> to vector<64x16xf32>
    %6 = arith.addf %3, %5 : vector<64x16xf32>
    %cst_6 = arith.constant 0.000000e+00 : f32
    %7 = vector.broadcast %cst_6 : f32 to vector<64x16xf32>
    %8 = arith.maximumf %6, %7 : vector<64x16xf32>
    %c0_7 = arith.constant 0 : index
    %c0_8 = arith.constant 0 : index
    %c0_9 = arith.constant 0 : index
    %9 = vector.load %arg4[%c0_7, %c0_8, %c0_9] : memref<1x64x16xf32, #tpu.memory_space<vmem>>, vector<1x64x16xf32>
    %10 = vector.shape_cast %9 : vector<1x64x16xf32> to vector<64x16xf32>
    %11 = vector.shape_cast %8 : vector<64x16xf32> to vector<1x64x16xf32>
    tpu.vector_store %arg4[%c0_7, %c0_8, %c0_9], %11 {strides = array<i32>} : memref<1x64x16xf32, #tpu.memory_space<vmem>>, vector<1x64x16xf32>,
    return
  }
  func.func @transform_0(%arg0: i32) -> (i32, i32, i32) {
    %c0_i32 = arith.constant 0 : i32
    %c0_i32_0 = arith.constant 0 : i32
    %c0_i32_1 = arith.constant 0 : i32
    return %arg0, %c0_i32, %c0_i32_0 : i32, i32, i32
  }
  func.func @transform_1(%arg0: i32) -> (i32, i32) {
    %c0_i32 = arith.constant 0 : i32
    %c0_i32_0 = arith.constant 0 : i32
    %c0_i32_1 = arith.constant 0 : i32
    return %c0_i32, %c0_i32_0 : i32, i32
  }
  func.func @transform_2(%arg0: i32) -> (i32, i32) {
    %c0_i32 = arith.constant 0 : i32
    %c0_i32_0 = arith.constant 0 : i32
    %c0_i32_1 = arith.constant 0 : i32
    return %c0_i32, %c0_i32_0 : i32, i32
  }
  func.func @transform_3(%arg0: i32) -> (i32, i32, i32) {
    %c0_i32 = arith.constant 0 : i32
    %c0_i32_0 = arith.constant 0 : i32
    %c0_i32_1 = arith.constant 0 : i32
    return %arg0, %c0_i32, %c0_i32_0 : i32, i32, i32
  }
}

module attributes {stable_mosaic.version = 11 : i64} {
  func.func @_conv_bn_relu_add_proj_kernel(%arg0: i32, %arg1: memref<1x576x16xf32, #tpu.memory_space<vmem>>, %arg2: memref<64x576xf32, #tpu.memory_space<vmem>>, %arg3: memref<64x1xf32, #tpu.memory_space<vmem>>, %arg4: memref<1x32x16xf32, #tpu.memory_space<vmem>>, %arg5: memref<64x32xf32, #tpu.memory_space<vmem>>, %arg6: memref<64x1xf32, #tpu.memory_space<vmem>>, %arg7: memref<1x64x16xf32, #tpu.memory_space<vmem>>) attributes {dimension_semantics = [#tpu.dimension_semantics<parallel>], iteration_bounds = array<i64: 2>, scalar_prefetch = 0 : i64, scratch_operands = 0 : i64, tpu.core_type = #tpu.core_type<tc>, window_params = [{transform_indices = @transform_0, window_bounds = array<i64: 1, 576, 16>}, {pipeline_mode = #tpu.pipeline_mode<synchronous>, transform_indices = @transform_1, window_bounds = array<i64: 64, 576>}, {pipeline_mode = #tpu.pipeline_mode<synchronous>, transform_indices = @transform_2, window_bounds = array<i64: 64, 1>}, {transform_indices = @transform_3, window_bounds = array<i64: 1, 32, 16>}, {pipeline_mode = #tpu.pipeline_mode<synchronous>, transform_indices = @transform_4, window_bounds = array<i64: 64, 32>}, {pipeline_mode = #tpu.pipeline_mode<synchronous>, transform_indices = @transform_5, window_bounds = array<i64: 64, 1>}, {transform_indices = @transform_6, window_bounds = array<i64: 1, 64, 16>}]} {
    %c0 = arith.constant 0 : index
    %c0_0 = arith.constant 0 : index
    %0 = vector.load %arg2[%c0, %c0_0] : memref<64x576xf32, #tpu.memory_space<vmem>>, vector<64x576xf32>
    %c0_1 = arith.constant 0 : index
    %c0_2 = arith.constant 0 : index
    %c0_3 = arith.constant 0 : index
    %1 = vector.load %arg1[%c0_1, %c0_2, %c0_3] : memref<1x576x16xf32, #tpu.memory_space<vmem>>, vector<1x576x16xf32>
    %2 = vector.shape_cast %1 : vector<1x576x16xf32> to vector<576x16xf32>
    %cst = arith.constant dense<0.000000e+00> : vector<64x16xf32>
    %3 = tpu.matmul %0, %2, %cst {dimension_numbers = #tpu.dot_dimension_numbers<[1], [0], [0], [1], [0, 0, 1, 1], [], []>} : vector<64x576xf32>, vector<576x16xf32>, vector<64x16xf32> -> vector<64x16xf32>
    %c0_4 = arith.constant 0 : index
    %c0_5 = arith.constant 0 : index
    %4 = vector.load %arg3[%c0_4, %c0_5] : memref<64x1xf32, #tpu.memory_space<vmem>>, vector<64x1xf32>
    %5 = vector.broadcast %4 : vector<64x1xf32> to vector<64x16xf32>
    %6 = arith.addf %3, %5 : vector<64x16xf32>
    %c0_6 = arith.constant 0 : index
    %c0_7 = arith.constant 0 : index
    %7 = vector.load %arg5[%c0_6, %c0_7] : memref<64x32xf32, #tpu.memory_space<vmem>>, vector<64x32xf32>
    %c0_8 = arith.constant 0 : index
    %c0_9 = arith.constant 0 : index
    %c0_10 = arith.constant 0 : index
    %8 = vector.load %arg4[%c0_8, %c0_9, %c0_10] : memref<1x32x16xf32, #tpu.memory_space<vmem>>, vector<1x32x16xf32>
    %9 = vector.shape_cast %8 : vector<1x32x16xf32> to vector<32x16xf32>
    %cst_11 = arith.constant dense<0.000000e+00> : vector<64x16xf32>
    %10 = tpu.matmul %7, %9, %cst_11 {dimension_numbers = #tpu.dot_dimension_numbers<[1], [0], [0], [1], [0, 0, 1, 1], [], []>} : vector<64x32xf32>, vector<32x16xf32>, vector<64x16xf32> -> vector<64x16xf32>
    %c0_12 = arith.constant 0 : index
    %c0_13 = arith.constant 0 : index
    %11 = vector.load %arg6[%c0_12, %c0_13] : memref<64x1xf32, #tpu.memory_space<vmem>>, vector<64x1xf32>
    %12 = vector.broadcast %11 : vector<64x1xf32> to vector<64x16xf32>
    %13 = arith.addf %10, %12 : vector<64x16xf32>
    %cst_14 = arith.constant 0.000000e+00 : f32
    %14 = vector.broadcast %cst_14 : f32 to vector<64x16xf32>
    %15 = arith.maximumf %6, %14 : vector<64x16xf32>
    %cst_15 = arith.constant 0.000000e+00 : f32
    %16 = vector.broadcast %cst_15 : f32 to vector<64x16xf32>
    %17 = arith.maximumf %13, %16 : vector<64x16xf32>
    %18 = arith.addf %15, %17 : vector<64x16xf32>
    %c0_16 = arith.constant 0 : index
    %c0_17 = arith.constant 0 : index
    %c0_18 = arith.constant 0 : index
    %19 = vector.load %arg7[%c0_16, %c0_17, %c0_18] : memref<1x64x16xf32, #tpu.memory_space<vmem>>, vector<1x64x16xf32>
    %20 = vector.shape_cast %19 : vector<1x64x16xf32> to vector<64x16xf32>
    %21 = vector.shape_cast %18 : vector<64x16xf32> to vector<1x64x16xf32>
    tpu.vector_store %arg7[%c0_16, %c0_17, %c0_18], %21 {strides = array<i32>} : memref<1x64x16xf32, #tpu.memory_space<vmem>>, vector<1x64x16xf32>,
    return
  }
  func.func @transform_0(%arg0: i32) -> (i32, i32, i32) {
    %c0_i32 = arith.constant 0 : i32
    %c0_i32_0 = arith.constant 0 : i32
    %c0_i32_1 = arith.constant 0 : i32
    return %arg0, %c0_i32, %c0_i32_0 : i32, i32, i32
  }
  func.func @transform_1(%arg0: i32) -> (i32, i32) {
    %c0_i32 = arith.constant 0 : i32
    %c0_i32_0 = arith.constant 0 : i32
    %c0_i32_1 = arith.constant 0 : i32
    return %c0_i32, %c0_i32_0 : i32, i32
  }
  func.func @transform_2(%arg0: i32) -> (i32, i32) {
    %c0_i32 = arith.constant 0 : i32
    %c0_i32_0 = arith.constant 0 : i32
    %c0_i32_1 = arith.constant 0 : i32
    return %c0_i32, %c0_i32_0 : i32, i32
  }
  func.func @transform_3(%arg0: i32) -> (i32, i32, i32) {
    %c0_i32 = arith.constant 0 : i32
    %c0_i32_0 = arith.constant 0 : i32
    %c0_i32_1 = arith.constant 0 : i32
    return %arg0, %c0_i32, %c0_i32_0 : i32, i32, i32
  }
  func.func @transform_4(%arg0: i32) -> (i32, i32) {
    %c0_i32 = arith.constant 0 : i32
    %c0_i32_0 = arith.constant 0 : i32
    %c0_i32_1 = arith.constant 0 : i32
    return %c0_i32, %c0_i32_0 : i32, i32
  }
  func.func @transform_5(%arg0: i32) -> (i32, i32) {
    %c0_i32 = arith.constant 0 : i32
    %c0_i32_0 = arith.constant 0 : i32
    %c0_i32_1 = arith.constant 0 : i32
    return %c0_i32, %c0_i32_0 : i32, i32
  }
  func.func @transform_6(%arg0: i32) -> (i32, i32, i32) {
    %c0_i32 = arith.constant 0 : i32
    %c0_i32_0 = arith.constant 0 : i32
    %c0_i32_1 = arith.constant 0 : i32
    return %arg0, %c0_i32, %c0_i32_0 : i32, i32, i32
  }
}

module attributes {stable_mosaic.version = 11 : i64} {
  func.func @_attn_out_mlp_kernel(%arg0: i32, %arg1: memref<1x9x64x16xf32, #tpu.memory_space<vmem>>, %arg2: memref<9x64x1xf32, #tpu.memory_space<vmem>>, %arg3: memref<64x64xf32, #tpu.memory_space<vmem>>, %arg4: memref<1x64x16xf32, #tpu.memory_space<vmem>>, %arg5: memref<64x1xf32, #tpu.memory_space<vmem>>, %arg6: memref<64x1xf32, #tpu.memory_space<vmem>>, %arg7: memref<64x64xf32, #tpu.memory_space<vmem>>, %arg8: memref<1x64x16xf32, #tpu.memory_space<vmem>>) attributes {dimension_semantics = [#tpu.dimension_semantics<parallel>], iteration_bounds = array<i64: 2>, scalar_prefetch = 0 : i64, scratch_operands = 0 : i64, tpu.core_type = #tpu.core_type<tc>, window_params = [{transform_indices = @transform_0, window_bounds = array<i64: 1, 9, 64, 16>}, {pipeline_mode = #tpu.pipeline_mode<synchronous>, transform_indices = @transform_1, window_bounds = array<i64: 9, 64, 1>}, {pipeline_mode = #tpu.pipeline_mode<synchronous>, transform_indices = @transform_2, window_bounds = array<i64: 64, 64>}, {transform_indices = @transform_3, window_bounds = array<i64: 1, 64, 16>}, {pipeline_mode = #tpu.pipeline_mode<synchronous>, transform_indices = @transform_4, window_bounds = array<i64: 64, 1>}, {pipeline_mode = #tpu.pipeline_mode<synchronous>, transform_indices = @transform_5, window_bounds = array<i64: 64, 1>}, {pipeline_mode = #tpu.pipeline_mode<synchronous>, transform_indices = @transform_6, window_bounds = array<i64: 64, 64>}, {transform_indices = @transform_7, window_bounds = array<i64: 1, 64, 16>}]} {
    %c0 = arith.constant 0 : index
    %c0_0 = arith.constant 0 : index
    %c0_1 = arith.constant 0 : index
    %c0_2 = arith.constant 0 : index
    %0 = vector.load %arg1[%c0, %c0_0, %c0_1, %c0_2] : memref<1x9x64x16xf32, #tpu.memory_space<vmem>>, vector<1x1x64x16xf32>
    %1 = vector.shape_cast %0 : vector<1x1x64x16xf32> to vector<64x16xf32>
    %c0_3 = arith.constant 0 : index
    %c0_4 = arith.constant 0 : index
    %c0_5 = arith.constant 0 : index
    %2 = vector.load %arg2[%c0_3, %c0_4, %c0_5] : memref<9x64x1xf32, #tpu.memory_space<vmem>>, vector<1x64x1xf32>
    %3 = vector.shape_cast %2 : vector<1x64x1xf32> to vector<64x1xf32>
    %4 = vector.broadcast %3 : vector<64x1xf32> to vector<64x16xf32>
    %5 = arith.mulf %1, %4 : vector<64x16xf32>
    %c0_6 = arith.constant 0 : index
    %c1 = arith.constant 1 : index
    %c0_7 = arith.constant 0 : index
    %c0_8 = arith.constant 0 : index
    %6 = vector.load %arg1[%c0_6, %c1, %c0_7, %c0_8] : memref<1x9x64x16xf32, #tpu.memory_space<vmem>>, vector<1x1x64x16xf32>
    %7 = vector.shape_cast %6 : vector<1x1x64x16xf32> to vector<64x16xf32>
    %c1_9 = arith.constant 1 : index
    %c0_10 = arith.constant 0 : index
    %c0_11 = arith.constant 0 : index
    %8 = vector.load %arg2[%c1_9, %c0_10, %c0_11] : memref<9x64x1xf32, #tpu.memory_space<vmem>>, vector<1x64x1xf32>
    %9 = vector.shape_cast %8 : vector<1x64x1xf32> to vector<64x1xf32>
    %10 = vector.broadcast %9 : vector<64x1xf32> to vector<64x16xf32>
    %11 = arith.mulf %7, %10 : vector<64x16xf32>
    %12 = arith.addf %5, %11 : vector<64x16xf32>
    %c0_12 = arith.constant 0 : index
    %c2 = arith.constant 2 : index
    %c0_13 = arith.constant 0 : index
    %c0_14 = arith.constant 0 : index
    %13 = vector.load %arg1[%c0_12, %c2, %c0_13, %c0_14] : memref<1x9x64x16xf32, #tpu.memory_space<vmem>>, vector<1x1x64x16xf32>
    %14 = vector.shape_cast %13 : vector<1x1x64x16xf32> to vector<64x16xf32>
    %c2_15 = arith.constant 2 : index
    %c0_16 = arith.constant 0 : index
    %c0_17 = arith.constant 0 : index
    %15 = vector.load %arg2[%c2_15, %c0_16, %c0_17] : memref<9x64x1xf32, #tpu.memory_space<vmem>>, vector<1x64x1xf32>
    %16 = vector.shape_cast %15 : vector<1x64x1xf32> to vector<64x1xf32>
    %17 = vector.broadcast %16 : vector<64x1xf32> to vector<64x16xf32>
    %18 = arith.mulf %14, %17 : vector<64x16xf32>
    %19 = arith.addf %12, %18 : vector<64x16xf32>
    %c0_18 = arith.constant 0 : index
    %c3 = arith.constant 3 : index
    %c0_19 = arith.constant 0 : index
    %c0_20 = arith.constant 0 : index
    %20 = vector.load %arg1[%c0_18, %c3, %c0_19, %c0_20] : memref<1x9x64x16xf32, #tpu.memory_space<vmem>>, vector<1x1x64x16xf32>
    %21 = vector.shape_cast %20 : vector<1x1x64x16xf32> to vector<64x16xf32>
    %c3_21 = arith.constant 3 : index
    %c0_22 = arith.constant 0 : index
    %c0_23 = arith.constant 0 : index
    %22 = vector.load %arg2[%c3_21, %c0_22, %c0_23] : memref<9x64x1xf32, #tpu.memory_space<vmem>>, vector<1x64x1xf32>
    %23 = vector.shape_cast %22 : vector<1x64x1xf32> to vector<64x1xf32>
    %24 = vector.broadcast %23 : vector<64x1xf32> to vector<64x16xf32>
    %25 = arith.mulf %21, %24 : vector<64x16xf32>
    %26 = arith.addf %19, %25 : vector<64x16xf32>
    %c0_24 = arith.constant 0 : index
    %c4 = arith.constant 4 : index
    %c0_25 = arith.constant 0 : index
    %c0_26 = arith.constant 0 : index
    %27 = vector.load %arg1[%c0_24, %c4, %c0_25, %c0_26] : memref<1x9x64x16xf32, #tpu.memory_space<vmem>>, vector<1x1x64x16xf32>
    %28 = vector.shape_cast %27 : vector<1x1x64x16xf32> to vector<64x16xf32>
    %c4_27 = arith.constant 4 : index
    %c0_28 = arith.constant 0 : index
    %c0_29 = arith.constant 0 : index
    %29 = vector.load %arg2[%c4_27, %c0_28, %c0_29] : memref<9x64x1xf32, #tpu.memory_space<vmem>>, vector<1x64x1xf32>
    %30 = vector.shape_cast %29 : vector<1x64x1xf32> to vector<64x1xf32>
    %31 = vector.broadcast %30 : vector<64x1xf32> to vector<64x16xf32>
    %32 = arith.mulf %28, %31 : vector<64x16xf32>
    %33 = arith.addf %26, %32 : vector<64x16xf32>
    %c0_30 = arith.constant 0 : index
    %c5 = arith.constant 5 : index
    %c0_31 = arith.constant 0 : index
    %c0_32 = arith.constant 0 : index
    %34 = vector.load %arg1[%c0_30, %c5, %c0_31, %c0_32] : memref<1x9x64x16xf32, #tpu.memory_space<vmem>>, vector<1x1x64x16xf32>
    %35 = vector.shape_cast %34 : vector<1x1x64x16xf32> to vector<64x16xf32>
    %c5_33 = arith.constant 5 : index
    %c0_34 = arith.constant 0 : index
    %c0_35 = arith.constant 0 : index
    %36 = vector.load %arg2[%c5_33, %c0_34, %c0_35] : memref<9x64x1xf32, #tpu.memory_space<vmem>>, vector<1x64x1xf32>
    %37 = vector.shape_cast %36 : vector<1x64x1xf32> to vector<64x1xf32>
    %38 = vector.broadcast %37 : vector<64x1xf32> to vector<64x16xf32>
    %39 = arith.mulf %35, %38 : vector<64x16xf32>
    %40 = arith.addf %33, %39 : vector<64x16xf32>
    %c0_36 = arith.constant 0 : index
    %c6 = arith.constant 6 : index
    %c0_37 = arith.constant 0 : index
    %c0_38 = arith.constant 0 : index
    %41 = vector.load %arg1[%c0_36, %c6, %c0_37, %c0_38] : memref<1x9x64x16xf32, #tpu.memory_space<vmem>>, vector<1x1x64x16xf32>
    %42 = vector.shape_cast %41 : vector<1x1x64x16xf32> to vector<64x16xf32>
    %c6_39 = arith.constant 6 : index
    %c0_40 = arith.constant 0 : index
    %c0_41 = arith.constant 0 : index
    %43 = vector.load %arg2[%c6_39, %c0_40, %c0_41] : memref<9x64x1xf32, #tpu.memory_space<vmem>>, vector<1x64x1xf32>
    %44 = vector.shape_cast %43 : vector<1x64x1xf32> to vector<64x1xf32>
    %45 = vector.broadcast %44 : vector<64x1xf32> to vector<64x16xf32>
    %46 = arith.mulf %42, %45 : vector<64x16xf32>
    %47 = arith.addf %40, %46 : vector<64x16xf32>
    %c0_42 = arith.constant 0 : index
    %c7 = arith.constant 7 : index
    %c0_43 = arith.constant 0 : index
    %c0_44 = arith.constant 0 : index
    %48 = vector.load %arg1[%c0_42, %c7, %c0_43, %c0_44] : memref<1x9x64x16xf32, #tpu.memory_space<vmem>>, vector<1x1x64x16xf32>
    %49 = vector.shape_cast %48 : vector<1x1x64x16xf32> to vector<64x16xf32>
    %c7_45 = arith.constant 7 : index
    %c0_46 = arith.constant 0 : index
    %c0_47 = arith.constant 0 : index
    %50 = vector.load %arg2[%c7_45, %c0_46, %c0_47] : memref<9x64x1xf32, #tpu.memory_space<vmem>>, vector<1x64x1xf32>
    %51 = vector.shape_cast %50 : vector<1x64x1xf32> to vector<64x1xf32>
    %52 = vector.broadcast %51 : vector<64x1xf32> to vector<64x16xf32>
    %53 = arith.mulf %49, %52 : vector<64x16xf32>
    %54 = arith.addf %47, %53 : vector<64x16xf32>
    %c0_48 = arith.constant 0 : index
    %c8 = arith.constant 8 : index
    %c0_49 = arith.constant 0 : index
    %c0_50 = arith.constant 0 : index
    %55 = vector.load %arg1[%c0_48, %c8, %c0_49, %c0_50] : memref<1x9x64x16xf32, #tpu.memory_space<vmem>>, vector<1x1x64x16xf32>
    %56 = vector.shape_cast %55 : vector<1x1x64x16xf32> to vector<64x16xf32>
    %c8_51 = arith.constant 8 : index
    %c0_52 = arith.constant 0 : index
    %c0_53 = arith.constant 0 : index
    %57 = vector.load %arg2[%c8_51, %c0_52, %c0_53] : memref<9x64x1xf32, #tpu.memory_space<vmem>>, vector<1x64x1xf32>
    %58 = vector.shape_cast %57 : vector<1x64x1xf32> to vector<64x1xf32>
    %59 = vector.broadcast %58 : vector<64x1xf32> to vector<64x16xf32>
    %60 = arith.mulf %56, %59 : vector<64x16xf32>
    %61 = arith.addf %54, %60 : vector<64x16xf32>
    %c0_54 = arith.constant 0 : index
    %c0_55 = arith.constant 0 : index
    %62 = vector.load %arg3[%c0_54, %c0_55] : memref<64x64xf32, #tpu.memory_space<vmem>>, vector<64x64xf32>
    %cst = arith.constant dense<0.000000e+00> : vector<64x16xf32>
    %63 = tpu.matmul %62, %61, %cst {dimension_numbers = #tpu.dot_dimension_numbers<[1], [0], [0], [1], [0, 0, 1, 1], [], []>} : vector<64x64xf32>, vector<64x16xf32>, vector<64x16xf32> -> vector<64x16xf32>
    %c0_56 = arith.constant 0 : index
    %c0_57 = arith.constant 0 : index
    %c0_58 = arith.constant 0 : index
    %64 = vector.load %arg4[%c0_56, %c0_57, %c0_58] : memref<1x64x16xf32, #tpu.memory_space<vmem>>, vector<1x64x16xf32>
    %65 = vector.shape_cast %64 : vector<1x64x16xf32> to vector<64x16xf32>
    %66 = arith.addf %63, %65 : vector<64x16xf32>
    %c0_59 = arith.constant 0 : index
    %c0_60 = arith.constant 0 : index
    %67 = vector.load %arg5[%c0_59, %c0_60] : memref<64x1xf32, #tpu.memory_space<vmem>>, vector<64x1xf32>
    %68 = vector.broadcast %67 : vector<64x1xf32> to vector<64x16xf32>
    %69 = arith.mulf %66, %68 : vector<64x16xf32>
    %c0_61 = arith.constant 0 : index
    %c0_62 = arith.constant 0 : index
    %70 = vector.load %arg6[%c0_61, %c0_62] : memref<64x1xf32, #tpu.memory_space<vmem>>, vector<64x1xf32>
    %71 = vector.broadcast %70 : vector<64x1xf32> to vector<64x16xf32>
    %72 = arith.addf %69, %71 : vector<64x16xf32>
    %c0_63 = arith.constant 0 : index
    %c0_64 = arith.constant 0 : index
    %73 = vector.load %arg7[%c0_63, %c0_64] : memref<64x64xf32, #tpu.memory_space<vmem>>, vector<64x64xf32>
    %cst_65 = arith.constant dense<0.000000e+00> : vector<64x16xf32>
    %74 = tpu.matmul %73, %72, %cst_65 {dimension_numbers = #tpu.dot_dimension_numbers<[1], [0], [0], [1], [0, 0, 1, 1], [], []>} : vector<64x64xf32>, vector<64x16xf32>, vector<64x16xf32> -> vector<64x16xf32>
    %cst_66 = arith.constant 0.000000e+00 : f32
    %75 = vector.broadcast %cst_66 : f32 to vector<64x16xf32>
    %76 = arith.maximumf %74, %75 : vector<64x16xf32>
    %77 = arith.addf %76, %66 : vector<64x16xf32>
    %c0_67 = arith.constant 0 : index
    %c0_68 = arith.constant 0 : index
    %c0_69 = arith.constant 0 : index
    %78 = vector.load %arg8[%c0_67, %c0_68, %c0_69] : memref<1x64x16xf32, #tpu.memory_space<vmem>>, vector<1x64x16xf32>
    %79 = vector.shape_cast %78 : vector<1x64x16xf32> to vector<64x16xf32>
    %80 = vector.shape_cast %77 : vector<64x16xf32> to vector<1x64x16xf32>
    tpu.vector_store %arg8[%c0_67, %c0_68, %c0_69], %80 {strides = array<i32>} : memref<1x64x16xf32, #tpu.memory_space<vmem>>, vector<1x64x16xf32>,
    return
  }
  func.func @transform_0(%arg0: i32) -> (i32, i32, i32, i32) {
    %c0_i32 = arith.constant 0 : i32
    %c0_i32_0 = arith.constant 0 : i32
    %c0_i32_1 = arith.constant 0 : i32
    %c0_i32_2 = arith.constant 0 : i32
    return %arg0, %c0_i32, %c0_i32_0, %c0_i32_1 : i32, i32, i32, i32
  }
  func.func @transform_1(%arg0: i32) -> (i32, i32, i32) {
    %c0_i32 = arith.constant 0 : i32
    %c0_i32_0 = arith.constant 0 : i32
    %c0_i32_1 = arith.constant 0 : i32
    %c0_i32_2 = arith.constant 0 : i32
    return %c0_i32, %c0_i32_0, %c0_i32_1 : i32, i32, i32
  }
  func.func @transform_2(%arg0: i32) -> (i32, i32) {
    %c0_i32 = arith.constant 0 : i32
    %c0_i32_0 = arith.constant 0 : i32
    %c0_i32_1 = arith.constant 0 : i32
    return %c0_i32, %c0_i32_0 : i32, i32
  }
  func.func @transform_3(%arg0: i32) -> (i32, i32, i32) {
    %c0_i32 = arith.constant 0 : i32
    %c0_i32_0 = arith.constant 0 : i32
    %c0_i32_1 = arith.constant 0 : i32
    return %arg0, %c0_i32, %c0_i32_0 : i32, i32, i32
  }
  func.func @transform_4(%arg0: i32) -> (i32, i32) {
    %c0_i32 = arith.constant 0 : i32
    %c0_i32_0 = arith.constant 0 : i32
    %c0_i32_1 = arith.constant 0 : i32
    return %c0_i32, %c0_i32_0 : i32, i32
  }
  func.func @transform_5(%arg0: i32) -> (i32, i32) {
    %c0_i32 = arith.constant 0 : i32
    %c0_i32_0 = arith.constant 0 : i32
    %c0_i32_1 = arith.constant 0 : i32
    return %c0_i32, %c0_i32_0 : i32, i32
  }
  func.func @transform_6(%arg0: i32) -> (i32, i32) {
    %c0_i32 = arith.constant 0 : i32
    %c0_i32_0 = arith.constant 0 : i32
    %c0_i32_1 = arith.constant 0 : i32
    return %c0_i32, %c0_i32_0 : i32, i32
  }
  func.func @transform_7(%arg0: i32) -> (i32, i32, i32) {
    %c0_i32 = arith.constant 0 : i32
    %c0_i32_0 = arith.constant 0 : i32
    %c0_i32_1 = arith.constant 0 : i32
    return %arg0, %c0_i32, %c0_i32_0 : i32, i32, i32
  }
}

module attributes {stable_mosaic.version = 11 : i64} {
  func.func @kernel(%arg0: i32, %arg1: memref<1x9x64x16xf32, #tpu.memory_space<vmem>>, %arg2: memref<9x64x1xf32, #tpu.memory_space<vmem>>, %arg3: memref<192x64xf32, #tpu.memory_space<vmem>>, %arg4: memref<16x4xf32, #tpu.memory_space<vmem>>, %arg5: memref<1x64x16xf32, #tpu.memory_space<vmem>>) attributes {dimension_semantics = [#tpu.dimension_semantics<parallel>], iteration_bounds = array<i64: 2>, scalar_prefetch = 0 : i64, scratch_operands = 0 : i64, tpu.core_type = #tpu.core_type<tc>, window_params = [{transform_indices = @transform_0, window_bounds = array<i64: 1, 9, 64, 16>}, {pipeline_mode = #tpu.pipeline_mode<synchronous>, transform_indices = @transform_1, window_bounds = array<i64: 9, 64, 1>}, {pipeline_mode = #tpu.pipeline_mode<synchronous>, transform_indices = @transform_2, window_bounds = array<i64: 192, 64>}, {pipeline_mode = #tpu.pipeline_mode<synchronous>, transform_indices = @transform_3, window_bounds = array<i64: 16, 4>}, {transform_indices = @transform_4, window_bounds = array<i64: 1, 64, 16>}]} {
    %c0 = arith.constant 0 : index
    %c0_0 = arith.constant 0 : index
    %c0_1 = arith.constant 0 : index
    %c0_2 = arith.constant 0 : index
    %0 = vector.load %arg1[%c0, %c0_0, %c0_1, %c0_2] : memref<1x9x64x16xf32, #tpu.memory_space<vmem>>, vector<1x1x64x16xf32>
    %1 = vector.shape_cast %0 : vector<1x1x64x16xf32> to vector<64x16xf32>
    %c0_3 = arith.constant 0 : index
    %c0_4 = arith.constant 0 : index
    %c0_5 = arith.constant 0 : index
    %2 = vector.load %arg2[%c0_3, %c0_4, %c0_5] : memref<9x64x1xf32, #tpu.memory_space<vmem>>, vector<1x64x1xf32>
    %3 = vector.shape_cast %2 : vector<1x64x1xf32> to vector<64x1xf32>
    %4 = vector.broadcast %3 : vector<64x1xf32> to vector<64x16xf32>
    %5 = arith.mulf %1, %4 : vector<64x16xf32>
    %c0_6 = arith.constant 0 : index
    %c1 = arith.constant 1 : index
    %c0_7 = arith.constant 0 : index
    %c0_8 = arith.constant 0 : index
    %6 = vector.load %arg1[%c0_6, %c1, %c0_7, %c0_8] : memref<1x9x64x16xf32, #tpu.memory_space<vmem>>, vector<1x1x64x16xf32>
    %7 = vector.shape_cast %6 : vector<1x1x64x16xf32> to vector<64x16xf32>
    %c1_9 = arith.constant 1 : index
    %c0_10 = arith.constant 0 : index
    %c0_11 = arith.constant 0 : index
    %8 = vector.load %arg2[%c1_9, %c0_10, %c0_11] : memref<9x64x1xf32, #tpu.memory_space<vmem>>, vector<1x64x1xf32>
    %9 = vector.shape_cast %8 : vector<1x64x1xf32> to vector<64x1xf32>
    %10 = vector.broadcast %9 : vector<64x1xf32> to vector<64x16xf32>
    %11 = arith.mulf %7, %10 : vector<64x16xf32>
    %12 = arith.addf %5, %11 : vector<64x16xf32>
    %c0_12 = arith.constant 0 : index
    %c2 = arith.constant 2 : index
    %c0_13 = arith.constant 0 : index
    %c0_14 = arith.constant 0 : index
    %13 = vector.load %arg1[%c0_12, %c2, %c0_13, %c0_14] : memref<1x9x64x16xf32, #tpu.memory_space<vmem>>, vector<1x1x64x16xf32>
    %14 = vector.shape_cast %13 : vector<1x1x64x16xf32> to vector<64x16xf32>
    %c2_15 = arith.constant 2 : index
    %c0_16 = arith.constant 0 : index
    %c0_17 = arith.constant 0 : index
    %15 = vector.load %arg2[%c2_15, %c0_16, %c0_17] : memref<9x64x1xf32, #tpu.memory_space<vmem>>, vector<1x64x1xf32>
    %16 = vector.shape_cast %15 : vector<1x64x1xf32> to vector<64x1xf32>
    %17 = vector.broadcast %16 : vector<64x1xf32> to vector<64x16xf32>
    %18 = arith.mulf %14, %17 : vector<64x16xf32>
    %19 = arith.addf %12, %18 : vector<64x16xf32>
    %c0_18 = arith.constant 0 : index
    %c3 = arith.constant 3 : index
    %c0_19 = arith.constant 0 : index
    %c0_20 = arith.constant 0 : index
    %20 = vector.load %arg1[%c0_18, %c3, %c0_19, %c0_20] : memref<1x9x64x16xf32, #tpu.memory_space<vmem>>, vector<1x1x64x16xf32>
    %21 = vector.shape_cast %20 : vector<1x1x64x16xf32> to vector<64x16xf32>
    %c3_21 = arith.constant 3 : index
    %c0_22 = arith.constant 0 : index
    %c0_23 = arith.constant 0 : index
    %22 = vector.load %arg2[%c3_21, %c0_22, %c0_23] : memref<9x64x1xf32, #tpu.memory_space<vmem>>, vector<1x64x1xf32>
    %23 = vector.shape_cast %22 : vector<1x64x1xf32> to vector<64x1xf32>
    %24 = vector.broadcast %23 : vector<64x1xf32> to vector<64x16xf32>
    %25 = arith.mulf %21, %24 : vector<64x16xf32>
    %26 = arith.addf %19, %25 : vector<64x16xf32>
    %c0_24 = arith.constant 0 : index
    %c4 = arith.constant 4 : index
    %c0_25 = arith.constant 0 : index
    %c0_26 = arith.constant 0 : index
    %27 = vector.load %arg1[%c0_24, %c4, %c0_25, %c0_26] : memref<1x9x64x16xf32, #tpu.memory_space<vmem>>, vector<1x1x64x16xf32>
    %28 = vector.shape_cast %27 : vector<1x1x64x16xf32> to vector<64x16xf32>
    %c4_27 = arith.constant 4 : index
    %c0_28 = arith.constant 0 : index
    %c0_29 = arith.constant 0 : index
    %29 = vector.load %arg2[%c4_27, %c0_28, %c0_29] : memref<9x64x1xf32, #tpu.memory_space<vmem>>, vector<1x64x1xf32>
    %30 = vector.shape_cast %29 : vector<1x64x1xf32> to vector<64x1xf32>
    %31 = vector.broadcast %30 : vector<64x1xf32> to vector<64x16xf32>
    %32 = arith.mulf %28, %31 : vector<64x16xf32>
    %33 = arith.addf %26, %32 : vector<64x16xf32>
    %c0_30 = arith.constant 0 : index
    %c5 = arith.constant 5 : index
    %c0_31 = arith.constant 0 : index
    %c0_32 = arith.constant 0 : index
    %34 = vector.load %arg1[%c0_30, %c5, %c0_31, %c0_32] : memref<1x9x64x16xf32, #tpu.memory_space<vmem>>, vector<1x1x64x16xf32>
    %35 = vector.shape_cast %34 : vector<1x1x64x16xf32> to vector<64x16xf32>
    %c5_33 = arith.constant 5 : index
    %c0_34 = arith.constant 0 : index
    %c0_35 = arith.constant 0 : index
    %36 = vector.load %arg2[%c5_33, %c0_34, %c0_35] : memref<9x64x1xf32, #tpu.memory_space<vmem>>, vector<1x64x1xf32>
    %37 = vector.shape_cast %36 : vector<1x64x1xf32> to vector<64x1xf32>
    %38 = vector.broadcast %37 : vector<64x1xf32> to vector<64x16xf32>
    %39 = arith.mulf %35, %38 : vector<64x16xf32>
    %40 = arith.addf %33, %39 : vector<64x16xf32>
    %c0_36 = arith.constant 0 : index
    %c6 = arith.constant 6 : index
    %c0_37 = arith.constant 0 : index
    %c0_38 = arith.constant 0 : index
    %41 = vector.load %arg1[%c0_36, %c6, %c0_37, %c0_38] : memref<1x9x64x16xf32, #tpu.memory_space<vmem>>, vector<1x1x64x16xf32>
    %42 = vector.shape_cast %41 : vector<1x1x64x16xf32> to vector<64x16xf32>
    %c6_39 = arith.constant 6 : index
    %c0_40 = arith.constant 0 : index
    %c0_41 = arith.constant 0 : index
    %43 = vector.load %arg2[%c6_39, %c0_40, %c0_41] : memref<9x64x1xf32, #tpu.memory_space<vmem>>, vector<1x64x1xf32>
    %44 = vector.shape_cast %43 : vector<1x64x1xf32> to vector<64x1xf32>
    %45 = vector.broadcast %44 : vector<64x1xf32> to vector<64x16xf32>
    %46 = arith.mulf %42, %45 : vector<64x16xf32>
    %47 = arith.addf %40, %46 : vector<64x16xf32>
    %c0_42 = arith.constant 0 : index
    %c7 = arith.constant 7 : index
    %c0_43 = arith.constant 0 : index
    %c0_44 = arith.constant 0 : index
    %48 = vector.load %arg1[%c0_42, %c7, %c0_43, %c0_44] : memref<1x9x64x16xf32, #tpu.memory_space<vmem>>, vector<1x1x64x16xf32>
    %49 = vector.shape_cast %48 : vector<1x1x64x16xf32> to vector<64x16xf32>
    %c7_45 = arith.constant 7 : index
    %c0_46 = arith.constant 0 : index
    %c0_47 = arith.constant 0 : index
    %50 = vector.load %arg2[%c7_45, %c0_46, %c0_47] : memref<9x64x1xf32, #tpu.memory_space<vmem>>, vector<1x64x1xf32>
    %51 = vector.shape_cast %50 : vector<1x64x1xf32> to vector<64x1xf32>
    %52 = vector.broadcast %51 : vector<64x1xf32> to vector<64x16xf32>
    %53 = arith.mulf %49, %52 : vector<64x16xf32>
    %54 = arith.addf %47, %53 : vector<64x16xf32>
    %c0_48 = arith.constant 0 : index
    %c8 = arith.constant 8 : index
    %c0_49 = arith.constant 0 : index
    %c0_50 = arith.constant 0 : index
    %55 = vector.load %arg1[%c0_48, %c8, %c0_49, %c0_50] : memref<1x9x64x16xf32, #tpu.memory_space<vmem>>, vector<1x1x64x16xf32>
    %56 = vector.shape_cast %55 : vector<1x1x64x16xf32> to vector<64x16xf32>
    %c8_51 = arith.constant 8 : index
    %c0_52 = arith.constant 0 : index
    %c0_53 = arith.constant 0 : index
    %57 = vector.load %arg2[%c8_51, %c0_52, %c0_53] : memref<9x64x1xf32, #tpu.memory_space<vmem>>, vector<1x64x1xf32>
    %58 = vector.shape_cast %57 : vector<1x64x1xf32> to vector<64x1xf32>
    %59 = vector.broadcast %58 : vector<64x1xf32> to vector<64x16xf32>
    %60 = arith.mulf %56, %59 : vector<64x16xf32>
    %61 = arith.addf %54, %60 : vector<64x16xf32>
    %c0_54 = arith.constant 0 : index
    %c0_55 = arith.constant 0 : index
    %62 = vector.load %arg3[%c0_54, %c0_55] : memref<192x64xf32, #tpu.memory_space<vmem>>, vector<192x64xf32>
    %cst = arith.constant dense<0.000000e+00> : vector<192x16xf32>
    %63 = tpu.matmul %62, %61, %cst {dimension_numbers = #tpu.dot_dimension_numbers<[1], [0], [0], [1], [0, 0, 1, 1], [], []>} : vector<192x64xf32>, vector<64x16xf32>, vector<192x16xf32> -> vector<192x16xf32>
    %c0_56 = arith.constant 0 : index
    %c0_57 = arith.constant 0 : index
    %64 = vector.load %arg4[%c0_56, %c0_57] : memref<16x4xf32, #tpu.memory_space<vmem>>, vector<16x4xf32>
    %65 = vector.extract_strided_slice %63 {offsets = [64, 0], sizes = [64, 16], strides = [1, 1]} : vector<192x16xf32> to vector<64x16xf32>
    %66 = vector.extract_strided_slice %63 {offsets = [128, 0], sizes = [64, 16], strides = [1, 1]} : vector<192x16xf32> to vector<64x16xf32>
    %cst_58 = arith.constant dense<0.000000e+00> : vector<64x4xf32>
    %67 = tpu.matmul %65, %64, %cst_58 {dimension_numbers = #tpu.dot_dimension_numbers<[1], [0], [0], [1], [0, 0, 1, 1], [], []>} : vector<64x16xf32>, vector<16x4xf32>, vector<64x4xf32> -> vector<64x4xf32>
    %cst_59 = arith.constant dense<0.000000e+00> : vector<64x4xf32>
    %68 = tpu.matmul %66, %64, %cst_59 {dimension_numbers = #tpu.dot_dimension_numbers<[1], [0], [0], [1], [0, 0, 1, 1], [], []>} : vector<64x16xf32>, vector<16x4xf32>, vector<64x4xf32> -> vector<64x4xf32>
    %69 = vector.extract_strided_slice %63 {offsets = [0, 0], sizes = [16, 16], strides = [1, 1]} : vector<192x16xf32> to vector<16x16xf32>
    %70 = vector.extract_strided_slice %67 {offsets = [0, 0], sizes = [16, 4], strides = [1, 1]} : vector<64x4xf32> to vector<16x4xf32>
    %71 = vector.extract_strided_slice %68 {offsets = [0, 0], sizes = [16, 4], strides = [1, 1]} : vector<64x4xf32> to vector<16x4xf32>
    %cst_60 = arith.constant dense<0.000000e+00> : vector<16x4xf32>
    %72 = tpu.matmul %69, %70, %cst_60 {dimension_numbers = #tpu.dot_dimension_numbers<[0], [0], [1], [1], [0, 1, 1, 1], [], []>} : vector<16x16xf32>, vector<16x4xf32>, vector<16x4xf32> -> vector<16x4xf32>
    %cst_61 = arith.constant dense<0xFF800000> : vector<16xf32>
    %73 = vector.multi_reduction <maximumf>, %72, %cst_61 [1] : vector<16x4xf32> to vector<16xf32>
    %74 = vector.shape_cast %73 : vector<16xf32> to vector<16x1xf32>
    %75 = vector.broadcast %74 : vector<16x1xf32> to vector<16x4xf32>
    %76 = arith.subf %72, %75 : vector<16x4xf32>
    %77 = math.exp %76 : vector<16x4xf32>
    %cst_62 = arith.constant dense<0.000000e+00> : vector<16xf32>
    %78 = vector.multi_reduction <add>, %77, %cst_62 [1] : vector<16x4xf32> to vector<16xf32>
    %79 = vector.shape_cast %78 : vector<16xf32> to vector<16x1xf32>
    %80 = tpu.reciprocal %79 {approx = true} : vector<16x1xf32> -> vector<16x1xf32>
    %81 = vector.broadcast %80 : vector<16x1xf32> to vector<16x4xf32>
    %82 = arith.mulf %77, %81 : vector<16x4xf32>
    %cst_63 = arith.constant dense<0.000000e+00> : vector<16x16xf32>
    %83 = tpu.matmul %71, %82, %cst_63 {dimension_numbers = #tpu.dot_dimension_numbers<[1], [1], [0], [0], [0, 0, 1, 0], [], []>} : vector<16x4xf32>, vector<16x4xf32>, vector<16x16xf32> -> vector<16x16xf32>
    %84 = vector.extract_strided_slice %63 {offsets = [16, 0], sizes = [16, 16], strides = [1, 1]} : vector<192x16xf32> to vector<16x16xf32>
    %85 = vector.extract_strided_slice %67 {offsets = [16, 0], sizes = [16, 4], strides = [1, 1]} : vector<64x4xf32> to vector<16x4xf32>
    %86 = vector.extract_strided_slice %68 {offsets = [16, 0], sizes = [16, 4], strides = [1, 1]} : vector<64x4xf32> to vector<16x4xf32>
    %cst_64 = arith.constant dense<0.000000e+00> : vector<16x4xf32>
    %87 = tpu.matmul %84, %85, %cst_64 {dimension_numbers = #tpu.dot_dimension_numbers<[0], [0], [1], [1], [0, 1, 1, 1], [], []>} : vector<16x16xf32>, vector<16x4xf32>, vector<16x4xf32> -> vector<16x4xf32>
    %cst_65 = arith.constant dense<0xFF800000> : vector<16xf32>
    %88 = vector.multi_reduction <maximumf>, %87, %cst_65 [1] : vector<16x4xf32> to vector<16xf32>
    %89 = vector.shape_cast %88 : vector<16xf32> to vector<16x1xf32>
    %90 = vector.broadcast %89 : vector<16x1xf32> to vector<16x4xf32>
    %91 = arith.subf %87, %90 : vector<16x4xf32>
    %92 = math.exp %91 : vector<16x4xf32>
    %cst_66 = arith.constant dense<0.000000e+00> : vector<16xf32>
    %93 = vector.multi_reduction <add>, %92, %cst_66 [1] : vector<16x4xf32> to vector<16xf32>
    %94 = vector.shape_cast %93 : vector<16xf32> to vector<16x1xf32>
    %95 = tpu.reciprocal %94 {approx = true} : vector<16x1xf32> -> vector<16x1xf32>
    %96 = vector.broadcast %95 : vector<16x1xf32> to vector<16x4xf32>
    %97 = arith.mulf %92, %96 : vector<16x4xf32>
    %cst_67 = arith.constant dense<0.000000e+00> : vector<16x16xf32>
    %98 = tpu.matmul %86, %97, %cst_67 {dimension_numbers = #tpu.dot_dimension_numbers<[1], [1], [0], [0], [0, 0, 1, 0], [], []>} : vector<16x4xf32>, vector<16x4xf32>, vector<16x16xf32> -> vector<16x16xf32>
    %99 = vector.extract_strided_slice %63 {offsets = [32, 0], sizes = [16, 16], strides = [1, 1]} : vector<192x16xf32> to vector<16x16xf32>
    %100 = vector.extract_strided_slice %67 {offsets = [32, 0], sizes = [16, 4], strides = [1, 1]} : vector<64x4xf32> to vector<16x4xf32>
    %101 = vector.extract_strided_slice %68 {offsets = [32, 0], sizes = [16, 4], strides = [1, 1]} : vector<64x4xf32> to vector<16x4xf32>
    %cst_68 = arith.constant dense<0.000000e+00> : vector<16x4xf32>
    %102 = tpu.matmul %99, %100, %cst_68 {dimension_numbers = #tpu.dot_dimension_numbers<[0], [0], [1], [1], [0, 1, 1, 1], [], []>} : vector<16x16xf32>, vector<16x4xf32>, vector<16x4xf32> -> vector<16x4xf32>
    %cst_69 = arith.constant dense<0xFF800000> : vector<16xf32>
    %103 = vector.multi_reduction <maximumf>, %102, %cst_69 [1] : vector<16x4xf32> to vector<16xf32>
    %104 = vector.shape_cast %103 : vector<16xf32> to vector<16x1xf32>
    %105 = vector.broadcast %104 : vector<16x1xf32> to vector<16x4xf32>
    %106 = arith.subf %102, %105 : vector<16x4xf32>
    %107 = math.exp %106 : vector<16x4xf32>
    %cst_70 = arith.constant dense<0.000000e+00> : vector<16xf32>
    %108 = vector.multi_reduction <add>, %107, %cst_70 [1] : vector<16x4xf32> to vector<16xf32>
    %109 = vector.shape_cast %108 : vector<16xf32> to vector<16x1xf32>
    %110 = tpu.reciprocal %109 {approx = true} : vector<16x1xf32> -> vector<16x1xf32>
    %111 = vector.broadcast %110 : vector<16x1xf32> to vector<16x4xf32>
    %112 = arith.mulf %107, %111 : vector<16x4xf32>
    %cst_71 = arith.constant dense<0.000000e+00> : vector<16x16xf32>
    %113 = tpu.matmul %101, %112, %cst_71 {dimension_numbers = #tpu.dot_dimension_numbers<[1], [1], [0], [0], [0, 0, 1, 0], [], []>} : vector<16x4xf32>, vector<16x4xf32>, vector<16x16xf32> -> vector<16x16xf32>
    %114 = vector.extract_strided_slice %63 {offsets = [48, 0], sizes = [16, 16], strides = [1, 1]} : vector<192x16xf32> to vector<16x16xf32>
    %115 = vector.extract_strided_slice %67 {offsets = [48, 0], sizes = [16, 4], strides = [1, 1]} : vector<64x4xf32> to vector<16x4xf32>
    %116 = vector.extract_strided_slice %68 {offsets = [48, 0], sizes = [16, 4], strides = [1, 1]} : vector<64x4xf32> to vector<16x4xf32>
    %cst_72 = arith.constant dense<0.000000e+00> : vector<16x4xf32>
    %117 = tpu.matmul %114, %115, %cst_72 {dimension_numbers = #tpu.dot_dimension_numbers<[0], [0], [1], [1], [0, 1, 1, 1], [], []>} : vector<16x16xf32>, vector<16x4xf32>, vector<16x4xf32> -> vector<16x4xf32>
    %cst_73 = arith.constant dense<0xFF800000> : vector<16xf32>
    %118 = vector.multi_reduction <maximumf>, %117, %cst_73 [1] : vector<16x4xf32> to vector<16xf32>
    %119 = vector.shape_cast %118 : vector<16xf32> to vector<16x1xf32>
    %120 = vector.broadcast %119 : vector<16x1xf32> to vector<16x4xf32>
    %121 = arith.subf %117, %120 : vector<16x4xf32>
    %122 = math.exp %121 : vector<16x4xf32>
    %cst_74 = arith.constant dense<0.000000e+00> : vector<16xf32>
    %123 = vector.multi_reduction <add>, %122, %cst_74 [1] : vector<16x4xf32> to vector<16xf32>
    %124 = vector.shape_cast %123 : vector<16xf32> to vector<16x1xf32>
    %125 = tpu.reciprocal %124 {approx = true} : vector<16x1xf32> -> vector<16x1xf32>
    %126 = vector.broadcast %125 : vector<16x1xf32> to vector<16x4xf32>
    %127 = arith.mulf %122, %126 : vector<16x4xf32>
    %cst_75 = arith.constant dense<0.000000e+00> : vector<16x16xf32>
    %128 = tpu.matmul %116, %127, %cst_75 {dimension_numbers = #tpu.dot_dimension_numbers<[1], [1], [0], [0], [0, 0, 1, 0], [], []>} : vector<16x4xf32>, vector<16x4xf32>, vector<16x16xf32> -> vector<16x16xf32>
    %129 = tpu.concatenate %83, %98, %113, %128 in 0 : vector<16x16xf32>, vector<16x16xf32>, vector<16x16xf32>, vector<16x16xf32> -> vector<64x16xf32>
    %c0_76 = arith.constant 0 : index
    %c0_77 = arith.constant 0 : index
    %c0_78 = arith.constant 0 : index
    %130 = vector.load %arg5[%c0_76, %c0_77, %c0_78] : memref<1x64x16xf32, #tpu.memory_space<vmem>>, vector<1x64x16xf32>
    %131 = vector.shape_cast %130 : vector<1x64x16xf32> to vector<64x16xf32>
    %132 = vector.shape_cast %129 : vector<64x16xf32> to vector<1x64x16xf32>
    tpu.vector_store %arg5[%c0_76, %c0_77, %c0_78], %132 {strides = array<i32>} : memref<1x64x16xf32, #tpu.memory_space<vmem>>, vector<1x64x16xf32>,
    return
  }
  func.func @transform_0(%arg0: i32) -> (i32, i32, i32, i32) {
    %c0_i32 = arith.constant 0 : i32
    %c0_i32_0 = arith.constant 0 : i32
    %c0_i32_1 = arith.constant 0 : i32
    %c0_i32_2 = arith.constant 0 : i32
    return %arg0, %c0_i32, %c0_i32_0, %c0_i32_1 : i32, i32, i32, i32
  }
  func.func @transform_1(%arg0: i32) -> (i32, i32, i32) {
    %c0_i32 = arith.constant 0 : i32
    %c0_i32_0 = arith.constant 0 : i32
    %c0_i32_1 = arith.constant 0 : i32
    %c0_i32_2 = arith.constant 0 : i32
    return %c0_i32, %c0_i32_0, %c0_i32_1 : i32, i32, i32
  }
  func.func @transform_2(%arg0: i32) -> (i32, i32) {
    %c0_i32 = arith.constant 0 : i32
    %c0_i32_0 = arith.constant 0 : i32
    %c0_i32_1 = arith.constant 0 : i32
    return %c0_i32, %c0_i32_0 : i32, i32
  }
  func.func @transform_3(%arg0: i32) -> (i32, i32) {
    %c0_i32 = arith.constant 0 : i32
    %c0_i32_0 = arith.constant 0 : i32
    %c0_i32_1 = arith.constant 0 : i32
    return %c0_i32, %c0_i32_0 : i32, i32
  }
  func.func @transform_4(%arg0: i32) -> (i32, i32, i32) {
    %c0_i32 = arith.constant 0 : i32
    %c0_i32_0 = arith.constant 0 : i32
    %c0_i32_1 = arith.constant 0 : i32
    return %arg0, %c0_i32, %c0_i32_0 : i32, i32, i32
  }
}

</mosaic_0001>

<bundles_post_ra>
// kernel: _lambda_.14
= control target key start
LH: loop header
LB: loop body
LE: loop exit
PB: predicated region body
PF: predicated region fallthrough
CT: control target
= control target key end

     0   :  { %s1974_s12 = smov 0   ;;  %s2301_s0 = inlined_call_operand.vmem [shape: f32[2,27,4096], index: 0, kind: input, shape index: {}]   ;;  %s2302_s1 = inlined_call_operand.vmem [shape: f32[4,27], index: 1, kind: input, shape index: {}]   ;;  %s2303_s2 = inlined_call_operand.vmem [shape: f32[4,1], index: 2, kind: input, shape index: {}]   ;;  %s2304_s3 = inlined_call_operand.vmem [shape: f32[2,4,4096], index: 3, kind: output, shape index: {}]  }
   0x1 LB: > { %s1710_s13 = sadd.s32 4294967295, %s1949_s12   ;;  %p1714_p0 = scmp.ge.s32.totalorder %s1949_s12, 1  ;;  %s1949_s12 = sphi %s1974_s12, %s13_s12  }
   0x2   : > { %p137_p1 = scmp.lt.s32.totalorder %s1949_s12, 3 }
   0x4   : > { %p138_p2 = pnand %p1714_p0, %p137_p1 }
   0x5   : > { %p161_p3 = scmp.lt.s32.totalorder (!%p138_p2), %s1710_s13, 1  ;;  %v1951_v0 = vmov (!%p138_p2), 0.0   ;;  %v300_v1 = vld [vmem:[%s2303_s2] sm:$0xf] (!%p138_p2)  ;;  %vm310_vm0 = vcmask (!%p138_p2), 1042432   ;;  %v1952_v2 = vmov (!%p138_p2), 0  }
   0x6   : > { %141 = sbr.rel (%p138_p2) target bundleno = 305 (0x131), region = 32  ;;  %471 = vmatprep.mubr.f32.mxu0 (!%p138_p2), %v1951_v0  ;;  %542 = vmatprep.mubr.f32.mxu1 (!%p138_p2), %v1951_v0  ;;  %vm1953_vm1 = vmmov (!%p138_p2), 1   ;;  %v2024_v30 = vld [vmem:[%s2302_s1] sm:$0xf] (!%p138_p2)  ;;  %vm306_vm3 = vcmask (!%p138_p2), 220160  }
   0x7   : > { %1942 = vset.pattern.permute.xlu0 (!%p138_p2), %v1952_v2  ;;  %vm1995_vm2 = vmpackc.low (!%p138_p2), %vm310_vm0, %vm1953_vm1 }
   0x8   : > { %303 = vperm.xlu0 (!%p138_p2), %1942, %v300_v1  }
   0xd   : > { %s2308_s13 = smov (!%p161_p3, %s1710_s13), 1 }
   0xe   : > { %s1769_s16 = sshll.u32 %s2308_s13, 10  ;;  %s1770_s22 = sshll.u32 %s2308_s13, 7 }
   0xf   : > { %s1993_s19 = scalar_lea.vmem %s2301_s0, %s1769_s16  ;;  %s2252_s25 = scalar_lea.vmem %s2304_s3, %s1770_s22 }
  0x10   : > { %v173_v4 = vld [vmem:[%s1993_s19 + $0x8] sm:$0xff]  ;;  %v175_v6 = vld [vmem:[%s1993_s19 + $0x18] sm:$0xff]  ;;  %v172_v9 = vld [vmem:[%s1993_s19] sm:$0xff] }
  0x11   : > { %v205_v5 = vld [vmem:[%s1993_s19 + $0x108] sm:$0xff]  ;;  %v207_v8 = vld [vmem:[%s1993_s19 + $0x118] sm:$0xff]  ;;  %v204_v10 = vld [vmem:[%s1993_s19 + $0x100] sm:$0xff] }
  0x12   : > { %v1771_v7 = vpack.c.bf16 %v205_v5, %v173_v4  ;;  %v1781_v11 = vpack.c.bf16 %v207_v8, %v175_v6  ;;  %v1773_v12 = vpack.c.bf16 %v204_v10, %v172_v9  ;;  %v174_v13 = vld [vmem:[%s1993_s19 + $0x10] sm:$0xff]  ;;  %v237_v15 = vld [vmem:[%s1993_s19 + $0x208] sm:$0xff]  ;;  %v239_v18 = vld [vmem:[%s1993_s19 + $0x218] sm:$0xff] }
  0x13   : > { %v206_v14 = vld [vmem:[%s1993_s19 + $0x110] sm:$0xff]  ;;  %v269_v17 = vld [vmem:[%s1993_s19 + $0x308] sm:$0x7]  ;;  %v271_v19 = vld [vmem:[%s1993_s19 + $0x318] sm:$0x7] }
  0x14   : > { %1772 = vmatprep.subr.bf16.mxu0 %v1771_v7  ;;  %v1783_v16 = vpack.c.bf16 %v206_v14, %v174_v13  ;;  %1782 = vmatprep.subr.bf16.mxu1 %v1781_v11  ;;  %v1775_v20 = vpack.c.bf16 %v269_v17, %v237_v15  ;;  %v1785_v21 = vpack.c.bf16 %v271_v19, %v239_v18  ;;  %v236_v22 = vld [vmem:[%s1993_s19 + $0x200] sm:$0xff]  ;;  %v238_v24 = vld [vmem:[%s1993_s19 + $0x210] sm:$0xff]  ;;  %v177_v27 = vld [vmem:[%s1993_s19 + $0x28] sm:$0xff] }
  0x15   : > { %1774 = vmatpush1.bf16.msra.mxu0 %v1773_v12  ;;  %v268_v23 = vld [vmem:[%s1993_s19 + $0x300] sm:$0x7]  ;;  %v270_v26 = vld [vmem:[%s1993_s19 + $0x310] sm:$0x7]  ;;  %v209_v28 = vld [vmem:[%s1993_s19 + $0x128] sm:$0xff] }
  0x16   : > { %1784 = vmatpush1.bf16.msra.mxu1 %v1783_v16  ;;  %v1778_v25 = vpack.c.bf16 %v268_v23, %v236_v22  ;;  %1777 = vmatprep.subr.msk.bf16.mxu0 %vm1995_vm2, %v1775_v20  ;;  %v1788_v29 = vpack.c.bf16 %v270_v26, %v238_v24  ;;  %v1791_v31 = vpack.c.bf16 %v209_v28, %v177_v27  ;;  %v179_v32 = vld [vmem:[%s1993_s19 + $0x38] sm:$0xff]  ;;  %v176_v34 = vld [vmem:[%s1993_s19 + $0x20] sm:$0xff]  ;;  %v178_v37 = vld [vmem:[%s1993_s19 + $0x30] sm:$0xff] }
  0x17   : > { %1787 = vmatprep.subr.msk.bf16.mxu1 %vm1995_vm2, %v1785_v21  ;;  %v211_v33 = vld [vmem:[%s1993_s19 + $0x138] sm:$0xff]  ;;  %v208_v36 = vld [vmem:[%s1993_s19 + $0x120] sm:$0xff]  ;;  %v210_v38 = vld [vmem:[%s1993_s19 + $0x130] sm:$0xff] }
  0x18   : > { %v1801_v35 = vpack.c.bf16 %v211_v33, %v179_v32  ;;  %v1793_v39 = vpack.c.bf16 %v208_v36, %v176_v34  ;;  %v241_v40 = vld [vmem:[%s1993_s19 + $0x228] sm:$0xff]  ;;  %v243_v42 = vld [vmem:[%s1993_s19 + $0x238] sm:$0xff]  ;;  %v1803_v43 = vpack.c.bf16 %v210_v38, %v178_v37  ;;  %v240_v46 = vld [vmem:[%s1993_s19 + $0x220] sm:$0xff] }
  0x19   : > { %1780 = vmatpush1.bf16.msk.msra.mxu0 %vm1995_vm2, %v1778_v25  ;;  %v273_v41 = vld [vmem:[%s1993_s19 + $0x328] sm:$0x7]  ;;  %v275_v45 = vld [vmem:[%s1993_s19 + $0x338] sm:$0x7]  ;;  %v272_v47 = vld [vmem:[%s1993_s19 + $0x320] sm:$0x7] }
  0x1a   : > { %1790 = vmatpush1.bf16.msk.msra.mxu1 %vm1995_vm2, %v1788_v29  ;;  %1792 = vmatprep.subr.bf16.mxu0 %v1791_v31  ;;  %v1795_v44 = vpack.c.bf16 %v273_v41, %v241_v40  ;;  %v1805_v48 = vpack.c.bf16 %v275_v45, %v243_v42  ;;  %v242_v49 = vld [vmem:[%s1993_s19 + $0x230] sm:$0xff]  ;;  %v181_v51 = vld [vmem:[%s1993_s19 + $0x48] sm:$0xff]  ;;  %v183_v53 = vld [vmem:[%s1993_s19 + $0x58] sm:$0xff]  ;;  %v1798_v55 = vpack.c.bf16 %v272_v47, %v240_v46 }
  0x1b   : > { %1802 = vmatprep.subr.bf16.mxu1 %v1801_v35  ;;  %v274_v50 = vld [vmem:[%s1993_s19 + $0x330] sm:$0x7]  ;;  %v213_v52 = vld [vmem:[%s1993_s19 + $0x148] sm:$0xff]  ;;  %v215_v54 = vld [vmem:[%s1993_s19 + $0x158] sm:$0xff] }
  0x1c   : > { %1721 = vmatmul.mubr.msk.f32.vlgmr.msra.gmra.mrb[0].mxu0 %vm306_vm3, %v2024_v30  ;;  %v1808_v56 = vpack.c.bf16 %v274_v50, %v242_v49  ;;  %v1811_v57 = vpack.c.bf16 %v213_v52, %v181_v51  ;;  %v180_v58 = vld [vmem:[%s1993_s19 + $0x40] sm:$0xff]  ;;  %v182_v60 = vld [vmem:[%s1993_s19 + $0x50] sm:$0xff]  ;;  %v1821_v61 = vpack.c.bf16 %v215_v54, %v183_v53  ;;  %v245_v63 = vld [vmem:[%s1993_s19 + $0x248] sm:$0xff] }
  0x1d   : > { %1724 = vmatmul.mubr.msk.f32.vlgmr.msra.gmra.mrb[0].mxu1 %vm306_vm3, %v2024_v30  ;;  %1794 = vmatpush1.bf16.msra.mxu0 %v1793_v39  ;;  %v212_v59 = vld [vmem:[%s1993_s19 + $0x140] sm:$0xff]  ;;  %v214_v62 = vld [vmem:[%s1993_s19 + $0x150] sm:$0xff]  ;;  %v277_v1 = vld [vmem:[%s1993_s19 + $0x348] sm:$0x7] }
  0x1e   : > { %1804 = vmatpush1.bf16.msra.mxu1 %v1803_v43  ;;  %1797 = vmatprep.subr.msk.bf16.mxu0 %vm1995_vm2, %v1795_v44  ;;  %v247_v2 = vld [vmem:[%s1993_s19 + $0x258] sm:$0xff]  ;;  %v1813_v5 = vpack.c.bf16 %v212_v59, %v180_v58  ;;  %v1823_v6 = vpack.c.bf16 %v214_v62, %v182_v60  ;;  %v1815_v7 = vpack.c.bf16 %v277_v1, %v245_v63  ;;  %v244_v8 = vld [vmem:[%s1993_s19 + $0x240] sm:$0xff]  ;;  %v246_v10 = vld [vmem:[%s1993_s19 + $0x250] sm:$0xff] }
  0x1f   : > { %1807 = vmatprep.subr.msk.bf16.mxu1 %vm1995_vm2, %v1805_v48  ;;  %613 = vmatprep.mubr.f32.mxu0 %v1951_v0  ;;  %v279_v4 = vld [vmem:[%s1993_s19 + $0x358] sm:$0x7]  ;;  %v276_v9 = vld [vmem:[%s1993_s19 + $0x340] sm:$0x7]  ;;  %v278_v12 = vld [vmem:[%s1993_s19 + $0x350] sm:$0x7] }
  0x20   : > { %684 = vmatprep.mubr.f32.mxu1 %v1951_v0  ;;  %v1825_v11 = vpack.c.bf16 %v279_v4, %v247_v2  ;;  %v185_v13 = vld [vmem:[%s1993_s19 + $0x68] sm:$0xff]  ;;  %v187_v15 = vld [vmem:[%s1993_s19 + $0x78] sm:$0xff]  ;;  %v1818_v17 = vpack.c.bf16 %v276_v9, %v244_v8  ;;  %v1828_v18 = vpack.c.bf16 %v278_v12, %v246_v10  ;;  %v184_v20 = vld [vmem:[%s1993_s19 + $0x60] sm:$0xff] }
  0x21   : > { %1800 = vmatpush1.bf16.msk.msra.mxu0 %vm1995_vm2, %v1798_v55  ;;  %v217_v14 = vld [vmem:[%s1993_s19 + $0x168] sm:$0xff]  ;;  %v219_v16 = vld [vmem:[%s1993_s19 + $0x178] sm:$0xff]  ;;  %v216_v21 = vld [vmem:[%s1993_s19 + $0x160] sm:$0xff] }
  0x22   : > { %1810 = vmatpush1.bf16.msk.msra.mxu1 %vm1995_vm2, %v1808_v56  ;;  %1812 = vmatprep.subr.bf16.mxu0 %v1811_v57  ;;  %v1831_v19 = vpack.c.bf16 %v217_v14, %v185_v13  ;;  %v186_v22 = vld [vmem:[%s1993_s19 + $0x70] sm:$0xff]  ;;  %v1841_v23 = vpack.c.bf16 %v219_v16, %v187_v15  ;;  %v249_v25 = vld [vmem:[%s1993_s19 + $0x268] sm:$0xff]  ;;  %v251_v27 = vld [vmem:[%s1993_s19 + $0x278] sm:$0xff]  ;;  %v1833_v29 = vpack.c.bf16 %v216_v21, %v184_v20 }
  0x23   : > { %1822 = vmatprep.subr.bf16.mxu1 %v1821_v61  ;;  %v218_v24 = vld [vmem:[%s1993_s19 + $0x170] sm:$0xff]  ;;  %v281_v26 = vld [vmem:[%s1993_s19 + $0x368] sm:$0x7]  ;;  %v283_v28 = vld [vmem:[%s1993_s19 + $0x378] sm:$0x7] }
  0x24   : > { %1727 = vmatmul.mubr.msk.f32.vlgmr.msra.gmra.mrb[2].mxu0 %vm306_vm3, %v2024_v30  ;;  %v1843_v31 = vpack.c.bf16 %v218_v24, %v186_v22  ;;  %v1835_v32 = vpack.c.bf16 %v281_v26, %v249_v25  ;;  %v248_v33 = vld [vmem:[%s1993_s19 + $0x260] sm:$0xff]  ;;  %v250_v35 = vld [vmem:[%s1993_s19 + $0x270] sm:$0xff]  ;;  %v1845_v36 = vpack.c.bf16 %v283_v28, %v251_v27  ;;  %v189_v38 = vld [vmem:[%s1993_s19 + $0x88] sm:$0xff] }
  0x25   : > { %1730 = vmatmul.mubr.msk.f32.vlgmr.msra.gmra.mrb[2].mxu1 %vm306_vm3, %v2024_v30  ;;  %1814 = vmatpush1.bf16.msra.mxu0 %v1813_v5  ;;  %v280_v34 = vld [vmem:[%s1993_s19 + $0x360] sm:$0x7]  ;;  %v282_v37 = vld [vmem:[%s1993_s19 + $0x370] sm:$0x7]  ;;  %v221_v39 = vld [vmem:[%s1993_s19 + $0x188] sm:$0xff] }
  0x26   : > { %1824 = vmatpush1.bf16.msra.mxu1 %v1823_v6  ;;  %1817 = vmatprep.subr.msk.bf16.mxu0 %vm1995_vm2, %v1815_v7  ;;  %v191_v40 = vld [vmem:[%s1993_s19 + $0x98] sm:$0xff]  ;;  %v1838_v42 = vpack.c.bf16 %v280_v34, %v248_v33  ;;  %v1848_v43 = vpack.c.bf16 %v282_v37, %v250_v35  ;;  %v1851_v44 = vpack.c.bf16 %v221_v39, %v189_v38  ;;  %v188_v45 = vld [vmem:[%s1993_s19 + $0x80] sm:$0xff]  ;;  %v190_v47 = vld [vmem:[%s1993_s19 + $0x90] sm:$0xff] }
  0x27   : > { %1827 = vmatprep.subr.msk.bf16.mxu1 %vm1995_vm2, %v1825_v11  ;;  %755 = vmatprep.mubr.f32.mxu0 %v1951_v0  ;;  %v223_v41 = vld [vmem:[%s1993_s19 + $0x198] sm:$0xff]  ;;  %v220_v46 = vld [vmem:[%s1993_s19 + $0x180] sm:$0xff]  ;;  %v222_v49 = vld [vmem:[%s1993_s19 + $0x190] sm:$0xff] }
  0x28   : > { %826 = vmatprep.mubr.f32.mxu1 %v1951_v0  ;;  %v1861_v48 = vpack.c.bf16 %v223_v41, %v191_v40  ;;  %v253_v50 = vld [vmem:[%s1993_s19 + $0x288] sm:$0xff]  ;;  %v255_v52 = vld [vmem:[%s1993_s19 + $0x298] sm:$0xff]  ;;  %v1853_v54 = vpack.c.bf16 %v220_v46, %v188_v45  ;;  %v1863_v55 = vpack.c.bf16 %v222_v49, %v190_v47  ;;  %v252_v57 = vld [vmem:[%s1993_s19 + $0x280] sm:$0xff] }
  0x29   : > { %1820 = vmatpush1.bf16.msk.msra.mxu0 %vm1995_vm2, %v1818_v17  ;;  %v285_v51 = vld [vmem:[%s1993_s19 + $0x388] sm:$0x7]  ;;  %v287_v53 = vld [vmem:[%s1993_s19 + $0x398] sm:$0x7]  ;;  %v284_v58 = vld [vmem:[%s1993_s19 + $0x380] sm:$0x7] }
  0x2a   : > { %1830 = vmatpush1.bf16.msk.msra.mxu1 %vm1995_vm2, %v1828_v18  ;;  %1832 = vmatprep.subr.bf16.mxu0 %v1831_v19  ;;  %v1855_v56 = vpack.c.bf16 %v285_v51, %v253_v50  ;;  %v254_v59 = vld [vmem:[%s1993_s19 + $0x290] sm:$0xff]  ;;  %v1865_v60 = vpack.c.bf16 %v287_v53, %v255_v52  ;;  %v193_v62 = vld [vmem:[%s1993_s19 + $0xa8] sm:$0xff]  ;;  %v195_v1 = vld [vmem:[%s1993_s19 + $0xb8] sm:$0xff]  ;;  %v1858_v4 = vpack.c.bf16 %v284_v58, %v252_v57 }
  0x2b   : > { %1842 = vmatprep.subr.bf16.mxu1 %v1841_v23  ;;  %v286_v61 = vld [vmem:[%s1993_s19 + $0x390] sm:$0x7]  ;;  %v225_v63 = vld [vmem:[%s1993_s19 + $0x1a8] sm:$0xff]  ;;  %v227_v2 = vld [vmem:[%s1993_s19 + $0x1b8] sm:$0xff] }
  0x2c   : > { %1733 = vmatmul.mubr.msk.f32.vlgmr.msra.gmra.mrb[4].mxu0 %vm306_vm3, %v2024_v30  ;;  %v1868_v5 = vpack.c.bf16 %v286_v61, %v254_v59  ;;  %v1871_v6 = vpack.c.bf16 %v225_v63, %v193_v62  ;;  %v192_v7 = vld [vmem:[%s1993_s19 + $0xa0] sm:$0xff]  ;;  %v194_v9 = vld [vmem:[%s1993_s19 + $0xb0] sm:$0xff]  ;;  %v1881_v10 = vpack.c.bf16 %v227_v2, %v195_v1  ;;  %v257_v12 = vld [vmem:[%s1993_s19 + $0x2a8] sm:$0xff] }
  0x2d   : > { %1736 = vmatmul.mubr.msk.f32.vlgmr.msra.gmra.mrb[4].mxu1 %vm306_vm3, %v2024_v30  ;;  %1834 = vmatpush1.bf16.msra.mxu0 %v1833_v29  ;;  %v224_v8 = vld [vmem:[%s1993_s19 + $0x1a0] sm:$0xff]  ;;  %v226_v11 = vld [vmem:[%s1993_s19 + $0x1b0] sm:$0xff]  ;;  %v289_v13 = vld [vmem:[%s1993_s19 + $0x3a8] sm:$0x7] }
  0x2e   : > { %1844 = vmatpush1.bf16.msra.mxu1 %v1843_v31  ;;  %1837 = vmatprep.subr.msk.bf16.mxu0 %vm1995_vm2, %v1835_v32  ;;  %v259_v14 = vld [vmem:[%s1993_s19 + $0x2b8] sm:$0xff]  ;;  %v1873_v16 = vpack.c.bf16 %v224_v8, %v192_v7  ;;  %v1883_v17 = vpack.c.bf16 %v226_v11, %v194_v9  ;;  %v1875_v18 = vpack.c.bf16 %v289_v13, %v257_v12  ;;  %v256_v19 = vld [vmem:[%s1993_s19 + $0x2a0] sm:$0xff]  ;;  %v258_v21 = vld [vmem:[%s1993_s19 + $0x2b0] sm:$0xff] }
  0x2f   : > { %1847 = vmatprep.subr.msk.bf16.mxu1 %vm1995_vm2, %v1845_v36  ;;  %897 = vmatprep.mubr.f32.mxu0 %v1951_v0  ;;  %v291_v15 = vld [vmem:[%s1993_s19 + $0x3b8] sm:$0x7]  ;;  %v288_v20 = vld [vmem:[%s1993_s19 + $0x3a0] sm:$0x7]  ;;  %v290_v23 = vld [vmem:[%s1993_s19 + $0x3b0] sm:$0x7] }
  0x30   : > { %968 = vmatprep.mubr.f32.mxu1 %v1951_v0  ;;  %v1885_v22 = vpack.c.bf16 %v291_v15, %v259_v14  ;;  %v197_v24 = vld [vmem:[%s1993_s19 + $0xc8] sm:$0xff]  ;;  %v199_v26 = vld [vmem:[%s1993_s19 + $0xd8] sm:$0xff]  ;;  %v1878_v28 = vpack.c.bf16 %v288_v20, %v256_v19  ;;  %v1888_v29 = vpack.c.bf16 %v290_v23, %v258_v21  ;;  %v196_v32 = vld [vmem:[%s1993_s19 + $0xc0] sm:$0xff] }
  0x31   : > { %1840 = vmatpush1.bf16.msk.msra.mxu0 %vm1995_vm2, %v1838_v42  ;;  %v229_v25 = vld [vmem:[%s1993_s19 + $0x1c8] sm:$0xff]  ;;  %v231_v27 = vld [vmem:[%s1993_s19 + $0x1d8] sm:$0xff]  ;;  %v228_v33 = vld [vmem:[%s1993_s19 + $0x1c0] sm:$0xff] }
  0x32   : > { %1850 = vmatpush1.bf16.msk.msra.mxu1 %vm1995_vm2, %v1848_v43  ;;  %1852 = vmatprep.subr.bf16.mxu0 %v1851_v44  ;;  %v1891_v31 = vpack.c.bf16 %v229_v25, %v197_v24  ;;  %v198_v34 = vld [vmem:[%s1993_s19 + $0xd0] sm:$0xff]  ;;  %v1901_v35 = vpack.c.bf16 %v231_v27, %v199_v26  ;;  %v261_v37 = vld [vmem:[%s1993_s19 + $0x2c8] sm:$0xff]  ;;  %v263_v39 = vld [vmem:[%s1993_s19 + $0x2d8] sm:$0xff]  ;;  %v1893_v41 = vpack.c.bf16 %v228_v33, %v196_v32 }
  0x33   : > { %1862 = vmatprep.subr.bf16.mxu1 %v1861_v48  ;;  %v230_v36 = vld [vmem:[%s1993_s19 + $0x1d0] sm:$0xff]  ;;  %v293_v38 = vld [vmem:[%s1993_s19 + $0x3c8] sm:$0x7]  ;;  %v295_v40 = vld [vmem:[%s1993_s19 + $0x3d8] sm:$0x7] }
  0x34   : > { %1739 = vmatmul.mubr.msk.f32.vlgmr.msra.gmra.mrb[6].mxu0 %vm306_vm3, %v2024_v30  ;;  %v1903_v42 = vpack.c.bf16 %v230_v36, %v198_v34  ;;  %v1895_v43 = vpack.c.bf16 %v293_v38, %v261_v37  ;;  %v260_v44 = vld [vmem:[%s1993_s19 + $0x2c0] sm:$0xff]  ;;  %v262_v46 = vld [vmem:[%s1993_s19 + $0x2d0] sm:$0xff]  ;;  %v1905_v47 = vpack.c.bf16 %v295_v40, %v263_v39  ;;  %v201_v49 = vld [vmem:[%s1993_s19 + $0xe8] sm:$0xff] }
  0x35   : > { %1742 = vmatmul.mubr.msk.f32.vlgmr.msra.gmra.mrb[6].mxu1 %vm306_vm3, %v2024_v30  ;;  %1854 = vmatpush1.bf16.msra.mxu0 %v1853_v54  ;;  %v292_v45 = vld [vmem:[%s1993_s19 + $0x3c0] sm:$0x7]  ;;  %v294_v48 = vld [vmem:[%s1993_s19 + $0x3d0] sm:$0x7]  ;;  %v233_v50 = vld [vmem:[%s1993_s19 + $0x1e8] sm:$0xff] }
  0x36   : > { %1864 = vmatpush1.bf16.msra.mxu1 %v1863_v55  ;;  %1857 = vmatprep.subr.msk.bf16.mxu0 %vm1995_vm2, %v1855_v56  ;;  %v203_v51 = vld [vmem:[%s1993_s19 + $0xf8] sm:$0xff]  ;;  %v1898_v53 = vpack.c.bf16 %v292_v45, %v260_v44  ;;  %v1908_v54 = vpack.c.bf16 %v294_v48, %v262_v46  ;;  %v1911_v55 = vpack.c.bf16 %v233_v50, %v201_v49  ;;  %v200_v56 = vld [vmem:[%s1993_s19 + $0xe0] sm:$0xff]  ;;  %v202_v58 = vld [vmem:[%s1993_s19 + $0xf0] sm:$0xff] }
  0x37   : > { %1867 = vmatprep.subr.msk.bf16.mxu1 %vm1995_vm2, %v1865_v60  ;;  %1039 = vmatprep.mubr.f32.mxu0 %v1951_v0  ;;  %v235_v52 = vld [vmem:[%s1993_s19 + $0x1f8] sm:$0xff]  ;;  %v232_v57 = vld [vmem:[%s1993_s19 + $0x1e0] sm:$0xff]  ;;  %v234_v60 = vld [vmem:[%s1993_s19 + $0x1f0] sm:$0xff] }
  0x38   : > { %1110 = vmatprep.mubr.f32.mxu1 %v1951_v0  ;;  %v1921_v59 = vpack.c.bf16 %v235_v52, %v203_v51  ;;  %v265_v61 = vld [vmem:[%s1993_s19 + $0x2e8] sm:$0xff]  ;;  %v267_v63 = vld [vmem:[%s1993_s19 + $0x2f8] sm:$0xff]  ;;  %v1913_v2 = vpack.c.bf16 %v232_v57, %v200_v56  ;;  %v296_v7 = vld [vmem:[%s1993_s19 + $0x3e0] sm:$0x7] }
  0x39   : > { %1860 = vmatpush1.bf16.msk.msra.mxu0 %vm1995_vm2, %v1858_v4  ;;  %v297_v62 = vld [vmem:[%s1993_s19 + $0x3e8] sm:$0x7]  ;;  %v299_v1 = vld [vmem:[%s1993_s19 + $0x3f8] sm:$0x7]  ;;  %v1923_v4 = vpack.c.bf16 %v234_v60, %v202_v58  ;;  %v266_v9 = vld [vmem:[%s1993_s19 + $0x2f0] sm:$0xff] }
  0x3a   : > { %1870 = vmatpush1.bf16.msk.msra.mxu1 %vm1995_vm2, %v1868_v5  ;;  %1872 = vmatprep.subr.bf16.mxu0 %v1871_v6  ;;  %v1915_v5 = vpack.c.bf16 %v297_v62, %v265_v61  ;;  %v264_v6 = vld [vmem:[%s1993_s19 + $0x2e0] sm:$0xff]  ;;  %v1925_v8 = vpack.c.bf16 %v299_v1, %v267_v63 }
  0x3b   : > { %1882 = vmatprep.subr.bf16.mxu1 %v1881_v10  ;;  %v298_v10 = vld [vmem:[%s1993_s19 + $0x3f0] sm:$0x7]  ;;  %v1918_v11 = vpack.c.bf16 %v296_v7, %v264_v6 }
  0x3c   : > { %1745 = vmatmul.mubr.msk.f32.vlgmr.msra.gmra.mrb[8].mxu0 %vm306_vm3, %v2024_v30  ;;  %v1928_v12 = vpack.c.bf16 %v298_v10, %v266_v9 }
  0x3d   : > { %1748 = vmatmul.mubr.msk.f32.vlgmr.msra.gmra.mrb[8].mxu1 %vm306_vm3, %v2024_v30  ;;  %1874 = vmatpush1.bf16.msra.mxu0 %v1873_v16 }
  0x3e   : > { %1884 = vmatpush1.bf16.msra.mxu1 %v1883_v17  ;;  %1877 = vmatprep.subr.msk.bf16.mxu0 %vm1995_vm2, %v1875_v18 }
  0x3f   : > { %1887 = vmatprep.subr.msk.bf16.mxu1 %vm1995_vm2, %v1885_v22  ;;  %1181 = vmatprep.mubr.f32.mxu0 %v1951_v0 }
  0x40   : > { %1252 = vmatprep.mubr.f32.mxu1 %v1951_v0 }
  0x41   : > { %1880 = vmatpush1.bf16.msk.msra.mxu0 %vm1995_vm2, %v1878_v28 }
  0x42   : > { %1890 = vmatpush1.bf16.msk.msra.mxu1 %vm1995_vm2, %v1888_v29  ;;  %1892 = vmatprep.subr.bf16.mxu0 %v1891_v31 }
  0x43   : > { %1902 = vmatprep.subr.bf16.mxu1 %v1901_v35 }
  0x44   : > { %1751 = vmatmul.mubr.msk.f32.vlgmr.msra.gmra.mrb[10].mxu0 %vm306_vm3, %v2024_v30 }
  0x45   : > { %1754 = vmatmul.mubr.msk.f32.vlgmr.msra.gmra.mrb[10].mxu1 %vm306_vm3, %v2024_v30  ;;  %1894 = vmatpush1.bf16.msra.mxu0 %v1893_v41 }
  0x46   : > { %1904 = vmatpush1.bf16.msra.mxu1 %v1903_v42  ;;  %1897 = vmatprep.subr.msk.bf16.mxu0 %vm1995_vm2, %v1895_v43 }
  0x47   : > { %1907 = vmatprep.subr.msk.bf16.mxu1 %vm1995_vm2, %v1905_v47  ;;  %1323 = vmatprep.mubr.f32.mxu0 %v1951_v0 }
  0x48   : > { %1394 = vmatprep.mubr.f32.mxu1 %v1951_v0 }
  0x49   : > { %1900 = vmatpush1.bf16.msk.msra.mxu0 %vm1995_vm2, %v1898_v53 }
  0x4a   : > { %1910 = vmatpush1.bf16.msk.msra.mxu1 %vm1995_vm2, %v1908_v54  ;;  %1912 = vmatprep.subr.bf16.mxu0 %v1911_v55 }
  0x4b   : > { %1922 = vmatprep.subr.bf16.mxu1 %v1921_v59 }
  0x4c   : > { %1757 = vmatmul.mubr.msk.f32.vlgmr.msra.gmra.mrb[12].mxu0 %vm306_vm3, %v2024_v30 }
  0x4d   : > { %1760 = vmatmul.mubr.msk.f32.vlgmr.msra.gmra.mrb[12].mxu1 %vm306_vm3, %v2024_v30  ;;  %1914 = vmatpush1.bf16.msra.mxu0 %v1913_v2 }
  0x4e   : > { %1924 = vmatpush1.bf16.msra.mxu1 %v1923_v4  ;;  %1917 = vmatprep.subr.msk.bf16.mxu0 %vm1995_vm2, %v1915_v5 }
  0x4f   : > { %1927 = vmatprep.subr.msk.bf16.mxu1 %vm1995_vm2, %v1925_v8  ;;  %1465 = vmatprep.mubr.f32.mxu0 %v1951_v0 }
  0x50   : > { %1536 = vmatprep.mubr.f32.mxu1 %v1951_v0 }
  0x51   : > { %1920 = vmatpush1.bf16.msk.msra.mxu0 %vm1995_vm2, %v1918_v11 }
  0x52   : > { %1930 = vmatpush1.bf16.msk.msra.mxu1 %vm1995_vm2, %v1928_v12 }
  0x54   : > { %1763 = vmatmul.mubr.msk.f32.vlgmr.msra.gmra.mrb[14].mxu0 %vm306_vm3, %v2024_v30 }
  0x55   : > { %1766 = vmatmul.mubr.msk.f32.vlgmr.msra.gmra.mrb[14].mxu1 %vm306_vm3, %v2024_v30 }
  0x87   : > { %v2242_v13 = vpop.permute.xlu0 %303 }
  0xef   : > { %v473_v14 = vpop.f32.mrb[0].mxu0 }
  0xf0   : > { %v544_v15 = vpop.f32.mrb[0].mxu1  ;;  %v474_v16 = vadd.f32 %v473_v14, %v2242_v13  ;;  %v475_v17 = vpop.f32.mrb[1].mxu0 }
  0xf1   : > { %v476_v0 = vadd.f32 %v475_v17, %v2242_v13  ;;  %v545_v18 = vadd.f32 %v544_v15, %v2242_v13  ;;  %v546_v3 = vpop.f32.mrb[1].mxu1 }
  0xf2   : > { %v1543_v19 = vmax.f32 %v474_v16, 0.0  ;;  %v547_v20 = vadd.f32 %v546_v3, %v2242_v13 }
  0xf3   : > { %v1544_v21 = vmax.f32 %v476_v0, 0.0  ;;  %v1545_v22 = vmax.f32 %v545_v18, 0.0 }
  0xf4   : > { %v1546_v30 = vmax.f32 %v547_v20, 0.0 }
  0xf5   : > { %v1607_v23 = vcombine.low %v1543_v19, %v1544_v21 }
  0xf6   : > { %v1608_v24 = vcombine.low %v1545_v22, %v1546_v30 }
  0xf7   : > { %1639 = vst [vmem:[%s2252_s25] sm:$0xff] %v1607_v23  ;;  %v615_v25 = vpop.f32.mrb[2].mxu0 }
  0xf8   : > { %1640 = vst [vmem:[%s2252_s25 + $0x8] sm:$0xff] %v1608_v24  ;;  %v616_v26 = vadd.f32 %v615_v25, %v2242_v13  ;;  %v686_v27 = vpop.f32.mrb[2].mxu1  ;;  %v617_v28 = vpop.f32.mrb[3].mxu0 }
  0xf9   : > { %v687_v29 = vadd.f32 %v686_v27, %v2242_v13  ;;  %v618_v31 = vadd.f32 %v617_v28, %v2242_v13  ;;  %v688_v32 = vpop.f32.mrb[3].mxu1 }
  0xfa   : > { %v1547_v33 = vmax.f32 %v616_v26, 0.0  ;;  %v689_v34 = vadd.f32 %v688_v32, %v2242_v13 }
  0xfb   : > { %v1549_v35 = vmax.f32 %v687_v29, 0.0  ;;  %v1548_v36 = vmax.f32 %v618_v31, 0.0 }
  0xfc   : > { %v1550_v37 = vmax.f32 %v689_v34, 0.0 }
  0xfd   : > { %v1609_v38 = vcombine.low %v1547_v33, %v1548_v36 }
  0xfe   : > { %v1610_v39 = vcombine.low %v1549_v35, %v1550_v37 }
  0xff   : > { %1641 = vst [vmem:[%s2252_s25 + $0x10] sm:$0xff] %v1609_v38  ;;  %v757_v40 = vpop.f32.mrb[4].mxu0 }
 0x100   : > { %1642 = vst [vmem:[%s2252_s25 + $0x18] sm:$0xff] %v1610_v39  ;;  %v758_v41 = vadd.f32 %v757_v40, %v2242_v13  ;;  %v828_v42 = vpop.f32.mrb[4].mxu1  ;;  %v759_v43 = vpop.f32.mrb[5].mxu0 }
 0x101   : > { %v829_v44 = vadd.f32 %v828_v42, %v2242_v13  ;;  %v760_v45 = vadd.f32 %v759_v43, %v2242_v13  ;;  %v830_v46 = vpop.f32.mrb[5].mxu1 }
 0x102   : > { %v1551_v47 = vmax.f32 %v758_v41, 0.0  ;;  %v831_v48 = vadd.f32 %v830_v46, %v2242_v13 }
 0x103   : > { %v1553_v49 = vmax.f32 %v829_v44, 0.0  ;;  %v1552_v50 = vmax.f32 %v760_v45, 0.0 }
 0x104   : > { %v1554_v51 = vmax.f32 %v831_v48, 0.0 }
 0x105   : > { %v1611_v52 = vcombine.low %v1551_v47, %v1552_v50 }
 0x106   : > { %v1612_v53 = vcombine.low %v1553_v49, %v1554_v51 }
 0x107   : > { %1643 = vst [vmem:[%s2252_s25 + $0x20] sm:$0xff] %v1611_v52  ;;  %v899_v54 = vpop.f32.mrb[6].mxu0 }
 0x108   : > { %1644 = vst [vmem:[%s2252_s25 + $0x28] sm:$0xff] %v1612_v53  ;;  %v900_v55 = vadd.f32 %v899_v54, %v2242_v13  ;;  %v970_v56 = vpop.f32.mrb[6].mxu1  ;;  %v901_v57 = vpop.f32.mrb[7].mxu0 }
 0x109   : > { %v971_v58 = vadd.f32 %v970_v56, %v2242_v13  ;;  %v902_v59 = vadd.f32 %v901_v57, %v2242_v13  ;;  %v972_v60 = vpop.f32.mrb[7].mxu1 }
 0x10a   : > { %v1555_v61 = vmax.f32 %v900_v55, 0.0  ;;  %v973_v62 = vadd.f32 %v972_v60, %v2242_v13 }
 0x10b   : > { %v1557_v63 = vmax.f32 %v971_v58, 0.0  ;;  %v1556_v1 = vmax.f32 %v902_v59, 0.0 }
 0x10c   : > { %v1558_v2 = vmax.f32 %v973_v62, 0.0 }
 0x10d   : > { %v1613_v4 = vcombine.low %v1555_v61, %v1556_v1 }
 0x10e   : > { %v1614_v5 = vcombine.low %v1557_v63, %v1558_v2 }
 0x10f   : > { %1645 = vst [vmem:[%s2252_s25 + $0x30] sm:$0xff] %v1613_v4  ;;  %v1041_v6 = vpop.f32.mrb[8].mxu0 }
 0x110   : > { %1646 = vst [vmem:[%s2252_s25 + $0x38] sm:$0xff] %v1614_v5  ;;  %v1042_v7 = vadd.f32 %v1041_v6, %v2242_v13  ;;  %v1112_v8 = vpop.f32.mrb[8].mxu1  ;;  %v1043_v9 = vpop.f32.mrb[9].mxu0 }
 0x111   : > { %v1113_v10 = vadd.f32 %v1112_v8, %v2242_v13  ;;  %v1044_v11 = vadd.f32 %v1043_v9, %v2242_v13  ;;  %v1114_v12 = vpop.f32.mrb[9].mxu1 }
 0x112   : > { %v1559_v14 = vmax.f32 %v1042_v7, 0.0  ;;  %v1115_v15 = vadd.f32 %v1114_v12, %v2242_v13 }
 0x113   : > { %v1561_v16 = vmax.f32 %v1113_v10, 0.0  ;;  %v1560_v17 = vmax.f32 %v1044_v11, 0.0 }
 0x114   : > { %v1562_v0 = vmax.f32 %v1115_v15, 0.0 }
 0x115   : > { %v1615_v18 = vcombine.low %v1559_v14, %v1560_v17 }
 0x116   : > { %v1616_v3 = vcombine.low %v1561_v16, %v1562_v0 }
 0x117   : > { %1647 = vst [vmem:[%s2252_s25 + $0x40] sm:$0xff] %v1615_v18  ;;  %v1183_v19 = vpop.f32.mrb[10].mxu0 }
 0x118   : > { %1648 = vst [vmem:[%s2252_s25 + $0x48] sm:$0xff] %v1616_v3  ;;  %v1184_v20 = vadd.f32 %v1183_v19, %v2242_v13  ;;  %v1254_v21 = vpop.f32.mrb[10].mxu1  ;;  %v1185_v22 = vpop.f32.mrb[11].mxu0 }
 0x119   : > { %v1255_v30 = vadd.f32 %v1254_v21, %v2242_v13  ;;  %v1186_v23 = vadd.f32 %v1185_v22, %v2242_v13  ;;  %v1256_v24 = vpop.f32.mrb[11].mxu1 }
 0x11a   : > { %v1563_v25 = vmax.f32 %v1184_v20, 0.0  ;;  %v1257_v26 = vadd.f32 %v1256_v24, %v2242_v13 }
 0x11b   : > { %v1565_v27 = vmax.f32 %v1255_v30, 0.0  ;;  %v1564_v28 = vmax.f32 %v1186_v23, 0.0 }
 0x11c   : > { %v1566_v29 = vmax.f32 %v1257_v26, 0.0 }
 0x11d   : > { %v1617_v31 = vcombine.low %v1563_v25, %v1564_v28 }
 0x11e   : > { %v1618_v32 = vcombine.low %v1565_v27, %v1566_v29 }
 0x11f   : > { %1649 = vst [vmem:[%s2252_s25 + $0x50] sm:$0xff] %v1617_v31  ;;  %v1325_v33 = vpop.f32.mrb[12].mxu0 }
 0x120   : > { %1650 = vst [vmem:[%s2252_s25 + $0x58] sm:$0xff] %v1618_v32  ;;  %v1326_v34 = vadd.f32 %v1325_v33, %v2242_v13  ;;  %v1396_v35 = vpop.f32.mrb[12].mxu1  ;;  %v1327_v36 = vpop.f32.mrb[13].mxu0 }
 0x121   : > { %v1397_v37 = vadd.f32 %v1396_v35, %v2242_v13  ;;  %v1328_v38 = vadd.f32 %v1327_v36, %v2242_v13  ;;  %v1398_v39 = vpop.f32.mrb[13].mxu1 }
 0x122   : > { %v1567_v40 = vmax.f32 %v1326_v34, 0.0  ;;  %v1399_v41 = vadd.f32 %v1398_v39, %v2242_v13 }
 0x123   : > { %v1569_v42 = vmax.f32 %v1397_v37, 0.0  ;;  %v1568_v43 = vmax.f32 %v1328_v38, 0.0 }
 0x124   : > { %v1570_v44 = vmax.f32 %v1399_v41, 0.0 }
 0x125   : > { %v1619_v45 = vcombine.low %v1567_v40, %v1568_v43 }
 0x126   : > { %v1620_v46 = vcombine.low %v1569_v42, %v1570_v44 }
 0x127   : > { %1651 = vst [vmem:[%s2252_s25 + $0x60] sm:$0xff] %v1619_v45  ;;  %v1467_v47 = vpop.f32.mrb[14].mxu0 }
 0x128   : > { %1652 = vst [vmem:[%s2252_s25 + $0x68] sm:$0xff] %v1620_v46  ;;  %v1468_v48 = vadd.f32 %v1467_v47, %v2242_v13  ;;  %v1538_v49 = vpop.f32.mrb[14].mxu1  ;;  %v1469_v50 = vpop.f32.mrb[15].mxu0 }
 0x129   : > { %v1539_v51 = vadd.f32 %v1538_v49, %v2242_v13  ;;  %v1470_v52 = vadd.f32 %v1469_v50, %v2242_v13  ;;  %v1540_v53 = vpop.f32.mrb[15].mxu1 }
 0x12a   : > { %v1571_v54 = vmax.f32 %v1468_v48, 0.0  ;;  %v1541_v55 = vadd.f32 %v1540_v53, %v2242_v13 }
 0x12b   : > { %v1573_v56 = vmax.f32 %v1539_v51, 0.0  ;;  %v1572_v57 = vmax.f32 %v1470_v52, 0.0 }
 0x12c   : > { %v1574_v58 = vmax.f32 %v1541_v55, 0.0 }
 0x12d   : > { %v1621_v59 = vcombine.low %v1571_v54, %v1572_v57 }
 0x12e   : > { %v1622_v60 = vcombine.low %v1573_v56, %v1574_v58 }
 0x12f   : > { %1653 = vst [vmem:[%s2252_s25 + $0x70] sm:$0xff] %v1621_v59 }
 0x130   : > { %1654 = vst [vmem:[%s2252_s25 + $0x78] sm:$0xff] %v1622_v60 }
 0x131 PF: > { %s13_s12 = sadd.s32 1, %s1949_s12  }
 0x132   : > { %p10_p4 = scmp.ge.s32.totalorder %s13_s12, 4  }
 0x134   :  { %12 = sbr.rel (!%p10_p4) target bundleno = 1 (0x1), region = 62 }

// kernel: _lambda_.15
= control target key start
LH: loop header
LB: loop body
LE: loop exit
PB: predicated region body
PF: predicated region fallthrough
CT: control target
= control target key end

     0   :  { %s3490_s21 = smov 0   ;;  %s4123_s0 = inlined_call_operand.vmem [shape: f32[2,36,4096], index: 0, kind: input, shape index: {}]   ;;  %s4124_s1 = inlined_call_operand.vmem [shape: f32[4,36], index: 1, kind: input, shape index: {}]   ;;  %s4125_s2 = inlined_call_operand.vmem [shape: f32[4,1], index: 2, kind: input, shape index: {}]   ;;  %s4126_s3 = inlined_call_operand.vmem [shape: f32[2,3,4096], index: 3, kind: input, shape index: {}]   ;;  %s4127_s4 = inlined_call_operand.vmem [shape: f32[4,3], index: 4, kind: input, shape index: {}]   ;;  %s4128_s5 = inlined_call_operand.vmem [shape: f32[4,1], index: 5, kind: input, shape index: {}]   ;;  %s4129_s6 = inlined_call_operand.vmem [shape: f32[2,4,4096], index: 6, kind: output, shape index: {}]  }
   0x1 LB: > { %s3179_s22 = sadd.s32 4294967295, %s3451_s21   ;;  %p3183_p0 = scmp.ge.s32.totalorder %s3451_s21, 1  ;;  %s3451_s21 = sphi %s3490_s21, %s16_s21  }
   0x2   : > { %p222_p1 = scmp.lt.s32.totalorder %s3451_s21, 3 }
   0x4   : > { %p223_p2 = pnand %p3183_p0, %p222_p1 }
   0x5   : > { %p257_p3 = scmp.lt.s32.totalorder (!%p223_p2), %s3179_s22, 1  ;;  %v3453_v0 = vmov (!%p223_p2), 0.0   ;;  %v3454_v1 = vmov (!%p223_p2), 0   ;;  %v433_v2 = vld [vmem:[%s4125_s2] sm:$0xf] (!%p223_p2)  ;;  %vm443_vm0 = vcmask (!%p223_p2), 1043456  }
   0x6   : > { %226 = sbr.rel (%p223_p2) target bundleno = 364 (0x16c), region = 44  ;;  %604 = vmatprep.mubr.f32.mxu0 (!%p223_p2), %v3453_v0  ;;  %675 = vmatprep.mubr.f32.mxu1 (!%p223_p2), %v3453_v0  ;;  %v1693_v3 = vld [vmem:[%s4128_s5] sm:$0xf] (!%p223_p2)  ;;  %vm439_vm1 = vcmask (!%p223_p2), 293888   ;;  %vm1735_vm2 = vcmask (!%p223_p2), 1042432   ;;  %vm1731_vm3 = vcmask (!%p223_p2), 23552  }
   0x7   : > { %3428 = vset.pattern.permute.xlu0 (!%p223_p2), %v3454_v1  ;;  %v3540_v35 = vld [vmem:[%s4124_s1] sm:$0xf] (!%p223_p2) }
   0x8   : > { %436 = vperm.xlu0 (!%p223_p2), %3428, %v433_v2  }
   0xc   : > { %1696 = vperm.xlu0 (!%p223_p2), %3428, %v1693_v3  }
   0xd   : > { %s4140_s22 = smov (!%p257_p3, %s3179_s22), 1 }
   0xe   : > { %s3417_s25 = smul.u32 1280, %s4140_s22  ;;  %s3287_s9 = sshll.u32 %s4140_s22, 7 }
   0xf   : > { %s3749_s12 = scalar_lea.vmem %s4126_s3, %s3287_s9  ;;  %s4004_s17 = scalar_lea.vmem %s4129_s6, %s3287_s9 }
  0x10   : > { %s3512_s30 = scalar_lea.vmem %s4123_s0, %s3417_s25 }
  0x11   : > { %v274_v4 = vld [vmem:[%s3512_s30 + $0x8] sm:$0xff]  ;;  %v276_v6 = vld [vmem:[%s3512_s30 + $0x18] sm:$0xff]  ;;  %v273_v9 = vld [vmem:[%s3512_s30] sm:$0xff] }
  0x12   : > { %v306_v5 = vld [vmem:[%s3512_s30 + $0x108] sm:$0xff]  ;;  %v308_v8 = vld [vmem:[%s3512_s30 + $0x118] sm:$0xff]  ;;  %v305_v10 = vld [vmem:[%s3512_s30 + $0x100] sm:$0xff] }
  0x13   : > { %v3289_v7 = vpack.c.bf16 %v306_v5, %v274_v4  ;;  %v3297_v11 = vpack.c.bf16 %v308_v8, %v276_v6  ;;  %v3291_v12 = vpack.c.bf16 %v305_v10, %v273_v9  ;;  %v275_v13 = vld [vmem:[%s3512_s30 + $0x10] sm:$0xff]  ;;  %v338_v15 = vld [vmem:[%s3512_s30 + $0x208] sm:$0xff]  ;;  %v340_v18 = vld [vmem:[%s3512_s30 + $0x218] sm:$0xff] }
  0x14   : > { %v307_v14 = vld [vmem:[%s3512_s30 + $0x110] sm:$0xff]  ;;  %v370_v17 = vld [vmem:[%s3512_s30 + $0x308] sm:$0xff]  ;;  %v372_v19 = vld [vmem:[%s3512_s30 + $0x318] sm:$0xff] }
  0x15   : > { %3290 = vmatprep.subr.bf16.mxu0 %v3289_v7  ;;  %v3299_v16 = vpack.c.bf16 %v307_v14, %v275_v13  ;;  %3298 = vmatprep.subr.bf16.mxu1 %v3297_v11  ;;  %v3293_v20 = vpack.c.bf16 %v370_v17, %v338_v15  ;;  %v3301_v21 = vpack.c.bf16 %v372_v19, %v340_v18  ;;  %v337_v22 = vld [vmem:[%s3512_s30 + $0x200] sm:$0xff]  ;;  %v339_v24 = vld [vmem:[%s3512_s30 + $0x210] sm:$0xff]  ;;  %v402_v28 = vld [vmem:[%s3512_s30 + $0x408] sm:$0xf] }
  0x16   : > { %3292 = vmatpush1.bf16.msra.mxu0 %v3291_v12  ;;  %v369_v23 = vld [vmem:[%s3512_s30 + $0x300] sm:$0xff]  ;;  %v371_v26 = vld [vmem:[%s3512_s30 + $0x310] sm:$0xff]  ;;  %v404_v29 = vld [vmem:[%s3512_s30 + $0x418] sm:$0xf] }
  0x17   : > { %3300 = vmatpush1.bf16.msra.mxu1 %v3299_v16  ;;  %v3295_v25 = vpack.c.bf16 %v369_v23, %v337_v22  ;;  %3294 = vmatprep.subr.bf16.mxu0 %v3293_v20  ;;  %v3303_v27 = vpack.c.bf16 %v371_v26, %v339_v24  ;;  %v278_v30 = vld [vmem:[%s3512_s30 + $0x28] sm:$0xff]  ;;  %v401_v31 = vld [vmem:[%s3512_s30 + $0x400] sm:$0xf]  ;;  %v280_v33 = vld [vmem:[%s3512_s30 + $0x38] sm:$0xff] }
  0x18   : > { %3302 = vmatprep.subr.bf16.mxu1 %v3301_v21  ;;  %v310_v32 = vld [vmem:[%s3512_s30 + $0x128] sm:$0xff]  ;;  %v312_v34 = vld [vmem:[%s3512_s30 + $0x138] sm:$0xff]  ;;  %v277_v36 = vld [vmem:[%s3512_s30 + $0x20] sm:$0xff] }
  0x19   : > { %v309_v37 = vld [vmem:[%s3512_s30 + $0x120] sm:$0xff]  ;;  %v279_v38 = vld [vmem:[%s3512_s30 + $0x30] sm:$0xff]  ;;  %v342_v40 = vld [vmem:[%s3512_s30 + $0x228] sm:$0xff]  ;;  %v3305_v43 = vpack.c.bf16 %v310_v32, %v278_v30  ;;  %v3313_v46 = vpack.c.bf16 %v312_v34, %v280_v33 }
  0x1a   : > { %3296 = vmatpush1.bf16.msra.mxu0 %v3295_v25  ;;  %v311_v39 = vld [vmem:[%s3512_s30 + $0x130] sm:$0xff]  ;;  %v374_v41 = vld [vmem:[%s3512_s30 + $0x328] sm:$0xff]  ;;  %v344_v44 = vld [vmem:[%s3512_s30 + $0x238] sm:$0xff]  ;;  %v3307_v47 = vpack.c.bf16 %v309_v37, %v277_v36 }
  0x1b   : > { %3304 = vmatpush1.bf16.msra.mxu1 %v3303_v27  ;;  %3189 = vmatprep.subr.msk.mxu0 %vm443_vm0, %v402_v28  ;;  %v403_v42 = vld [vmem:[%s3512_s30 + $0x410] sm:$0xf]  ;;  %v376_v45 = vld [vmem:[%s3512_s30 + $0x338] sm:$0xff]  ;;  %v3315_v48 = vpack.c.bf16 %v311_v39, %v279_v38  ;;  %v3309_v49 = vpack.c.bf16 %v374_v41, %v342_v40  ;;  %v341_v50 = vld [vmem:[%s3512_s30 + $0x220] sm:$0xff] }
  0x1c   : > { %3192 = vmatprep.subr.msk.mxu1 %vm443_vm0, %v404_v29  ;;  %v373_v51 = vld [vmem:[%s3512_s30 + $0x320] sm:$0xff]  ;;  %v3317_v52 = vpack.c.bf16 %v376_v45, %v344_v44  ;;  %v343_v53 = vld [vmem:[%s3512_s30 + $0x230] sm:$0xff]  ;;  %v406_v57 = vld [vmem:[%s3512_s30 + $0x428] sm:$0xf] }
  0x1d   : > { %v375_v54 = vld [vmem:[%s3512_s30 + $0x330] sm:$0xff]  ;;  %v3311_v55 = vpack.c.bf16 %v373_v51, %v341_v50  ;;  %v408_v58 = vld [vmem:[%s3512_s30 + $0x438] sm:$0xf]  ;;  %v282_v59 = vld [vmem:[%s3512_s30 + $0x48] sm:$0xff] }
  0x1e   : > { %3190 = vmatpush1.msk.msra.mxu0 %vm443_vm0, %v401_v31  ;;  %v3319_v56 = vpack.c.bf16 %v375_v54, %v343_v53  ;;  %v405_v60 = vld [vmem:[%s3512_s30 + $0x420] sm:$0xf]  ;;  %v314_v61 = vld [vmem:[%s3512_s30 + $0x148] sm:$0xff]  ;;  %v284_v62 = vld [vmem:[%s3512_s30 + $0x58] sm:$0xff] }
  0x1f   : > { %3193 = vmatpush1.msk.msra.mxu1 %vm443_vm0, %v403_v42  ;;  %3191 = vmatmul.mubr.msk.f32.vlgmr.msra.gmra.mrb[0].mxu0 %vm439_vm1, %v3540_v35  ;;  %v316_v63 = vld [vmem:[%s3512_s30 + $0x158] sm:$0xff]  ;;  %v281_v1 = vld [vmem:[%s3512_s30 + $0x40] sm:$0xff]  ;;  %v283_v3 = vld [vmem:[%s3512_s30 + $0x50] sm:$0xff]  ;;  %v3321_v8 = vpack.c.bf16 %v314_v61, %v282_v59 }
  0x20   : > { %3194 = vmatmul.mubr.msk.f32.vlgmr.msra.gmra.mrb[0].mxu1 %vm439_vm1, %v3540_v35  ;;  %3306 = vmatprep.subr.bf16.mxu0 %v3305_v43  ;;  %v313_v2 = vld [vmem:[%s3512_s30 + $0x140] sm:$0xff]  ;;  %v315_v4 = vld [vmem:[%s3512_s30 + $0x150] sm:$0xff]  ;;  %v346_v5 = vld [vmem:[%s3512_s30 + $0x248] sm:$0xff]  ;;  %v3329_v11 = vpack.c.bf16 %v316_v63, %v284_v62 }
  0x21   : > { %3314 = vmatprep.subr.bf16.mxu1 %v3313_v46  ;;  %3308 = vmatpush1.bf16.msra.mxu0 %v3307_v47  ;;  %v378_v6 = vld [vmem:[%s3512_s30 + $0x348] sm:$0xff]  ;;  %v407_v7 = vld [vmem:[%s3512_s30 + $0x430] sm:$0xf]  ;;  %v348_v9 = vld [vmem:[%s3512_s30 + $0x258] sm:$0xff]  ;;  %v3323_v12 = vpack.c.bf16 %v313_v2, %v281_v1  ;;  %v3331_v13 = vpack.c.bf16 %v315_v4, %v283_v3 }
  0x22   : > { %3316 = vmatpush1.bf16.msra.mxu1 %v3315_v48  ;;  %3310 = vmatprep.subr.bf16.mxu0 %v3309_v49  ;;  %v380_v10 = vld [vmem:[%s3512_s30 + $0x358] sm:$0xff]  ;;  %v3325_v14 = vpack.c.bf16 %v378_v6, %v346_v5  ;;  %v345_v15 = vld [vmem:[%s3512_s30 + $0x240] sm:$0xff]  ;;  %v347_v18 = vld [vmem:[%s3512_s30 + $0x250] sm:$0xff] }
  0x23   : > { %3318 = vmatprep.subr.bf16.mxu1 %v3317_v52  ;;  %746 = vmatprep.mubr.f32.mxu0 %v3453_v0  ;;  %v377_v16 = vld [vmem:[%s3512_s30 + $0x340] sm:$0xff]  ;;  %v3333_v17 = vpack.c.bf16 %v380_v10, %v348_v9  ;;  %v379_v19 = vld [vmem:[%s3512_s30 + $0x350] sm:$0xff]  ;;  %v410_v22 = vld [vmem:[%s3512_s30 + $0x448] sm:$0xf] }
  0x24   : > { %817 = vmatprep.mubr.f32.mxu1 %v3453_v0  ;;  %v3327_v20 = vpack.c.bf16 %v377_v16, %v345_v15  ;;  %v3335_v21 = vpack.c.bf16 %v379_v19, %v347_v18  ;;  %v412_v23 = vld [vmem:[%s3512_s30 + $0x458] sm:$0xf]  ;;  %v286_v24 = vld [vmem:[%s3512_s30 + $0x68] sm:$0xff]  ;;  %v409_v25 = vld [vmem:[%s3512_s30 + $0x440] sm:$0xf] }
  0x25   : > { %3312 = vmatpush1.bf16.msra.mxu0 %v3311_v55  ;;  %v318_v26 = vld [vmem:[%s3512_s30 + $0x168] sm:$0xff]  ;;  %v288_v27 = vld [vmem:[%s3512_s30 + $0x78] sm:$0xff]  ;;  %v285_v29 = vld [vmem:[%s3512_s30 + $0x60] sm:$0xff] }
  0x26   : > { %3320 = vmatpush1.bf16.msra.mxu1 %v3319_v56  ;;  %3195 = vmatprep.subr.msk.mxu0 %vm443_vm0, %v406_v57  ;;  %v320_v28 = vld [vmem:[%s3512_s30 + $0x178] sm:$0xff]  ;;  %v317_v30 = vld [vmem:[%s3512_s30 + $0x160] sm:$0xff]  ;;  %v287_v31 = vld [vmem:[%s3512_s30 + $0x70] sm:$0xff]  ;;  %v3337_v37 = vpack.c.bf16 %v318_v26, %v286_v24 }
  0x27   : > { %3198 = vmatprep.subr.msk.mxu1 %vm443_vm0, %v408_v58  ;;  %v319_v32 = vld [vmem:[%s3512_s30 + $0x170] sm:$0xff]  ;;  %v350_v33 = vld [vmem:[%s3512_s30 + $0x268] sm:$0xff]  ;;  %v352_v38 = vld [vmem:[%s3512_s30 + $0x278] sm:$0xff]  ;;  %v3345_v40 = vpack.c.bf16 %v320_v28, %v288_v27  ;;  %v3339_v41 = vpack.c.bf16 %v317_v30, %v285_v29 }
  0x28   : > { %v382_v34 = vld [vmem:[%s3512_s30 + $0x368] sm:$0xff]  ;;  %v411_v36 = vld [vmem:[%s3512_s30 + $0x450] sm:$0xf]  ;;  %v384_v39 = vld [vmem:[%s3512_s30 + $0x378] sm:$0xff]  ;;  %v3347_v42 = vpack.c.bf16 %v319_v32, %v287_v31 }
  0x29   : > { %3196 = vmatpush1.msk.msra.mxu0 %vm443_vm0, %v405_v60  ;;  %v3341_v43 = vpack.c.bf16 %v382_v34, %v350_v33  ;;  %v349_v44 = vld [vmem:[%s3512_s30 + $0x260] sm:$0xff]  ;;  %v3349_v46 = vpack.c.bf16 %v384_v39, %v352_v38  ;;  %v351_v47 = vld [vmem:[%s3512_s30 + $0x270] sm:$0xff]  ;;  %v414_v51 = vld [vmem:[%s3512_s30 + $0x468] sm:$0xf] }
  0x2a   : > { %3199 = vmatpush1.msk.msra.mxu1 %vm443_vm0, %v407_v7  ;;  %3197 = vmatmul.mubr.msk.f32.vlgmr.msra.gmra.mrb[2].mxu0 %vm439_vm1, %v3540_v35  ;;  %v381_v45 = vld [vmem:[%s3512_s30 + $0x360] sm:$0xff]  ;;  %v383_v48 = vld [vmem:[%s3512_s30 + $0x370] sm:$0xff]  ;;  %v416_v52 = vld [vmem:[%s3512_s30 + $0x478] sm:$0xf] }
  0x2b   : > { %3200 = vmatmul.mubr.msk.f32.vlgmr.msra.gmra.mrb[2].mxu1 %vm439_vm1, %v3540_v35  ;;  %3322 = vmatprep.subr.bf16.mxu0 %v3321_v8  ;;  %v3343_v49 = vpack.c.bf16 %v381_v45, %v349_v44  ;;  %v3351_v50 = vpack.c.bf16 %v383_v48, %v351_v47  ;;  %v290_v53 = vld [vmem:[%s3512_s30 + $0x88] sm:$0xff]  ;;  %v413_v54 = vld [vmem:[%s3512_s30 + $0x460] sm:$0xf]  ;;  %v292_v56 = vld [vmem:[%s3512_s30 + $0x98] sm:$0xff] }
  0x2c   : > { %3330 = vmatprep.subr.bf16.mxu1 %v3329_v11  ;;  %3324 = vmatpush1.bf16.msra.mxu0 %v3323_v12  ;;  %v322_v55 = vld [vmem:[%s3512_s30 + $0x188] sm:$0xff]  ;;  %v324_v57 = vld [vmem:[%s3512_s30 + $0x198] sm:$0xff]  ;;  %v289_v58 = vld [vmem:[%s3512_s30 + $0x80] sm:$0xff] }
  0x2d   : > { %3332 = vmatpush1.bf16.msra.mxu1 %v3331_v13  ;;  %3326 = vmatprep.subr.bf16.mxu0 %v3325_v14  ;;  %v321_v59 = vld [vmem:[%s3512_s30 + $0x180] sm:$0xff]  ;;  %v291_v60 = vld [vmem:[%s3512_s30 + $0x90] sm:$0xff]  ;;  %v354_v62 = vld [vmem:[%s3512_s30 + $0x288] sm:$0xff]  ;;  %v3353_v2 = vpack.c.bf16 %v322_v55, %v290_v53  ;;  %v3361_v5 = vpack.c.bf16 %v324_v57, %v292_v56 }
  0x2e   : > { %3334 = vmatprep.subr.bf16.mxu1 %v3333_v17  ;;  %888 = vmatprep.mubr.f32.mxu0 %v3453_v0  ;;  %v323_v61 = vld [vmem:[%s3512_s30 + $0x190] sm:$0xff]  ;;  %v386_v63 = vld [vmem:[%s3512_s30 + $0x388] sm:$0xff]  ;;  %v356_v3 = vld [vmem:[%s3512_s30 + $0x298] sm:$0xff]  ;;  %v3355_v6 = vpack.c.bf16 %v321_v59, %v289_v58 }
  0x2f   : > { %959 = vmatprep.mubr.f32.mxu1 %v3453_v0  ;;  %v415_v1 = vld [vmem:[%s3512_s30 + $0x470] sm:$0xf]  ;;  %v388_v4 = vld [vmem:[%s3512_s30 + $0x398] sm:$0xff]  ;;  %v3363_v7 = vpack.c.bf16 %v323_v61, %v291_v60  ;;  %v3357_v8 = vpack.c.bf16 %v386_v63, %v354_v62  ;;  %v353_v9 = vld [vmem:[%s3512_s30 + $0x280] sm:$0xff] }
  0x30   : > { %3328 = vmatpush1.bf16.msra.mxu0 %v3327_v20  ;;  %v385_v10 = vld [vmem:[%s3512_s30 + $0x380] sm:$0xff]  ;;  %v3365_v11 = vpack.c.bf16 %v388_v4, %v356_v3  ;;  %v355_v12 = vld [vmem:[%s3512_s30 + $0x290] sm:$0xff]  ;;  %v418_v16 = vld [vmem:[%s3512_s30 + $0x488] sm:$0xf] }
  0x31   : > { %3336 = vmatpush1.bf16.msra.mxu1 %v3335_v21  ;;  %3201 = vmatprep.subr.msk.mxu0 %vm443_vm0, %v410_v22  ;;  %v387_v13 = vld [vmem:[%s3512_s30 + $0x390] sm:$0xff]  ;;  %v3359_v14 = vpack.c.bf16 %v385_v10, %v353_v9  ;;  %v420_v17 = vld [vmem:[%s3512_s30 + $0x498] sm:$0xf]  ;;  %v294_v18 = vld [vmem:[%s3512_s30 + $0xa8] sm:$0xff] }
  0x32   : > { %3204 = vmatprep.subr.msk.mxu1 %vm443_vm0, %v412_v23  ;;  %v3367_v15 = vpack.c.bf16 %v387_v13, %v355_v12  ;;  %v417_v19 = vld [vmem:[%s3512_s30 + $0x480] sm:$0xf]  ;;  %v326_v20 = vld [vmem:[%s3512_s30 + $0x1a8] sm:$0xff]  ;;  %v296_v21 = vld [vmem:[%s3512_s30 + $0xb8] sm:$0xff] }
  0x33   : > { %v328_v22 = vld [vmem:[%s3512_s30 + $0x1b8] sm:$0xff]  ;;  %v293_v23 = vld [vmem:[%s3512_s30 + $0xa0] sm:$0xff]  ;;  %v327_v26 = vld [vmem:[%s3512_s30 + $0x1b0] sm:$0xff]  ;;  %v3369_v30 = vpack.c.bf16 %v326_v20, %v294_v18 }
  0x34   : > { %3202 = vmatpush1.msk.msra.mxu0 %vm443_vm0, %v409_v25  ;;  %v325_v24 = vld [vmem:[%s3512_s30 + $0x1a0] sm:$0xff]  ;;  %v295_v25 = vld [vmem:[%s3512_s30 + $0xb0] sm:$0xff]  ;;  %v358_v27 = vld [vmem:[%s3512_s30 + $0x2a8] sm:$0xff]  ;;  %v3377_v33 = vpack.c.bf16 %v328_v22, %v296_v21 }
  0x35   : > { %3205 = vmatpush1.msk.msra.mxu1 %vm443_vm0, %v411_v36  ;;  %3203 = vmatmul.mubr.msk.f32.vlgmr.msra.gmra.mrb[4].mxu0 %vm439_vm1, %v3540_v35  ;;  %v390_v28 = vld [vmem:[%s3512_s30 + $0x3a8] sm:$0xff]  ;;  %v419_v29 = vld [vmem:[%s3512_s30 + $0x490] sm:$0xf]  ;;  %v360_v31 = vld [vmem:[%s3512_s30 + $0x2b8] sm:$0xff]  ;;  %v3371_v34 = vpack.c.bf16 %v325_v24, %v293_v23  ;;  %v3379_v36 = vpack.c.bf16 %v327_v26, %v295_v25 }
  0x36   : > { %3206 = vmatmul.mubr.msk.f32.vlgmr.msra.gmra.mrb[4].mxu1 %vm439_vm1, %v3540_v35  ;;  %3338 = vmatprep.subr.bf16.mxu0 %v3337_v37  ;;  %v392_v32 = vld [vmem:[%s3512_s30 + $0x3b8] sm:$0xff]  ;;  %v3373_v37 = vpack.c.bf16 %v390_v28, %v358_v27  ;;  %v357_v38 = vld [vmem:[%s3512_s30 + $0x2a0] sm:$0xff]  ;;  %v422_v45 = vld [vmem:[%s3512_s30 + $0x4a8] sm:$0xf] }
  0x37   : > { %3346 = vmatprep.subr.bf16.mxu1 %v3345_v40  ;;  %3340 = vmatpush1.bf16.msra.mxu0 %v3339_v41  ;;  %v389_v39 = vld [vmem:[%s3512_s30 + $0x3a0] sm:$0xff]  ;;  %v3381_v40 = vpack.c.bf16 %v392_v32, %v360_v31  ;;  %v359_v41 = vld [vmem:[%s3512_s30 + $0x2b0] sm:$0xff]  ;;  %v298_v47 = vld [vmem:[%s3512_s30 + $0xc8] sm:$0xff] }
  0x38   : > { %3348 = vmatpush1.bf16.msra.mxu1 %v3347_v42  ;;  %3342 = vmatprep.subr.bf16.mxu0 %v3341_v43  ;;  %v391_v42 = vld [vmem:[%s3512_s30 + $0x3b0] sm:$0xff]  ;;  %v3375_v43 = vpack.c.bf16 %v389_v39, %v357_v38  ;;  %v421_v48 = vld [vmem:[%s3512_s30 + $0x4a0] sm:$0xf]  ;;  %v362_v56 = vld [vmem:[%s3512_s30 + $0x2c8] sm:$0xff] }
  0x39   : > { %3350 = vmatprep.subr.bf16.mxu1 %v3349_v46  ;;  %1030 = vmatprep.mubr.f32.mxu0 %v3453_v0  ;;  %v3383_v44 = vpack.c.bf16 %v391_v42, %v359_v41  ;;  %v424_v46 = vld [vmem:[%s3512_s30 + $0x4b8] sm:$0xf]  ;;  %v329_v53 = vld [vmem:[%s3512_s30 + $0x1c0] sm:$0xff]  ;;  %v331_v55 = vld [vmem:[%s3512_s30 + $0x1d0] sm:$0xff] }
  0x3a   : > { %1101 = vmatprep.mubr.f32.mxu1 %v3453_v0  ;;  %v394_v57 = vld [vmem:[%s3512_s30 + $0x3c8] sm:$0xff]  ;;  %v423_v58 = vld [vmem:[%s3512_s30 + $0x4b0] sm:$0xf]  ;;  %v364_v60 = vld [vmem:[%s3512_s30 + $0x2d8] sm:$0xff] }
  0x3b   : > { %3344 = vmatpush1.bf16.msra.mxu0 %v3343_v49  ;;  %v330_v49 = vld [vmem:[%s3512_s30 + $0x1c8] sm:$0xff]  ;;  %v396_v61 = vld [vmem:[%s3512_s30 + $0x3d8] sm:$0xff]  ;;  %v361_v3 = vld [vmem:[%s3512_s30 + $0x2c0] sm:$0xff] }
  0x3c   : > { %3352 = vmatpush1.bf16.msra.mxu1 %v3351_v50  ;;  %3207 = vmatprep.subr.msk.mxu0 %vm443_vm0, %v414_v51  ;;  %v300_v50 = vld [vmem:[%s3512_s30 + $0xd8] sm:$0xff]  ;;  %v3385_v59 = vpack.c.bf16 %v330_v49, %v298_v47  ;;  %v393_v4 = vld [vmem:[%s3512_s30 + $0x3c0] sm:$0xff]  ;;  %v426_v10 = vld [vmem:[%s3512_s30 + $0x4c8] sm:$0xf] }
  0x3d   : > { %3210 = vmatprep.subr.msk.mxu1 %vm443_vm0, %v416_v52  ;;  %v332_v51 = vld [vmem:[%s3512_s30 + $0x1d8] sm:$0xff]  ;;  %v297_v52 = vld [vmem:[%s3512_s30 + $0xc0] sm:$0xff]  ;;  %v302_v12 = vld [vmem:[%s3512_s30 + $0xe8] sm:$0xff] }
  0x3e   : > { %v3393_v62 = vpack.c.bf16 %v332_v51, %v300_v50  ;;  %v3387_v63 = vpack.c.bf16 %v329_v53, %v297_v52  ;;  %v425_v13 = vld [vmem:[%s3512_s30 + $0x4c0] sm:$0xf]  ;;  %v335_v20 = vld [vmem:[%s3512_s30 + $0x1f0] sm:$0xff]  ;;  %v366_v21 = vld [vmem:[%s3512_s30 + $0x2e8] sm:$0xff] }
  0x3f   : > { %3208 = vmatpush1.msk.msra.mxu0 %vm443_vm0, %v413_v54  ;;  %v299_v54 = vld [vmem:[%s3512_s30 + $0xd0] sm:$0xff]  ;;  %v333_v18 = vld [vmem:[%s3512_s30 + $0x1e0] sm:$0xff]  ;;  %v398_v22 = vld [vmem:[%s3512_s30 + $0x3e8] sm:$0xff] }
  0x40   : > { %3211 = vmatpush1.msk.msra.mxu1 %vm443_vm0, %v415_v1  ;;  %3209 = vmatmul.mubr.msk.f32.vlgmr.msra.gmra.mrb[6].mxu0 %vm439_vm1, %v3540_v35  ;;  %v3395_v1 = vpack.c.bf16 %v331_v55, %v299_v54  ;;  %v427_v23 = vld [vmem:[%s3512_s30 + $0x4d0] sm:$0xf]  ;;  %v368_v25 = vld [vmem:[%s3512_s30 + $0x2f8] sm:$0xff]  ;;  %v365_v31 = vld [vmem:[%s3512_s30 + $0x2e0] sm:$0xff] }
  0x41   : > { %3212 = vmatmul.mubr.msk.f32.vlgmr.msra.gmra.mrb[6].mxu1 %vm439_vm1, %v3540_v35  ;;  %3354 = vmatprep.subr.bf16.mxu0 %v3353_v2  ;;  %v3389_v2 = vpack.c.bf16 %v394_v57, %v362_v56  ;;  %v400_v26 = vld [vmem:[%s3512_s30 + $0x3f8] sm:$0xff]  ;;  %v397_v32 = vld [vmem:[%s3512_s30 + $0x3e0] sm:$0xff]  ;;  %v430_v39 = vld [vmem:[%s3512_s30 + $0x4e8] sm:$0xf] }
  0x42   : > { %3362 = vmatprep.subr.bf16.mxu1 %v3361_v5  ;;  %3356 = vmatpush1.bf16.msra.mxu0 %v3355_v6  ;;  %v3397_v5 = vpack.c.bf16 %v396_v61, %v364_v60  ;;  %v363_v6 = vld [vmem:[%s3512_s30 + $0x2d0] sm:$0xff]  ;;  %v1677_v41 = vld [vmem:[%s3749_s12] sm:$0x77]  ;;  %v1678_v42 = vld [vmem:[%s3749_s12 + $0x8] sm:$0x77] }
  0x43   : > { %3364 = vmatpush1.bf16.msra.mxu1 %v3363_v7  ;;  %3358 = vmatprep.subr.bf16.mxu0 %v3357_v8  ;;  %v395_v7 = vld [vmem:[%s3512_s30 + $0x3d0] sm:$0xff]  ;;  %v3391_v8 = vpack.c.bf16 %v393_v4, %v361_v3  ;;  %v3773_v49 = vld [vmem:[%s4127_s4] sm:$0xf]  ;;  %v1684_v56 = vld [vmem:[%s3749_s12 + $0x38] sm:$0x77] }
  0x44   : > { %3366 = vmatprep.subr.bf16.mxu1 %v3365_v11  ;;  %1172 = vmatprep.mubr.f32.mxu0 %v3453_v0  ;;  %v3399_v9 = vpack.c.bf16 %v395_v7, %v363_v6  ;;  %v428_v11 = vld [vmem:[%s3512_s30 + $0x4d8] sm:$0xf]  ;;  %v1679_v47 = vld [vmem:[%s3749_s12 + $0x10] sm:$0x77]  ;;  %v1681_v52 = vld [vmem:[%s3749_s12 + $0x20] sm:$0x77] }
  0x45   : > { %1243 = vmatprep.mubr.f32.mxu1 %v3453_v0  ;;  %v1717_v50 = vcombine.high %v1679_v47, %v1679_v47  ;;  %v1719_v53 = vcombine.high %v1681_v52, %v1681_v52  ;;  %v1683_v55 = vld [vmem:[%s3749_s12 + $0x30] sm:$0x77]  ;;  %v1686_v60 = vld [vmem:[%s3749_s12 + $0x48] sm:$0x77]  ;;  %v1689_v4 = vld [vmem:[%s3749_s12 + $0x60] sm:$0x77] }
  0x46   : > { %3360 = vmatpush1.bf16.msra.mxu0 %v3359_v14  ;;  %v334_v14 = vld [vmem:[%s3512_s30 + $0x1e8] sm:$0xff]  ;;  %v1721_v57 = vcombine.high %v1683_v55, %v1683_v55  ;;  %v1727_v6 = vcombine.high %v1689_v4, %v1689_v4 }
  0x47   : > { %3368 = vmatpush1.bf16.msra.mxu1 %v3367_v15  ;;  %3213 = vmatprep.subr.msk.mxu0 %vm443_vm0, %v418_v16  ;;  %v304_v15 = vld [vmem:[%s3512_s30 + $0xf8] sm:$0xff]  ;;  %v3401_v24 = vpack.c.bf16 %v334_v14, %v302_v12 }
  0x48   : > { %3216 = vmatprep.subr.msk.mxu1 %vm443_vm0, %v420_v17  ;;  %v336_v16 = vld [vmem:[%s3512_s30 + $0x1f8] sm:$0xff]  ;;  %v301_v17 = vld [vmem:[%s3512_s30 + $0xe0] sm:$0xff] }
  0x49   : > { %v3409_v27 = vpack.c.bf16 %v336_v16, %v304_v15  ;;  %v3403_v28 = vpack.c.bf16 %v333_v18, %v301_v17 }
  0x4a   : > { %3214 = vmatpush1.msk.msra.mxu0 %vm443_vm0, %v417_v19  ;;  %v303_v19 = vld [vmem:[%s3512_s30 + $0xf0] sm:$0xff] }
  0x4b   : > { %3217 = vmatpush1.msk.msra.mxu1 %vm443_vm0, %v419_v29  ;;  %3215 = vmatmul.mubr.msk.f32.vlgmr.msra.gmra.mrb[8].mxu0 %vm439_vm1, %v3540_v35  ;;  %v3411_v29 = vpack.c.bf16 %v335_v20, %v303_v19 }
  0x4c   : > { %3218 = vmatmul.mubr.msk.f32.vlgmr.msra.gmra.mrb[8].mxu1 %vm439_vm1, %v3540_v35  ;;  %3370 = vmatprep.subr.bf16.mxu0 %v3369_v30  ;;  %v3405_v30 = vpack.c.bf16 %v398_v22, %v366_v21 }
  0x4d   : > { %3378 = vmatprep.subr.bf16.mxu1 %v3377_v33  ;;  %3372 = vmatpush1.bf16.msra.mxu0 %v3371_v34  ;;  %v3413_v33 = vpack.c.bf16 %v400_v26, %v368_v25  ;;  %v367_v34 = vld [vmem:[%s3512_s30 + $0x2f0] sm:$0xff] }
  0x4e   : > { %3380 = vmatpush1.bf16.msra.mxu1 %v3379_v36  ;;  %3374 = vmatprep.subr.bf16.mxu0 %v3373_v37  ;;  %v399_v36 = vld [vmem:[%s3512_s30 + $0x3f0] sm:$0xff]  ;;  %v3407_v37 = vpack.c.bf16 %v397_v32, %v365_v31 }
  0x4f   : > { %3382 = vmatprep.subr.bf16.mxu1 %v3381_v40  ;;  %1314 = vmatprep.mubr.f32.mxu0 %v3453_v0  ;;  %v3415_v38 = vpack.c.bf16 %v399_v36, %v367_v34  ;;  %v432_v40 = vld [vmem:[%s3512_s30 + $0x4f8] sm:$0xf] }
  0x50   : > { %1385 = vmatprep.mubr.f32.mxu1 %v3453_v0 }
  0x51   : > { %3376 = vmatpush1.bf16.msra.mxu0 %v3375_v43  ;;  %v429_v43 = vld [vmem:[%s3512_s30 + $0x4e0] sm:$0xf] }
  0x52   : > { %3384 = vmatpush1.bf16.msra.mxu1 %v3383_v44  ;;  %3219 = vmatprep.subr.msk.mxu0 %vm443_vm0, %v422_v45  ;;  %v431_v44 = vld [vmem:[%s3512_s30 + $0x4f0] sm:$0xf]  ;;  %v1715_v45 = vcombine.high %v1677_v41, %v1677_v41 }
  0x53   : > { %3222 = vmatprep.subr.msk.mxu1 %vm443_vm0, %v424_v46  ;;  %v1716_v46 = vcombine.high %v1678_v42, %v1678_v42 }
  0x55   : > { %3220 = vmatpush1.msk.msra.mxu0 %vm443_vm0, %v421_v48  ;;  %v1680_v48 = vld [vmem:[%s3749_s12 + $0x18] sm:$0x77] }
  0x56   : > { %3223 = vmatpush1.msk.msra.mxu1 %vm443_vm0, %v423_v58  ;;  %3221 = vmatmul.mubr.msk.f32.vlgmr.msra.gmra.mrb[10].mxu0 %vm439_vm1, %v3540_v35  ;;  %v1718_v51 = vcombine.high %v1680_v48, %v1680_v48  ;;  %v1722_v58 = vcombine.high %v1684_v56, %v1684_v56 }
  0x57   : > { %3224 = vmatmul.mubr.msk.f32.vlgmr.msra.gmra.mrb[10].mxu1 %vm439_vm1, %v3540_v35  ;;  %3386 = vmatprep.subr.bf16.mxu0 %v3385_v59  ;;  %v1685_v59 = vld [vmem:[%s3749_s12 + $0x40] sm:$0x77] }
  0x58   : > { %3394 = vmatprep.subr.bf16.mxu1 %v3393_v62  ;;  %3388 = vmatpush1.bf16.msra.mxu0 %v3387_v63  ;;  %v1723_v61 = vcombine.high %v1685_v59, %v1685_v59  ;;  %v1724_v62 = vcombine.high %v1686_v60, %v1686_v60  ;;  %v1687_v63 = vld [vmem:[%s3749_s12 + $0x50] sm:$0x77] }
  0x59   : > { %3396 = vmatpush1.bf16.msra.mxu1 %v3395_v1  ;;  %3390 = vmatprep.subr.bf16.mxu0 %v3389_v2  ;;  %v1688_v1 = vld [vmem:[%s3749_s12 + $0x58] sm:$0x77]  ;;  %v1725_v2 = vcombine.high %v1687_v63, %v1687_v63 }
  0x5a   : > { %3398 = vmatprep.subr.bf16.mxu1 %v3397_v5  ;;  %1456 = vmatprep.mubr.f32.mxu0 %v3453_v0  ;;  %v1726_v3 = vcombine.high %v1688_v1, %v1688_v1  ;;  %v1690_v5 = vld [vmem:[%s3749_s12 + $0x68] sm:$0x77] }
  0x5b   : > { %1527 = vmatprep.mubr.f32.mxu1 %v3453_v0  ;;  %v1728_v7 = vcombine.high %v1690_v5, %v1690_v5 }
  0x5c   : > { %3392 = vmatpush1.bf16.msra.mxu0 %v3391_v8  ;;  %v1691_v8 = vld [vmem:[%s3749_s12 + $0x70] sm:$0x77] }
  0x5d   : > { %3400 = vmatpush1.bf16.msra.mxu1 %v3399_v9  ;;  %3225 = vmatprep.subr.msk.mxu0 %vm443_vm0, %v426_v10  ;;  %v1692_v9 = vld [vmem:[%s3749_s12 + $0x78] sm:$0x77]  ;;  %v1729_v10 = vcombine.high %v1691_v8, %v1691_v8 }
  0x5e   : > { %3228 = vmatprep.subr.msk.mxu1 %vm443_vm0, %v428_v11  ;;  %v1730_v11 = vcombine.high %v1692_v9, %v1692_v9 }
  0x60   : > { %3226 = vmatpush1.msk.msra.mxu0 %vm443_vm0, %v425_v13 }
  0x61   : > { %3229 = vmatpush1.msk.msra.mxu1 %vm443_vm0, %v427_v23  ;;  %3227 = vmatmul.mubr.msk.f32.vlgmr.msra.gmra.mrb[12].mxu0 %vm439_vm1, %v3540_v35 }
  0x62   : > { %3230 = vmatmul.mubr.msk.f32.vlgmr.msra.gmra.mrb[12].mxu1 %vm439_vm1, %v3540_v35  ;;  %3402 = vmatprep.subr.bf16.mxu0 %v3401_v24 }
  0x63   : > { %3410 = vmatprep.subr.bf16.mxu1 %v3409_v27  ;;  %3404 = vmatpush1.bf16.msra.mxu0 %v3403_v28 }
  0x64   : > { %3412 = vmatpush1.bf16.msra.mxu1 %v3411_v29  ;;  %3406 = vmatprep.subr.bf16.mxu0 %v3405_v30 }
  0x65   : > { %3414 = vmatprep.subr.bf16.mxu1 %v3413_v33  ;;  %1598 = vmatprep.mubr.f32.mxu0 %v3453_v0 }
  0x66   : > { %1669 = vmatprep.mubr.f32.mxu1 %v3453_v0 }
  0x67   : > { %3408 = vmatpush1.bf16.msra.mxu0 %v3407_v37 }
  0x68   : > { %3416 = vmatpush1.bf16.msra.mxu1 %v3415_v38  ;;  %3231 = vmatprep.subr.msk.mxu0 %vm443_vm0, %v430_v39 }
  0x69   : > { %3234 = vmatprep.subr.msk.mxu1 %vm443_vm0, %v432_v40 }
  0x6b   : > { %3232 = vmatpush1.msk.msra.mxu0 %vm443_vm0, %v429_v43 }
  0x6c   : > { %3235 = vmatpush1.msk.msra.mxu1 %vm443_vm0, %v431_v44  ;;  %3233 = vmatmul.mubr.msk.f32.vlgmr.msra.gmra.mrb[14].mxu0 %vm439_vm1, %v3540_v35 }
  0x6d   : > { %3236 = vmatmul.mubr.msk.f32.vlgmr.msra.gmra.mrb[14].mxu1 %vm439_vm1, %v3540_v35  ;;  %3237 = vmatprep.subr.msk.mxu0 %vm1735_vm2, %v1715_v45  ;;  %v1682_v35 = vld [vmem:[%s3749_s12 + $0x28] sm:$0x77] }
  0x6e   : > { %3240 = vmatprep.subr.msk.mxu1 %vm1735_vm2, %v1716_v46  ;;  %3238 = vmatpush1.msk.msra.mxu0 %vm1735_vm2, %v1677_v41  ;;  %v1720_v54 = vcombine.high %v1682_v35, %v1682_v35 }
  0x6f   : > { %3241 = vmatpush1.msk.msra.mxu1 %vm1735_vm2, %v1678_v42  ;;  %1864 = vmatprep.mubr.f32.mxu0 %v3453_v0 }
  0x70   : > { %1935 = vmatprep.mubr.f32.mxu1 %v3453_v0  ;;  %3239 = vmatmul.mubr.msk.f32.vlgmr.msra.gmra.mrb[16].mxu0 %vm1731_vm3, %v3773_v49 }
  0x71   : > { %3242 = vmatmul.mubr.msk.f32.vlgmr.msra.gmra.mrb[16].mxu1 %vm1731_vm3, %v3773_v49  ;;  %3243 = vmatprep.subr.msk.mxu0 %vm1735_vm2, %v1717_v50 }
  0x72   : > { %3246 = vmatprep.subr.msk.mxu1 %vm1735_vm2, %v1718_v51  ;;  %3244 = vmatpush1.msk.msra.mxu0 %vm1735_vm2, %v1679_v47 }
  0x73   : > { %3247 = vmatpush1.msk.msra.mxu1 %vm1735_vm2, %v1680_v48  ;;  %2006 = vmatprep.mubr.f32.mxu0 %v3453_v0 }
  0x74   : > { %2077 = vmatprep.mubr.f32.mxu1 %v3453_v0  ;;  %3245 = vmatmul.mubr.msk.f32.vlgmr.msra.gmra.mrb[18].mxu0 %vm1731_vm3, %v3773_v49 }
  0x75   : > { %3248 = vmatmul.mubr.msk.f32.vlgmr.msra.gmra.mrb[18].mxu1 %vm1731_vm3, %v3773_v49  ;;  %3249 = vmatprep.subr.msk.mxu0 %vm1735_vm2, %v1719_v53 }
  0x76   : > { %3252 = vmatprep.subr.msk.mxu1 %vm1735_vm2, %v1720_v54  ;;  %3250 = vmatpush1.msk.msra.mxu0 %vm1735_vm2, %v1681_v52 }
  0x77   : > { %3253 = vmatpush1.msk.msra.mxu1 %vm1735_vm2, %v1682_v35  ;;  %2148 = vmatprep.mubr.f32.mxu0 %v3453_v0 }
  0x78   : > { %2219 = vmatprep.mubr.f32.mxu1 %v3453_v0  ;;  %3251 = vmatmul.mubr.msk.f32.vlgmr.msra.gmra.mrb[20].mxu0 %vm1731_vm3, %v3773_v49 }
  0x79   : > { %3254 = vmatmul.mubr.msk.f32.vlgmr.msra.gmra.mrb[20].mxu1 %vm1731_vm3, %v3773_v49  ;;  %3255 = vmatprep.subr.msk.mxu0 %vm1735_vm2, %v1721_v57 }
  0x7a   : > { %3258 = vmatprep.subr.msk.mxu1 %vm1735_vm2, %v1722_v58  ;;  %3256 = vmatpush1.msk.msra.mxu0 %vm1735_vm2, %v1683_v55 }
  0x7b   : > { %3259 = vmatpush1.msk.msra.mxu1 %vm1735_vm2, %v1684_v56  ;;  %2290 = vmatprep.mubr.f32.mxu0 %v3453_v0 }
  0x7c   : > { %2361 = vmatprep.mubr.f32.mxu1 %v3453_v0  ;;  %3257 = vmatmul.mubr.msk.f32.vlgmr.msra.gmra.mrb[22].mxu0 %vm1731_vm3, %v3773_v49 }
  0x7d   : > { %3260 = vmatmul.mubr.msk.f32.vlgmr.msra.gmra.mrb[22].mxu1 %vm1731_vm3, %v3773_v49  ;;  %3261 = vmatprep.subr.msk.mxu0 %vm1735_vm2, %v1723_v61 }
  0x7e   : > { %3264 = vmatprep.subr.msk.mxu1 %vm1735_vm2, %v1724_v62  ;;  %3262 = vmatpush1.msk.msra.mxu0 %vm1735_vm2, %v1685_v59 }
  0x7f   : > { %3265 = vmatpush1.msk.msra.mxu1 %vm1735_vm2, %v1686_v60  ;;  %2432 = vmatprep.mubr.f32.mxu0 %v3453_v0 }
  0x80   : > { %2503 = vmatprep.mubr.f32.mxu1 %v3453_v0  ;;  %3263 = vmatmul.mubr.msk.f32.vlgmr.msra.gmra.mrb[24].mxu0 %vm1731_vm3, %v3773_v49 }
  0x81   : > { %3266 = vmatmul.mubr.msk.f32.vlgmr.msra.gmra.mrb[24].mxu1 %vm1731_vm3, %v3773_v49  ;;  %3267 = vmatprep.subr.msk.mxu0 %vm1735_vm2, %v1725_v2 }
  0x82   : > { %3270 = vmatprep.subr.msk.mxu1 %vm1735_vm2, %v1726_v3  ;;  %3268 = vmatpush1.msk.msra.mxu0 %vm1735_vm2, %v1687_v63 }
  0x83   : > { %3271 = vmatpush1.msk.msra.mxu1 %vm1735_vm2, %v1688_v1  ;;  %2574 = vmatprep.mubr.f32.mxu0 %v3453_v0 }
  0x84   : > { %2645 = vmatprep.mubr.f32.mxu1 %v3453_v0  ;;  %3269 = vmatmul.mubr.msk.f32.vlgmr.msra.gmra.mrb[26].mxu0 %vm1731_vm3, %v3773_v49 }
  0x85   : > { %3272 = vmatmul.mubr.msk.f32.vlgmr.msra.gmra.mrb[26].mxu1 %vm1731_vm3, %v3773_v49  ;;  %3273 = vmatprep.subr.msk.mxu0 %vm1735_vm2, %v1727_v6 }
  0x86   : > { %3276 = vmatprep.subr.msk.mxu1 %vm1735_vm2, %v1728_v7  ;;  %3274 = vmatpush1.msk.msra.mxu0 %vm1735_vm2, %v1689_v4 }
  0x87   : > { %3277 = vmatpush1.msk.msra.mxu1 %vm1735_vm2, %v1690_v5  ;;  %2716 = vmatprep.mubr.f32.mxu0 %v3453_v0  ;;  %v3866_v36 = vpop.permute.xlu0 %436 }
  0x88   : > { %2787 = vmatprep.mubr.f32.mxu1 %v3453_v0  ;;  %3275 = vmatmul.mubr.msk.f32.vlgmr.msra.gmra.mrb[28].mxu0 %vm1731_vm3, %v3773_v49 }
  0x89   : > { %3278 = vmatmul.mubr.msk.f32.vlgmr.msra.gmra.mrb[28].mxu1 %vm1731_vm3, %v3773_v49  ;;  %3279 = vmatprep.subr.msk.mxu0 %vm1735_vm2, %v1729_v10 }
  0x8a   : > { %3282 = vmatprep.subr.msk.mxu1 %vm1735_vm2, %v1730_v11  ;;  %3280 = vmatpush1.msk.msra.mxu0 %vm1735_vm2, %v1691_v8 }
  0x8b   : > { %3283 = vmatpush1.msk.msra.mxu1 %vm1735_vm2, %v1692_v9  ;;  %2858 = vmatprep.mubr.f32.mxu0 %v3453_v0 }
  0x8c   : > { %2929 = vmatprep.mubr.f32.mxu1 %v3453_v0  ;;  %3281 = vmatmul.mubr.msk.f32.vlgmr.msra.gmra.mrb[30].mxu0 %vm1731_vm3, %v3773_v49 }
  0x8d   : > { %3284 = vmatmul.mubr.msk.f32.vlgmr.msra.gmra.mrb[30].mxu1 %vm1731_vm3, %v3773_v49 }
  0xf2   : > { %v606_v12 = vpop.f32.mrb[0].mxu0 }
  0xf3   : > { %v677_v13 = vpop.f32.mrb[0].mxu1  ;;  %v608_v14 = vpop.f32.mrb[1].mxu0  ;;  %v3880_v42 = vadd.f32 %v606_v12, %v3866_v36 }
  0xf4   : > { %v679_v15 = vpop.f32.mrb[1].mxu1  ;;  %v3877_v41 = vadd.f32 %v608_v14, %v3866_v36  ;;  %v3886_v44 = vadd.f32 %v677_v13, %v3866_v36  ;;  %v3955_v12 = vpop.permute.xlu0 %1696 }
  0xf5   : > { %v3883_v43 = vadd.f32 %v679_v15, %v3866_v36  ;;  %v2936_v51 = vmax.f32 %v3880_v42, 0.0 }
  0xf6   : > { %v2937_v49 = vmax.f32 %v3877_v41, 0.0  ;;  %v2938_v54 = vmax.f32 %v3886_v44, 0.0 }
  0xf7   : > { %v2939_v52 = vmax.f32 %v3883_v43, 0.0 }
  0xfd   : > { %v748_v16 = vpop.f32.mrb[2].mxu0 }
  0xfe   : > { %v819_v17 = vpop.f32.mrb[2].mxu1  ;;  %v750_v18 = vpop.f32.mrb[3].mxu0  ;;  %v3889_v45 = vadd.f32 %v748_v16, %v3866_v36 }
  0xff   : > { %v821_v19 = vpop.f32.mrb[3].mxu1  ;;  %v3892_v46 = vadd.f32 %v819_v17, %v3866_v36  ;;  %v3895_v47 = vadd.f32 %v750_v18, %v3866_v36 }
 0x100   : > { %v3898_v48 = vadd.f32 %v821_v19, %v3866_v36  ;;  %v2940_v55 = vmax.f32 %v3889_v45, 0.0 }
 0x101   : > { %v2942_v56 = vmax.f32 %v3892_v46, 0.0  ;;  %v2941_v59 = vmax.f32 %v3895_v47, 0.0 }
 0x102   : > { %v2943_v60 = vmax.f32 %v3898_v48, 0.0 }
 0x108   : > { %v890_v20 = vpop.f32.mrb[4].mxu0 }
 0x109   : > { %v961_v21 = vpop.f32.mrb[4].mxu1  ;;  %v892_v22 = vpop.f32.mrb[5].mxu0  ;;  %v3902_v50 = vadd.f32 %v890_v20, %v3866_v36 }
 0x10a   : > { %v963_v23 = vpop.f32.mrb[5].mxu1  ;;  %v3907_v35 = vadd.f32 %v961_v21, %v3866_v36  ;;  %v3910_v53 = vadd.f32 %v892_v22, %v3866_v36 }
 0x10b   : > { %v3916_v57 = vadd.f32 %v963_v23, %v3866_v36  ;;  %v2944_v1 = vmax.f32 %v3902_v50, 0.0 }
 0x10c   : > { %v2946_v7 = vmax.f32 %v3907_v35, 0.0  ;;  %v2945_v8 = vmax.f32 %v3910_v53, 0.0 }
 0x10d   : > { %v2947_v13 = vmax.f32 %v3916_v57, 0.0 }
 0x113   : > { %v1032_v24 = vpop.f32.mrb[6].mxu0 }
 0x114   : > { %v1103_v0 = vpop.f32.mrb[6].mxu1  ;;  %v1034_v25 = vpop.f32.mrb[7].mxu0  ;;  %v3919_v58 = vadd.f32 %v1032_v24, %v3866_v36 }
 0x115   : > { %v1105_v26 = vpop.f32.mrb[7].mxu1  ;;  %v3924_v61 = vadd.f32 %v1103_v0, %v3866_v36  ;;  %v3927_v62 = vadd.f32 %v1034_v25, %v3866_v36 }
 0x116   : > { %v3933_v2 = vadd.f32 %v1105_v26, %v3866_v36  ;;  %v2948_v14 = vmax.f32 %v3919_v58, 0.0 }
 0x117   : > { %v2950_v17 = vmax.f32 %v3924_v61, 0.0  ;;  %v2949_v18 = vmax.f32 %v3927_v62, 0.0 }
 0x11e   : > { %v1174_v27 = vpop.f32.mrb[8].mxu0 }
 0x11f   : > { %v1245_v28 = vpop.f32.mrb[8].mxu1  ;;  %v1176_v29 = vpop.f32.mrb[9].mxu0  ;;  %v3936_v3 = vadd.f32 %v1174_v27, %v3866_v36 }
 0x120   : > { %v1247_v30 = vpop.f32.mrb[9].mxu1  ;;  %v3939_v4 = vadd.f32 %v1245_v28, %v3866_v36  ;;  %v3948_v9 = vadd.f32 %v1176_v29, %v3866_v36 }
 0x121   : > { %v3951_v10 = vadd.f32 %v1247_v30, %v3866_v36 }
 0x129   : > { %v1316_v31 = vpop.f32.mrb[10].mxu0 }
 0x12a   : > { %v1387_v32 = vpop.f32.mrb[10].mxu1  ;;  %v1318_v33 = vpop.f32.mrb[11].mxu0  ;;  %v3960_v15 = vadd.f32 %v1316_v31, %v3866_v36 }
 0x12b   : > { %v1389_v34 = vpop.f32.mrb[11].mxu1  ;;  %v3963_v16 = vadd.f32 %v1387_v32, %v3866_v36  ;;  %v3968_v19 = vadd.f32 %v1318_v33, %v3866_v36 }
 0x12c   : > { %v3971_v20 = vadd.f32 %v1389_v34, %v3866_v36 }
 0x134   : > { %v3868_v37 = vpop.f32.mrb[12].mxu0 }
 0x135   : > { %v3870_v38 = vpop.f32.mrb[12].mxu1  ;;  %v3872_v39 = vpop.f32.mrb[13].mxu0 }
 0x136   : > { %v3874_v40 = vpop.f32.mrb[13].mxu1  ;;  %v3997_v44 = vadd.f32 %v3870_v38, %v3866_v36 }
 0x137   : > { %v4030_v46 = vadd.f32 %v3874_v40, %v3866_v36 }
 0x138   : > { %v2962_v50 = vmax.f32 %v3997_v44, 0.0 }
 0x139   : > { %v2963_v58 = vmax.f32 %v4030_v46, 0.0 }
 0x13f   : > { %v3929_v63 = vpop.f32.mrb[14].mxu0 }
 0x140   : > { %v3941_v5 = vpop.f32.mrb[14].mxu1  ;;  %v3943_v6 = vpop.f32.mrb[15].mxu0  ;;  %v4065_v61 = vadd.f32 %v3929_v63, %v3866_v36  ;;  %v4133_v63 = vmax.f32 %v3948_v9, 0.0 }
 0x141   : > { %v3953_v11 = vpop.f32.mrb[15].mxu1  ;;  %v1603_v9 = vadd.f32 %v3943_v6, %v3866_v36  ;;  %v4137_v6 = vmax.f32 %v3968_v19, 0.0 }
 0x143   : > { %v1866_v21 = vpop.f32.mrb[16].mxu0  ;;  %v2965_v44 = vmax.f32 %v1603_v9, 0.0 }
 0x144   : > { %v1867_v0 = vadd.f32 %v1866_v21, %v3955_v12  ;;  %v1937_v25 = vpop.f32.mrb[16].mxu1  ;;  %v1868_v26 = vpop.f32.mrb[17].mxu0 }
 0x145   : > { %v1938_v29 = vadd.f32 %v1937_v25, %v3955_v12  ;;  %v1869_v30 = vadd.f32 %v1868_v26, %v3955_v12  ;;  %v1939_v31 = vpop.f32.mrb[17].mxu1  ;;  %v3988_v25 = vadd.f32 %v3868_v37, %v3866_v36 }
 0x146   : > { %v2968_v34 = vmax.f32 %v1867_v0, 0.0  ;;  %v1940_v42 = vadd.f32 %v1939_v31, %v3955_v12 }
 0x147   : > { %v2970_v27 = vmax.f32 %v1938_v29, 0.0  ;;  %v2969_v24 = vmax.f32 %v1869_v30, 0.0  ;;  %v2008_v28 = vpop.f32.mrb[18].mxu0  ;;  %v2960_v45 = vmax.f32 %v3988_v25, 0.0 }
 0x148   : > { %v3000_v26 = vadd.f32 %v2968_v34, %v2936_v51  ;;  %v2971_v23 = vmax.f32 %v1940_v42, 0.0  ;;  %v2009_v32 = vadd.f32 %v2008_v28, %v3955_v12  ;;  %v2079_v33 = vpop.f32.mrb[18].mxu1  ;;  %v2010_v0 = vpop.f32.mrb[19].mxu0  ;;  %v4011_v51 = vadd.f32 %v3872_v39, %v3866_v36 }
 0x149   : > { %v3002_v22 = vadd.f32 %v2970_v27, %v2938_v54  ;;  %v3001_v31 = vadd.f32 %v2969_v24, %v2937_v49  ;;  %v2080_v21 = vadd.f32 %v2079_v33, %v3955_v12  ;;  %v2011_v29 = vadd.f32 %v2010_v0, %v3955_v12  ;;  %v2081_v30 = vpop.f32.mrb[19].mxu1 }
 0x14a   : > { %v3003_v37 = vadd.f32 %v2971_v23, %v2939_v52  ;;  %v2972_v41 = vmax.f32 %v2009_v32, 0.0  ;;  %v2082_v49 = vadd.f32 %v2081_v30, %v3955_v12  ;;  %v2961_v35 = vmax.f32 %v4011_v51, 0.0 }
 0x14b   : > { %v3064_v54 = vcombine.low %v3000_v26, %v3001_v31  ;;  %v2974_v38 = vmax.f32 %v2080_v21, 0.0  ;;  %v2973_v24 = vmax.f32 %v2011_v29, 0.0  ;;  %v2150_v27 = vpop.f32.mrb[20].mxu0 }
 0x14c   : > { %v3065_v28 = vcombine.low %v3002_v22, %v3003_v37  ;;  %v3004_v33 = vadd.f32 %v2972_v41, %v2940_v55  ;;  %v2975_v34 = vmax.f32 %v2082_v49, 0.0  ;;  %v2151_v43 = vadd.f32 %v2150_v27, %v3955_v12  ;;  %v2221_v52 = vpop.f32.mrb[20].mxu1  ;;  %v2152_v23 = vpop.f32.mrb[21].mxu0 }
 0x14d   : > { %3096 = vst [vmem:[%s4004_s17] sm:$0xff] %v3064_v54  ;;  %v3006_v32 = vadd.f32 %v2974_v38, %v2942_v56  ;;  %v3005_v39 = vadd.f32 %v2973_v24, %v2941_v59  ;;  %v2222_v42 = vadd.f32 %v2221_v52, %v3955_v12  ;;  %v2153_v21 = vadd.f32 %v2152_v23, %v3955_v12  ;;  %v2223_v22 = vpop.f32.mrb[21].mxu1 }
 0x14e   : > { %3097 = vst [vmem:[%s4004_s17 + $0x8] sm:$0xff] %v3065_v28  ;;  %v3007_v55 = vadd.f32 %v2975_v34, %v2943_v60  ;;  %v2976_v26 = vmax.f32 %v2151_v43, 0.0  ;;  %v2224_v0 = vadd.f32 %v2223_v22, %v3955_v12 }
 0x14f   : > { %v3066_v47 = vcombine.low %v3004_v33, %v3005_v39  ;;  %v2978_v56 = vmax.f32 %v2222_v42, 0.0  ;;  %v2977_v59 = vmax.f32 %v2153_v21, 0.0  ;;  %v2292_v31 = vpop.f32.mrb[22].mxu0 }
 0x150   : > { %v3067_v29 = vcombine.low %v3006_v32, %v3007_v55  ;;  %v3008_v30 = vadd.f32 %v2976_v26, %v2944_v1  ;;  %v2979_v37 = vmax.f32 %v2224_v0, 0.0  ;;  %v2293_v48 = vadd.f32 %v2292_v31, %v3955_v12  ;;  %v2363_v60 = vpop.f32.mrb[22].mxu1  ;;  %v2294_v41 = vpop.f32.mrb[23].mxu0 }
 0x151   : > { %3098 = vst [vmem:[%s4004_s17 + $0x10] sm:$0xff] %v3066_v47  ;;  %v3010_v49 = vadd.f32 %v2978_v56, %v2946_v7  ;;  %v3009_v40 = vadd.f32 %v2977_v59, %v2945_v8  ;;  %v2364_v54 = vadd.f32 %v2363_v60, %v3955_v12  ;;  %v2295_v38 = vadd.f32 %v2294_v41, %v3955_v12  ;;  %v2365_v24 = vpop.f32.mrb[23].mxu1 }
 0x152   : > { %3099 = vst [vmem:[%s4004_s17 + $0x18] sm:$0xff] %v3067_v29  ;;  %v3011_v1 = vadd.f32 %v2979_v37, %v2947_v13  ;;  %v2980_v27 = vmax.f32 %v2293_v48, 0.0  ;;  %v2366_v28 = vadd.f32 %v2365_v24, %v3955_v12  ;;  %v4131_v59 = vmax.f32 %v3936_v3, 0.0 }
 0x153   : > { %v3068_v7 = vcombine.low %v3008_v30, %v3009_v40  ;;  %v2982_v53 = vmax.f32 %v2364_v54, 0.0  ;;  %v2981_v8 = vmax.f32 %v2295_v38, 0.0  ;;  %v2434_v33 = vpop.f32.mrb[24].mxu0  ;;  %v4132_v48 = vmax.f32 %v3939_v4, 0.0 }
 0x154   : > { %v3069_v34 = vcombine.low %v3010_v49, %v3011_v1  ;;  %v3012_v43 = vadd.f32 %v2980_v27, %v2948_v14  ;;  %v2983_v52 = vmax.f32 %v2366_v28, 0.0  ;;  %v2435_v23 = vadd.f32 %v2434_v33, %v3955_v12  ;;  %v2505_v32 = vpop.f32.mrb[24].mxu1  ;;  %v2436_v57 = vpop.f32.mrb[25].mxu0 }
 0x155   : > { %3100 = vst [vmem:[%s4004_s17 + $0x20] sm:$0xff] %v3068_v7  ;;  %v3014_v13 = vadd.f32 %v2982_v53, %v2950_v17  ;;  %v3013_v39 = vadd.f32 %v2981_v8, %v2949_v18  ;;  %v2506_v42 = vadd.f32 %v2505_v32, %v3955_v12  ;;  %v2437_v21 = vadd.f32 %v2436_v57, %v3955_v12  ;;  %v2507_v22 = vpop.f32.mrb[25].mxu1 }
 0x156   : > { %3101 = vst [vmem:[%s4004_s17 + $0x28] sm:$0xff] %v3069_v34  ;;  %v4130_v14 = vmax.f32 %v3933_v2, 0.0  ;;  %v2984_v26 = vmax.f32 %v2435_v23, 0.0  ;;  %v2508_v0 = vadd.f32 %v2507_v22, %v3955_v12  ;;  %v1672_v3 = vadd.f32 %v3941_v5, %v3866_v36 }
 0x157   : > { %v3070_v62 = vcombine.low %v3012_v43, %v3013_v39  ;;  %v2986_v17 = vmax.f32 %v2506_v42, 0.0  ;;  %v2985_v18 = vmax.f32 %v2437_v21, 0.0  ;;  %v2576_v47 = vpop.f32.mrb[26].mxu0  ;;  %v4134_v38 = vmax.f32 %v3951_v10, 0.0 }
 0x158   : > { %v3015_v55 = vadd.f32 %v2983_v52, %v4130_v14  ;;  %v3016_v31 = vadd.f32 %v2984_v26, %v4131_v59  ;;  %v2987_v29 = vmax.f32 %v2508_v0, 0.0  ;;  %v2577_v2 = vadd.f32 %v2576_v47, %v3955_v12  ;;  %v2647_v30 = vpop.f32.mrb[26].mxu1  ;;  %v2578_v37 = vpop.f32.mrb[27].mxu0 }
 0x159   : > { %3102 = vst [vmem:[%s4004_s17 + $0x30] sm:$0xff] %v3070_v62  ;;  %v3018_v60 = vadd.f32 %v2986_v17, %v4132_v48  ;;  %v3017_v41 = vadd.f32 %v2985_v18, %v4133_v63  ;;  %v2648_v49 = vadd.f32 %v2647_v30, %v3955_v12  ;;  %v2579_v40 = vadd.f32 %v2578_v37, %v3955_v12  ;;  %v2649_v54 = vpop.f32.mrb[27].mxu1 }
 0x15a   : > { %v3071_v56 = vcombine.low %v3014_v13, %v3015_v55  ;;  %v3019_v24 = vadd.f32 %v2987_v29, %v4134_v38  ;;  %v2988_v1 = vmax.f32 %v2577_v2, 0.0  ;;  %v2650_v4 = vadd.f32 %v2649_v54, %v3955_v12 }
 0x15b   : > { %v3072_v27 = vcombine.low %v3016_v31, %v3017_v41  ;;  %v2990_v28 = vmax.f32 %v2648_v49, 0.0  ;;  %v2989_v7 = vmax.f32 %v2579_v40, 0.0  ;;  %v2718_v53 = vpop.f32.mrb[28].mxu0  ;;  %v4135_v33 = vmax.f32 %v3960_v15, 0.0 }
 0x15c   : > { %3103 = vst [vmem:[%s4004_s17 + $0x38] sm:$0xff] %v3071_v56  ;;  %v3073_v8 = vcombine.low %v3018_v60, %v3019_v24  ;;  %v2991_v34 = vmax.f32 %v2650_v4, 0.0  ;;  %v2719_v43 = vadd.f32 %v2718_v53, %v3955_v12  ;;  %v2789_v10 = vpop.f32.mrb[28].mxu1  ;;  %v2720_v52 = vpop.f32.mrb[29].mxu0  ;;  %v4136_v23 = vmax.f32 %v3963_v16, 0.0 }
 0x15d   : > { %v3020_v5 = vadd.f32 %v2988_v1, %v4135_v33  ;;  %3104 = vst [vmem:[%s4004_s17 + $0x40] sm:$0xff] %v3072_v27  ;;  %v3021_v57 = vadd.f32 %v2989_v7, %v4137_v6  ;;  %v2790_v13 = vadd.f32 %v2789_v10, %v3955_v12  ;;  %v2721_v39 = vadd.f32 %v2720_v52, %v3955_v12  ;;  %v2791_v42 = vpop.f32.mrb[29].mxu1 }
 0x15e   : > { %v3022_v32 = vadd.f32 %v2990_v28, %v4136_v23  ;;  %v2964_v15 = vmax.f32 %v4065_v61, 0.0  ;;  %3105 = vst [vmem:[%s4004_s17 + $0x48] sm:$0xff] %v3073_v8  ;;  %v4138_v21 = vmax.f32 %v3971_v20, 0.0  ;;  %v2992_v14 = vmax.f32 %v2719_v43, 0.0 }
 0x15f   : > { %v2792_v55 = vadd.f32 %v2791_v42, %v3955_v12  ;;  %v1674_v16 = vadd.f32 %v3953_v11, %v3866_v36  ;;  %v3074_v19 = vcombine.low %v3020_v5, %v3021_v57  ;;  %v2994_v26 = vmax.f32 %v2790_v13, 0.0  ;;  %v2860_v62 = vpop.f32.mrb[30].mxu0 }
 0x160   : > { %v3023_v22 = vadd.f32 %v2991_v34, %v4138_v21  ;;  %v2993_v0 = vmax.f32 %v2721_v39, 0.0  ;;  %v3024_v61 = vadd.f32 %v2992_v14, %v2960_v45  ;;  %v2861_v47 = vadd.f32 %v2860_v62, %v3955_v12  ;;  %v2931_v20 = vpop.f32.mrb[30].mxu1  ;;  %v2862_v56 = vpop.f32.mrb[31].mxu0 }
 0x161   : > { %v2995_v18 = vmax.f32 %v2792_v55, 0.0  ;;  %3106 = vst [vmem:[%s4004_s17 + $0x50] sm:$0xff] %v3074_v19  ;;  %v3026_v59 = vadd.f32 %v2994_v26, %v2962_v50  ;;  %v2932_v11 = vadd.f32 %v2931_v20, %v3955_v12  ;;  %v2863_v31 = vadd.f32 %v2862_v56, %v3955_v12  ;;  %v2933_v29 = vpop.f32.mrb[31].mxu1 }
 0x162   : > { %v3075_v17 = vcombine.low %v3022_v32, %v3023_v22  ;;  %v3025_v36 = vadd.f32 %v2993_v0, %v2961_v35  ;;  %v2966_v25 = vmax.f32 %v1672_v3, 0.0  ;;  %v2996_v2 = vmax.f32 %v2861_v47, 0.0 }
 0x163   : > { %v3027_v45 = vadd.f32 %v2995_v18, %v2963_v58  ;;  %v2934_v30 = vadd.f32 %v2933_v29, %v3955_v12  ;;  %v2998_v50 = vmax.f32 %v2932_v11, 0.0  ;;  %v2997_v35 = vmax.f32 %v2863_v31, 0.0 }
 0x164   : > { %3107 = vst [vmem:[%s4004_s17 + $0x58] sm:$0xff] %v3075_v17  ;;  %v3076_v51 = vcombine.low %v3024_v61, %v3025_v36  ;;  %v2967_v37 = vmax.f32 %v1674_v16, 0.0  ;;  %v3028_v60 = vadd.f32 %v2996_v2, %v2964_v15 }
 0x165   : > { %v3077_v48 = vcombine.low %v3026_v59, %v3027_v45  ;;  %v2999_v63 = vmax.f32 %v2934_v30, 0.0  ;;  %v3030_v41 = vadd.f32 %v2998_v50, %v2966_v25  ;;  %v3029_v49 = vadd.f32 %v2997_v35, %v2965_v44 }
 0x166   : > { %3108 = vst [vmem:[%s4004_s17 + $0x60] sm:$0xff] %v3076_v51 }
 0x167   : > { %3109 = vst [vmem:[%s4004_s17 + $0x68] sm:$0xff] %v3077_v48  ;;  %v3031_v40 = vadd.f32 %v2999_v63, %v2967_v37  ;;  %v3078_v46 = vcombine.low %v3028_v60, %v3029_v49 }
 0x169   : > { %v3079_v58 = vcombine.low %v3030_v41, %v3031_v40  ;;  %3110 = vst [vmem:[%s4004_s17 + $0x70] sm:$0xff] %v3078_v46 }
 0x16b   : > { %3111 = vst [vmem:[%s4004_s17 + $0x78] sm:$0xff] %v3079_v58 }
 0x16c PF: > { %s16_s21 = sadd.s32 1, %s3451_s21  }
 0x16d   : > { %p13_p4 = scmp.ge.s32.totalorder %s16_s21, 4  }
 0x16f   :  { %15 = sbr.rel (!%p13_p4) target bundleno = 1 (0x1), region = 77 }

// kernel: _lambda_.16
= control target key start
LH: loop header
LB: loop body
LE: loop exit
PB: predicated region body
PF: predicated region fallthrough
CT: control target
= control target key end

     0   :  { %s1971_s12 = smov 0   ;;  %s2294_s0 = inlined_call_operand.vmem [shape: f32[2,36,4096], index: 0, kind: input, shape index: {}]   ;;  %s2295_s1 = inlined_call_operand.vmem [shape: f32[4,36], index: 1, kind: input, shape index: {}]   ;;  %s2296_s2 = inlined_call_operand.vmem [shape: f32[4,1], index: 2, kind: input, shape index: {}]   ;;  %s2297_s3 = inlined_call_operand.vmem [shape: f32[2,4,4096], index: 3, kind: output, shape index: {}]  }
   0x1 LB: > { %s1742_s13 = sadd.s32 4294967295, %s1947_s12   ;;  %p1746_p0 = scmp.ge.s32.totalorder %s1947_s12, 1  ;;  %s1947_s12 = sphi %s1971_s12, %s13_s12  }
   0x2   : > { %p137_p1 = scmp.lt.s32.totalorder %s1947_s12, 3 }
   0x4   : > { %p138_p2 = pnand %p1746_p0, %p137_p1 }
   0x5   : > { %p161_p3 = scmp.lt.s32.totalorder (!%p138_p2), %s1742_s13, 1  ;;  %v1949_v0 = vmov (!%p138_p2), 0.0   ;;  %v332_v1 = vld [vmem:[%s2296_s2] sm:$0xf] (!%p138_p2)  ;;  %v1950_v2 = vmov (!%p138_p2), 0   ;;  %vm342_vm0 = vcmask (!%p138_p2), 1043456  }
   0x6   : > { %141 = sbr.rel (%p138_p2) target bundleno = 329 (0x149), region = 32  ;;  %503 = vmatprep.mubr.f32.mxu0 (!%p138_p2), %v1949_v0  ;;  %574 = vmatprep.mubr.f32.mxu1 (!%p138_p2), %v1949_v0  ;;  %v2018_v34 = vld [vmem:[%s2295_s1] sm:$0xf] (!%p138_p2)  ;;  %vm338_vm1 = vcmask (!%p138_p2), 293888  }
   0x7   : > { %1940 = vset.pattern.permute.xlu0 (!%p138_p2), %v1950_v2 }
   0x8   : > { %335 = vperm.xlu0 (!%p138_p2), %1940, %v332_v1  }
   0xd   : > { %s2299_s13 = smov (!%p161_p3, %s1742_s13), 1 }
   0xe   : > { %s1929_s16 = smul.u32 1280, %s2299_s13  ;;  %s1800_s22 = sshll.u32 %s2299_s13, 7 }
   0xf   : > { %s2245_s25 = scalar_lea.vmem %s2297_s3, %s1800_s22 }
  0x10   : > { %s1990_s19 = scalar_lea.vmem %s2294_s0, %s1929_s16 }
  0x11   : > { %v173_v3 = vld [vmem:[%s1990_s19 + $0x8] sm:$0xff]  ;;  %v175_v5 = vld [vmem:[%s1990_s19 + $0x18] sm:$0xff]  ;;  %v172_v8 = vld [vmem:[%s1990_s19] sm:$0xff] }
  0x12   : > { %v205_v4 = vld [vmem:[%s1990_s19 + $0x108] sm:$0xff]  ;;  %v207_v7 = vld [vmem:[%s1990_s19 + $0x118] sm:$0xff]  ;;  %v204_v9 = vld [vmem:[%s1990_s19 + $0x100] sm:$0xff] }
  0x13   : > { %v1801_v6 = vpack.c.bf16 %v205_v4, %v173_v3  ;;  %v1809_v10 = vpack.c.bf16 %v207_v7, %v175_v5  ;;  %v1803_v11 = vpack.c.bf16 %v204_v9, %v172_v8  ;;  %v174_v12 = vld [vmem:[%s1990_s19 + $0x10] sm:$0xff]  ;;  %v237_v14 = vld [vmem:[%s1990_s19 + $0x208] sm:$0xff]  ;;  %v239_v17 = vld [vmem:[%s1990_s19 + $0x218] sm:$0xff] }
  0x14   : > { %v206_v13 = vld [vmem:[%s1990_s19 + $0x110] sm:$0xff]  ;;  %v269_v16 = vld [vmem:[%s1990_s19 + $0x308] sm:$0xff]  ;;  %v271_v18 = vld [vmem:[%s1990_s19 + $0x318] sm:$0xff] }
  0x15   : > { %1802 = vmatprep.subr.bf16.mxu0 %v1801_v6  ;;  %v1811_v15 = vpack.c.bf16 %v206_v13, %v174_v12  ;;  %1810 = vmatprep.subr.bf16.mxu1 %v1809_v10  ;;  %v1805_v19 = vpack.c.bf16 %v269_v16, %v237_v14  ;;  %v1813_v20 = vpack.c.bf16 %v271_v18, %v239_v17  ;;  %v236_v21 = vld [vmem:[%s1990_s19 + $0x200] sm:$0xff]  ;;  %v238_v23 = vld [vmem:[%s1990_s19 + $0x210] sm:$0xff]  ;;  %v301_v27 = vld [vmem:[%s1990_s19 + $0x408] sm:$0xf] }
  0x16   : > { %1804 = vmatpush1.bf16.msra.mxu0 %v1803_v11  ;;  %v268_v22 = vld [vmem:[%s1990_s19 + $0x300] sm:$0xff]  ;;  %v270_v25 = vld [vmem:[%s1990_s19 + $0x310] sm:$0xff]  ;;  %v303_v28 = vld [vmem:[%s1990_s19 + $0x418] sm:$0xf] }
  0x17   : > { %1812 = vmatpush1.bf16.msra.mxu1 %v1811_v15  ;;  %v1807_v24 = vpack.c.bf16 %v268_v22, %v236_v21  ;;  %1806 = vmatprep.subr.bf16.mxu0 %v1805_v19  ;;  %v1815_v26 = vpack.c.bf16 %v270_v25, %v238_v23  ;;  %v177_v29 = vld [vmem:[%s1990_s19 + $0x28] sm:$0xff]  ;;  %v300_v30 = vld [vmem:[%s1990_s19 + $0x400] sm:$0xf]  ;;  %v179_v32 = vld [vmem:[%s1990_s19 + $0x38] sm:$0xff] }
  0x18   : > { %1814 = vmatprep.subr.bf16.mxu1 %v1813_v20  ;;  %v209_v31 = vld [vmem:[%s1990_s19 + $0x128] sm:$0xff]  ;;  %v211_v33 = vld [vmem:[%s1990_s19 + $0x138] sm:$0xff]  ;;  %v176_v35 = vld [vmem:[%s1990_s19 + $0x20] sm:$0xff] }
  0x19   : > { %v208_v36 = vld [vmem:[%s1990_s19 + $0x120] sm:$0xff]  ;;  %v178_v37 = vld [vmem:[%s1990_s19 + $0x30] sm:$0xff]  ;;  %v241_v39 = vld [vmem:[%s1990_s19 + $0x228] sm:$0xff]  ;;  %v1817_v42 = vpack.c.bf16 %v209_v31, %v177_v29  ;;  %v1825_v45 = vpack.c.bf16 %v211_v33, %v179_v32 }
  0x1a   : > { %1808 = vmatpush1.bf16.msra.mxu0 %v1807_v24  ;;  %v210_v38 = vld [vmem:[%s1990_s19 + $0x130] sm:$0xff]  ;;  %v273_v40 = vld [vmem:[%s1990_s19 + $0x328] sm:$0xff]  ;;  %v243_v43 = vld [vmem:[%s1990_s19 + $0x238] sm:$0xff]  ;;  %v1819_v46 = vpack.c.bf16 %v208_v36, %v176_v35 }
  0x1b   : > { %1816 = vmatpush1.bf16.msra.mxu1 %v1815_v26  ;;  %1750 = vmatprep.subr.msk.mxu0 %vm342_vm0, %v301_v27  ;;  %v302_v41 = vld [vmem:[%s1990_s19 + $0x410] sm:$0xf]  ;;  %v275_v44 = vld [vmem:[%s1990_s19 + $0x338] sm:$0xff]  ;;  %v1827_v47 = vpack.c.bf16 %v210_v38, %v178_v37  ;;  %v1821_v48 = vpack.c.bf16 %v273_v40, %v241_v39  ;;  %v240_v49 = vld [vmem:[%s1990_s19 + $0x220] sm:$0xff] }
  0x1c   : > { %1753 = vmatprep.subr.msk.mxu1 %vm342_vm0, %v303_v28  ;;  %v272_v50 = vld [vmem:[%s1990_s19 + $0x320] sm:$0xff]  ;;  %v1829_v51 = vpack.c.bf16 %v275_v44, %v243_v43  ;;  %v242_v52 = vld [vmem:[%s1990_s19 + $0x230] sm:$0xff]  ;;  %v305_v56 = vld [vmem:[%s1990_s19 + $0x428] sm:$0xf] }
  0x1d   : > { %v274_v53 = vld [vmem:[%s1990_s19 + $0x330] sm:$0xff]  ;;  %v1823_v54 = vpack.c.bf16 %v272_v50, %v240_v49  ;;  %v307_v57 = vld [vmem:[%s1990_s19 + $0x438] sm:$0xf]  ;;  %v181_v58 = vld [vmem:[%s1990_s19 + $0x48] sm:$0xff] }
  0x1e   : > { %1751 = vmatpush1.msk.msra.mxu0 %vm342_vm0, %v300_v30  ;;  %v1831_v55 = vpack.c.bf16 %v274_v53, %v242_v52  ;;  %v304_v59 = vld [vmem:[%s1990_s19 + $0x420] sm:$0xf]  ;;  %v213_v60 = vld [vmem:[%s1990_s19 + $0x148] sm:$0xff]  ;;  %v183_v61 = vld [vmem:[%s1990_s19 + $0x58] sm:$0xff] }
  0x1f   : > { %1754 = vmatpush1.msk.msra.mxu1 %vm342_vm0, %v302_v41  ;;  %1752 = vmatmul.mubr.msk.f32.vlgmr.msra.gmra.mrb[0].mxu0 %vm338_vm1, %v2018_v34  ;;  %v215_v62 = vld [vmem:[%s1990_s19 + $0x158] sm:$0xff]  ;;  %v180_v63 = vld [vmem:[%s1990_s19 + $0x40] sm:$0xff]  ;;  %v182_v2 = vld [vmem:[%s1990_s19 + $0x50] sm:$0xff]  ;;  %v1833_v7 = vpack.c.bf16 %v213_v60, %v181_v58 }
  0x20   : > { %1755 = vmatmul.mubr.msk.f32.vlgmr.msra.gmra.mrb[0].mxu1 %vm338_vm1, %v2018_v34  ;;  %1818 = vmatprep.subr.bf16.mxu0 %v1817_v42  ;;  %v212_v1 = vld [vmem:[%s1990_s19 + $0x140] sm:$0xff]  ;;  %v214_v3 = vld [vmem:[%s1990_s19 + $0x150] sm:$0xff]  ;;  %v245_v4 = vld [vmem:[%s1990_s19 + $0x248] sm:$0xff]  ;;  %v1841_v10 = vpack.c.bf16 %v215_v62, %v183_v61 }
  0x21   : > { %1826 = vmatprep.subr.bf16.mxu1 %v1825_v45  ;;  %1820 = vmatpush1.bf16.msra.mxu0 %v1819_v46  ;;  %v277_v5 = vld [vmem:[%s1990_s19 + $0x348] sm:$0xff]  ;;  %v306_v6 = vld [vmem:[%s1990_s19 + $0x430] sm:$0xf]  ;;  %v247_v8 = vld [vmem:[%s1990_s19 + $0x258] sm:$0xff]  ;;  %v1835_v11 = vpack.c.bf16 %v212_v1, %v180_v63  ;;  %v1843_v12 = vpack.c.bf16 %v214_v3, %v182_v2 }
  0x22   : > { %1828 = vmatpush1.bf16.msra.mxu1 %v1827_v47  ;;  %1822 = vmatprep.subr.bf16.mxu0 %v1821_v48  ;;  %v279_v9 = vld [vmem:[%s1990_s19 + $0x358] sm:$0xff]  ;;  %v1837_v13 = vpack.c.bf16 %v277_v5, %v245_v4  ;;  %v244_v14 = vld [vmem:[%s1990_s19 + $0x240] sm:$0xff]  ;;  %v246_v17 = vld [vmem:[%s1990_s19 + $0x250] sm:$0xff] }
  0x23   : > { %1830 = vmatprep.subr.bf16.mxu1 %v1829_v51  ;;  %645 = vmatprep.mubr.f32.mxu0 %v1949_v0  ;;  %v276_v15 = vld [vmem:[%s1990_s19 + $0x340] sm:$0xff]  ;;  %v1845_v16 = vpack.c.bf16 %v279_v9, %v247_v8  ;;  %v278_v18 = vld [vmem:[%s1990_s19 + $0x350] sm:$0xff]  ;;  %v309_v21 = vld [vmem:[%s1990_s19 + $0x448] sm:$0xf] }
  0x24   : > { %716 = vmatprep.mubr.f32.mxu1 %v1949_v0  ;;  %v1839_v19 = vpack.c.bf16 %v276_v15, %v244_v14  ;;  %v1847_v20 = vpack.c.bf16 %v278_v18, %v246_v17  ;;  %v311_v22 = vld [vmem:[%s1990_s19 + $0x458] sm:$0xf]  ;;  %v185_v23 = vld [vmem:[%s1990_s19 + $0x68] sm:$0xff]  ;;  %v308_v24 = vld [vmem:[%s1990_s19 + $0x440] sm:$0xf] }
  0x25   : > { %1824 = vmatpush1.bf16.msra.mxu0 %v1823_v54  ;;  %v217_v25 = vld [vmem:[%s1990_s19 + $0x168] sm:$0xff]  ;;  %v187_v26 = vld [vmem:[%s1990_s19 + $0x78] sm:$0xff]  ;;  %v184_v28 = vld [vmem:[%s1990_s19 + $0x60] sm:$0xff] }
  0x26   : > { %1832 = vmatpush1.bf16.msra.mxu1 %v1831_v55  ;;  %1756 = vmatprep.subr.msk.mxu0 %vm342_vm0, %v305_v56  ;;  %v219_v27 = vld [vmem:[%s1990_s19 + $0x178] sm:$0xff]  ;;  %v216_v29 = vld [vmem:[%s1990_s19 + $0x160] sm:$0xff]  ;;  %v186_v30 = vld [vmem:[%s1990_s19 + $0x70] sm:$0xff]  ;;  %v1849_v36 = vpack.c.bf16 %v217_v25, %v185_v23 }
  0x27   : > { %1759 = vmatprep.subr.msk.mxu1 %vm342_vm0, %v307_v57  ;;  %v218_v31 = vld [vmem:[%s1990_s19 + $0x170] sm:$0xff]  ;;  %v249_v32 = vld [vmem:[%s1990_s19 + $0x268] sm:$0xff]  ;;  %v251_v37 = vld [vmem:[%s1990_s19 + $0x278] sm:$0xff]  ;;  %v1857_v39 = vpack.c.bf16 %v219_v27, %v187_v26  ;;  %v1851_v40 = vpack.c.bf16 %v216_v29, %v184_v28 }
  0x28   : > { %v281_v33 = vld [vmem:[%s1990_s19 + $0x368] sm:$0xff]  ;;  %v310_v35 = vld [vmem:[%s1990_s19 + $0x450] sm:$0xf]  ;;  %v283_v38 = vld [vmem:[%s1990_s19 + $0x378] sm:$0xff]  ;;  %v1859_v41 = vpack.c.bf16 %v218_v31, %v186_v30 }
  0x29   : > { %1757 = vmatpush1.msk.msra.mxu0 %vm342_vm0, %v304_v59  ;;  %v1853_v42 = vpack.c.bf16 %v281_v33, %v249_v32  ;;  %v248_v43 = vld [vmem:[%s1990_s19 + $0x260] sm:$0xff]  ;;  %v1861_v45 = vpack.c.bf16 %v283_v38, %v251_v37  ;;  %v250_v46 = vld [vmem:[%s1990_s19 + $0x270] sm:$0xff]  ;;  %v313_v50 = vld [vmem:[%s1990_s19 + $0x468] sm:$0xf] }
  0x2a   : > { %1760 = vmatpush1.msk.msra.mxu1 %vm342_vm0, %v306_v6  ;;  %1758 = vmatmul.mubr.msk.f32.vlgmr.msra.gmra.mrb[2].mxu0 %vm338_vm1, %v2018_v34  ;;  %v280_v44 = vld [vmem:[%s1990_s19 + $0x360] sm:$0xff]  ;;  %v282_v47 = vld [vmem:[%s1990_s19 + $0x370] sm:$0xff]  ;;  %v315_v51 = vld [vmem:[%s1990_s19 + $0x478] sm:$0xf] }
  0x2b   : > { %1761 = vmatmul.mubr.msk.f32.vlgmr.msra.gmra.mrb[2].mxu1 %vm338_vm1, %v2018_v34  ;;  %1834 = vmatprep.subr.bf16.mxu0 %v1833_v7  ;;  %v1855_v48 = vpack.c.bf16 %v280_v44, %v248_v43  ;;  %v1863_v49 = vpack.c.bf16 %v282_v47, %v250_v46  ;;  %v189_v52 = vld [vmem:[%s1990_s19 + $0x88] sm:$0xff]  ;;  %v312_v53 = vld [vmem:[%s1990_s19 + $0x460] sm:$0xf]  ;;  %v191_v55 = vld [vmem:[%s1990_s19 + $0x98] sm:$0xff] }
  0x2c   : > { %1842 = vmatprep.subr.bf16.mxu1 %v1841_v10  ;;  %1836 = vmatpush1.bf16.msra.mxu0 %v1835_v11  ;;  %v221_v54 = vld [vmem:[%s1990_s19 + $0x188] sm:$0xff]  ;;  %v223_v56 = vld [vmem:[%s1990_s19 + $0x198] sm:$0xff]  ;;  %v188_v57 = vld [vmem:[%s1990_s19 + $0x80] sm:$0xff] }
  0x2d   : > { %1844 = vmatpush1.bf16.msra.mxu1 %v1843_v12  ;;  %1838 = vmatprep.subr.bf16.mxu0 %v1837_v13  ;;  %v220_v58 = vld [vmem:[%s1990_s19 + $0x180] sm:$0xff]  ;;  %v190_v59 = vld [vmem:[%s1990_s19 + $0x90] sm:$0xff]  ;;  %v253_v61 = vld [vmem:[%s1990_s19 + $0x288] sm:$0xff]  ;;  %v1865_v1 = vpack.c.bf16 %v221_v54, %v189_v52  ;;  %v1873_v4 = vpack.c.bf16 %v223_v56, %v191_v55 }
  0x2e   : > { %1846 = vmatprep.subr.bf16.mxu1 %v1845_v16  ;;  %787 = vmatprep.mubr.f32.mxu0 %v1949_v0  ;;  %v222_v60 = vld [vmem:[%s1990_s19 + $0x190] sm:$0xff]  ;;  %v285_v62 = vld [vmem:[%s1990_s19 + $0x388] sm:$0xff]  ;;  %v255_v2 = vld [vmem:[%s1990_s19 + $0x298] sm:$0xff]  ;;  %v1867_v5 = vpack.c.bf16 %v220_v58, %v188_v57 }
  0x2f   : > { %858 = vmatprep.mubr.f32.mxu1 %v1949_v0  ;;  %v314_v63 = vld [vmem:[%s1990_s19 + $0x470] sm:$0xf]  ;;  %v287_v3 = vld [vmem:[%s1990_s19 + $0x398] sm:$0xff]  ;;  %v1875_v6 = vpack.c.bf16 %v222_v60, %v190_v59  ;;  %v1869_v7 = vpack.c.bf16 %v285_v62, %v253_v61  ;;  %v252_v8 = vld [vmem:[%s1990_s19 + $0x280] sm:$0xff] }
  0x30   : > { %1840 = vmatpush1.bf16.msra.mxu0 %v1839_v19  ;;  %v284_v9 = vld [vmem:[%s1990_s19 + $0x380] sm:$0xff]  ;;  %v1877_v10 = vpack.c.bf16 %v287_v3, %v255_v2  ;;  %v254_v11 = vld [vmem:[%s1990_s19 + $0x290] sm:$0xff]  ;;  %v317_v15 = vld [vmem:[%s1990_s19 + $0x488] sm:$0xf] }
  0x31   : > { %1848 = vmatpush1.bf16.msra.mxu1 %v1847_v20  ;;  %1762 = vmatprep.subr.msk.mxu0 %vm342_vm0, %v309_v21  ;;  %v286_v12 = vld [vmem:[%s1990_s19 + $0x390] sm:$0xff]  ;;  %v1871_v13 = vpack.c.bf16 %v284_v9, %v252_v8  ;;  %v319_v16 = vld [vmem:[%s1990_s19 + $0x498] sm:$0xf]  ;;  %v193_v17 = vld [vmem:[%s1990_s19 + $0xa8] sm:$0xff] }
  0x32   : > { %1765 = vmatprep.subr.msk.mxu1 %vm342_vm0, %v311_v22  ;;  %v1879_v14 = vpack.c.bf16 %v286_v12, %v254_v11  ;;  %v316_v18 = vld [vmem:[%s1990_s19 + $0x480] sm:$0xf]  ;;  %v225_v19 = vld [vmem:[%s1990_s19 + $0x1a8] sm:$0xff]  ;;  %v195_v20 = vld [vmem:[%s1990_s19 + $0xb8] sm:$0xff] }
  0x33   : > { %v227_v21 = vld [vmem:[%s1990_s19 + $0x1b8] sm:$0xff]  ;;  %v192_v22 = vld [vmem:[%s1990_s19 + $0xa0] sm:$0xff]  ;;  %v226_v25 = vld [vmem:[%s1990_s19 + $0x1b0] sm:$0xff]  ;;  %v1881_v29 = vpack.c.bf16 %v225_v19, %v193_v17 }
  0x34   : > { %1763 = vmatpush1.msk.msra.mxu0 %vm342_vm0, %v308_v24  ;;  %v224_v23 = vld [vmem:[%s1990_s19 + $0x1a0] sm:$0xff]  ;;  %v194_v24 = vld [vmem:[%s1990_s19 + $0xb0] sm:$0xff]  ;;  %v257_v26 = vld [vmem:[%s1990_s19 + $0x2a8] sm:$0xff]  ;;  %v1889_v32 = vpack.c.bf16 %v227_v21, %v195_v20 }
  0x35   : > { %1766 = vmatpush1.msk.msra.mxu1 %vm342_vm0, %v310_v35  ;;  %1764 = vmatmul.mubr.msk.f32.vlgmr.msra.gmra.mrb[4].mxu0 %vm338_vm1, %v2018_v34  ;;  %v289_v27 = vld [vmem:[%s1990_s19 + $0x3a8] sm:$0xff]  ;;  %v318_v28 = vld [vmem:[%s1990_s19 + $0x490] sm:$0xf]  ;;  %v259_v30 = vld [vmem:[%s1990_s19 + $0x2b8] sm:$0xff]  ;;  %v1883_v33 = vpack.c.bf16 %v224_v23, %v192_v22  ;;  %v1891_v35 = vpack.c.bf16 %v226_v25, %v194_v24 }
  0x36   : > { %1767 = vmatmul.mubr.msk.f32.vlgmr.msra.gmra.mrb[4].mxu1 %vm338_vm1, %v2018_v34  ;;  %1850 = vmatprep.subr.bf16.mxu0 %v1849_v36  ;;  %v291_v31 = vld [vmem:[%s1990_s19 + $0x3b8] sm:$0xff]  ;;  %v1885_v36 = vpack.c.bf16 %v289_v27, %v257_v26  ;;  %v256_v37 = vld [vmem:[%s1990_s19 + $0x2a0] sm:$0xff]  ;;  %v321_v44 = vld [vmem:[%s1990_s19 + $0x4a8] sm:$0xf] }
  0x37   : > { %1858 = vmatprep.subr.bf16.mxu1 %v1857_v39  ;;  %1852 = vmatpush1.bf16.msra.mxu0 %v1851_v40  ;;  %v288_v38 = vld [vmem:[%s1990_s19 + $0x3a0] sm:$0xff]  ;;  %v1893_v39 = vpack.c.bf16 %v291_v31, %v259_v30  ;;  %v258_v40 = vld [vmem:[%s1990_s19 + $0x2b0] sm:$0xff]  ;;  %v197_v46 = vld [vmem:[%s1990_s19 + $0xc8] sm:$0xff] }
  0x38   : > { %1860 = vmatpush1.bf16.msra.mxu1 %v1859_v41  ;;  %1854 = vmatprep.subr.bf16.mxu0 %v1853_v42  ;;  %v290_v41 = vld [vmem:[%s1990_s19 + $0x3b0] sm:$0xff]  ;;  %v1887_v42 = vpack.c.bf16 %v288_v38, %v256_v37  ;;  %v320_v47 = vld [vmem:[%s1990_s19 + $0x4a0] sm:$0xf]  ;;  %v261_v55 = vld [vmem:[%s1990_s19 + $0x2c8] sm:$0xff] }
  0x39   : > { %1862 = vmatprep.subr.bf16.mxu1 %v1861_v45  ;;  %929 = vmatprep.mubr.f32.mxu0 %v1949_v0  ;;  %v1895_v43 = vpack.c.bf16 %v290_v41, %v258_v40  ;;  %v323_v45 = vld [vmem:[%s1990_s19 + $0x4b8] sm:$0xf]  ;;  %v228_v52 = vld [vmem:[%s1990_s19 + $0x1c0] sm:$0xff]  ;;  %v230_v54 = vld [vmem:[%s1990_s19 + $0x1d0] sm:$0xff] }
  0x3a   : > { %1000 = vmatprep.mubr.f32.mxu1 %v1949_v0  ;;  %v293_v56 = vld [vmem:[%s1990_s19 + $0x3c8] sm:$0xff]  ;;  %v322_v57 = vld [vmem:[%s1990_s19 + $0x4b0] sm:$0xf]  ;;  %v263_v59 = vld [vmem:[%s1990_s19 + $0x2d8] sm:$0xff] }
  0x3b   : > { %1856 = vmatpush1.bf16.msra.mxu0 %v1855_v48  ;;  %v229_v48 = vld [vmem:[%s1990_s19 + $0x1c8] sm:$0xff]  ;;  %v295_v60 = vld [vmem:[%s1990_s19 + $0x3d8] sm:$0xff]  ;;  %v260_v2 = vld [vmem:[%s1990_s19 + $0x2c0] sm:$0xff] }
  0x3c   : > { %1864 = vmatpush1.bf16.msra.mxu1 %v1863_v49  ;;  %1768 = vmatprep.subr.msk.mxu0 %vm342_vm0, %v313_v50  ;;  %v199_v49 = vld [vmem:[%s1990_s19 + $0xd8] sm:$0xff]  ;;  %v1897_v58 = vpack.c.bf16 %v229_v48, %v197_v46  ;;  %v292_v3 = vld [vmem:[%s1990_s19 + $0x3c0] sm:$0xff]  ;;  %v325_v9 = vld [vmem:[%s1990_s19 + $0x4c8] sm:$0xf] }
  0x3d   : > { %1771 = vmatprep.subr.msk.mxu1 %vm342_vm0, %v315_v51  ;;  %v231_v50 = vld [vmem:[%s1990_s19 + $0x1d8] sm:$0xff]  ;;  %v196_v51 = vld [vmem:[%s1990_s19 + $0xc0] sm:$0xff]  ;;  %v201_v11 = vld [vmem:[%s1990_s19 + $0xe8] sm:$0xff] }
  0x3e   : > { %v1905_v61 = vpack.c.bf16 %v231_v50, %v199_v49  ;;  %v1899_v62 = vpack.c.bf16 %v228_v52, %v196_v51  ;;  %v324_v12 = vld [vmem:[%s1990_s19 + $0x4c0] sm:$0xf]  ;;  %v234_v19 = vld [vmem:[%s1990_s19 + $0x1f0] sm:$0xff]  ;;  %v265_v20 = vld [vmem:[%s1990_s19 + $0x2e8] sm:$0xff] }
  0x3f   : > { %1769 = vmatpush1.msk.msra.mxu0 %vm342_vm0, %v312_v53  ;;  %v198_v53 = vld [vmem:[%s1990_s19 + $0xd0] sm:$0xff]  ;;  %v232_v17 = vld [vmem:[%s1990_s19 + $0x1e0] sm:$0xff]  ;;  %v297_v21 = vld [vmem:[%s1990_s19 + $0x3e8] sm:$0xff] }
  0x40   : > { %1772 = vmatpush1.msk.msra.mxu1 %vm342_vm0, %v314_v63  ;;  %1770 = vmatmul.mubr.msk.f32.vlgmr.msra.gmra.mrb[6].mxu0 %vm338_vm1, %v2018_v34  ;;  %v1907_v63 = vpack.c.bf16 %v230_v54, %v198_v53  ;;  %v326_v22 = vld [vmem:[%s1990_s19 + $0x4d0] sm:$0xf]  ;;  %v267_v24 = vld [vmem:[%s1990_s19 + $0x2f8] sm:$0xff]  ;;  %v264_v30 = vld [vmem:[%s1990_s19 + $0x2e0] sm:$0xff] }
  0x41   : > { %1773 = vmatmul.mubr.msk.f32.vlgmr.msra.gmra.mrb[6].mxu1 %vm338_vm1, %v2018_v34  ;;  %1866 = vmatprep.subr.bf16.mxu0 %v1865_v1  ;;  %v1901_v1 = vpack.c.bf16 %v293_v56, %v261_v55  ;;  %v299_v25 = vld [vmem:[%s1990_s19 + $0x3f8] sm:$0xff]  ;;  %v296_v31 = vld [vmem:[%s1990_s19 + $0x3e0] sm:$0xff]  ;;  %v329_v38 = vld [vmem:[%s1990_s19 + $0x4e8] sm:$0xf] }
  0x42   : > { %1874 = vmatprep.subr.bf16.mxu1 %v1873_v4  ;;  %1868 = vmatpush1.bf16.msra.mxu0 %v1867_v5  ;;  %v1909_v4 = vpack.c.bf16 %v295_v60, %v263_v59  ;;  %v262_v5 = vld [vmem:[%s1990_s19 + $0x2d0] sm:$0xff]  ;;  %v328_v40 = vld [vmem:[%s1990_s19 + $0x4e0] sm:$0xf] }
  0x43   : > { %1876 = vmatpush1.bf16.msra.mxu1 %v1875_v6  ;;  %1870 = vmatprep.subr.bf16.mxu0 %v1869_v7  ;;  %v294_v6 = vld [vmem:[%s1990_s19 + $0x3d0] sm:$0xff]  ;;  %v1903_v7 = vpack.c.bf16 %v292_v3, %v260_v2 }
  0x44   : > { %1878 = vmatprep.subr.bf16.mxu1 %v1877_v10  ;;  %1071 = vmatprep.mubr.f32.mxu0 %v1949_v0  ;;  %v1911_v8 = vpack.c.bf16 %v294_v6, %v262_v5  ;;  %v327_v10 = vld [vmem:[%s1990_s19 + $0x4d8] sm:$0xf]  ;;  %v330_v41 = vld [vmem:[%s1990_s19 + $0x4f0] sm:$0xf] }
  0x45   : > { %1142 = vmatprep.mubr.f32.mxu1 %v1949_v0 }
  0x46   : > { %1872 = vmatpush1.bf16.msra.mxu0 %v1871_v13  ;;  %v233_v13 = vld [vmem:[%s1990_s19 + $0x1e8] sm:$0xff] }
  0x47   : > { %1880 = vmatpush1.bf16.msra.mxu1 %v1879_v14  ;;  %1774 = vmatprep.subr.msk.mxu0 %vm342_vm0, %v317_v15  ;;  %v203_v14 = vld [vmem:[%s1990_s19 + $0xf8] sm:$0xff]  ;;  %v1913_v23 = vpack.c.bf16 %v233_v13, %v201_v11 }
  0x48   : > { %1777 = vmatprep.subr.msk.mxu1 %vm342_vm0, %v319_v16  ;;  %v235_v15 = vld [vmem:[%s1990_s19 + $0x1f8] sm:$0xff]  ;;  %v200_v16 = vld [vmem:[%s1990_s19 + $0xe0] sm:$0xff] }
  0x49   : > { %v1921_v26 = vpack.c.bf16 %v235_v15, %v203_v14  ;;  %v1915_v27 = vpack.c.bf16 %v232_v17, %v200_v16 }
  0x4a   : > { %1775 = vmatpush1.msk.msra.mxu0 %vm342_vm0, %v316_v18  ;;  %v202_v18 = vld [vmem:[%s1990_s19 + $0xf0] sm:$0xff] }
  0x4b   : > { %1778 = vmatpush1.msk.msra.mxu1 %vm342_vm0, %v318_v28  ;;  %1776 = vmatmul.mubr.msk.f32.vlgmr.msra.gmra.mrb[8].mxu0 %vm338_vm1, %v2018_v34  ;;  %v1923_v28 = vpack.c.bf16 %v234_v19, %v202_v18 }
  0x4c   : > { %1779 = vmatmul.mubr.msk.f32.vlgmr.msra.gmra.mrb[8].mxu1 %vm338_vm1, %v2018_v34  ;;  %1882 = vmatprep.subr.bf16.mxu0 %v1881_v29  ;;  %v1917_v29 = vpack.c.bf16 %v297_v21, %v265_v20 }
  0x4d   : > { %1890 = vmatprep.subr.bf16.mxu1 %v1889_v32  ;;  %1884 = vmatpush1.bf16.msra.mxu0 %v1883_v33  ;;  %v1925_v32 = vpack.c.bf16 %v299_v25, %v267_v24  ;;  %v266_v33 = vld [vmem:[%s1990_s19 + $0x2f0] sm:$0xff] }
  0x4e   : > { %1892 = vmatpush1.bf16.msra.mxu1 %v1891_v35  ;;  %1886 = vmatprep.subr.bf16.mxu0 %v1885_v36  ;;  %v298_v35 = vld [vmem:[%s1990_s19 + $0x3f0] sm:$0xff]  ;;  %v1919_v36 = vpack.c.bf16 %v296_v31, %v264_v30 }
  0x4f   : > { %1894 = vmatprep.subr.bf16.mxu1 %v1893_v39  ;;  %1213 = vmatprep.mubr.f32.mxu0 %v1949_v0  ;;  %v1927_v37 = vpack.c.bf16 %v298_v35, %v266_v33  ;;  %v331_v39 = vld [vmem:[%s1990_s19 + $0x4f8] sm:$0xf] }
  0x50   : > { %1284 = vmatprep.mubr.f32.mxu1 %v1949_v0 }
  0x51   : > { %1888 = vmatpush1.bf16.msra.mxu0 %v1887_v42 }
  0x52   : > { %1896 = vmatpush1.bf16.msra.mxu1 %v1895_v43  ;;  %1780 = vmatprep.subr.msk.mxu0 %vm342_vm0, %v321_v44 }
  0x53   : > { %1783 = vmatprep.subr.msk.mxu1 %vm342_vm0, %v323_v45 }
  0x55   : > { %1781 = vmatpush1.msk.msra.mxu0 %vm342_vm0, %v320_v47 }
  0x56   : > { %1784 = vmatpush1.msk.msra.mxu1 %vm342_vm0, %v322_v57  ;;  %1782 = vmatmul.mubr.msk.f32.vlgmr.msra.gmra.mrb[10].mxu0 %vm338_vm1, %v2018_v34 }
  0x57   : > { %1785 = vmatmul.mubr.msk.f32.vlgmr.msra.gmra.mrb[10].mxu1 %vm338_vm1, %v2018_v34  ;;  %1898 = vmatprep.subr.bf16.mxu0 %v1897_v58 }
  0x58   : > { %1906 = vmatprep.subr.bf16.mxu1 %v1905_v61  ;;  %1900 = vmatpush1.bf16.msra.mxu0 %v1899_v62 }
  0x59   : > { %1908 = vmatpush1.bf16.msra.mxu1 %v1907_v63  ;;  %1902 = vmatprep.subr.bf16.mxu0 %v1901_v1 }
  0x5a   : > { %1910 = vmatprep.subr.bf16.mxu1 %v1909_v4  ;;  %1355 = vmatprep.mubr.f32.mxu0 %v1949_v0 }
  0x5b   : > { %1426 = vmatprep.mubr.f32.mxu1 %v1949_v0 }
  0x5c   : > { %1904 = vmatpush1.bf16.msra.mxu0 %v1903_v7 }
  0x5d   : > { %1912 = vmatpush1.bf16.msra.mxu1 %v1911_v8  ;;  %1786 = vmatprep.subr.msk.mxu0 %vm342_vm0, %v325_v9 }
  0x5e   : > { %1789 = vmatprep.subr.msk.mxu1 %vm342_vm0, %v327_v10 }
  0x60   : > { %1787 = vmatpush1.msk.msra.mxu0 %vm342_vm0, %v324_v12 }
  0x61   : > { %1790 = vmatpush1.msk.msra.mxu1 %vm342_vm0, %v326_v22  ;;  %1788 = vmatmul.mubr.msk.f32.vlgmr.msra.gmra.mrb[12].mxu0 %vm338_vm1, %v2018_v34 }
  0x62   : > { %1791 = vmatmul.mubr.msk.f32.vlgmr.msra.gmra.mrb[12].mxu1 %vm338_vm1, %v2018_v34  ;;  %1914 = vmatprep.subr.bf16.mxu0 %v1913_v23 }
  0x63   : > { %1922 = vmatprep.subr.bf16.mxu1 %v1921_v26  ;;  %1916 = vmatpush1.bf16.msra.mxu0 %v1915_v27 }
  0x64   : > { %1924 = vmatpush1.bf16.msra.mxu1 %v1923_v28  ;;  %1918 = vmatprep.subr.bf16.mxu0 %v1917_v29 }
  0x65   : > { %1926 = vmatprep.subr.bf16.mxu1 %v1925_v32  ;;  %1497 = vmatprep.mubr.f32.mxu0 %v1949_v0 }
  0x66   : > { %1568 = vmatprep.mubr.f32.mxu1 %v1949_v0 }
  0x67   : > { %1920 = vmatpush1.bf16.msra.mxu0 %v1919_v36 }
  0x68   : > { %1928 = vmatpush1.bf16.msra.mxu1 %v1927_v37  ;;  %1792 = vmatprep.subr.msk.mxu0 %vm342_vm0, %v329_v38 }
  0x69   : > { %1795 = vmatprep.subr.msk.mxu1 %vm342_vm0, %v331_v39 }
  0x6b   : > { %1793 = vmatpush1.msk.msra.mxu0 %vm342_vm0, %v328_v40 }
  0x6c   : > { %1796 = vmatpush1.msk.msra.mxu1 %vm342_vm0, %v330_v41  ;;  %1794 = vmatmul.mubr.msk.f32.vlgmr.msra.gmra.mrb[14].mxu0 %vm338_vm1, %v2018_v34 }
  0x6d   : > { %1797 = vmatmul.mubr.msk.f32.vlgmr.msra.gmra.mrb[14].mxu1 %vm338_vm1, %v2018_v34 }
  0x87   : > { %v2235_v0 = vpop.permute.xlu0 %335 }
  0xf2   : > { %v505_v42 = vpop.f32.mrb[0].mxu0 }
  0xf3   : > { %v576_v43 = vpop.f32.mrb[0].mxu1  ;;  %v506_v44 = vadd.f32 %v505_v42, %v2235_v0  ;;  %v507_v45 = vpop.f32.mrb[1].mxu0 }
  0xf4   : > { %v508_v46 = vadd.f32 %v507_v45, %v2235_v0  ;;  %v577_v47 = vadd.f32 %v576_v43, %v2235_v0  ;;  %v578_v48 = vpop.f32.mrb[1].mxu1 }
  0xf5   : > { %v1575_v49 = vmax.f32 %v506_v44, 0.0  ;;  %v579_v50 = vadd.f32 %v578_v48, %v2235_v0 }
  0xf6   : > { %v1576_v51 = vmax.f32 %v508_v46, 0.0  ;;  %v1577_v52 = vmax.f32 %v577_v47, 0.0 }
  0xf7   : > { %v1578_v34 = vmax.f32 %v579_v50, 0.0 }
  0xf8   : > { %v1639_v53 = vcombine.low %v1575_v49, %v1576_v51 }
  0xf9   : > { %v1640_v54 = vcombine.low %v1577_v52, %v1578_v34 }
  0xfa   : > { %1671 = vst [vmem:[%s2245_s25] sm:$0xff] %v1639_v53 }
  0xfb   : > { %1672 = vst [vmem:[%s2245_s25 + $0x8] sm:$0xff] %v1640_v54 }
  0xfd   : > { %v647_v55 = vpop.f32.mrb[2].mxu0 }
  0xfe   : > { %v648_v56 = vadd.f32 %v647_v55, %v2235_v0  ;;  %v718_v57 = vpop.f32.mrb[2].mxu1  ;;  %v649_v58 = vpop.f32.mrb[3].mxu0 }
  0xff   : > { %v719_v59 = vadd.f32 %v718_v57, %v2235_v0  ;;  %v650_v60 = vadd.f32 %v649_v58, %v2235_v0  ;;  %v720_v61 = vpop.f32.mrb[3].mxu1 }
 0x100   : > { %v1579_v62 = vmax.f32 %v648_v56, 0.0  ;;  %v721_v63 = vadd.f32 %v720_v61, %v2235_v0 }
 0x101   : > { %v1581_v1 = vmax.f32 %v719_v59, 0.0  ;;  %v1580_v2 = vmax.f32 %v650_v60, 0.0 }
 0x102   : > { %v1582_v3 = vmax.f32 %v721_v63, 0.0 }
 0x103   : > { %v1641_v4 = vcombine.low %v1579_v62, %v1580_v2 }
 0x104   : > { %v1642_v5 = vcombine.low %v1581_v1, %v1582_v3 }
 0x105   : > { %1673 = vst [vmem:[%s2245_s25 + $0x10] sm:$0xff] %v1641_v4 }
 0x106   : > { %1674 = vst [vmem:[%s2245_s25 + $0x18] sm:$0xff] %v1642_v5 }
 0x108   : > { %v789_v6 = vpop.f32.mrb[4].mxu0 }
 0x109   : > { %v790_v7 = vadd.f32 %v789_v6, %v2235_v0  ;;  %v860_v8 = vpop.f32.mrb[4].mxu1  ;;  %v791_v9 = vpop.f32.mrb[5].mxu0 }
 0x10a   : > { %v861_v10 = vadd.f32 %v860_v8, %v2235_v0  ;;  %v792_v11 = vadd.f32 %v791_v9, %v2235_v0  ;;  %v862_v12 = vpop.f32.mrb[5].mxu1 }
 0x10b   : > { %v1583_v13 = vmax.f32 %v790_v7, 0.0  ;;  %v863_v14 = vadd.f32 %v862_v12, %v2235_v0 }
 0x10c   : > { %v1585_v15 = vmax.f32 %v861_v10, 0.0  ;;  %v1584_v16 = vmax.f32 %v792_v11, 0.0 }
 0x10d   : > { %v1586_v17 = vmax.f32 %v863_v14, 0.0 }
 0x10e   : > { %v1643_v18 = vcombine.low %v1583_v13, %v1584_v16 }
 0x10f   : > { %v1644_v19 = vcombine.low %v1585_v15, %v1586_v17 }
 0x110   : > { %1675 = vst [vmem:[%s2245_s25 + $0x20] sm:$0xff] %v1643_v18 }
 0x111   : > { %1676 = vst [vmem:[%s2245_s25 + $0x28] sm:$0xff] %v1644_v19 }
 0x113   : > { %v931_v20 = vpop.f32.mrb[6].mxu0 }
 0x114   : > { %v932_v21 = vadd.f32 %v931_v20, %v2235_v0  ;;  %v1002_v22 = vpop.f32.mrb[6].mxu1  ;;  %v933_v23 = vpop.f32.mrb[7].mxu0 }
 0x115   : > { %v1003_v24 = vadd.f32 %v1002_v22, %v2235_v0  ;;  %v934_v25 = vadd.f32 %v933_v23, %v2235_v0  ;;  %v1004_v26 = vpop.f32.mrb[7].mxu1 }
 0x116   : > { %v1587_v27 = vmax.f32 %v932_v21, 0.0  ;;  %v1005_v28 = vadd.f32 %v1004_v26, %v2235_v0 }
 0x117   : > { %v1589_v29 = vmax.f32 %v1003_v24, 0.0  ;;  %v1588_v30 = vmax.f32 %v934_v25, 0.0 }
 0x118   : > { %v1590_v31 = vmax.f32 %v1005_v28, 0.0 }
 0x119   : > { %v1645_v32 = vcombine.low %v1587_v27, %v1588_v30 }
 0x11a   : > { %v1646_v33 = vcombine.low %v1589_v29, %v1590_v31 }
 0x11b   : > { %1677 = vst [vmem:[%s2245_s25 + $0x30] sm:$0xff] %v1645_v32 }
 0x11c   : > { %1678 = vst [vmem:[%s2245_s25 + $0x38] sm:$0xff] %v1646_v33 }
 0x11e   : > { %v1073_v35 = vpop.f32.mrb[8].mxu0 }
 0x11f   : > { %v1074_v36 = vadd.f32 %v1073_v35, %v2235_v0  ;;  %v1144_v37 = vpop.f32.mrb[8].mxu1  ;;  %v1075_v38 = vpop.f32.mrb[9].mxu0 }
 0x120   : > { %v1145_v39 = vadd.f32 %v1144_v37, %v2235_v0  ;;  %v1076_v40 = vadd.f32 %v1075_v38, %v2235_v0  ;;  %v1146_v41 = vpop.f32.mrb[9].mxu1 }
 0x121   : > { %v1591_v42 = vmax.f32 %v1074_v36, 0.0  ;;  %v1147_v43 = vadd.f32 %v1146_v41, %v2235_v0 }
 0x122   : > { %v1593_v44 = vmax.f32 %v1145_v39, 0.0  ;;  %v1592_v45 = vmax.f32 %v1076_v40, 0.0 }
 0x123   : > { %v1594_v46 = vmax.f32 %v1147_v43, 0.0 }
 0x124   : > { %v1647_v47 = vcombine.low %v1591_v42, %v1592_v45 }
 0x125   : > { %v1648_v48 = vcombine.low %v1593_v44, %v1594_v46 }
 0x126   : > { %1679 = vst [vmem:[%s2245_s25 + $0x40] sm:$0xff] %v1647_v47 }
 0x127   : > { %1680 = vst [vmem:[%s2245_s25 + $0x48] sm:$0xff] %v1648_v48 }
 0x129   : > { %v1215_v49 = vpop.f32.mrb[10].mxu0 }
 0x12a   : > { %v1216_v50 = vadd.f32 %v1215_v49, %v2235_v0  ;;  %v1286_v51 = vpop.f32.mrb[10].mxu1  ;;  %v1217_v52 = vpop.f32.mrb[11].mxu0 }
 0x12b   : > { %v1287_v34 = vadd.f32 %v1286_v51, %v2235_v0  ;;  %v1218_v53 = vadd.f32 %v1217_v52, %v2235_v0  ;;  %v1288_v54 = vpop.f32.mrb[11].mxu1 }
 0x12c   : > { %v1595_v55 = vmax.f32 %v1216_v50, 0.0  ;;  %v1289_v56 = vadd.f32 %v1288_v54, %v2235_v0 }
 0x12d   : > { %v1597_v57 = vmax.f32 %v1287_v34, 0.0  ;;  %v1596_v58 = vmax.f32 %v1218_v53, 0.0 }
 0x12e   : > { %v1598_v59 = vmax.f32 %v1289_v56, 0.0 }
 0x12f   : > { %v1649_v60 = vcombine.low %v1595_v55, %v1596_v58 }
 0x130   : > { %v1650_v61 = vcombine.low %v1597_v57, %v1598_v59 }
 0x131   : > { %1681 = vst [vmem:[%s2245_s25 + $0x50] sm:$0xff] %v1649_v60 }
 0x132   : > { %1682 = vst [vmem:[%s2245_s25 + $0x58] sm:$0xff] %v1650_v61 }
 0x134   : > { %v1357_v62 = vpop.f32.mrb[12].mxu0 }
 0x135   : > { %v1358_v63 = vadd.f32 %v1357_v62, %v2235_v0  ;;  %v1428_v1 = vpop.f32.mrb[12].mxu1  ;;  %v1359_v2 = vpop.f32.mrb[13].mxu0 }
 0x136   : > { %v1429_v3 = vadd.f32 %v1428_v1, %v2235_v0  ;;  %v1360_v4 = vadd.f32 %v1359_v2, %v2235_v0  ;;  %v1430_v5 = vpop.f32.mrb[13].mxu1 }
 0x137   : > { %v1599_v6 = vmax.f32 %v1358_v63, 0.0  ;;  %v1431_v7 = vadd.f32 %v1430_v5, %v2235_v0 }
 0x138   : > { %v1601_v8 = vmax.f32 %v1429_v3, 0.0  ;;  %v1600_v9 = vmax.f32 %v1360_v4, 0.0 }
 0x139   : > { %v1602_v10 = vmax.f32 %v1431_v7, 0.0 }
 0x13a   : > { %v1651_v11 = vcombine.low %v1599_v6, %v1600_v9 }
 0x13b   : > { %v1652_v12 = vcombine.low %v1601_v8, %v1602_v10 }
 0x13c   : > { %1683 = vst [vmem:[%s2245_s25 + $0x60] sm:$0xff] %v1651_v11 }
 0x13d   : > { %1684 = vst [vmem:[%s2245_s25 + $0x68] sm:$0xff] %v1652_v12 }
 0x13f   : > { %v1499_v13 = vpop.f32.mrb[14].mxu0 }
 0x140   : > { %v1500_v14 = vadd.f32 %v1499_v13, %v2235_v0  ;;  %v1570_v15 = vpop.f32.mrb[14].mxu1  ;;  %v1501_v16 = vpop.f32.mrb[15].mxu0 }
 0x141   : > { %v1571_v17 = vadd.f32 %v1570_v15, %v2235_v0  ;;  %v1502_v18 = vadd.f32 %v1501_v16, %v2235_v0  ;;  %v1572_v19 = vpop.f32.mrb[15].mxu1 }
 0x142   : > { %v1603_v20 = vmax.f32 %v1500_v14, 0.0  ;;  %v1573_v21 = vadd.f32 %v1572_v19, %v2235_v0 }
 0x143   : > { %v1605_v22 = vmax.f32 %v1571_v17, 0.0  ;;  %v1604_v23 = vmax.f32 %v1502_v18, 0.0 }
 0x144   : > { %v1606_v24 = vmax.f32 %v1573_v21, 0.0 }
 0x145   : > { %v1653_v25 = vcombine.low %v1603_v20, %v1604_v23 }
 0x146   : > { %v1654_v26 = vcombine.low %v1605_v22, %v1606_v24 }
 0x147   : > { %1685 = vst [vmem:[%s2245_s25 + $0x70] sm:$0xff] %v1653_v25 }
 0x148   : > { %1686 = vst [vmem:[%s2245_s25 + $0x78] sm:$0xff] %v1654_v26 }
 0x149 PF: > { %s13_s12 = sadd.s32 1, %s1947_s12  }
 0x14a   : > { %p10_p4 = scmp.ge.s32.totalorder %s13_s12, 4  }
 0x14c   :  { %12 = sbr.rel (!%p10_p4) target bundleno = 1 (0x1), region = 62 }

// kernel: _lambda_.17
= control target key start
LH: loop header
LB: loop body
LE: loop exit
PB: predicated region body
PF: predicated region fallthrough
CT: control target
= control target key end

     0   :  { %s2150_s15 = smov 0   ;;  %s2494_s0 = inlined_call_operand.vmem [shape: f32[2,36,4096], index: 0, kind: input, shape index: {}]   ;;  %s2495_s1 = inlined_call_operand.vmem [shape: f32[4,36], index: 1, kind: input, shape index: {}]   ;;  %s2496_s2 = inlined_call_operand.vmem [shape: f32[4,1], index: 2, kind: input, shape index: {}]   ;;  %s2497_s3 = inlined_call_operand.vmem [shape: f32[2,4,4096], index: 3, kind: input, shape index: {}]   ;;  %s2498_s4 = inlined_call_operand.vmem [shape: f32[2,4,4096], index: 4, kind: output, shape index: {}]  }
   0x1 LB: > { %s1897_s16 = sadd.s32 4294967295, %s2121_s15   ;;  %p1901_p0 = scmp.ge.s32.totalorder %s2121_s15, 1  ;;  %s2121_s15 = sphi %s2150_s15, %s14_s15  }
   0x2   : > { %p172_p1 = scmp.lt.s32.totalorder %s2121_s15, 3 }
   0x4   : > { %p173_p2 = pnand %p1901_p0, %p172_p1 }
   0x5   : > { %p203_p3 = scmp.lt.s32.totalorder (!%p173_p2), %s1897_s16, 1  ;;  %v2123_v0 = vmov (!%p173_p2), 0.0   ;;  %v379_v1 = vld [vmem:[%s2496_s2] sm:$0xf] (!%p173_p2)  ;;  %v2124_v2 = vmov (!%p173_p2), 0   ;;  %vm389_vm0 = vcmask (!%p173_p2), 1043456  }
   0x6   : > { %176 = sbr.rel (%p173_p2) target bundleno = 331 (0x14b), region = 36  ;;  %550 = vmatprep.mubr.f32.mxu0 (!%p173_p2), %v2123_v0  ;;  %621 = vmatprep.mubr.f32.mxu1 (!%p173_p2), %v2123_v0  ;;  %v2197_v34 = vld [vmem:[%s2495_s1] sm:$0xf] (!%p173_p2)  ;;  %vm385_vm1 = vcmask (!%p173_p2), 293888  }
   0x7   : > { %2098 = vset.pattern.permute.xlu0 (!%p173_p2), %v2124_v2 }
   0x8   : > { %382 = vperm.xlu0 (!%p173_p2), %2098, %v379_v1  }
   0xd   : > { %s2500_s16 = smov (!%p203_p3, %s1897_s16), 1 }
   0xe   : > { %s2087_s19 = smul.u32 1280, %s2500_s16  ;;  %s1957_s25 = sshll.u32 %s2500_s16, 7 }
   0xf   : > { %s2418_s28 = scalar_lea.vmem %s2497_s3, %s1957_s25  ;;  %s2431_s5 = scalar_lea.vmem %s2498_s4, %s1957_s25 }
  0x10   : > { %s2169_s22 = scalar_lea.vmem %s2494_s0, %s2087_s19 }
  0x11   : > { %v220_v3 = vld [vmem:[%s2169_s22 + $0x8] sm:$0xff]  ;;  %v222_v5 = vld [vmem:[%s2169_s22 + $0x18] sm:$0xff]  ;;  %v219_v8 = vld [vmem:[%s2169_s22] sm:$0xff] }
  0x12   : > { %v252_v4 = vld [vmem:[%s2169_s22 + $0x108] sm:$0xff]  ;;  %v254_v7 = vld [vmem:[%s2169_s22 + $0x118] sm:$0xff]  ;;  %v251_v9 = vld [vmem:[%s2169_s22 + $0x100] sm:$0xff] }
  0x13   : > { %v1959_v6 = vpack.c.bf16 %v252_v4, %v220_v3  ;;  %v1967_v10 = vpack.c.bf16 %v254_v7, %v222_v5  ;;  %v1961_v11 = vpack.c.bf16 %v251_v9, %v219_v8  ;;  %v221_v12 = vld [vmem:[%s2169_s22 + $0x10] sm:$0xff]  ;;  %v284_v14 = vld [vmem:[%s2169_s22 + $0x208] sm:$0xff]  ;;  %v286_v17 = vld [vmem:[%s2169_s22 + $0x218] sm:$0xff] }
  0x14   : > { %v253_v13 = vld [vmem:[%s2169_s22 + $0x110] sm:$0xff]  ;;  %v316_v16 = vld [vmem:[%s2169_s22 + $0x308] sm:$0xff]  ;;  %v318_v18 = vld [vmem:[%s2169_s22 + $0x318] sm:$0xff] }
  0x15   : > { %1960 = vmatprep.subr.bf16.mxu0 %v1959_v6  ;;  %v1969_v15 = vpack.c.bf16 %v253_v13, %v221_v12  ;;  %1968 = vmatprep.subr.bf16.mxu1 %v1967_v10  ;;  %v1963_v19 = vpack.c.bf16 %v316_v16, %v284_v14  ;;  %v1971_v20 = vpack.c.bf16 %v318_v18, %v286_v17  ;;  %v283_v21 = vld [vmem:[%s2169_s22 + $0x200] sm:$0xff]  ;;  %v285_v23 = vld [vmem:[%s2169_s22 + $0x210] sm:$0xff]  ;;  %v348_v27 = vld [vmem:[%s2169_s22 + $0x408] sm:$0xf] }
  0x16   : > { %1962 = vmatpush1.bf16.msra.mxu0 %v1961_v11  ;;  %v315_v22 = vld [vmem:[%s2169_s22 + $0x300] sm:$0xff]  ;;  %v317_v25 = vld [vmem:[%s2169_s22 + $0x310] sm:$0xff]  ;;  %v350_v28 = vld [vmem:[%s2169_s22 + $0x418] sm:$0xf] }
  0x17   : > { %1970 = vmatpush1.bf16.msra.mxu1 %v1969_v15  ;;  %v1965_v24 = vpack.c.bf16 %v315_v22, %v283_v21  ;;  %1964 = vmatprep.subr.bf16.mxu0 %v1963_v19  ;;  %v1973_v26 = vpack.c.bf16 %v317_v25, %v285_v23  ;;  %v224_v29 = vld [vmem:[%s2169_s22 + $0x28] sm:$0xff]  ;;  %v347_v30 = vld [vmem:[%s2169_s22 + $0x400] sm:$0xf]  ;;  %v226_v32 = vld [vmem:[%s2169_s22 + $0x38] sm:$0xff] }
  0x18   : > { %1972 = vmatprep.subr.bf16.mxu1 %v1971_v20  ;;  %v256_v31 = vld [vmem:[%s2169_s22 + $0x128] sm:$0xff]  ;;  %v258_v33 = vld [vmem:[%s2169_s22 + $0x138] sm:$0xff]  ;;  %v223_v35 = vld [vmem:[%s2169_s22 + $0x20] sm:$0xff] }
  0x19   : > { %v255_v36 = vld [vmem:[%s2169_s22 + $0x120] sm:$0xff]  ;;  %v225_v37 = vld [vmem:[%s2169_s22 + $0x30] sm:$0xff]  ;;  %v288_v39 = vld [vmem:[%s2169_s22 + $0x228] sm:$0xff]  ;;  %v1975_v42 = vpack.c.bf16 %v256_v31, %v224_v29  ;;  %v1983_v45 = vpack.c.bf16 %v258_v33, %v226_v32 }
  0x1a   : > { %1966 = vmatpush1.bf16.msra.mxu0 %v1965_v24  ;;  %v257_v38 = vld [vmem:[%s2169_s22 + $0x130] sm:$0xff]  ;;  %v320_v40 = vld [vmem:[%s2169_s22 + $0x328] sm:$0xff]  ;;  %v290_v43 = vld [vmem:[%s2169_s22 + $0x238] sm:$0xff]  ;;  %v1977_v46 = vpack.c.bf16 %v255_v36, %v223_v35 }
  0x1b   : > { %1974 = vmatpush1.bf16.msra.mxu1 %v1973_v26  ;;  %1907 = vmatprep.subr.msk.mxu0 %vm389_vm0, %v348_v27  ;;  %v349_v41 = vld [vmem:[%s2169_s22 + $0x410] sm:$0xf]  ;;  %v322_v44 = vld [vmem:[%s2169_s22 + $0x338] sm:$0xff]  ;;  %v1985_v47 = vpack.c.bf16 %v257_v38, %v225_v37  ;;  %v1979_v48 = vpack.c.bf16 %v320_v40, %v288_v39  ;;  %v287_v49 = vld [vmem:[%s2169_s22 + $0x220] sm:$0xff] }
  0x1c   : > { %1910 = vmatprep.subr.msk.mxu1 %vm389_vm0, %v350_v28  ;;  %v319_v50 = vld [vmem:[%s2169_s22 + $0x320] sm:$0xff]  ;;  %v1987_v51 = vpack.c.bf16 %v322_v44, %v290_v43  ;;  %v289_v52 = vld [vmem:[%s2169_s22 + $0x230] sm:$0xff]  ;;  %v352_v56 = vld [vmem:[%s2169_s22 + $0x428] sm:$0xf] }
  0x1d   : > { %v321_v53 = vld [vmem:[%s2169_s22 + $0x330] sm:$0xff]  ;;  %v1981_v54 = vpack.c.bf16 %v319_v50, %v287_v49  ;;  %v354_v57 = vld [vmem:[%s2169_s22 + $0x438] sm:$0xf]  ;;  %v228_v58 = vld [vmem:[%s2169_s22 + $0x48] sm:$0xff] }
  0x1e   : > { %1908 = vmatpush1.msk.msra.mxu0 %vm389_vm0, %v347_v30  ;;  %v1989_v55 = vpack.c.bf16 %v321_v53, %v289_v52  ;;  %v351_v59 = vld [vmem:[%s2169_s22 + $0x420] sm:$0xf]  ;;  %v260_v60 = vld [vmem:[%s2169_s22 + $0x148] sm:$0xff]  ;;  %v230_v61 = vld [vmem:[%s2169_s22 + $0x58] sm:$0xff] }
  0x1f   : > { %1911 = vmatpush1.msk.msra.mxu1 %vm389_vm0, %v349_v41  ;;  %1909 = vmatmul.mubr.msk.f32.vlgmr.msra.gmra.mrb[0].mxu0 %vm385_vm1, %v2197_v34  ;;  %v262_v62 = vld [vmem:[%s2169_s22 + $0x158] sm:$0xff]  ;;  %v227_v63 = vld [vmem:[%s2169_s22 + $0x40] sm:$0xff]  ;;  %v229_v2 = vld [vmem:[%s2169_s22 + $0x50] sm:$0xff]  ;;  %v1991_v7 = vpack.c.bf16 %v260_v60, %v228_v58 }
  0x20   : > { %1912 = vmatmul.mubr.msk.f32.vlgmr.msra.gmra.mrb[0].mxu1 %vm385_vm1, %v2197_v34  ;;  %1976 = vmatprep.subr.bf16.mxu0 %v1975_v42  ;;  %v259_v1 = vld [vmem:[%s2169_s22 + $0x140] sm:$0xff]  ;;  %v261_v3 = vld [vmem:[%s2169_s22 + $0x150] sm:$0xff]  ;;  %v292_v4 = vld [vmem:[%s2169_s22 + $0x248] sm:$0xff]  ;;  %v1999_v10 = vpack.c.bf16 %v262_v62, %v230_v61 }
  0x21   : > { %1984 = vmatprep.subr.bf16.mxu1 %v1983_v45  ;;  %1978 = vmatpush1.bf16.msra.mxu0 %v1977_v46  ;;  %v324_v5 = vld [vmem:[%s2169_s22 + $0x348] sm:$0xff]  ;;  %v353_v6 = vld [vmem:[%s2169_s22 + $0x430] sm:$0xf]  ;;  %v294_v8 = vld [vmem:[%s2169_s22 + $0x258] sm:$0xff]  ;;  %v1993_v11 = vpack.c.bf16 %v259_v1, %v227_v63  ;;  %v2001_v12 = vpack.c.bf16 %v261_v3, %v229_v2 }
  0x22   : > { %1986 = vmatpush1.bf16.msra.mxu1 %v1985_v47  ;;  %1980 = vmatprep.subr.bf16.mxu0 %v1979_v48  ;;  %v326_v9 = vld [vmem:[%s2169_s22 + $0x358] sm:$0xff]  ;;  %v1995_v13 = vpack.c.bf16 %v324_v5, %v292_v4  ;;  %v291_v14 = vld [vmem:[%s2169_s22 + $0x240] sm:$0xff]  ;;  %v293_v17 = vld [vmem:[%s2169_s22 + $0x250] sm:$0xff] }
  0x23   : > { %1988 = vmatprep.subr.bf16.mxu1 %v1987_v51  ;;  %692 = vmatprep.mubr.f32.mxu0 %v2123_v0  ;;  %v323_v15 = vld [vmem:[%s2169_s22 + $0x340] sm:$0xff]  ;;  %v2003_v16 = vpack.c.bf16 %v326_v9, %v294_v8  ;;  %v325_v18 = vld [vmem:[%s2169_s22 + $0x350] sm:$0xff]  ;;  %v356_v21 = vld [vmem:[%s2169_s22 + $0x448] sm:$0xf] }
  0x24   : > { %763 = vmatprep.mubr.f32.mxu1 %v2123_v0  ;;  %v1997_v19 = vpack.c.bf16 %v323_v15, %v291_v14  ;;  %v2005_v20 = vpack.c.bf16 %v325_v18, %v293_v17  ;;  %v358_v22 = vld [vmem:[%s2169_s22 + $0x458] sm:$0xf]  ;;  %v232_v23 = vld [vmem:[%s2169_s22 + $0x68] sm:$0xff]  ;;  %v355_v24 = vld [vmem:[%s2169_s22 + $0x440] sm:$0xf] }
  0x25   : > { %1982 = vmatpush1.bf16.msra.mxu0 %v1981_v54  ;;  %v264_v25 = vld [vmem:[%s2169_s22 + $0x168] sm:$0xff]  ;;  %v234_v26 = vld [vmem:[%s2169_s22 + $0x78] sm:$0xff]  ;;  %v231_v28 = vld [vmem:[%s2169_s22 + $0x60] sm:$0xff] }
  0x26   : > { %1990 = vmatpush1.bf16.msra.mxu1 %v1989_v55  ;;  %1913 = vmatprep.subr.msk.mxu0 %vm389_vm0, %v352_v56  ;;  %v266_v27 = vld [vmem:[%s2169_s22 + $0x178] sm:$0xff]  ;;  %v263_v29 = vld [vmem:[%s2169_s22 + $0x160] sm:$0xff]  ;;  %v233_v30 = vld [vmem:[%s2169_s22 + $0x70] sm:$0xff]  ;;  %v2007_v36 = vpack.c.bf16 %v264_v25, %v232_v23 }
  0x27   : > { %1916 = vmatprep.subr.msk.mxu1 %vm389_vm0, %v354_v57  ;;  %v265_v31 = vld [vmem:[%s2169_s22 + $0x170] sm:$0xff]  ;;  %v296_v32 = vld [vmem:[%s2169_s22 + $0x268] sm:$0xff]  ;;  %v298_v37 = vld [vmem:[%s2169_s22 + $0x278] sm:$0xff]  ;;  %v2015_v39 = vpack.c.bf16 %v266_v27, %v234_v26  ;;  %v2009_v40 = vpack.c.bf16 %v263_v29, %v231_v28 }
  0x28   : > { %v328_v33 = vld [vmem:[%s2169_s22 + $0x368] sm:$0xff]  ;;  %v357_v35 = vld [vmem:[%s2169_s22 + $0x450] sm:$0xf]  ;;  %v330_v38 = vld [vmem:[%s2169_s22 + $0x378] sm:$0xff]  ;;  %v2017_v41 = vpack.c.bf16 %v265_v31, %v233_v30 }
  0x29   : > { %1914 = vmatpush1.msk.msra.mxu0 %vm389_vm0, %v351_v59  ;;  %v2011_v42 = vpack.c.bf16 %v328_v33, %v296_v32  ;;  %v295_v43 = vld [vmem:[%s2169_s22 + $0x260] sm:$0xff]  ;;  %v2019_v45 = vpack.c.bf16 %v330_v38, %v298_v37  ;;  %v297_v46 = vld [vmem:[%s2169_s22 + $0x270] sm:$0xff]  ;;  %v360_v50 = vld [vmem:[%s2169_s22 + $0x468] sm:$0xf] }
  0x2a   : > { %1917 = vmatpush1.msk.msra.mxu1 %vm389_vm0, %v353_v6  ;;  %1915 = vmatmul.mubr.msk.f32.vlgmr.msra.gmra.mrb[2].mxu0 %vm385_vm1, %v2197_v34  ;;  %v327_v44 = vld [vmem:[%s2169_s22 + $0x360] sm:$0xff]  ;;  %v329_v47 = vld [vmem:[%s2169_s22 + $0x370] sm:$0xff]  ;;  %v362_v51 = vld [vmem:[%s2169_s22 + $0x478] sm:$0xf] }
  0x2b   : > { %1918 = vmatmul.mubr.msk.f32.vlgmr.msra.gmra.mrb[2].mxu1 %vm385_vm1, %v2197_v34  ;;  %1992 = vmatprep.subr.bf16.mxu0 %v1991_v7  ;;  %v2013_v48 = vpack.c.bf16 %v327_v44, %v295_v43  ;;  %v2021_v49 = vpack.c.bf16 %v329_v47, %v297_v46  ;;  %v236_v52 = vld [vmem:[%s2169_s22 + $0x88] sm:$0xff]  ;;  %v359_v53 = vld [vmem:[%s2169_s22 + $0x460] sm:$0xf]  ;;  %v238_v55 = vld [vmem:[%s2169_s22 + $0x98] sm:$0xff] }
  0x2c   : > { %2000 = vmatprep.subr.bf16.mxu1 %v1999_v10  ;;  %1994 = vmatpush1.bf16.msra.mxu0 %v1993_v11  ;;  %v268_v54 = vld [vmem:[%s2169_s22 + $0x188] sm:$0xff]  ;;  %v270_v56 = vld [vmem:[%s2169_s22 + $0x198] sm:$0xff]  ;;  %v235_v57 = vld [vmem:[%s2169_s22 + $0x80] sm:$0xff] }
  0x2d   : > { %2002 = vmatpush1.bf16.msra.mxu1 %v2001_v12  ;;  %1996 = vmatprep.subr.bf16.mxu0 %v1995_v13  ;;  %v267_v58 = vld [vmem:[%s2169_s22 + $0x180] sm:$0xff]  ;;  %v237_v59 = vld [vmem:[%s2169_s22 + $0x90] sm:$0xff]  ;;  %v300_v61 = vld [vmem:[%s2169_s22 + $0x288] sm:$0xff]  ;;  %v2023_v1 = vpack.c.bf16 %v268_v54, %v236_v52  ;;  %v2031_v4 = vpack.c.bf16 %v270_v56, %v238_v55 }
  0x2e   : > { %2004 = vmatprep.subr.bf16.mxu1 %v2003_v16  ;;  %834 = vmatprep.mubr.f32.mxu0 %v2123_v0  ;;  %v269_v60 = vld [vmem:[%s2169_s22 + $0x190] sm:$0xff]  ;;  %v332_v62 = vld [vmem:[%s2169_s22 + $0x388] sm:$0xff]  ;;  %v302_v2 = vld [vmem:[%s2169_s22 + $0x298] sm:$0xff]  ;;  %v2025_v5 = vpack.c.bf16 %v267_v58, %v235_v57 }
  0x2f   : > { %905 = vmatprep.mubr.f32.mxu1 %v2123_v0  ;;  %v361_v63 = vld [vmem:[%s2169_s22 + $0x470] sm:$0xf]  ;;  %v334_v3 = vld [vmem:[%s2169_s22 + $0x398] sm:$0xff]  ;;  %v2033_v6 = vpack.c.bf16 %v269_v60, %v237_v59  ;;  %v2027_v7 = vpack.c.bf16 %v332_v62, %v300_v61  ;;  %v299_v8 = vld [vmem:[%s2169_s22 + $0x280] sm:$0xff] }
  0x30   : > { %1998 = vmatpush1.bf16.msra.mxu0 %v1997_v19  ;;  %v331_v9 = vld [vmem:[%s2169_s22 + $0x380] sm:$0xff]  ;;  %v2035_v10 = vpack.c.bf16 %v334_v3, %v302_v2  ;;  %v301_v11 = vld [vmem:[%s2169_s22 + $0x290] sm:$0xff]  ;;  %v364_v15 = vld [vmem:[%s2169_s22 + $0x488] sm:$0xf] }
  0x31   : > { %2006 = vmatpush1.bf16.msra.mxu1 %v2005_v20  ;;  %1919 = vmatprep.subr.msk.mxu0 %vm389_vm0, %v356_v21  ;;  %v333_v12 = vld [vmem:[%s2169_s22 + $0x390] sm:$0xff]  ;;  %v2029_v13 = vpack.c.bf16 %v331_v9, %v299_v8  ;;  %v366_v16 = vld [vmem:[%s2169_s22 + $0x498] sm:$0xf]  ;;  %v240_v17 = vld [vmem:[%s2169_s22 + $0xa8] sm:$0xff] }
  0x32   : > { %1922 = vmatprep.subr.msk.mxu1 %vm389_vm0, %v358_v22  ;;  %v2037_v14 = vpack.c.bf16 %v333_v12, %v301_v11  ;;  %v363_v18 = vld [vmem:[%s2169_s22 + $0x480] sm:$0xf]  ;;  %v272_v19 = vld [vmem:[%s2169_s22 + $0x1a8] sm:$0xff]  ;;  %v242_v20 = vld [vmem:[%s2169_s22 + $0xb8] sm:$0xff] }
  0x33   : > { %v274_v21 = vld [vmem:[%s2169_s22 + $0x1b8] sm:$0xff]  ;;  %v239_v22 = vld [vmem:[%s2169_s22 + $0xa0] sm:$0xff]  ;;  %v273_v25 = vld [vmem:[%s2169_s22 + $0x1b0] sm:$0xff]  ;;  %v2039_v29 = vpack.c.bf16 %v272_v19, %v240_v17 }
  0x34   : > { %1920 = vmatpush1.msk.msra.mxu0 %vm389_vm0, %v355_v24  ;;  %v271_v23 = vld [vmem:[%s2169_s22 + $0x1a0] sm:$0xff]  ;;  %v241_v24 = vld [vmem:[%s2169_s22 + $0xb0] sm:$0xff]  ;;  %v304_v26 = vld [vmem:[%s2169_s22 + $0x2a8] sm:$0xff]  ;;  %v2047_v32 = vpack.c.bf16 %v274_v21, %v242_v20 }
  0x35   : > { %1923 = vmatpush1.msk.msra.mxu1 %vm389_vm0, %v357_v35  ;;  %1921 = vmatmul.mubr.msk.f32.vlgmr.msra.gmra.mrb[4].mxu0 %vm385_vm1, %v2197_v34  ;;  %v336_v27 = vld [vmem:[%s2169_s22 + $0x3a8] sm:$0xff]  ;;  %v365_v28 = vld [vmem:[%s2169_s22 + $0x490] sm:$0xf]  ;;  %v306_v30 = vld [vmem:[%s2169_s22 + $0x2b8] sm:$0xff]  ;;  %v2041_v33 = vpack.c.bf16 %v271_v23, %v239_v22  ;;  %v2049_v35 = vpack.c.bf16 %v273_v25, %v241_v24 }
  0x36   : > { %1924 = vmatmul.mubr.msk.f32.vlgmr.msra.gmra.mrb[4].mxu1 %vm385_vm1, %v2197_v34  ;;  %2008 = vmatprep.subr.bf16.mxu0 %v2007_v36  ;;  %v338_v31 = vld [vmem:[%s2169_s22 + $0x3b8] sm:$0xff]  ;;  %v2043_v36 = vpack.c.bf16 %v336_v27, %v304_v26  ;;  %v303_v37 = vld [vmem:[%s2169_s22 + $0x2a0] sm:$0xff]  ;;  %v368_v44 = vld [vmem:[%s2169_s22 + $0x4a8] sm:$0xf] }
  0x37   : > { %2016 = vmatprep.subr.bf16.mxu1 %v2015_v39  ;;  %2010 = vmatpush1.bf16.msra.mxu0 %v2009_v40  ;;  %v335_v38 = vld [vmem:[%s2169_s22 + $0x3a0] sm:$0xff]  ;;  %v2051_v39 = vpack.c.bf16 %v338_v31, %v306_v30  ;;  %v305_v40 = vld [vmem:[%s2169_s22 + $0x2b0] sm:$0xff]  ;;  %v244_v46 = vld [vmem:[%s2169_s22 + $0xc8] sm:$0xff] }
  0x38   : > { %2018 = vmatpush1.bf16.msra.mxu1 %v2017_v41  ;;  %2012 = vmatprep.subr.bf16.mxu0 %v2011_v42  ;;  %v337_v41 = vld [vmem:[%s2169_s22 + $0x3b0] sm:$0xff]  ;;  %v2045_v42 = vpack.c.bf16 %v335_v38, %v303_v37  ;;  %v367_v47 = vld [vmem:[%s2169_s22 + $0x4a0] sm:$0xf]  ;;  %v308_v55 = vld [vmem:[%s2169_s22 + $0x2c8] sm:$0xff] }
  0x39   : > { %2020 = vmatprep.subr.bf16.mxu1 %v2019_v45  ;;  %976 = vmatprep.mubr.f32.mxu0 %v2123_v0  ;;  %v2053_v43 = vpack.c.bf16 %v337_v41, %v305_v40  ;;  %v370_v45 = vld [vmem:[%s2169_s22 + $0x4b8] sm:$0xf]  ;;  %v275_v52 = vld [vmem:[%s2169_s22 + $0x1c0] sm:$0xff]  ;;  %v277_v54 = vld [vmem:[%s2169_s22 + $0x1d0] sm:$0xff] }
  0x3a   : > { %1047 = vmatprep.mubr.f32.mxu1 %v2123_v0  ;;  %v340_v56 = vld [vmem:[%s2169_s22 + $0x3c8] sm:$0xff]  ;;  %v369_v57 = vld [vmem:[%s2169_s22 + $0x4b0] sm:$0xf]  ;;  %v310_v59 = vld [vmem:[%s2169_s22 + $0x2d8] sm:$0xff] }
  0x3b   : > { %2014 = vmatpush1.bf16.msra.mxu0 %v2013_v48  ;;  %v276_v48 = vld [vmem:[%s2169_s22 + $0x1c8] sm:$0xff]  ;;  %v342_v60 = vld [vmem:[%s2169_s22 + $0x3d8] sm:$0xff]  ;;  %v307_v2 = vld [vmem:[%s2169_s22 + $0x2c0] sm:$0xff] }
  0x3c   : > { %2022 = vmatpush1.bf16.msra.mxu1 %v2021_v49  ;;  %1925 = vmatprep.subr.msk.mxu0 %vm389_vm0, %v360_v50  ;;  %v246_v49 = vld [vmem:[%s2169_s22 + $0xd8] sm:$0xff]  ;;  %v2055_v58 = vpack.c.bf16 %v276_v48, %v244_v46  ;;  %v339_v3 = vld [vmem:[%s2169_s22 + $0x3c0] sm:$0xff]  ;;  %v372_v9 = vld [vmem:[%s2169_s22 + $0x4c8] sm:$0xf] }
  0x3d   : > { %1928 = vmatprep.subr.msk.mxu1 %vm389_vm0, %v362_v51  ;;  %v278_v50 = vld [vmem:[%s2169_s22 + $0x1d8] sm:$0xff]  ;;  %v243_v51 = vld [vmem:[%s2169_s22 + $0xc0] sm:$0xff]  ;;  %v248_v11 = vld [vmem:[%s2169_s22 + $0xe8] sm:$0xff] }
  0x3e   : > { %v2063_v61 = vpack.c.bf16 %v278_v50, %v246_v49  ;;  %v2057_v62 = vpack.c.bf16 %v275_v52, %v243_v51  ;;  %v371_v12 = vld [vmem:[%s2169_s22 + $0x4c0] sm:$0xf]  ;;  %v281_v19 = vld [vmem:[%s2169_s22 + $0x1f0] sm:$0xff]  ;;  %v312_v20 = vld [vmem:[%s2169_s22 + $0x2e8] sm:$0xff] }
  0x3f   : > { %1926 = vmatpush1.msk.msra.mxu0 %vm389_vm0, %v359_v53  ;;  %v245_v53 = vld [vmem:[%s2169_s22 + $0xd0] sm:$0xff]  ;;  %v279_v17 = vld [vmem:[%s2169_s22 + $0x1e0] sm:$0xff]  ;;  %v344_v21 = vld [vmem:[%s2169_s22 + $0x3e8] sm:$0xff] }
  0x40   : > { %1929 = vmatpush1.msk.msra.mxu1 %vm389_vm0, %v361_v63  ;;  %1927 = vmatmul.mubr.msk.f32.vlgmr.msra.gmra.mrb[6].mxu0 %vm385_vm1, %v2197_v34  ;;  %v2065_v63 = vpack.c.bf16 %v277_v54, %v245_v53  ;;  %v373_v22 = vld [vmem:[%s2169_s22 + $0x4d0] sm:$0xf]  ;;  %v314_v24 = vld [vmem:[%s2169_s22 + $0x2f8] sm:$0xff]  ;;  %v311_v30 = vld [vmem:[%s2169_s22 + $0x2e0] sm:$0xff] }
  0x41   : > { %1930 = vmatmul.mubr.msk.f32.vlgmr.msra.gmra.mrb[6].mxu1 %vm385_vm1, %v2197_v34  ;;  %2024 = vmatprep.subr.bf16.mxu0 %v2023_v1  ;;  %v2059_v1 = vpack.c.bf16 %v340_v56, %v308_v55  ;;  %v346_v25 = vld [vmem:[%s2169_s22 + $0x3f8] sm:$0xff]  ;;  %v343_v31 = vld [vmem:[%s2169_s22 + $0x3e0] sm:$0xff]  ;;  %v376_v38 = vld [vmem:[%s2169_s22 + $0x4e8] sm:$0xf] }
  0x42   : > { %2032 = vmatprep.subr.bf16.mxu1 %v2031_v4  ;;  %2026 = vmatpush1.bf16.msra.mxu0 %v2025_v5  ;;  %v2067_v4 = vpack.c.bf16 %v342_v60, %v310_v59  ;;  %v309_v5 = vld [vmem:[%s2169_s22 + $0x2d0] sm:$0xff]  ;;  %v375_v40 = vld [vmem:[%s2169_s22 + $0x4e0] sm:$0xf] }
  0x43   : > { %2034 = vmatpush1.bf16.msra.mxu1 %v2033_v6  ;;  %2028 = vmatprep.subr.bf16.mxu0 %v2027_v7  ;;  %v341_v6 = vld [vmem:[%s2169_s22 + $0x3d0] sm:$0xff]  ;;  %v2061_v7 = vpack.c.bf16 %v339_v3, %v307_v2  ;;  %v1657_v2 = vld [vmem:[%s2418_s28 + $0x18] sm:$0xff] }
  0x44   : > { %2036 = vmatprep.subr.bf16.mxu1 %v2035_v10  ;;  %1118 = vmatprep.mubr.f32.mxu0 %v2123_v0  ;;  %v2069_v8 = vpack.c.bf16 %v341_v6, %v309_v5  ;;  %v374_v10 = vld [vmem:[%s2169_s22 + $0x4d8] sm:$0xf]  ;;  %v377_v41 = vld [vmem:[%s2169_s22 + $0x4f0] sm:$0xf] }
  0x45   : > { %1189 = vmatprep.mubr.f32.mxu1 %v2123_v0 }
  0x46   : > { %2030 = vmatpush1.bf16.msra.mxu0 %v2029_v13  ;;  %v280_v13 = vld [vmem:[%s2169_s22 + $0x1e8] sm:$0xff] }
  0x47   : > { %2038 = vmatpush1.bf16.msra.mxu1 %v2037_v14  ;;  %1931 = vmatprep.subr.msk.mxu0 %vm389_vm0, %v364_v15  ;;  %v250_v14 = vld [vmem:[%s2169_s22 + $0xf8] sm:$0xff]  ;;  %v2071_v23 = vpack.c.bf16 %v280_v13, %v248_v11 }
  0x48   : > { %1934 = vmatprep.subr.msk.mxu1 %vm389_vm0, %v366_v16  ;;  %v282_v15 = vld [vmem:[%s2169_s22 + $0x1f8] sm:$0xff]  ;;  %v247_v16 = vld [vmem:[%s2169_s22 + $0xe0] sm:$0xff] }
  0x49   : > { %v2079_v26 = vpack.c.bf16 %v282_v15, %v250_v14  ;;  %v2073_v27 = vpack.c.bf16 %v279_v17, %v247_v16 }
  0x4a   : > { %1932 = vmatpush1.msk.msra.mxu0 %vm389_vm0, %v363_v18  ;;  %v249_v18 = vld [vmem:[%s2169_s22 + $0xf0] sm:$0xff] }
  0x4b   : > { %1935 = vmatpush1.msk.msra.mxu1 %vm389_vm0, %v365_v28  ;;  %1933 = vmatmul.mubr.msk.f32.vlgmr.msra.gmra.mrb[8].mxu0 %vm385_vm1, %v2197_v34  ;;  %v2081_v28 = vpack.c.bf16 %v281_v19, %v249_v18 }
  0x4c   : > { %1936 = vmatmul.mubr.msk.f32.vlgmr.msra.gmra.mrb[8].mxu1 %vm385_vm1, %v2197_v34  ;;  %2040 = vmatprep.subr.bf16.mxu0 %v2039_v29  ;;  %v2075_v29 = vpack.c.bf16 %v344_v21, %v312_v20 }
  0x4d   : > { %2048 = vmatprep.subr.bf16.mxu1 %v2047_v32  ;;  %2042 = vmatpush1.bf16.msra.mxu0 %v2041_v33  ;;  %v2083_v32 = vpack.c.bf16 %v346_v25, %v314_v24  ;;  %v313_v33 = vld [vmem:[%s2169_s22 + $0x2f0] sm:$0xff]  ;;  %v1659_v24 = vld [vmem:[%s2418_s28 + $0x28] sm:$0xff] }
  0x4e   : > { %2050 = vmatpush1.bf16.msra.mxu1 %v2049_v35  ;;  %2044 = vmatprep.subr.bf16.mxu0 %v2043_v36  ;;  %v345_v35 = vld [vmem:[%s2169_s22 + $0x3f0] sm:$0xff]  ;;  %v2077_v36 = vpack.c.bf16 %v343_v31, %v311_v30 }
  0x4f   : > { %2052 = vmatprep.subr.bf16.mxu1 %v2051_v39  ;;  %1260 = vmatprep.mubr.f32.mxu0 %v2123_v0  ;;  %v2085_v37 = vpack.c.bf16 %v345_v35, %v313_v33  ;;  %v378_v39 = vld [vmem:[%s2169_s22 + $0x4f8] sm:$0xf]  ;;  %v1691_v35 = vcombine.high %v1659_v24, %v1659_v24 }
  0x50   : > { %1331 = vmatprep.mubr.f32.mxu1 %v2123_v0 }
  0x51   : > { %2046 = vmatpush1.bf16.msra.mxu0 %v2045_v42  ;;  %v1654_v42 = vld [vmem:[%s2418_s28] sm:$0xff] }
  0x52   : > { %2054 = vmatpush1.bf16.msra.mxu1 %v2053_v43  ;;  %1937 = vmatprep.subr.msk.mxu0 %vm389_vm0, %v368_v44  ;;  %v1655_v44 = vld [vmem:[%s2418_s28 + $0x8] sm:$0xff] }
  0x53   : > { %1940 = vmatprep.subr.msk.mxu1 %vm389_vm0, %v370_v45  ;;  %v1687_v53 = vcombine.high %v1655_v44, %v1655_v44 }
  0x55   : > { %1938 = vmatpush1.msk.msra.mxu0 %vm389_vm0, %v367_v47 }
  0x56   : > { %1941 = vmatpush1.msk.msra.mxu1 %vm389_vm0, %v369_v57  ;;  %1939 = vmatmul.mubr.msk.f32.vlgmr.msra.gmra.mrb[10].mxu0 %vm385_vm1, %v2197_v34 }
  0x57   : > { %1942 = vmatmul.mubr.msk.f32.vlgmr.msra.gmra.mrb[10].mxu1 %vm385_vm1, %v2197_v34  ;;  %2056 = vmatprep.subr.bf16.mxu0 %v2055_v58 }
  0x58   : > { %2064 = vmatprep.subr.bf16.mxu1 %v2063_v61  ;;  %2058 = vmatpush1.bf16.msra.mxu0 %v2057_v62 }
  0x59   : > { %2066 = vmatpush1.bf16.msra.mxu1 %v2065_v63  ;;  %2060 = vmatprep.subr.bf16.mxu0 %v2059_v1  ;;  %v1656_v63 = vld [vmem:[%s2418_s28 + $0x10] sm:$0xff] }
  0x5a   : > { %2068 = vmatprep.subr.bf16.mxu1 %v2067_v4  ;;  %1402 = vmatprep.mubr.f32.mxu0 %v2123_v0 }
  0x5b   : > { %1473 = vmatprep.mubr.f32.mxu1 %v2123_v0 }
  0x5c   : > { %2062 = vmatpush1.bf16.msra.mxu0 %v2061_v7 }
  0x5d   : > { %2070 = vmatpush1.bf16.msra.mxu1 %v2069_v8  ;;  %1943 = vmatprep.subr.msk.mxu0 %vm389_vm0, %v372_v9  ;;  %v1688_v8 = vcombine.high %v1656_v63, %v1656_v63 }
  0x5e   : > { %1946 = vmatprep.subr.msk.mxu1 %vm389_vm0, %v374_v10 }
  0x60   : > { %1944 = vmatpush1.msk.msra.mxu0 %vm389_vm0, %v371_v12  ;;  %v1689_v12 = vcombine.high %v1657_v2, %v1657_v2 }
  0x61   : > { %1947 = vmatpush1.msk.msra.mxu1 %vm389_vm0, %v373_v22  ;;  %1945 = vmatmul.mubr.msk.f32.vlgmr.msra.gmra.mrb[12].mxu0 %vm385_vm1, %v2197_v34  ;;  %v1658_v22 = vld [vmem:[%s2418_s28 + $0x20] sm:$0xff] }
  0x62   : > { %1948 = vmatmul.mubr.msk.f32.vlgmr.msra.gmra.mrb[12].mxu1 %vm385_vm1, %v2197_v34  ;;  %2072 = vmatprep.subr.bf16.mxu0 %v2071_v23  ;;  %v1690_v30 = vcombine.high %v1658_v22, %v1658_v22 }
  0x63   : > { %2080 = vmatprep.subr.bf16.mxu1 %v2079_v26  ;;  %2074 = vmatpush1.bf16.msra.mxu0 %v2073_v27 }
  0x64   : > { %2082 = vmatpush1.bf16.msra.mxu1 %v2081_v28  ;;  %2076 = vmatprep.subr.bf16.mxu0 %v2075_v29 }
  0x65   : > { %2084 = vmatprep.subr.bf16.mxu1 %v2083_v32  ;;  %1544 = vmatprep.mubr.f32.mxu0 %v2123_v0 }
  0x66   : > { %1615 = vmatprep.mubr.f32.mxu1 %v2123_v0 }
  0x67   : > { %2078 = vmatpush1.bf16.msra.mxu0 %v2077_v36 }
  0x68   : > { %2086 = vmatpush1.bf16.msra.mxu1 %v2085_v37  ;;  %1949 = vmatprep.subr.msk.mxu0 %vm389_vm0, %v376_v38 }
  0x69   : > { %1952 = vmatprep.subr.msk.mxu1 %vm389_vm0, %v378_v39 }
  0x6b   : > { %1950 = vmatpush1.msk.msra.mxu0 %vm389_vm0, %v375_v40 }
  0x6c   : > { %1953 = vmatpush1.msk.msra.mxu1 %vm389_vm0, %v377_v41  ;;  %1951 = vmatmul.mubr.msk.f32.vlgmr.msra.gmra.mrb[14].mxu0 %vm385_vm1, %v2197_v34 }
  0x6d   : > { %1954 = vmatmul.mubr.msk.f32.vlgmr.msra.gmra.mrb[14].mxu1 %vm385_vm1, %v2197_v34  ;;  %v1686_v34 = vcombine.high %v1654_v42, %v1654_v42 }
  0x87   : > { %v2420_v0 = vpop.permute.xlu0 %382 }
  0xf2   : > { %v552_v43 = vpop.f32.mrb[0].mxu0 }
  0xf3   : > { %v623_v45 = vpop.f32.mrb[0].mxu1  ;;  %v553_v46 = vadd.f32 %v552_v43, %v2420_v0  ;;  %v554_v47 = vpop.f32.mrb[1].mxu0 }
  0xf4   : > { %v555_v48 = vadd.f32 %v554_v47, %v2420_v0  ;;  %v624_v49 = vadd.f32 %v623_v45, %v2420_v0  ;;  %v625_v50 = vpop.f32.mrb[1].mxu1  ;;  %v1660_v45 = vld [vmem:[%s2418_s28 + $0x30] sm:$0xff]  ;;  %v1661_v47 = vld [vmem:[%s2418_s28 + $0x38] sm:$0xff] }
  0xf5   : > { %v1622_v51 = vmax.f32 %v553_v46, 0.0  ;;  %v626_v52 = vadd.f32 %v625_v50, %v2420_v0 }
  0xf6   : > { %v1623_v54 = vmax.f32 %v555_v48, 0.0  ;;  %v1624_v55 = vmax.f32 %v624_v49, 0.0 }
  0xf7   : > { %v1718_v56 = vadd.f32 %v1654_v42, %v1622_v51  ;;  %v1625_v57 = vmax.f32 %v626_v52, 0.0  ;;  %v1692_v52 = vcombine.high %v1660_v45, %v1660_v45 }
  0xf8   : > { %v1719_v58 = vadd.f32 %v1686_v34, %v1623_v54  ;;  %v1720_v59 = vadd.f32 %v1655_v44, %v1624_v55 }
  0xf9   : > { %v1721_v60 = vadd.f32 %v1687_v53, %v1625_v57 }
  0xfa   : > { %v1782_v61 = vcombine.low %v1718_v56, %v1719_v58  ;;  %v1693_v56 = vcombine.high %v1661_v47, %v1661_v47 }
  0xfb   : > { %v1783_v62 = vcombine.low %v1720_v59, %v1721_v60 }
  0xfc   : > { %1814 = vst [vmem:[%s2431_s5] sm:$0xff] %v1782_v61 }
  0xfd   : > { %1815 = vst [vmem:[%s2431_s5 + $0x8] sm:$0xff] %v1783_v62  ;;  %v694_v1 = vpop.f32.mrb[2].mxu0 }
  0xfe   : > { %v695_v3 = vadd.f32 %v694_v1, %v2420_v0  ;;  %v765_v4 = vpop.f32.mrb[2].mxu1  ;;  %v696_v5 = vpop.f32.mrb[3].mxu0 }
  0xff   : > { %v766_v6 = vadd.f32 %v765_v4, %v2420_v0  ;;  %v697_v7 = vadd.f32 %v696_v5, %v2420_v0  ;;  %v767_v9 = vpop.f32.mrb[3].mxu1  ;;  %v1663_v5 = vld [vmem:[%s2418_s28 + $0x48] sm:$0xff] }
 0x100   : > { %v1626_v10 = vmax.f32 %v695_v3, 0.0  ;;  %v768_v11 = vadd.f32 %v767_v9, %v2420_v0  ;;  %v1662_v3 = vld [vmem:[%s2418_s28 + $0x40] sm:$0xff] }
 0x101   : > { %v1628_v13 = vmax.f32 %v766_v6, 0.0  ;;  %v1627_v14 = vmax.f32 %v697_v7, 0.0 }
 0x102   : > { %v1722_v15 = vadd.f32 %v1656_v63, %v1626_v10  ;;  %v1629_v16 = vmax.f32 %v768_v11, 0.0  ;;  %v1694_v11 = vcombine.high %v1662_v3, %v1662_v3 }
 0x103   : > { %v1724_v17 = vadd.f32 %v1657_v2, %v1628_v13  ;;  %v1723_v18 = vadd.f32 %v1688_v8, %v1627_v14 }
 0x104   : > { %v1725_v19 = vadd.f32 %v1689_v12, %v1629_v16 }
 0x105   : > { %v1784_v20 = vcombine.low %v1722_v15, %v1723_v18  ;;  %v1695_v15 = vcombine.high %v1663_v5, %v1663_v5 }
 0x106   : > { %v1785_v21 = vcombine.low %v1724_v17, %v1725_v19 }
 0x107   : > { %1816 = vst [vmem:[%s2431_s5 + $0x10] sm:$0xff] %v1784_v20 }
 0x108   : > { %1817 = vst [vmem:[%s2431_s5 + $0x18] sm:$0xff] %v1785_v21  ;;  %v836_v23 = vpop.f32.mrb[4].mxu0 }
 0x109   : > { %v837_v25 = vadd.f32 %v836_v23, %v2420_v0  ;;  %v907_v26 = vpop.f32.mrb[4].mxu1  ;;  %v838_v27 = vpop.f32.mrb[5].mxu0 }
 0x10a   : > { %v908_v28 = vadd.f32 %v907_v26, %v2420_v0  ;;  %v839_v29 = vadd.f32 %v838_v27, %v2420_v0  ;;  %v909_v31 = vpop.f32.mrb[5].mxu1  ;;  %v1665_v27 = vld [vmem:[%s2418_s28 + $0x58] sm:$0xff] }
 0x10b   : > { %v1630_v32 = vmax.f32 %v837_v25, 0.0  ;;  %v910_v33 = vadd.f32 %v909_v31, %v2420_v0  ;;  %v1664_v25 = vld [vmem:[%s2418_s28 + $0x50] sm:$0xff] }
 0x10c   : > { %v1632_v36 = vmax.f32 %v908_v28, 0.0  ;;  %v1631_v37 = vmax.f32 %v839_v29, 0.0 }
 0x10d   : > { %v1726_v38 = vadd.f32 %v1658_v22, %v1630_v32  ;;  %v1633_v39 = vmax.f32 %v910_v33, 0.0  ;;  %v1696_v33 = vcombine.high %v1664_v25, %v1664_v25 }
 0x10e   : > { %v1728_v40 = vadd.f32 %v1659_v24, %v1632_v36  ;;  %v1727_v41 = vadd.f32 %v1690_v30, %v1631_v37 }
 0x10f   : > { %v1729_v42 = vadd.f32 %v1691_v35, %v1633_v39 }
 0x110   : > { %v1786_v43 = vcombine.low %v1726_v38, %v1727_v41  ;;  %v1697_v38 = vcombine.high %v1665_v27, %v1665_v27 }
 0x111   : > { %v1787_v44 = vcombine.low %v1728_v40, %v1729_v42 }
 0x112   : > { %1818 = vst [vmem:[%s2431_s5 + $0x20] sm:$0xff] %v1786_v43 }
 0x113   : > { %1819 = vst [vmem:[%s2431_s5 + $0x28] sm:$0xff] %v1787_v44  ;;  %v978_v46 = vpop.f32.mrb[6].mxu0 }
 0x114   : > { %v979_v48 = vadd.f32 %v978_v46, %v2420_v0  ;;  %v1049_v34 = vpop.f32.mrb[6].mxu1  ;;  %v980_v49 = vpop.f32.mrb[7].mxu0 }
 0x115   : > { %v1050_v50 = vadd.f32 %v1049_v34, %v2420_v0  ;;  %v981_v51 = vadd.f32 %v980_v49, %v2420_v0  ;;  %v1051_v53 = vpop.f32.mrb[7].mxu1  ;;  %v1667_v49 = vld [vmem:[%s2418_s28 + $0x68] sm:$0xff] }
 0x116   : > { %v1634_v54 = vmax.f32 %v979_v48, 0.0  ;;  %v1052_v55 = vadd.f32 %v1051_v53, %v2420_v0  ;;  %v1666_v48 = vld [vmem:[%s2418_s28 + $0x60] sm:$0xff] }
 0x117   : > { %v1636_v57 = vmax.f32 %v1050_v50, 0.0  ;;  %v1635_v58 = vmax.f32 %v981_v51, 0.0 }
 0x118   : > { %v1730_v59 = vadd.f32 %v1660_v45, %v1634_v54  ;;  %v1637_v60 = vmax.f32 %v1052_v55, 0.0  ;;  %v1698_v55 = vcombine.high %v1666_v48, %v1666_v48 }
 0x119   : > { %v1732_v61 = vadd.f32 %v1661_v47, %v1636_v57  ;;  %v1731_v62 = vadd.f32 %v1692_v52, %v1635_v58 }
 0x11a   : > { %v1733_v63 = vadd.f32 %v1693_v56, %v1637_v60 }
 0x11b   : > { %v1788_v1 = vcombine.low %v1730_v59, %v1731_v62  ;;  %v1699_v59 = vcombine.high %v1667_v49, %v1667_v49 }
 0x11c   : > { %v1789_v2 = vcombine.low %v1732_v61, %v1733_v63 }
 0x11d   : > { %1820 = vst [vmem:[%s2431_s5 + $0x30] sm:$0xff] %v1788_v1 }
 0x11e   : > { %1821 = vst [vmem:[%s2431_s5 + $0x38] sm:$0xff] %v1789_v2  ;;  %v1120_v4 = vpop.f32.mrb[8].mxu0 }
 0x11f   : > { %v1121_v6 = vadd.f32 %v1120_v4, %v2420_v0  ;;  %v1191_v7 = vpop.f32.mrb[8].mxu1  ;;  %v1122_v8 = vpop.f32.mrb[9].mxu0 }
 0x120   : > { %v1192_v9 = vadd.f32 %v1191_v7, %v2420_v0  ;;  %v1123_v10 = vadd.f32 %v1122_v8, %v2420_v0  ;;  %v1193_v12 = vpop.f32.mrb[9].mxu1  ;;  %v1669_v8 = vld [vmem:[%s2418_s28 + $0x78] sm:$0xff] }
 0x121   : > { %v1638_v13 = vmax.f32 %v1121_v6, 0.0  ;;  %v1194_v14 = vadd.f32 %v1193_v12, %v2420_v0  ;;  %v1668_v6 = vld [vmem:[%s2418_s28 + $0x70] sm:$0xff] }
 0x122   : > { %v1640_v16 = vmax.f32 %v1192_v9, 0.0  ;;  %v1639_v17 = vmax.f32 %v1123_v10, 0.0 }
 0x123   : > { %v1734_v18 = vadd.f32 %v1662_v3, %v1638_v13  ;;  %v1641_v19 = vmax.f32 %v1194_v14, 0.0  ;;  %v1700_v14 = vcombine.high %v1668_v6, %v1668_v6 }
 0x124   : > { %v1736_v20 = vadd.f32 %v1663_v5, %v1640_v16  ;;  %v1735_v21 = vadd.f32 %v1694_v11, %v1639_v17 }
 0x125   : > { %v1737_v22 = vadd.f32 %v1695_v15, %v1641_v19 }
 0x126   : > { %v1790_v23 = vcombine.low %v1734_v18, %v1735_v21  ;;  %v1701_v18 = vcombine.high %v1669_v8, %v1669_v8 }
 0x127   : > { %v1791_v24 = vcombine.low %v1736_v20, %v1737_v22 }
 0x128   : > { %1822 = vst [vmem:[%s2431_s5 + $0x40] sm:$0xff] %v1790_v23 }
 0x129   : > { %1823 = vst [vmem:[%s2431_s5 + $0x48] sm:$0xff] %v1791_v24  ;;  %v1262_v26 = vpop.f32.mrb[10].mxu0 }
 0x12a   : > { %v1263_v28 = vadd.f32 %v1262_v26, %v2420_v0  ;;  %v1333_v29 = vpop.f32.mrb[10].mxu1  ;;  %v1264_v30 = vpop.f32.mrb[11].mxu0 }
 0x12b   : > { %v1334_v31 = vadd.f32 %v1333_v29, %v2420_v0  ;;  %v1265_v32 = vadd.f32 %v1264_v30, %v2420_v0  ;;  %v1335_v35 = vpop.f32.mrb[11].mxu1 }
 0x12c   : > { %v1642_v36 = vmax.f32 %v1263_v28, 0.0  ;;  %v1336_v37 = vadd.f32 %v1335_v35, %v2420_v0 }
 0x12d   : > { %v1644_v39 = vmax.f32 %v1334_v31, 0.0  ;;  %v1643_v40 = vmax.f32 %v1265_v32, 0.0 }
 0x12e   : > { %v1738_v41 = vadd.f32 %v1664_v25, %v1642_v36  ;;  %v1645_v42 = vmax.f32 %v1336_v37, 0.0 }
 0x12f   : > { %v1740_v43 = vadd.f32 %v1665_v27, %v1644_v39  ;;  %v1739_v44 = vadd.f32 %v1696_v33, %v1643_v40 }
 0x130   : > { %v1741_v45 = vadd.f32 %v1697_v38, %v1645_v42 }
 0x131   : > { %v1792_v46 = vcombine.low %v1738_v41, %v1739_v44 }
 0x132   : > { %v1793_v47 = vcombine.low %v1740_v43, %v1741_v45 }
 0x133   : > { %1824 = vst [vmem:[%s2431_s5 + $0x50] sm:$0xff] %v1792_v46 }
 0x134   : > { %1825 = vst [vmem:[%s2431_s5 + $0x58] sm:$0xff] %v1793_v47  ;;  %v1404_v34 = vpop.f32.mrb[12].mxu0 }
 0x135   : > { %v1405_v50 = vadd.f32 %v1404_v34, %v2420_v0  ;;  %v1475_v51 = vpop.f32.mrb[12].mxu1  ;;  %v1406_v52 = vpop.f32.mrb[13].mxu0 }
 0x136   : > { %v1476_v53 = vadd.f32 %v1475_v51, %v2420_v0  ;;  %v1407_v54 = vadd.f32 %v1406_v52, %v2420_v0  ;;  %v1477_v56 = vpop.f32.mrb[13].mxu1 }
 0x137   : > { %v1646_v57 = vmax.f32 %v1405_v50, 0.0  ;;  %v1478_v58 = vadd.f32 %v1477_v56, %v2420_v0 }
 0x138   : > { %v1648_v60 = vmax.f32 %v1476_v53, 0.0  ;;  %v1647_v61 = vmax.f32 %v1407_v54, 0.0 }
 0x139   : > { %v1742_v62 = vadd.f32 %v1666_v48, %v1646_v57  ;;  %v1649_v63 = vmax.f32 %v1478_v58, 0.0 }
 0x13a   : > { %v1744_v1 = vadd.f32 %v1667_v49, %v1648_v60  ;;  %v1743_v2 = vadd.f32 %v1698_v55, %v1647_v61 }
 0x13b   : > { %v1745_v3 = vadd.f32 %v1699_v59, %v1649_v63 }
 0x13c   : > { %v1794_v4 = vcombine.low %v1742_v62, %v1743_v2 }
 0x13d   : > { %v1795_v5 = vcombine.low %v1744_v1, %v1745_v3 }
 0x13e   : > { %1826 = vst [vmem:[%s2431_s5 + $0x60] sm:$0xff] %v1794_v4 }
 0x13f   : > { %1827 = vst [vmem:[%s2431_s5 + $0x68] sm:$0xff] %v1795_v5  ;;  %v1546_v7 = vpop.f32.mrb[14].mxu0 }
 0x140   : > { %v1547_v9 = vadd.f32 %v1546_v7, %v2420_v0  ;;  %v1617_v10 = vpop.f32.mrb[14].mxu1  ;;  %v1548_v11 = vpop.f32.mrb[15].mxu0 }
 0x141   : > { %v1618_v12 = vadd.f32 %v1617_v10, %v2420_v0  ;;  %v1549_v13 = vadd.f32 %v1548_v11, %v2420_v0  ;;  %v1619_v15 = vpop.f32.mrb[15].mxu1 }
 0x142   : > { %v1650_v16 = vmax.f32 %v1547_v9, 0.0  ;;  %v1620_v17 = vadd.f32 %v1619_v15, %v2420_v0 }
 0x143   : > { %v1652_v19 = vmax.f32 %v1618_v12, 0.0  ;;  %v1651_v20 = vmax.f32 %v1549_v13, 0.0 }
 0x144   : > { %v1746_v21 = vadd.f32 %v1668_v6, %v1650_v16  ;;  %v1653_v22 = vmax.f32 %v1620_v17, 0.0 }
 0x145   : > { %v1748_v23 = vadd.f32 %v1669_v8, %v1652_v19  ;;  %v1747_v24 = vadd.f32 %v1700_v14, %v1651_v20 }
 0x146   : > { %v1749_v25 = vadd.f32 %v1701_v18, %v1653_v22 }
 0x147   : > { %v1796_v26 = vcombine.low %v1746_v21, %v1747_v24 }
 0x148   : > { %v1797_v27 = vcombine.low %v1748_v23, %v1749_v25 }
 0x149   : > { %1828 = vst [vmem:[%s2431_s5 + $0x70] sm:$0xff] %v1796_v26 }
 0x14a   : > { %1829 = vst [vmem:[%s2431_s5 + $0x78] sm:$0xff] %v1797_v27 }
 0x14b PF: > { %s14_s15 = sadd.s32 1, %s2121_s15  }
 0x14c   : > { %p11_p4 = scmp.ge.s32.totalorder %s14_s15, 4  }
 0x14e   :  { %13 = sbr.rel (!%p11_p4) target bundleno = 1 (0x1), region = 69 }

// kernel: _lambda_.18
= control target key start
LH: loop header
LB: loop body
LE: loop exit
PB: predicated region body
PF: predicated region fallthrough
CT: control target
= control target key end

     0   :  { %s699_s12 = smov 0   ;;  %s784_s0 = inlined_call_operand.vmem [shape: f32[2,36,1024], index: 0, kind: input, shape index: {}]   ;;  %s785_s1 = inlined_call_operand.vmem [shape: f32[8,36], index: 1, kind: input, shape index: {}]   ;;  %s786_s2 = inlined_call_operand.vmem [shape: f32[8,1], index: 2, kind: input, shape index: {}]   ;;  %s787_s3 = inlined_call_operand.vmem [shape: f32[2,8,1024], index: 3, kind: output, shape index: {}]  }
   0x1 LB: > { %s602_s13 = sadd.s32 4294967295, %s675_s12   ;;  %p606_p0 = scmp.ge.s32.totalorder %s675_s12, 1  ;;  %s675_s12 = sphi %s699_s12, %s13_s12  }
   0x2   : > { %p137_p1 = scmp.lt.s32.totalorder %s675_s12, 3 }
   0x4   : > { %p138_p2 = pnand %p606_p0, %p137_p1 }
   0x5   : > { %p161_p3 = scmp.lt.s32.totalorder (!%p138_p2), %s602_s13, 1  ;;  %v677_v0 = vmov (!%p138_p2), 0.0   ;;  %v212_v1 = vld [vmem:[%s786_s2] sm:$0xff] (!%p138_p2)  ;;  %v678_v2 = vmov (!%p138_p2), 0   ;;  %vm222_vm0 = vcmask (!%p138_p2), 1043456   ;;  %vm218_vm1 = vcmask (!%p138_p2), 293888  }
   0x6   : > { %141 = sbr.rel (%p138_p2) target bundleno = 261 (0x105), region = 32  ;;  %311 = vmatprep.mubr.f32.mxu0 (!%p138_p2), %v677_v0  ;;  %382 = vmatprep.mubr.f32.mxu1 (!%p138_p2), %v677_v0  ;;  %v171_v34 = vld [vmem:[%s785_s1] sm:$0xff] (!%p138_p2) }
   0x7   : > { %668 = vset.pattern.permute.xlu0 (!%p138_p2), %v678_v2 }
   0x8   : > { %215 = vperm.xlu0 (!%p138_p2), %668, %v212_v1  }
   0xd   : > { %s789_s13 = smov (!%p161_p3, %s602_s13), 1 }
   0xe   : > { %s657_s16 = smul.u32 320, %s789_s13  ;;  %s624_s22 = sshll.u32 %s789_s13, 6 }
   0xf   : > { %s170_s25 = scalar_lea.vmem %s787_s3, %s624_s22 }
  0x10   : > { %s718_s19 = scalar_lea.vmem %s784_s0, %s657_s16 }
  0x11   : > { %v173_v3 = vld [vmem:[%s718_s19 + $0x8] sm:$0xff]  ;;  %v175_v5 = vld [vmem:[%s718_s19 + $0x18] sm:$0xff]  ;;  %v172_v8 = vld [vmem:[%s718_s19] sm:$0xff] }
  0x12   : > { %v181_v4 = vld [vmem:[%s718_s19 + $0x48] sm:$0xff]  ;;  %v183_v7 = vld [vmem:[%s718_s19 + $0x58] sm:$0xff]  ;;  %v180_v9 = vld [vmem:[%s718_s19 + $0x40] sm:$0xff] }
  0x13   : > { %v625_v6 = vpack.c.bf16 %v181_v4, %v173_v3  ;;  %v633_v10 = vpack.c.bf16 %v183_v7, %v175_v5  ;;  %v627_v11 = vpack.c.bf16 %v180_v9, %v172_v8  ;;  %v174_v12 = vld [vmem:[%s718_s19 + $0x10] sm:$0xff]  ;;  %v189_v14 = vld [vmem:[%s718_s19 + $0x88] sm:$0xff]  ;;  %v191_v17 = vld [vmem:[%s718_s19 + $0x98] sm:$0xff] }
  0x14   : > { %v182_v13 = vld [vmem:[%s718_s19 + $0x50] sm:$0xff]  ;;  %v197_v16 = vld [vmem:[%s718_s19 + $0xc8] sm:$0xff]  ;;  %v199_v18 = vld [vmem:[%s718_s19 + $0xd8] sm:$0xff] }
  0x15   : > { %626 = vmatprep.subr.bf16.mxu0 %v625_v6  ;;  %v635_v15 = vpack.c.bf16 %v182_v13, %v174_v12  ;;  %634 = vmatprep.subr.bf16.mxu1 %v633_v10  ;;  %v629_v19 = vpack.c.bf16 %v197_v16, %v189_v14  ;;  %v637_v20 = vpack.c.bf16 %v199_v18, %v191_v17  ;;  %v188_v21 = vld [vmem:[%s718_s19 + $0x80] sm:$0xff]  ;;  %v190_v23 = vld [vmem:[%s718_s19 + $0x90] sm:$0xff]  ;;  %v205_v27 = vld [vmem:[%s718_s19 + $0x108] sm:$0xf] }
  0x16   : > { %628 = vmatpush1.bf16.msra.mxu0 %v627_v11  ;;  %v196_v22 = vld [vmem:[%s718_s19 + $0xc0] sm:$0xff]  ;;  %v198_v25 = vld [vmem:[%s718_s19 + $0xd0] sm:$0xff]  ;;  %v207_v28 = vld [vmem:[%s718_s19 + $0x118] sm:$0xf] }
  0x17   : > { %636 = vmatpush1.bf16.msra.mxu1 %v635_v15  ;;  %v631_v24 = vpack.c.bf16 %v196_v22, %v188_v21  ;;  %630 = vmatprep.subr.bf16.mxu0 %v629_v19  ;;  %v639_v26 = vpack.c.bf16 %v198_v25, %v190_v23  ;;  %v177_v29 = vld [vmem:[%s718_s19 + $0x28] sm:$0xff]  ;;  %v204_v30 = vld [vmem:[%s718_s19 + $0x100] sm:$0xf]  ;;  %v179_v32 = vld [vmem:[%s718_s19 + $0x38] sm:$0xff] }
  0x18   : > { %638 = vmatprep.subr.bf16.mxu1 %v637_v20  ;;  %v185_v31 = vld [vmem:[%s718_s19 + $0x68] sm:$0xff]  ;;  %v187_v33 = vld [vmem:[%s718_s19 + $0x78] sm:$0xff]  ;;  %v176_v35 = vld [vmem:[%s718_s19 + $0x20] sm:$0xff] }
  0x19   : > { %v184_v36 = vld [vmem:[%s718_s19 + $0x60] sm:$0xff]  ;;  %v178_v37 = vld [vmem:[%s718_s19 + $0x30] sm:$0xff]  ;;  %v193_v39 = vld [vmem:[%s718_s19 + $0xa8] sm:$0xff]  ;;  %v641_v42 = vpack.c.bf16 %v185_v31, %v177_v29  ;;  %v649_v45 = vpack.c.bf16 %v187_v33, %v179_v32 }
  0x1a   : > { %632 = vmatpush1.bf16.msra.mxu0 %v631_v24  ;;  %v186_v38 = vld [vmem:[%s718_s19 + $0x70] sm:$0xff]  ;;  %v201_v40 = vld [vmem:[%s718_s19 + $0xe8] sm:$0xff]  ;;  %v195_v43 = vld [vmem:[%s718_s19 + $0xb8] sm:$0xff]  ;;  %v643_v46 = vpack.c.bf16 %v184_v36, %v176_v35 }
  0x1b   : > { %640 = vmatpush1.bf16.msra.mxu1 %v639_v26  ;;  %610 = vmatprep.subr.msk.mxu0 %vm222_vm0, %v205_v27  ;;  %v206_v41 = vld [vmem:[%s718_s19 + $0x110] sm:$0xf]  ;;  %v203_v44 = vld [vmem:[%s718_s19 + $0xf8] sm:$0xff]  ;;  %v651_v47 = vpack.c.bf16 %v186_v38, %v178_v37  ;;  %v645_v48 = vpack.c.bf16 %v201_v40, %v193_v39  ;;  %v192_v49 = vld [vmem:[%s718_s19 + $0xa0] sm:$0xff] }
  0x1c   : > { %613 = vmatprep.subr.msk.mxu1 %vm222_vm0, %v207_v28  ;;  %v200_v50 = vld [vmem:[%s718_s19 + $0xe0] sm:$0xff]  ;;  %v653_v51 = vpack.c.bf16 %v203_v44, %v195_v43  ;;  %v194_v52 = vld [vmem:[%s718_s19 + $0xb0] sm:$0xff]  ;;  %v209_v56 = vld [vmem:[%s718_s19 + $0x128] sm:$0xf] }
  0x1d   : > { %v202_v53 = vld [vmem:[%s718_s19 + $0xf0] sm:$0xff]  ;;  %v647_v54 = vpack.c.bf16 %v200_v50, %v192_v49  ;;  %v211_v57 = vld [vmem:[%s718_s19 + $0x138] sm:$0xf]  ;;  %v208_v58 = vld [vmem:[%s718_s19 + $0x120] sm:$0xf] }
  0x1e   : > { %611 = vmatpush1.msk.msra.mxu0 %vm222_vm0, %v204_v30  ;;  %v655_v55 = vpack.c.bf16 %v202_v53, %v194_v52  ;;  %v210_v59 = vld [vmem:[%s718_s19 + $0x130] sm:$0xf] }
  0x1f   : > { %614 = vmatpush1.msk.msra.mxu1 %vm222_vm0, %v206_v41  ;;  %612 = vmatmul.mubr.msk.f32.vlgmr.msra.gmra.mrb[0].mxu0 %vm218_vm1, %v171_v34 }
  0x20   : > { %615 = vmatmul.mubr.msk.f32.vlgmr.msra.gmra.mrb[0].mxu1 %vm218_vm1, %v171_v34  ;;  %642 = vmatprep.subr.bf16.mxu0 %v641_v42 }
  0x21   : > { %650 = vmatprep.subr.bf16.mxu1 %v649_v45  ;;  %644 = vmatpush1.bf16.msra.mxu0 %v643_v46 }
  0x22   : > { %652 = vmatpush1.bf16.msra.mxu1 %v651_v47  ;;  %646 = vmatprep.subr.bf16.mxu0 %v645_v48 }
  0x23   : > { %654 = vmatprep.subr.bf16.mxu1 %v653_v51  ;;  %453 = vmatprep.mubr.f32.mxu0 %v677_v0 }
  0x24   : > { %524 = vmatprep.mubr.f32.mxu1 %v677_v0 }
  0x25   : > { %648 = vmatpush1.bf16.msra.mxu0 %v647_v54 }
  0x26   : > { %656 = vmatpush1.bf16.msra.mxu1 %v655_v55  ;;  %616 = vmatprep.subr.msk.mxu0 %vm222_vm0, %v209_v56 }
  0x27   : > { %619 = vmatprep.subr.msk.mxu1 %vm222_vm0, %v211_v57 }
  0x29   : > { %617 = vmatpush1.msk.msra.mxu0 %vm222_vm0, %v208_v58 }
  0x2a   : > { %620 = vmatpush1.msk.msra.mxu1 %vm222_vm0, %v210_v59  ;;  %618 = vmatmul.mubr.msk.f32.vlgmr.msra.gmra.mrb[2].mxu0 %vm218_vm1, %v171_v34 }
  0x2b   : > { %621 = vmatmul.mubr.msk.f32.vlgmr.msra.gmra.mrb[2].mxu1 %vm218_vm1, %v171_v34 }
  0x87   : > { %v216_v60 = vpop.permute.xlu0 %215 }
  0xf2   : > { %v313_v61 = vpop.f32.mrb[0].mxu0 }
  0xf3   : > { %v384_v62 = vpop.f32.mrb[0].mxu1  ;;  %v314_v63 = vadd.f32 %v313_v61, %v216_v60  ;;  %v315_v0 = vpop.f32.mrb[1].mxu0 }
  0xf4   : > { %v385_v1 = vadd.f32 %v384_v62, %v216_v60  ;;  %v316_v2 = vadd.f32 %v315_v0, %v216_v60  ;;  %v386_v3 = vpop.f32.mrb[1].mxu1 }
  0xf5   : > { %v531_v4 = vmax.f32 %v314_v63, 0.0  ;;  %v387_v5 = vadd.f32 %v386_v3, %v216_v60 }
  0xf6   : > { %v533_v6 = vmax.f32 %v385_v1, 0.0  ;;  %v532_v7 = vmax.f32 %v316_v2, 0.0 }
  0xf7   : > { %539 = vst [vmem:[%s170_s25] sm:$0xff] %v531_v4  ;;  %v534_v8 = vmax.f32 %v387_v5, 0.0 }
  0xf8   : > { %541 = vst [vmem:[%s170_s25 + $0x10] sm:$0xff] %v533_v6  ;;  %540 = vst [vmem:[%s170_s25 + $0x8] sm:$0xff] %v532_v7 }
  0xf9   : > { %542 = vst [vmem:[%s170_s25 + $0x18] sm:$0xff] %v534_v8 }
  0xfd   : > { %v455_v9 = vpop.f32.mrb[2].mxu0 }
  0xfe   : > { %v456_v10 = vadd.f32 %v455_v9, %v216_v60  ;;  %v526_v11 = vpop.f32.mrb[2].mxu1  ;;  %v457_v12 = vpop.f32.mrb[3].mxu0 }
  0xff   : > { %v527_v13 = vadd.f32 %v526_v11, %v216_v60  ;;  %v458_v14 = vadd.f32 %v457_v12, %v216_v60  ;;  %v528_v15 = vpop.f32.mrb[3].mxu1 }
 0x100   : > { %v535_v16 = vmax.f32 %v456_v10, 0.0  ;;  %v529_v17 = vadd.f32 %v528_v15, %v216_v60 }
 0x101   : > { %v537_v18 = vmax.f32 %v527_v13, 0.0  ;;  %v536_v19 = vmax.f32 %v458_v14, 0.0 }
 0x102   : > { %543 = vst [vmem:[%s170_s25 + $0x20] sm:$0xff] %v535_v16  ;;  %v538_v20 = vmax.f32 %v529_v17, 0.0 }
 0x103   : > { %545 = vst [vmem:[%s170_s25 + $0x30] sm:$0xff] %v537_v18  ;;  %544 = vst [vmem:[%s170_s25 + $0x28] sm:$0xff] %v536_v19 }
 0x104   : > { %546 = vst [vmem:[%s170_s25 + $0x38] sm:$0xff] %v538_v20 }
 0x105 PF: > { %s13_s12 = sadd.s32 1, %s675_s12  }
 0x106   : > { %p10_p4 = scmp.ge.s32.totalorder %s13_s12, 4  }
 0x108   :  { %12 = sbr.rel (!%p10_p4) target bundleno = 1 (0x1), region = 62 }

// kernel: _lambda_.19
= control target key start
LH: loop header
LB: loop body
LE: loop exit
PB: predicated region body
PF: predicated region fallthrough
CT: control target
= control target key end

     0   :  { %s1217_s21 = smov 0   ;;  %s1368_s0 = inlined_call_operand.vmem [shape: f32[2,72,1024], index: 0, kind: input, shape index: {}]   ;;  %s1369_s1 = inlined_call_operand.vmem [shape: f32[8,72], index: 1, kind: input, shape index: {}]   ;;  %s1370_s2 = inlined_call_operand.vmem [shape: f32[8,1], index: 2, kind: input, shape index: {}]   ;;  %s1371_s3 = inlined_call_operand.vmem [shape: f32[2,4,1024], index: 3, kind: input, shape index: {}]   ;;  %s1372_s4 = inlined_call_operand.vmem [shape: f32[8,4], index: 4, kind: input, shape index: {}]   ;;  %s1373_s5 = inlined_call_operand.vmem [shape: f32[8,1], index: 5, kind: input, shape index: {}]   ;;  %s1374_s6 = inlined_call_operand.vmem [shape: f32[2,8,1024], index: 6, kind: output, shape index: {}]  }
   0x1 LB: > { %s1062_s22 = sadd.s32 4294967295, %s1178_s21   ;;  %p1066_p0 = scmp.ge.s32.totalorder %s1178_s21, 1  ;;  %s1178_s21 = sphi %s1217_s21, %s16_s21  }
   0x2   : > { %p222_p1 = scmp.lt.s32.totalorder %s1178_s21, 3 }
   0x4   : > { %p223_p2 = pnand %p1066_p0, %p222_p1 }
   0x5   : > { %p257_p3 = scmp.lt.s32.totalorder (!%p223_p2), %s1062_s22, 1  ;;  %v1180_v0 = vmov (!%p223_p2), 0.0   ;;  %v345_v1 = vld [vmem:[%s1370_s2] sm:$0xff] (!%p223_p2)  ;;  %v1181_v2 = vmov (!%p223_p2), 0   ;;  %vm351_vm0 = vcmask (!%p223_p2), 588800   ;;  %vm662_vm1 = vcmask (!%p223_p2), 1043456  }
   0x6   : > { %226 = sbr.rel (%p223_p2) target bundleno = 287 (0x11f), region = 44  ;;  %419 = vmatprep.mubr.f32.mxu0 (!%p223_p2), %v1180_v0  ;;  %490 = vmatprep.mubr.f32.mxu1 (!%p223_p2), %v1180_v0  ;;  %v644_v3 = vld [vmem:[%s1373_s5] sm:$0xff] (!%p223_p2)  ;;  %vm658_vm2 = vcmask (!%p223_p2), 31744  }
   0x7   : > { %1167 = vset.pattern.permute.xlu0 (!%p223_p2), %v1181_v2  ;;  %v1283_v59 = vld [vmem:[%s1369_s1] sm:$0xff] (!%p223_p2) }
   0x8   : > { %348 = vperm.xlu0 (!%p223_p2), %1167, %v345_v1  }
   0xc   : > { %647 = vperm.xlu0 (!%p223_p2), %1167, %v644_v3  }
   0xd   : > { %s1376_s22 = smov (!%p257_p3, %s1062_s22), 1 }
   0xe   : > { %s1156_s25 = smul.u32 576, %s1376_s22  ;;  %s1090_s9 = sshll.u32 %s1376_s22, 5 }
   0xf   : > { %s266_s12 = scalar_lea.vmem %s1371_s3, %s1090_s9  ;;  %s1091_s15 = sshll.u32 %s1376_s22, 6 }
  0x10   : > { %s1239_s30 = scalar_lea.vmem %s1368_s0, %s1156_s25  ;;  %s1355_s18 = scalar_lea.vmem %s1374_s6, %s1091_s15 }
  0x11   : > { %v274_v4 = vld [vmem:[%s1239_s30 + $0x8] sm:$0xff]  ;;  %v276_v6 = vld [vmem:[%s1239_s30 + $0x18] sm:$0xff]  ;;  %v273_v9 = vld [vmem:[%s1239_s30] sm:$0xff] }
  0x12   : > { %v282_v5 = vld [vmem:[%s1239_s30 + $0x48] sm:$0xff]  ;;  %v284_v8 = vld [vmem:[%s1239_s30 + $0x58] sm:$0xff]  ;;  %v281_v10 = vld [vmem:[%s1239_s30 + $0x40] sm:$0xff] }
  0x13   : > { %v1092_v7 = vpack.c.bf16 %v282_v5, %v274_v4  ;;  %v1108_v11 = vpack.c.bf16 %v284_v8, %v276_v6  ;;  %v1094_v12 = vpack.c.bf16 %v281_v10, %v273_v9  ;;  %v275_v13 = vld [vmem:[%s1239_s30 + $0x10] sm:$0xff]  ;;  %v290_v15 = vld [vmem:[%s1239_s30 + $0x88] sm:$0xff]  ;;  %v292_v18 = vld [vmem:[%s1239_s30 + $0x98] sm:$0xff] }
  0x14   : > { %v283_v14 = vld [vmem:[%s1239_s30 + $0x50] sm:$0xff]  ;;  %v298_v17 = vld [vmem:[%s1239_s30 + $0xc8] sm:$0xff]  ;;  %v300_v19 = vld [vmem:[%s1239_s30 + $0xd8] sm:$0xff] }
  0x15   : > { %1093 = vmatprep.subr.bf16.mxu0 %v1092_v7  ;;  %v1110_v16 = vpack.c.bf16 %v283_v14, %v275_v13  ;;  %1109 = vmatprep.subr.bf16.mxu1 %v1108_v11  ;;  %v1096_v20 = vpack.c.bf16 %v298_v17, %v290_v15  ;;  %v1112_v21 = vpack.c.bf16 %v300_v19, %v292_v18  ;;  %v289_v22 = vld [vmem:[%s1239_s30 + $0x80] sm:$0xff]  ;;  %v291_v24 = vld [vmem:[%s1239_s30 + $0x90] sm:$0xff]  ;;  %v306_v27 = vld [vmem:[%s1239_s30 + $0x108] sm:$0xff] }
  0x16   : > { %1095 = vmatpush1.bf16.msra.mxu0 %v1094_v12  ;;  %v297_v23 = vld [vmem:[%s1239_s30 + $0xc0] sm:$0xff]  ;;  %v299_v26 = vld [vmem:[%s1239_s30 + $0xd0] sm:$0xff]  ;;  %v314_v28 = vld [vmem:[%s1239_s30 + $0x148] sm:$0xff] }
  0x17   : > { %1111 = vmatpush1.bf16.msra.mxu1 %v1110_v16  ;;  %v1098_v25 = vpack.c.bf16 %v297_v23, %v289_v22  ;;  %1097 = vmatprep.subr.bf16.mxu0 %v1096_v20  ;;  %v1114_v29 = vpack.c.bf16 %v299_v26, %v291_v24  ;;  %v1100_v30 = vpack.c.bf16 %v314_v28, %v306_v27  ;;  %v308_v31 = vld [vmem:[%s1239_s30 + $0x118] sm:$0xff]  ;;  %v305_v33 = vld [vmem:[%s1239_s30 + $0x100] sm:$0xff]  ;;  %v307_v36 = vld [vmem:[%s1239_s30 + $0x110] sm:$0xff] }
  0x18   : > { %1113 = vmatprep.subr.bf16.mxu1 %v1112_v21  ;;  %v316_v32 = vld [vmem:[%s1239_s30 + $0x158] sm:$0xff]  ;;  %v313_v35 = vld [vmem:[%s1239_s30 + $0x140] sm:$0xff]  ;;  %v315_v37 = vld [vmem:[%s1239_s30 + $0x150] sm:$0xff] }
  0x19   : > { %v1116_v34 = vpack.c.bf16 %v316_v32, %v308_v31  ;;  %v1102_v38 = vpack.c.bf16 %v313_v35, %v305_v33  ;;  %v322_v39 = vld [vmem:[%s1239_s30 + $0x188] sm:$0xff]  ;;  %v324_v41 = vld [vmem:[%s1239_s30 + $0x198] sm:$0xff]  ;;  %v1118_v42 = vpack.c.bf16 %v315_v37, %v307_v36  ;;  %v321_v45 = vld [vmem:[%s1239_s30 + $0x180] sm:$0xff] }
  0x1a   : > { %1099 = vmatpush1.bf16.msra.mxu0 %v1098_v25  ;;  %v330_v40 = vld [vmem:[%s1239_s30 + $0x1c8] sm:$0xff]  ;;  %v332_v44 = vld [vmem:[%s1239_s30 + $0x1d8] sm:$0xff]  ;;  %v329_v46 = vld [vmem:[%s1239_s30 + $0x1c0] sm:$0xff] }
  0x1b   : > { %1115 = vmatpush1.bf16.msra.mxu1 %v1114_v29  ;;  %1101 = vmatprep.subr.bf16.mxu0 %v1100_v30  ;;  %v1104_v43 = vpack.c.bf16 %v330_v40, %v322_v39  ;;  %v1120_v47 = vpack.c.bf16 %v332_v44, %v324_v41  ;;  %v323_v48 = vld [vmem:[%s1239_s30 + $0x190] sm:$0xff]  ;;  %v1106_v50 = vpack.c.bf16 %v329_v46, %v321_v45  ;;  %v338_v52 = vld [vmem:[%s1239_s30 + $0x208] sm:$0xff]  ;;  %v340_v53 = vld [vmem:[%s1239_s30 + $0x218] sm:$0xff] }
  0x1c   : > { %1117 = vmatprep.subr.bf16.mxu1 %v1116_v34  ;;  %v331_v49 = vld [vmem:[%s1239_s30 + $0x1d0] sm:$0xff]  ;;  %v278_v54 = vld [vmem:[%s1239_s30 + $0x28] sm:$0xff]  ;;  %v337_v55 = vld [vmem:[%s1239_s30 + $0x200] sm:$0xff] }
  0x1d   : > { %v1122_v51 = vpack.c.bf16 %v331_v49, %v323_v48  ;;  %v286_v56 = vld [vmem:[%s1239_s30 + $0x68] sm:$0xff]  ;;  %v280_v57 = vld [vmem:[%s1239_s30 + $0x38] sm:$0xff]  ;;  %v277_v60 = vld [vmem:[%s1239_s30 + $0x20] sm:$0xff] }
  0x1e   : > { %1103 = vmatpush1.bf16.msra.mxu0 %v1102_v38  ;;  %v288_v58 = vld [vmem:[%s1239_s30 + $0x78] sm:$0xff]  ;;  %v285_v61 = vld [vmem:[%s1239_s30 + $0x60] sm:$0xff]  ;;  %v279_v62 = vld [vmem:[%s1239_s30 + $0x30] sm:$0xff]  ;;  %v1124_v4 = vpack.c.bf16 %v286_v56, %v278_v54 }
  0x1f   : > { %1119 = vmatpush1.bf16.msra.mxu1 %v1118_v42  ;;  %1105 = vmatprep.subr.bf16.mxu0 %v1104_v43  ;;  %v287_v63 = vld [vmem:[%s1239_s30 + $0x70] sm:$0xff]  ;;  %v294_v1 = vld [vmem:[%s1239_s30 + $0xa8] sm:$0xff]  ;;  %v296_v5 = vld [vmem:[%s1239_s30 + $0xb8] sm:$0xff]  ;;  %v1140_v7 = vpack.c.bf16 %v288_v58, %v280_v57  ;;  %v1126_v8 = vpack.c.bf16 %v285_v61, %v277_v60 }
  0x20   : > { %1121 = vmatprep.subr.bf16.mxu1 %v1120_v47  ;;  %v302_v2 = vld [vmem:[%s1239_s30 + $0xe8] sm:$0xff]  ;;  %v339_v3 = vld [vmem:[%s1239_s30 + $0x210] sm:$0xff]  ;;  %v304_v6 = vld [vmem:[%s1239_s30 + $0xf8] sm:$0xff]  ;;  %v1142_v9 = vpack.c.bf16 %v287_v63, %v279_v62 }
  0x21   : > { %v1128_v10 = vpack.c.bf16 %v302_v2, %v294_v1  ;;  %v293_v11 = vld [vmem:[%s1239_s30 + $0xa0] sm:$0xff]  ;;  %v295_v13 = vld [vmem:[%s1239_s30 + $0xb0] sm:$0xff]  ;;  %v1144_v14 = vpack.c.bf16 %v304_v6, %v296_v5  ;;  %v310_v16 = vld [vmem:[%s1239_s30 + $0x128] sm:$0xff] }
  0x22   : > { %1107 = vmatpush1.bf16.msra.mxu0 %v1106_v50  ;;  %v301_v12 = vld [vmem:[%s1239_s30 + $0xe0] sm:$0xff]  ;;  %v303_v15 = vld [vmem:[%s1239_s30 + $0xf0] sm:$0xff]  ;;  %v318_v17 = vld [vmem:[%s1239_s30 + $0x168] sm:$0xff] }
  0x23   : > { %1123 = vmatpush1.bf16.msra.mxu1 %v1122_v51  ;;  %371 = vmatprep.subr.mxu0 %v338_v52  ;;  %v312_v18 = vld [vmem:[%s1239_s30 + $0x138] sm:$0xff]  ;;  %v1130_v20 = vpack.c.bf16 %v301_v12, %v293_v11  ;;  %v1146_v21 = vpack.c.bf16 %v303_v15, %v295_v13  ;;  %v1132_v22 = vpack.c.bf16 %v318_v17, %v310_v16  ;;  %v309_v23 = vld [vmem:[%s1239_s30 + $0x120] sm:$0xff]  ;;  %v311_v25 = vld [vmem:[%s1239_s30 + $0x130] sm:$0xff] }
  0x24   : > { %442 = vmatprep.subr.mxu1 %v340_v53  ;;  %v320_v19 = vld [vmem:[%s1239_s30 + $0x178] sm:$0xff]  ;;  %v317_v24 = vld [vmem:[%s1239_s30 + $0x160] sm:$0xff]  ;;  %v319_v27 = vld [vmem:[%s1239_s30 + $0x170] sm:$0xff] }
  0x25   : > { %v1148_v26 = vpack.c.bf16 %v320_v19, %v312_v18  ;;  %v326_v28 = vld [vmem:[%s1239_s30 + $0x1a8] sm:$0xff]  ;;  %v328_v30 = vld [vmem:[%s1239_s30 + $0x1b8] sm:$0xff]  ;;  %v1134_v32 = vpack.c.bf16 %v317_v24, %v309_v23  ;;  %v1150_v33 = vpack.c.bf16 %v319_v27, %v311_v25  ;;  %v325_v35 = vld [vmem:[%s1239_s30 + $0x1a0] sm:$0xff] }
  0x26   : > { %372 = vmatpush1.msra.mxu0 %v337_v55  ;;  %v334_v29 = vld [vmem:[%s1239_s30 + $0x1e8] sm:$0xff]  ;;  %v336_v31 = vld [vmem:[%s1239_s30 + $0x1f8] sm:$0xff]  ;;  %v333_v36 = vld [vmem:[%s1239_s30 + $0x1e0] sm:$0xff] }
  0x27   : > { %443 = vmatpush1.msra.mxu1 %v339_v3  ;;  %1072 = vmatmul.mubr.msk.f32.vlgmr.msra.gmra.mrb[0].mxu0 %vm351_vm0, %v1283_v59  ;;  %v1136_v34 = vpack.c.bf16 %v334_v29, %v326_v28  ;;  %v1152_v37 = vpack.c.bf16 %v336_v31, %v328_v30  ;;  %v327_v38 = vld [vmem:[%s1239_s30 + $0x1b0] sm:$0xff]  ;;  %v1138_v40 = vpack.c.bf16 %v333_v36, %v325_v35  ;;  %v342_v42 = vld [vmem:[%s1239_s30 + $0x228] sm:$0xff]  ;;  %v344_v43 = vld [vmem:[%s1239_s30 + $0x238] sm:$0xff] }
  0x28   : > { %1073 = vmatmul.mubr.msk.f32.vlgmr.msra.gmra.mrb[0].mxu1 %vm351_vm0, %v1283_v59  ;;  %1125 = vmatprep.subr.bf16.mxu0 %v1124_v4  ;;  %v335_v39 = vld [vmem:[%s1239_s30 + $0x1f0] sm:$0xff]  ;;  %v640_v44 = vld [vmem:[%s266_s12] sm:$0xff]  ;;  %v641_v45 = vld [vmem:[%s266_s12 + $0x8] sm:$0xff] }
  0x29   : > { %1141 = vmatprep.subr.bf16.mxu1 %v1140_v7  ;;  %1127 = vmatpush1.bf16.msra.mxu0 %v1126_v8  ;;  %v1154_v41 = vpack.c.bf16 %v335_v39, %v327_v38  ;;  %v341_v46 = vld [vmem:[%s1239_s30 + $0x220] sm:$0xff]  ;;  %v343_v47 = vld [vmem:[%s1239_s30 + $0x230] sm:$0xff]  ;;  %v654_v48 = vcombine.high %v640_v44, %v640_v44  ;;  %v655_v49 = vcombine.high %v641_v45, %v641_v45  ;;  %v643_v51 = vld [vmem:[%s266_s12 + $0x18] sm:$0xff] }
  0x2a   : > { %1143 = vmatpush1.bf16.msra.mxu1 %v1142_v9  ;;  %1129 = vmatprep.subr.bf16.mxu0 %v1128_v10  ;;  %v642_v50 = vld [vmem:[%s266_s12 + $0x10] sm:$0xff]  ;;  %v639_v52 = vld [vmem:[%s1372_s4] sm:$0xff]  ;;  %v657_v54 = vcombine.high %v643_v51, %v643_v51 }
  0x2b   : > { %1145 = vmatprep.subr.bf16.mxu1 %v1144_v14  ;;  %561 = vmatprep.mubr.f32.mxu0 %v1180_v0  ;;  %v656_v53 = vcombine.high %v642_v50, %v642_v50 }
  0x2c   : > { %632 = vmatprep.mubr.f32.mxu1 %v1180_v0 }
  0x2d   : > { %1131 = vmatpush1.bf16.msra.mxu0 %v1130_v20 }
  0x2e   : > { %1147 = vmatpush1.bf16.msra.mxu1 %v1146_v21  ;;  %1133 = vmatprep.subr.bf16.mxu0 %v1132_v22 }
  0x2f   : > { %1149 = vmatprep.subr.bf16.mxu1 %v1148_v26 }
  0x31   : > { %1135 = vmatpush1.bf16.msra.mxu0 %v1134_v32 }
  0x32   : > { %1151 = vmatpush1.bf16.msra.mxu1 %v1150_v33  ;;  %1137 = vmatprep.subr.bf16.mxu0 %v1136_v34 }
  0x33   : > { %1153 = vmatprep.subr.bf16.mxu1 %v1152_v37 }
  0x35   : > { %1139 = vmatpush1.bf16.msra.mxu0 %v1138_v40 }
  0x36   : > { %1155 = vmatpush1.bf16.msra.mxu1 %v1154_v41  ;;  %513 = vmatprep.subr.mxu0 %v342_v42 }
  0x37   : > { %584 = vmatprep.subr.mxu1 %v344_v43 }
  0x39   : > { %514 = vmatpush1.msra.mxu0 %v341_v46 }
  0x3a   : > { %585 = vmatpush1.msra.mxu1 %v343_v47  ;;  %1074 = vmatmul.mubr.msk.f32.vlgmr.msra.gmra.mrb[2].mxu0 %vm351_vm0, %v1283_v59 }
  0x3b   : > { %1075 = vmatmul.mubr.msk.f32.vlgmr.msra.gmra.mrb[2].mxu1 %vm351_vm0, %v1283_v59  ;;  %1076 = vmatprep.subr.msk.mxu0 %vm662_vm1, %v654_v48 }
  0x3c   : > { %1079 = vmatprep.subr.msk.mxu1 %vm662_vm1, %v655_v49  ;;  %1077 = vmatpush1.msk.msra.mxu0 %vm662_vm1, %v640_v44 }
  0x3d   : > { %1080 = vmatpush1.msk.msra.mxu1 %vm662_vm1, %v641_v45  ;;  %743 = vmatprep.mubr.f32.mxu0 %v1180_v0 }
  0x3e   : > { %814 = vmatprep.mubr.f32.mxu1 %v1180_v0  ;;  %1078 = vmatmul.mubr.msk.f32.vlgmr.msra.gmra.mrb[4].mxu0 %vm658_vm2, %v639_v52 }
  0x3f   : > { %1081 = vmatmul.mubr.msk.f32.vlgmr.msra.gmra.mrb[4].mxu1 %vm658_vm2, %v639_v52  ;;  %1082 = vmatprep.subr.msk.mxu0 %vm662_vm1, %v656_v53 }
  0x40   : > { %1085 = vmatprep.subr.msk.mxu1 %vm662_vm1, %v657_v54  ;;  %1083 = vmatpush1.msk.msra.mxu0 %vm662_vm1, %v642_v50 }
  0x41   : > { %1086 = vmatpush1.msk.msra.mxu1 %vm662_vm1, %v643_v51  ;;  %885 = vmatprep.mubr.f32.mxu0 %v1180_v0 }
  0x42   : > { %956 = vmatprep.mubr.f32.mxu1 %v1180_v0  ;;  %1084 = vmatmul.mubr.msk.f32.vlgmr.msra.gmra.mrb[6].mxu0 %vm658_vm2, %v639_v52 }
  0x43   : > { %1087 = vmatmul.mubr.msk.f32.vlgmr.msra.gmra.mrb[6].mxu1 %vm658_vm2, %v639_v52 }
  0x87   : > { %v349_v59 = vpop.permute.xlu0 %348 }
  0x8b   : > { %v648_v3 = vpop.permute.xlu0 %647 }
  0xfa   : > { %v421_v55 = vpop.f32.mrb[0].mxu0 }
  0xfb   : > { %v492_v56 = vpop.f32.mrb[0].mxu1  ;;  %v423_v57 = vpop.f32.mrb[1].mxu0  ;;  %v422_v63 = vadd.f32 %v421_v55, %v349_v59 }
  0xfc   : > { %v494_v58 = vpop.f32.mrb[1].mxu1  ;;  %v424_v1 = vadd.f32 %v423_v57, %v349_v59  ;;  %v493_v4 = vadd.f32 %v492_v56, %v349_v59 }
  0xfd   : > { %v495_v5 = vadd.f32 %v494_v58, %v349_v59  ;;  %v963_v7 = vmax.f32 %v422_v63, 0.0 }
  0xfe   : > { %v964_v10 = vmax.f32 %v424_v1, 0.0  ;;  %v965_v12 = vmax.f32 %v493_v4, 0.0 }
  0xff   : > { %v966_v15 = vmax.f32 %v495_v5, 0.0 }
 0x10d   : > { %v563_v60 = vpop.f32.mrb[2].mxu0 }
 0x10e   : > { %v634_v61 = vpop.f32.mrb[2].mxu1  ;;  %v565_v62 = vpop.f32.mrb[3].mxu0  ;;  %v564_v16 = vadd.f32 %v563_v60, %v349_v59 }
 0x10f   : > { %v636_v2 = vpop.f32.mrb[3].mxu1  ;;  %v635_v19 = vadd.f32 %v634_v61, %v349_v59  ;;  %v566_v20 = vadd.f32 %v565_v62, %v349_v59 }
 0x110   : > { %v637_v24 = vadd.f32 %v636_v2, %v349_v59  ;;  %v967_v35 = vmax.f32 %v564_v16, 0.0 }
 0x111   : > { %v745_v0 = vpop.f32.mrb[4].mxu0  ;;  %v969_v39 = vmax.f32 %v635_v19, 0.0  ;;  %v968_v40 = vmax.f32 %v566_v20, 0.0 }
 0x112   : > { %v746_v6 = vadd.f32 %v745_v0, %v648_v3  ;;  %v816_v8 = vpop.f32.mrb[4].mxu1  ;;  %v747_v9 = vpop.f32.mrb[5].mxu0  ;;  %v970_v43 = vmax.f32 %v637_v24, 0.0 }
 0x113   : > { %v817_v11 = vadd.f32 %v816_v8, %v648_v3  ;;  %v748_v13 = vadd.f32 %v747_v9, %v648_v3  ;;  %v818_v14 = vpop.f32.mrb[5].mxu1 }
 0x114   : > { %v971_v17 = vmax.f32 %v746_v6, 0.0  ;;  %v819_v18 = vadd.f32 %v818_v14, %v648_v3 }
 0x115   : > { %v973_v21 = vmax.f32 %v817_v11, 0.0  ;;  %v972_v22 = vmax.f32 %v748_v13, 0.0  ;;  %v887_v23 = vpop.f32.mrb[6].mxu0 }
 0x116   : > { %v979_v25 = vadd.f32 %v971_v17, %v963_v7  ;;  %v974_v26 = vmax.f32 %v819_v18, 0.0  ;;  %v888_v27 = vadd.f32 %v887_v23, %v648_v3  ;;  %v958_v28 = vpop.f32.mrb[6].mxu1  ;;  %v889_v29 = vpop.f32.mrb[7].mxu0 }
 0x117   : > { %v981_v30 = vadd.f32 %v973_v21, %v965_v12  ;;  %v980_v31 = vadd.f32 %v972_v22, %v964_v10  ;;  %v959_v32 = vadd.f32 %v958_v28, %v648_v3  ;;  %v890_v33 = vadd.f32 %v889_v29, %v648_v3  ;;  %v960_v34 = vpop.f32.mrb[7].mxu1 }
 0x118   : > { %987 = vst [vmem:[%s1355_s18] sm:$0xff] %v979_v25  ;;  %v982_v36 = vadd.f32 %v974_v26, %v966_v15  ;;  %v975_v37 = vmax.f32 %v888_v27, 0.0  ;;  %v961_v38 = vadd.f32 %v960_v34, %v648_v3 }
 0x119   : > { %989 = vst [vmem:[%s1355_s18 + $0x10] sm:$0xff] %v981_v30  ;;  %988 = vst [vmem:[%s1355_s18 + $0x8] sm:$0xff] %v980_v31  ;;  %v977_v41 = vmax.f32 %v959_v32, 0.0  ;;  %v976_v42 = vmax.f32 %v890_v33, 0.0 }
 0x11a   : > { %990 = vst [vmem:[%s1355_s18 + $0x18] sm:$0xff] %v982_v36  ;;  %v983_v44 = vadd.f32 %v975_v37, %v967_v35  ;;  %v978_v45 = vmax.f32 %v961_v38, 0.0 }
 0x11b   : > { %v985_v46 = vadd.f32 %v977_v41, %v969_v39  ;;  %v984_v47 = vadd.f32 %v976_v42, %v968_v40 }
 0x11c   : > { %991 = vst [vmem:[%s1355_s18 + $0x20] sm:$0xff] %v983_v44  ;;  %v986_v48 = vadd.f32 %v978_v45, %v970_v43 }
 0x11d   : > { %993 = vst [vmem:[%s1355_s18 + $0x30] sm:$0xff] %v985_v46  ;;  %992 = vst [vmem:[%s1355_s18 + $0x28] sm:$0xff] %v984_v47 }
 0x11e   : > { %994 = vst [vmem:[%s1355_s18 + $0x38] sm:$0xff] %v986_v48 }
 0x11f PF: > { %s16_s21 = sadd.s32 1, %s1178_s21  }
 0x120   : > { %p13_p4 = scmp.ge.s32.totalorder %s16_s21, 4  }
 0x122   :  { %15 = sbr.rel (!%p13_p4) target bundleno = 1 (0x1), region = 77 }

// kernel: _lambda_.20
= control target key start
LH: loop header
LB: loop body
LE: loop exit
PB: predicated region body
PF: predicated region fallthrough
CT: control target
= control target key end

     0   :  { %s431_s12 = smov 0   ;;  %s484_s0 = inlined_call_operand.vmem [shape: f32[2,72,256], index: 0, kind: input, shape index: {}]   ;;  %s485_s1 = inlined_call_operand.vmem [shape: f32[16,72], index: 1, kind: input, shape index: {}]   ;;  %s486_s2 = inlined_call_operand.vmem [shape: f32[16,1], index: 2, kind: input, shape index: {}]   ;;  %s487_s3 = inlined_call_operand.vmem [shape: f32[2,16,256], index: 3, kind: output, shape index: {}]  }
   0x1 LB: > { %s350_s13 = sadd.s32 4294967295, %s407_s12   ;;  %p354_p0 = scmp.ge.s32.totalorder %s407_s12, 1  ;;  %s407_s12 = sphi %s431_s12, %s13_s12  }
   0x2   : > { %p137_p1 = scmp.lt.s32.totalorder %s407_s12, 3 }
   0x4   : > { %p138_p2 = pnand %p354_p0, %p137_p1 }
   0x5   : > { %p161_p3 = scmp.lt.s32.totalorder (!%p138_p2), %s350_s13, 1  ;;  %v409_v0 = vmov (!%p138_p2), 0.0   ;;  %v191_v1 = vld [vmem:[%s486_s2] sm:$0xff] (!%p138_p2)  ;;  %v410_v2 = vmov (!%p138_p2), 0   ;;  %v192_v3 = vld [vmem:[%s486_s2 + $0x8] sm:$0xff] (!%p138_p2)  ;;  %vm203_vm0 = vcmask (!%p138_p2), 588800  }
   0x6   : > { %141 = sbr.rel (%p138_p2) target bundleno = 256 (0x100), region = 32  ;;  %274 = vmatprep.mubr.f32.mxu0 (!%p138_p2), %v409_v0  ;;  %280 = vmatprep.mubr.f32.mxu1 (!%p138_p2), %v409_v0  ;;  %v171_v30 = vld [vmem:[%s485_s1] sm:$0xff] (!%p138_p2)  ;;  %v172_v31 = vld [vmem:[%s485_s1 + $0x8] sm:$0xff] (!%p138_p2) }
   0x7   : > { %400 = vset.pattern.permute.xlu0 (!%p138_p2), %v410_v2 }
   0x8   : > { %195 = vperm.xlu0 (!%p138_p2), %400, %v191_v1  }
   0xc   : > { %200 = vperm.xlu0 (!%p138_p2), %400, %v192_v3  }
   0xd   : > { %s489_s13 = smov (!%p161_p3, %s350_s13), 1 }
   0xe   : > { %s389_s16 = smul.u32 144, %s489_s13  ;;  %s362_s26 = sshll.u32 %s489_s13, 5 }
   0xf   : > { %s170_s29 = scalar_lea.vmem %s487_s3, %s362_s26 }
  0x10   : > { %s451_s21 = scalar_lea.vmem %s484_s0, %s389_s16 }
  0x11   : > { %v174_v4 = vld [vmem:[%s451_s21 + $0x8] sm:$0xff]  ;;  %v176_v5 = vld [vmem:[%s451_s21 + $0x18] sm:$0xff]  ;;  %v173_v6 = vld [vmem:[%s451_s21] sm:$0xff] }
  0x12   : > { %v363_v7 = vpack.c.bf16 %v176_v5, %v174_v4  ;;  %v175_v8 = vld [vmem:[%s451_s21 + $0x10] sm:$0xff]  ;;  %v178_v9 = vld [vmem:[%s451_s21 + $0x28] sm:$0xff]  ;;  %v180_v10 = vld [vmem:[%s451_s21 + $0x38] sm:$0xff] }
  0x13   : > { %v365_v11 = vpack.c.bf16 %v175_v8, %v173_v6  ;;  %v367_v12 = vpack.c.bf16 %v180_v10, %v178_v9  ;;  %v177_v13 = vld [vmem:[%s451_s21 + $0x20] sm:$0xff]  ;;  %v179_v14 = vld [vmem:[%s451_s21 + $0x30] sm:$0xff]  ;;  %v182_v15 = vld [vmem:[%s451_s21 + $0x48] sm:$0xff] }
  0x14   : > { %364 = vmatprep.subr.bf16.mxu0 %v363_v7  ;;  %379 = vmatprep.subr.bf16.mxu1 %v363_v7  ;;  %v184_v16 = vld [vmem:[%s451_s21 + $0x58] sm:$0xff]  ;;  %v369_v17 = vpack.c.bf16 %v179_v14, %v177_v13  ;;  %v181_v19 = vld [vmem:[%s451_s21 + $0x40] sm:$0xff]  ;;  %v183_v20 = vld [vmem:[%s451_s21 + $0x50] sm:$0xff] }
  0x15   : > { %366 = vmatpush1.bf16.msra.mxu0 %v365_v11  ;;  %384 = vmatpush1.bf16.msra.mxu1 %v365_v11  ;;  %v371_v18 = vpack.c.bf16 %v184_v16, %v182_v15  ;;  %v186_v21 = vld [vmem:[%s451_s21 + $0x68] sm:$0xff]  ;;  %v188_v22 = vld [vmem:[%s451_s21 + $0x78] sm:$0xff]  ;;  %v373_v23 = vpack.c.bf16 %v183_v20, %v181_v19  ;;  %v185_v25 = vld [vmem:[%s451_s21 + $0x60] sm:$0xff] }
  0x16   : > { %368 = vmatprep.subr.bf16.mxu0 %v367_v12  ;;  %380 = vmatprep.subr.bf16.mxu1 %v367_v12  ;;  %v375_v24 = vpack.c.bf16 %v188_v22, %v186_v21  ;;  %v187_v26 = vld [vmem:[%s451_s21 + $0x70] sm:$0xff]  ;;  %v190_v28 = vld [vmem:[%s451_s21 + $0x88] sm:$0xff]  ;;  %v189_v29 = vld [vmem:[%s451_s21 + $0x80] sm:$0xff] }
  0x17   : > { %v377_v27 = vpack.c.bf16 %v187_v26, %v185_v25 }
  0x19   : > { %370 = vmatpush1.bf16.msra.mxu0 %v369_v17  ;;  %385 = vmatpush1.bf16.msra.mxu1 %v369_v17 }
  0x1a   : > { %372 = vmatprep.subr.bf16.mxu0 %v371_v18  ;;  %381 = vmatprep.subr.bf16.mxu1 %v371_v18 }
  0x1d   : > { %374 = vmatpush1.bf16.msra.mxu0 %v373_v23  ;;  %386 = vmatpush1.bf16.msra.mxu1 %v373_v23 }
  0x1e   : > { %376 = vmatprep.subr.bf16.mxu0 %v375_v24  ;;  %382 = vmatprep.subr.bf16.mxu1 %v375_v24 }
  0x21   : > { %378 = vmatpush1.bf16.msra.mxu0 %v377_v27  ;;  %387 = vmatpush1.bf16.msra.mxu1 %v377_v27 }
  0x22   : > { %226 = vmatprep.subr.mxu0 %v190_v28  ;;  %383 = vmatprep.subr.mxu1 %v190_v28 }
  0x25   : > { %227 = vmatpush1.msra.mxu0 %v189_v29  ;;  %388 = vmatpush1.msra.mxu1 %v189_v29 }
  0x26   : > { %358 = vmatmul.mubr.msk.f32.vlgmr.msra.gmra.mrb[0].mxu0 %vm203_vm0, %v171_v30  ;;  %359 = vmatmul.mubr.msk.f32.vlgmr.msra.gmra.mrb[0].mxu1 %vm203_vm0, %v172_v31 }
  0x87   : > { %v196_v32 = vpop.permute.xlu0 %195 }
  0x8b   : > { %v201_v33 = vpop.permute.xlu0 %200 }
  0xf9   : > { %v276_v34 = vpop.f32.mrb[0].mxu0  ;;  %v282_v35 = vpop.f32.mrb[0].mxu1 }
  0xfa   : > { %v277_v36 = vadd.f32 %v276_v34, %v196_v32  ;;  %v283_v37 = vadd.f32 %v282_v35, %v201_v33  ;;  %v278_v38 = vpop.f32.mrb[1].mxu0  ;;  %v284_v39 = vpop.f32.mrb[1].mxu1 }
  0xfb   : > { %v279_v40 = vadd.f32 %v278_v38, %v196_v32  ;;  %v285_v41 = vadd.f32 %v284_v39, %v201_v33 }
  0xfc   : > { %v287_v42 = vmax.f32 %v277_v36, 0.0  ;;  %v289_v43 = vmax.f32 %v283_v37, 0.0 }
  0xfd   : > { %v288_v44 = vmax.f32 %v279_v40, 0.0  ;;  %v290_v45 = vmax.f32 %v285_v41, 0.0 }
  0xfe   : > { %291 = vst [vmem:[%s170_s29] sm:$0xff] %v287_v42  ;;  %293 = vst [vmem:[%s170_s29 + $0x10] sm:$0xff] %v289_v43 }
  0xff   : > { %292 = vst [vmem:[%s170_s29 + $0x8] sm:$0xff] %v288_v44  ;;  %294 = vst [vmem:[%s170_s29 + $0x18] sm:$0xff] %v290_v45 }
 0x100 PF: > { %s13_s12 = sadd.s32 1, %s407_s12  }
 0x101   : > { %p10_p4 = scmp.ge.s32.totalorder %s13_s12, 4  }
 0x103   :  { %12 = sbr.rel (!%p10_p4) target bundleno = 1 (0x1), region = 62 }

// kernel: _lambda_.21
= control target key start
LH: loop header
LB: loop body
LE: loop exit
PB: predicated region body
PF: predicated region fallthrough
CT: control target
= control target key end

     0   :  { %s703_s21 = smov 0   ;;  %s800_s0 = inlined_call_operand.vmem [shape: f32[2,144,256], index: 0, kind: input, shape index: {}]   ;;  %s801_s1 = inlined_call_operand.vmem [shape: f32[16,144], index: 1, kind: input, shape index: {}]   ;;  %s802_s2 = inlined_call_operand.vmem [shape: f32[16,1], index: 2, kind: input, shape index: {}]   ;;  %s803_s3 = inlined_call_operand.vmem [shape: f32[2,8,256], index: 3, kind: input, shape index: {}]   ;;  %s804_s4 = inlined_call_operand.vmem [shape: f32[16,8], index: 4, kind: input, shape index: {}]   ;;  %s805_s5 = inlined_call_operand.vmem [shape: f32[16,1], index: 5, kind: input, shape index: {}]   ;;  %s806_s6 = inlined_call_operand.vmem [shape: f32[2,16,256], index: 6, kind: output, shape index: {}]  }
   0x1 LB: > { %s591_s22 = sadd.s32 4294967295, %s664_s21   ;;  %p595_p0 = scmp.ge.s32.totalorder %s664_s21, 1  ;;  %s664_s21 = sphi %s703_s21, %s16_s21  }
   0x2   : > { %p222_p1 = scmp.lt.s32.totalorder %s664_s21, 3 }
   0x4   : > { %p223_p2 = pnand %p595_p0, %p222_p1 }
   0x5   : > { %p257_p3 = scmp.lt.s32.totalorder (!%p223_p2), %s591_s22, 1  ;;  %v273_v0 = vld [vmem:[%s801_s1 + $0x8] sm:$0xff] (!%p223_p2)  ;;  %vm324_vm0 = vcmask (!%p223_p2), 130048   ;;  %v666_v1 = vmov (!%p223_p2), 0.0   ;;  %v667_v2 = vmov (!%p223_p2), 0   ;;  %v412_v3 = vld [vmem:[%s805_s5] sm:$0xff] (!%p223_p2) }
   0x6   : > { %226 = sbr.rel (%p223_p2) target bundleno = 280 (0x118), region = 44  ;;  %495 = vmatprep.mubr.f32.mxu1 (!%p223_p2), %v666_v1  ;;  %601 = vmatprep.mubr.msk.f32.mxu0 (!%p223_p2), %vm324_vm0, %v273_v0  ;;  %v312_v4 = vld [vmem:[%s802_s2] sm:$0xff] (!%p223_p2)  ;;  %v413_v5 = vld [vmem:[%s805_s5 + $0x8] sm:$0xff] (!%p223_p2)  ;;  %vm424_vm1 = vcmask (!%p223_p2), 64512  }
   0x7   : > { %657 = vset.pattern.permute.xlu1 (!%p223_p2), %v667_v2  ;;  %656 = vset.pattern.permute.xlu0 (!%p223_p2), %v667_v2  ;;  %v313_v6 = vld [vmem:[%s802_s2 + $0x8] sm:$0xff] (!%p223_p2)  ;;  %v408_v9 = vld [vmem:[%s804_s4] sm:$0xff] (!%p223_p2)  ;;  %v275_v2 = vld [vmem:[%s801_s1 + $0x18] sm:$0xff] (!%p223_p2) }
   0x8   : > { %416 = vperm.xlu1 (!%p223_p2), %657, %v412_v3   ;;  %316 = vperm.xlu0 (!%p223_p2), %656, %v312_v4   ;;  %v409_v23 = vld [vmem:[%s804_s4 + $0x8] sm:$0xff] (!%p223_p2)  ;;  %v274_v3 = vld [vmem:[%s801_s1 + $0x10] sm:$0xff] (!%p223_p2) }
   0xc   : > { %421 = vperm.xlu1 (!%p223_p2), %657, %v413_v5   ;;  %321 = vperm.xlu0 (!%p223_p2), %656, %v313_v6  }
   0xd   : > { %s808_s22 = smov (!%p257_p3, %s591_s22), 1 }
   0xe   : > { %s645_s29 = smul.u32 288, %s808_s22  ;;  %s607_s30 = sshll.u32 %s808_s22, 4 }
   0xf   : > { %s266_s11 = scalar_lea.vmem %s803_s3, %s607_s30 }
  0x10   : > { %s737_s16 = scalar_lea.vmem %s800_s0, %s645_s29  ;;  %v411_v7 = vld [vmem:[%s266_s11 + $0x8] sm:$0xff]  ;;  %v410_v8 = vld [vmem:[%s266_s11] sm:$0xff]  ;;  %s608_s29 = sshll.u32 %s808_s22, 5 }
  0x11   : > { %v277_v10 = vld [vmem:[%s737_s16 + $0x8] sm:$0xff]  ;;  %v279_v11 = vld [vmem:[%s737_s16 + $0x18] sm:$0xff]  ;;  %v276_v12 = vld [vmem:[%s737_s16] sm:$0xff]  ;;  %431 = vmatprep.subr.mxu1 %v411_v7  ;;  %s271_s8 = scalar_lea.vmem %s806_s6, %s608_s29 }
  0x12   : > { %v609_v13 = vpack.c.bf16 %v279_v11, %v277_v10  ;;  %v278_v14 = vld [vmem:[%s737_s16 + $0x10] sm:$0xff]  ;;  %v281_v15 = vld [vmem:[%s737_s16 + $0x28] sm:$0xff]  ;;  %v283_v16 = vld [vmem:[%s737_s16 + $0x38] sm:$0xff]  ;;  %432 = vmatpush1.msra.mxu1 %v410_v8 }
  0x13   : > { %v611_v17 = vpack.c.bf16 %v278_v14, %v276_v12  ;;  %v613_v18 = vpack.c.bf16 %v283_v16, %v281_v15  ;;  %v280_v19 = vld [vmem:[%s737_s16 + $0x20] sm:$0xff]  ;;  %v282_v20 = vld [vmem:[%s737_s16 + $0x30] sm:$0xff]  ;;  %v285_v21 = vld [vmem:[%s737_s16 + $0x48] sm:$0xff]  ;;  %603 = vmatmul.mubr.msk.f32.vlgmr.msra.gmra.mrb[0].mxu1 %vm424_vm1, %v408_v9 }
  0x14   : > { %610 = vmatprep.subr.bf16.mxu0 %v609_v13  ;;  %v287_v22 = vld [vmem:[%s737_s16 + $0x58] sm:$0xff]  ;;  %501 = vmatprep.mubr.f32.mxu1 %v666_v1  ;;  %v615_v24 = vpack.c.bf16 %v282_v20, %v280_v19  ;;  %v284_v26 = vld [vmem:[%s737_s16 + $0x40] sm:$0xff]  ;;  %v286_v27 = vld [vmem:[%s737_s16 + $0x50] sm:$0xff] }
  0x15   : > { %612 = vmatpush1.bf16.msra.mxu0 %v611_v17  ;;  %v617_v25 = vpack.c.bf16 %v287_v22, %v285_v21  ;;  %v289_v28 = vld [vmem:[%s737_s16 + $0x68] sm:$0xff]  ;;  %v291_v29 = vld [vmem:[%s737_s16 + $0x78] sm:$0xff]  ;;  %v619_v30 = vpack.c.bf16 %v286_v27, %v284_v26  ;;  %v288_v32 = vld [vmem:[%s737_s16 + $0x60] sm:$0xff] }
  0x16   : > { %614 = vmatprep.subr.bf16.mxu0 %v613_v18  ;;  %v621_v31 = vpack.c.bf16 %v291_v29, %v289_v28  ;;  %v290_v33 = vld [vmem:[%s737_s16 + $0x70] sm:$0xff]  ;;  %v293_v34 = vld [vmem:[%s737_s16 + $0x88] sm:$0xff]  ;;  %v295_v35 = vld [vmem:[%s737_s16 + $0x98] sm:$0xff] }
  0x17   : > { %604 = vmatmul.mubr.msk.f32.gmra.mrb[2].mxu1 %vm424_vm1, %v409_v23  ;;  %v623_v36 = vpack.c.bf16 %v290_v33, %v288_v32  ;;  %v625_v37 = vpack.c.bf16 %v295_v35, %v293_v34  ;;  %v292_v38 = vld [vmem:[%s737_s16 + $0x80] sm:$0xff]  ;;  %v294_v39 = vld [vmem:[%s737_s16 + $0x90] sm:$0xff]  ;;  %v297_v40 = vld [vmem:[%s737_s16 + $0xa8] sm:$0xff] }
  0x18   : > { %v299_v41 = vld [vmem:[%s737_s16 + $0xb8] sm:$0xff]  ;;  %v627_v42 = vpack.c.bf16 %v294_v39, %v292_v38  ;;  %v296_v44 = vld [vmem:[%s737_s16 + $0xa0] sm:$0xff]  ;;  %v298_v45 = vld [vmem:[%s737_s16 + $0xb0] sm:$0xff] }
  0x19   : > { %616 = vmatpush1.bf16.msra.mxu0 %v615_v24  ;;  %v629_v43 = vpack.c.bf16 %v299_v41, %v297_v40  ;;  %v301_v46 = vld [vmem:[%s737_s16 + $0xc8] sm:$0xff]  ;;  %v303_v47 = vld [vmem:[%s737_s16 + $0xd8] sm:$0xff]  ;;  %v631_v48 = vpack.c.bf16 %v298_v45, %v296_v44  ;;  %v300_v50 = vld [vmem:[%s737_s16 + $0xc0] sm:$0xff] }
  0x1a   : > { %618 = vmatprep.subr.bf16.mxu0 %v617_v25  ;;  %v633_v49 = vpack.c.bf16 %v303_v47, %v301_v46  ;;  %v302_v51 = vld [vmem:[%s737_s16 + $0xd0] sm:$0xff]  ;;  %v305_v52 = vld [vmem:[%s737_s16 + $0xe8] sm:$0xff]  ;;  %v307_v53 = vld [vmem:[%s737_s16 + $0xf8] sm:$0xff] }
  0x1b   : > { %v635_v54 = vpack.c.bf16 %v302_v51, %v300_v50  ;;  %v637_v55 = vpack.c.bf16 %v307_v53, %v305_v52  ;;  %v304_v56 = vld [vmem:[%s737_s16 + $0xe0] sm:$0xff]  ;;  %v306_v57 = vld [vmem:[%s737_s16 + $0xf0] sm:$0xff]  ;;  %v309_v58 = vld [vmem:[%s737_s16 + $0x108] sm:$0xff] }
  0x1c   : > { %v311_v59 = vld [vmem:[%s737_s16 + $0x118] sm:$0xff]  ;;  %v639_v60 = vpack.c.bf16 %v306_v57, %v304_v56  ;;  %v308_v62 = vld [vmem:[%s737_s16 + $0x100] sm:$0xff]  ;;  %v310_v63 = vld [vmem:[%s737_s16 + $0x110] sm:$0xff] }
  0x1d   : > { %620 = vmatpush1.bf16.msra.mxu0 %v619_v30  ;;  %v641_v61 = vpack.c.bf16 %v311_v59, %v309_v58  ;;  %v643_v0 = vpack.c.bf16 %v310_v63, %v308_v62  ;;  %v272_v1 = vld [vmem:[%s801_s1] sm:$0xff] }
  0x1e   : > { %622 = vmatprep.subr.bf16.mxu0 %v621_v31 }
  0x21   : > { %624 = vmatpush1.bf16.msra.mxu0 %v623_v36 }
  0x22   : > { %626 = vmatprep.subr.bf16.mxu0 %v625_v37 }
  0x25   : > { %628 = vmatpush1.bf16.msra.mxu0 %v627_v42 }
  0x26   : > { %630 = vmatprep.subr.bf16.mxu0 %v629_v43 }
  0x29   : > { %632 = vmatpush1.bf16.msra.mxu0 %v631_v48 }
  0x2a   : > { %634 = vmatprep.subr.bf16.mxu0 %v633_v49 }
  0x2d   : > { %636 = vmatpush1.bf16.msra.mxu0 %v635_v54 }
  0x2e   : > { %638 = vmatprep.subr.bf16.mxu0 %v637_v55 }
  0x31   : > { %640 = vmatpush1.bf16.msra.mxu0 %v639_v60 }
  0x32   : > { %642 = vmatprep.subr.bf16.mxu0 %v641_v61 }
  0x35   : > { %644 = vmatpush1.bf16.msra.mxu0 %v643_v0 }
  0x38   : > { %396 = vmatmul.mubr.f32.vlgmr.msra.gmra.mrb[0].mxu0 %v272_v1 }
  0x39   : > { %602 = vmatprep.mubr.msk.f32.mxu0 %vm324_vm0, %v275_v2 }
  0x3c   : > { %402 = vmatmul.mubr.f32.gmra.mrb[2].mxu0 %v274_v3 }
  0x87   : > { %v417_v8 = vpop.permute.xlu1 %416  ;;  %v317_v10 = vpop.permute.xlu0 %316 }
  0x8b   : > { %v422_v13 = vpop.permute.xlu1 %421  ;;  %v322_v21 = vpop.permute.xlu0 %321 }
  0xe6   : > { %v497_v4 = vpop.f32.mrb[0].mxu1 }
  0xe7   : > { %v499_v5 = vpop.f32.mrb[1].mxu1  ;;  %v498_v9 = vadd.f32 %v497_v4, %v417_v8 }
  0xe8   : > { %v500_v11 = vadd.f32 %v499_v5, %v417_v8 }
  0xe9   : > { %v512_v14 = vmax.f32 %v498_v9, 0.0 }
  0xea   : > { %v503_v6 = vpop.f32.mrb[2].mxu1  ;;  %v513_v17 = vmax.f32 %v500_v11, 0.0 }
  0xeb   : > { %v505_v7 = vpop.f32.mrb[3].mxu1  ;;  %v504_v20 = vadd.f32 %v503_v6, %v422_v13 }
  0xec   : > { %v506_v23 = vadd.f32 %v505_v7, %v422_v13 }
  0xed   : > { %v514_v30 = vmax.f32 %v504_v20, 0.0 }
  0xee   : > { %v515_v32 = vmax.f32 %v506_v23, 0.0 }
 0x10b   : > { %v397_v12 = vpop.f32.mrb[0].mxu0 }
 0x10c   : > { %v398_v15 = vadd.f32 %v397_v12, %v317_v10  ;;  %v399_v16 = vpop.f32.mrb[1].mxu0 }
 0x10d   : > { %v400_v18 = vadd.f32 %v399_v16, %v317_v10 }
 0x10e   : > { %v508_v19 = vmax.f32 %v398_v15, 0.0 }
 0x10f   : > { %v509_v22 = vmax.f32 %v400_v18, 0.0  ;;  %v403_v24 = vpop.f32.mrb[2].mxu0 }
 0x110   : > { %v516_v25 = vadd.f32 %v512_v14, %v508_v19  ;;  %v404_v26 = vadd.f32 %v403_v24, %v322_v21  ;;  %v405_v27 = vpop.f32.mrb[3].mxu0 }
 0x111   : > { %v517_v28 = vadd.f32 %v513_v17, %v509_v22  ;;  %v406_v29 = vadd.f32 %v405_v27, %v322_v21 }
 0x112   : > { %520 = vst [vmem:[%s271_s8] sm:$0xff] %v516_v25  ;;  %v510_v31 = vmax.f32 %v404_v26, 0.0 }
 0x113   : > { %521 = vst [vmem:[%s271_s8 + $0x8] sm:$0xff] %v517_v28  ;;  %v511_v33 = vmax.f32 %v406_v29, 0.0 }
 0x114   : > { %v518_v34 = vadd.f32 %v514_v30, %v510_v31 }
 0x115   : > { %v519_v35 = vadd.f32 %v515_v32, %v511_v33 }
 0x116   : > { %522 = vst [vmem:[%s271_s8 + $0x10] sm:$0xff] %v518_v34 }
 0x117   : > { %523 = vst [vmem:[%s271_s8 + $0x18] sm:$0xff] %v519_v35 }
 0x118 PF: > { %s16_s21 = sadd.s32 1, %s664_s21  }
 0x119   : > { %p13_p4 = scmp.ge.s32.totalorder %s16_s21, 4  }
 0x11b   :  { %15 = sbr.rel (!%p13_p4) target bundleno = 1 (0x1), region = 77 }

// kernel: _lambda_.22
= control target key start
LH: loop header
LB: loop body
LE: loop exit
PB: predicated region body
PF: predicated region fallthrough
CT: control target
= control target key end

     0   :  { %s486_s12 = smov 0   ;;  %s589_s0 = inlined_call_operand.vmem [shape: f32[2,144,64], index: 0, kind: input, shape index: {}]   ;;  %s590_s1 = inlined_call_operand.vmem [shape: f32[32,144], index: 1, kind: input, shape index: {}]   ;;  %s591_s2 = inlined_call_operand.vmem [shape: f32[32,1], index: 2, kind: input, shape index: {}]   ;;  %s592_s3 = inlined_call_operand.vmem [shape: f32[2,32,64], index: 3, kind: output, shape index: {}]  }
   0x1 LB: > { %s383_s13 = sadd.s32 4294967295, %s462_s12   ;;  %p387_p0 = scmp.ge.s32.totalorder %s462_s12, 1  ;;  %s462_s12 = sphi %s486_s12, %s13_s12  }
   0x2   : > { %p137_p1 = scmp.lt.s32.totalorder %s462_s12, 3 }
   0x4   : > { %p138_p2 = pnand %p387_p0, %p137_p1 }
   0x5   : > { %p161_p3 = scmp.lt.s32.totalorder (!%p138_p2), %s383_s13, 1  ;;  %v172_v0 = vld [vmem:[%s590_s1 + $0x8] sm:$0xff] (!%p138_p2)  ;;  %vm221_vm0 = vcmask (!%p138_p2), 130048   ;;  %v464_v2 = vmov (!%p138_p2), 0.0|0.0   ;;  %v199_v3 = vld [vmem:[%s591_s2 + $0x10] sm:$0xff] (!%p138_p2)  ;;  %v465_v4 = vmov (!%p138_p2), 0  }
   0x6   : > { %141 = sbr.rel (%p138_p2) target bundleno = 276 (0x114), region = 32  ;;  %v176_v1 = vld [vmem:[%s590_s1 + $0x28] sm:$0xff] (!%p138_p2)  ;;  %398 = vmatprep.subr.bf16.mxu0 (!%p138_p2), %v464_v2  ;;  %425 = vmatprep.subr.bf16.mxu1 (!%p138_p2), %v464_v2  ;;  %v197_v5 = vld [vmem:[%s591_s2] sm:$0xff] (!%p138_p2)  ;;  %v200_v6 = vld [vmem:[%s591_s2 + $0x18] sm:$0xff] (!%p138_p2)  ;;  %vm323_vm1 = vcmask (!%p138_p2), 523264  }
   0x7   : > { %391 = vmatprep.mubr.msk.f32.mxu0 (!%p138_p2), %vm221_vm0, %v172_v0  ;;  %393 = vmatprep.mubr.msk.f32.mxu1 (!%p138_p2), %vm221_vm0, %v176_v1  ;;  %v198_v7 = vld [vmem:[%s591_s2 + $0x8] sm:$0xff] (!%p138_p2)  ;;  %v171_v35 = vld [vmem:[%s590_s1] sm:$0xff] (!%p138_p2)  ;;  %v174_v37 = vld [vmem:[%s590_s1 + $0x18] sm:$0xff] (!%p138_p2) }
   0x8   : > { %455 = vset.pattern.permute.xlu1 (!%p138_p2), %v465_v4  ;;  %454 = vset.pattern.permute.xlu0 (!%p138_p2), %v465_v4  ;;  %v175_v36 = vld [vmem:[%s590_s1 + $0x20] sm:$0xff] (!%p138_p2)  ;;  %v178_v38 = vld [vmem:[%s590_s1 + $0x38] sm:$0xff] (!%p138_p2)  ;;  %v173_v39 = vld [vmem:[%s590_s1 + $0x10] sm:$0xff] (!%p138_p2) }
   0x9   : > { %213 = vperm.xlu1 (!%p138_p2), %455, %v199_v3   ;;  %203 = vperm.xlu0 (!%p138_p2), %454, %v197_v5   ;;  %v177_v40 = vld [vmem:[%s590_s1 + $0x30] sm:$0xff] (!%p138_p2) }
   0xd   : > { %s594_s13 = smov (!%p161_p3, %s383_s13), 1  ;;  %218 = vperm.xlu1 %455, %v200_v6   ;;  %208 = vperm.xlu0 %454, %v198_v7  }
   0xe   : > { %s443_s22 = smul.u32 144, %s594_s13  ;;  %s397_s17 = sshll.u32 %s594_s13, 5 }
   0xf   : > { %s170_s20 = scalar_lea.vmem %s592_s3, %s397_s17 }
  0x10   : > { %s522_s29 = scalar_lea.vmem %s589_s0, %s443_s22 }
  0x11   : > { %v179_v8 = vld [vmem:[%s522_s29] sm:$0xff]  ;;  %v180_v9 = vld [vmem:[%s522_s29 + $0x8] sm:$0xff]  ;;  %v181_v10 = vld [vmem:[%s522_s29 + $0x10] sm:$0xff] }
  0x12   : > { %v399_v11 = vpack.c.bf16 %v180_v9, %v179_v8  ;;  %v182_v12 = vld [vmem:[%s522_s29 + $0x18] sm:$0xff]  ;;  %v183_v14 = vld [vmem:[%s522_s29 + $0x20] sm:$0xff]  ;;  %v184_v15 = vld [vmem:[%s522_s29 + $0x28] sm:$0xff] }
  0x13   : > { %v402_v13 = vpack.c.bf16 %v182_v12, %v181_v10  ;;  %v405_v16 = vpack.c.bf16 %v184_v15, %v183_v14  ;;  %v185_v17 = vld [vmem:[%s522_s29 + $0x30] sm:$0xff]  ;;  %v186_v18 = vld [vmem:[%s522_s29 + $0x38] sm:$0xff]  ;;  %v187_v20 = vld [vmem:[%s522_s29 + $0x40] sm:$0xff] }
  0x14   : > { %400 = vmatpush1.bf16.msra.mxu0 %v399_v11  ;;  %434 = vmatpush1.bf16.msra.mxu1 %v399_v11  ;;  %v408_v19 = vpack.c.bf16 %v186_v18, %v185_v17  ;;  %v188_v21 = vld [vmem:[%s522_s29 + $0x48] sm:$0xff]  ;;  %v189_v23 = vld [vmem:[%s522_s29 + $0x50] sm:$0xff]  ;;  %v190_v24 = vld [vmem:[%s522_s29 + $0x58] sm:$0xff] }
  0x15   : > { %401 = vmatprep.subr.bf16.mxu0 %v464_v2  ;;  %426 = vmatprep.subr.bf16.mxu1 %v464_v2  ;;  %v411_v22 = vpack.c.bf16 %v188_v21, %v187_v20  ;;  %v414_v25 = vpack.c.bf16 %v190_v24, %v189_v23  ;;  %v191_v26 = vld [vmem:[%s522_s29 + $0x60] sm:$0xff]  ;;  %v192_v27 = vld [vmem:[%s522_s29 + $0x68] sm:$0xff]  ;;  %v193_v29 = vld [vmem:[%s522_s29 + $0x70] sm:$0xff] }
  0x16   : > { %v417_v28 = vpack.c.bf16 %v192_v27, %v191_v26  ;;  %v194_v30 = vld [vmem:[%s522_s29 + $0x78] sm:$0xff]  ;;  %v195_v32 = vld [vmem:[%s522_s29 + $0x80] sm:$0xff]  ;;  %v196_v33 = vld [vmem:[%s522_s29 + $0x88] sm:$0xff] }
  0x17   : > { %v420_v31 = vpack.c.bf16 %v194_v30, %v193_v29  ;;  %v423_v34 = vpack.c.bf16 %v196_v33, %v195_v32 }
  0x18   : > { %403 = vmatpush1.bf16.msra.mxu0 %v402_v13  ;;  %435 = vmatpush1.bf16.msra.mxu1 %v402_v13 }
  0x19   : > { %404 = vmatprep.subr.bf16.mxu0 %v464_v2  ;;  %427 = vmatprep.subr.bf16.mxu1 %v464_v2 }
  0x1c   : > { %406 = vmatpush1.bf16.msra.mxu0 %v405_v16  ;;  %436 = vmatpush1.bf16.msra.mxu1 %v405_v16 }
  0x1d   : > { %407 = vmatprep.subr.bf16.mxu0 %v464_v2  ;;  %428 = vmatprep.subr.bf16.mxu1 %v464_v2 }
  0x20   : > { %409 = vmatpush1.bf16.msra.mxu0 %v408_v19  ;;  %437 = vmatpush1.bf16.msra.mxu1 %v408_v19 }
  0x21   : > { %410 = vmatprep.subr.bf16.mxu0 %v464_v2  ;;  %429 = vmatprep.subr.bf16.mxu1 %v464_v2 }
  0x24   : > { %412 = vmatpush1.bf16.msra.mxu0 %v411_v22  ;;  %438 = vmatpush1.bf16.msra.mxu1 %v411_v22 }
  0x25   : > { %413 = vmatprep.subr.bf16.mxu0 %v464_v2  ;;  %430 = vmatprep.subr.bf16.mxu1 %v464_v2 }
  0x28   : > { %415 = vmatpush1.bf16.msra.mxu0 %v414_v25  ;;  %439 = vmatpush1.bf16.msra.mxu1 %v414_v25 }
  0x29   : > { %416 = vmatprep.subr.bf16.mxu0 %v464_v2  ;;  %431 = vmatprep.subr.bf16.mxu1 %v464_v2 }
  0x2c   : > { %418 = vmatpush1.bf16.msra.mxu0 %v417_v28  ;;  %440 = vmatpush1.bf16.msra.mxu1 %v417_v28 }
  0x2d   : > { %419 = vmatprep.subr.bf16.mxu0 %v464_v2  ;;  %432 = vmatprep.subr.bf16.mxu1 %v464_v2 }
  0x30   : > { %421 = vmatpush1.bf16.msra.mxu0 %v420_v31  ;;  %441 = vmatpush1.bf16.msra.mxu1 %v420_v31 }
  0x31   : > { %422 = vmatprep.subr.bf16.mxu0 %v464_v2  ;;  %433 = vmatprep.subr.bf16.mxu1 %v464_v2 }
  0x34   : > { %424 = vmatpush1.bf16.msra.mxu0 %v423_v34  ;;  %442 = vmatpush1.bf16.msra.mxu1 %v423_v34 }
  0x37   : > { %299 = vmatmul.mubr.f32.vlgmr.msra.gmra.mrb[0].mxu0 %v171_v35  ;;  %309 = vmatmul.mubr.f32.vlgmr.msra.gmra.mrb[0].mxu1 %v175_v36 }
  0x38   : > { %392 = vmatprep.mubr.msk.f32.mxu0 %vm221_vm0, %v174_v37  ;;  %394 = vmatprep.mubr.msk.f32.mxu1 %vm221_vm0, %v178_v38 }
  0x3b   : > { %304 = vmatmul.mubr.f32.gmra.mrb[2].mxu0 %v173_v39  ;;  %314 = vmatmul.mubr.f32.gmra.mrb[2].mxu1 %v177_v40 }
  0x88   : > { %v214_v41 = vpop.permute.xlu1 %213  ;;  %v204_v42 = vpop.permute.xlu0 %203 }
  0x8c   : > { %v219_v49 = vpop.permute.xlu1 %218  ;;  %v209_v50 = vpop.permute.xlu0 %208 }
 0x10a   : > { %v300_v43 = vpop.f32.mrb[0].mxu0  ;;  %v310_v44 = vpop.f32.mrb[0].mxu1 }
 0x10b   : > { %v301_v45 = vadd.f32 %v300_v43, %v204_v42  ;;  %v311_v46 = vadd.f32 %v310_v44, %v214_v41  ;;  %v302_v47 = vpop.f32.mrb[1].mxu0  ;;  %v312_v48 = vpop.f32.mrb[1].mxu1 }
 0x10d   : > { %v319_v51 = vmax.f32 %v301_v45, 0.0  ;;  %v321_v52 = vmax.f32 %v311_v46, 0.0 }
 0x10e   : > { %v305_v53 = vpop.f32.mrb[2].mxu0  ;;  %v315_v54 = vpop.f32.mrb[2].mxu1 }
 0x10f   : > { %324 = vst.msk [vmem:[%s170_s20] sm:$0xff] %vm323_vm1, %v319_v51  ;;  %326 = vst.msk [vmem:[%s170_s20 + $0x10] sm:$0xff] %vm323_vm1, %v321_v52  ;;  %v306_v55 = vadd.f32 %v305_v53, %v209_v50  ;;  %v316_v56 = vadd.f32 %v315_v54, %v219_v49  ;;  %v307_v57 = vpop.f32.mrb[3].mxu0  ;;  %v317_v58 = vpop.f32.mrb[3].mxu1 }
 0x111   : > { %v320_v59 = vmax.f32 %v306_v55, 0.0  ;;  %v322_v60 = vmax.f32 %v316_v56, 0.0 }
 0x113   : > { %325 = vst.msk [vmem:[%s170_s20 + $0x8] sm:$0xff] %vm323_vm1, %v320_v59  ;;  %327 = vst.msk [vmem:[%s170_s20 + $0x18] sm:$0xff] %vm323_vm1, %v322_v60 }
 0x114 PF: > { %s13_s12 = sadd.s32 1, %s462_s12  }
 0x115   : > { %p10_p4 = scmp.ge.s32.totalorder %s13_s12, 4  }
 0x117   :  { %12 = sbr.rel (!%p10_p4) target bundleno = 1 (0x1), region = 62 }

// kernel: _lambda_.23
= control target key start
LH: loop header
LB: loop body
LE: loop exit
PB: predicated region body
PF: predicated region fallthrough
CT: control target
= control target key end

     0   :  { %s943_s21 = smov 0   ;;  %s1090_s0 = inlined_call_operand.vmem [shape: f32[2,288,64], index: 0, kind: input, shape index: {}]   ;;  %s1091_s1 = inlined_call_operand.vmem [shape: f32[32,288], index: 1, kind: input, shape index: {}]   ;;  %s1092_s2 = inlined_call_operand.vmem [shape: f32[32,1], index: 2, kind: input, shape index: {}]   ;;  %s1093_s3 = inlined_call_operand.vmem [shape: f32[2,16,64], index: 3, kind: input, shape index: {}]   ;;  %s1094_s4 = inlined_call_operand.vmem [shape: f32[32,16], index: 4, kind: input, shape index: {}]   ;;  %s1095_s5 = inlined_call_operand.vmem [shape: f32[32,1], index: 5, kind: input, shape index: {}]   ;;  %s1096_s6 = inlined_call_operand.vmem [shape: f32[2,32,64], index: 6, kind: output, shape index: {}]  }
   0x1 LB: > { %s739_s22 = sadd.s32 4294967295, %s905_s21   ;;  %p743_p0 = scmp.ge.s32.totalorder %s905_s21, 1  ;;  %s905_s21 = sphi %s943_s21, %s16_s21  }
   0x2   : > { %p222_p1 = scmp.lt.s32.totalorder %s905_s21, 3 }
   0x4   : > { %p223_p2 = pnand %p743_p0, %p222_p1 }
   0x5   : > { %p257_p3 = scmp.lt.s32.totalorder (!%p223_p2), %s739_s22, 1  ;;  %v274_v0 = vld [vmem:[%s1091_s1 + $0x10] sm:$0xff] (!%p223_p2)  ;;  %vm344_vm0 = vcmask (!%p223_p2), 261120   ;;  %v273_v1 = vld [vmem:[%s1091_s1 + $0x8] sm:$0xff] (!%p223_p2)  ;;  %v907_v2 = vmov (!%p223_p2), 0   ;;  %v320_v4 = vld [vmem:[%s1092_s2] sm:$0xff] (!%p223_p2) }
   0x6   : > { %226 = sbr.rel (%p223_p2) target bundleno = 288 (0x120), region = 44  ;;  %827 = vmatprep.mubr.msk.f32.mxu1 (!%p223_p2), %vm344_vm0, %v274_v0  ;;  %421 = vmatprep.mubr.f32.mxu0 (!%p223_p2), %v273_v1  ;;  %v322_v3 = vld [vmem:[%s1092_s2 + $0x10] sm:$0xff] (!%p223_p2)  ;;  %v323_v5 = vld [vmem:[%s1092_s2 + $0x18] sm:$0xff] (!%p223_p2)  ;;  %v321_v41 = vld [vmem:[%s1092_s2 + $0x8] sm:$0xff] (!%p223_p2)  ;;  %vm557_vm1 = vcmask (!%p223_p2), 130048   ;;  %vm667_vm2 = vcmask (!%p223_p2), 523264  }
   0x7   : > { %898 = vset.pattern.permute.xlu1 (!%p223_p2), %v907_v2  ;;  %897 = vset.pattern.permute.xlu0 (!%p223_p2), %v907_v2  ;;  %v534_v42 = vld [vmem:[%s1095_s5 + $0x8] sm:$0xff] (!%p223_p2)  ;;  %v280_v49 = vld [vmem:[%s1091_s1 + $0x40] sm:$0xff] (!%p223_p2)  ;;  %v536_v52 = vld [vmem:[%s1095_s5 + $0x18] sm:$0xff] (!%p223_p2) }
   0x8   : > { %336 = vperm.xlu1 (!%p223_p2), %898, %v322_v3   ;;  %326 = vperm.xlu0 (!%p223_p2), %897, %v320_v4   ;;  %v277_v48 = vld [vmem:[%s1091_s1 + $0x28] sm:$0xff] (!%p223_p2)  ;;  %v533_v51 = vld [vmem:[%s1095_s5] sm:$0xff] (!%p223_p2)  ;;  %v283_v58 = vld [vmem:[%s1091_s1 + $0x58] sm:$0xff] (!%p223_p2) }
   0x9   : > { %v527_v59 = vld [vmem:[%s1094_s4] sm:$0xff] (!%p223_p2)  ;;  %v535_v61 = vld [vmem:[%s1095_s5 + $0x10] sm:$0xff] (!%p223_p2)  ;;  %v528_v3 = vld [vmem:[%s1094_s4 + $0x8] sm:$0xff] (!%p223_p2) }
   0xa   : > { %v529_v4 = vld [vmem:[%s1094_s4 + $0x10] sm:$0xff] (!%p223_p2) }
   0xc   : > { %341 = vperm.xlu1 (!%p223_p2), %898, %v323_v5   ;;  %331 = vperm.xlu0 (!%p223_p2), %897, %v321_v41  }
   0xd   : > { %s1098_s22 = smov (!%p257_p3, %s739_s22), 1 }
   0xe   : > { %s887_s27 = smul.u32 288, %s1098_s22  ;;  %s759_s13 = sshll.u32 %s1098_s22, 4 }
   0xf   : > { %s266_s16 = scalar_lea.vmem %s1093_s3, %s759_s13  ;;  %s760_s12 = sshll.u32 %s1098_s22, 5 }
  0x10   : > { %s970_s10 = scalar_lea.vmem %s1090_s0, %s887_s27  ;;  %v531_v28 = vld [vmem:[%s266_s16] sm:$0xff]  ;;  %v532_v32 = vld [vmem:[%s266_s16 + $0x8] sm:$0xff]  ;;  %544 = vperm.xlu1 %898, %v534_v42   ;;  %539 = vperm.xlu0 %897, %v533_v51   ;;  %s271_s15 = scalar_lea.vmem %s1096_s6, %s760_s12 }
  0x11   : > { %v300_v6 = vld [vmem:[%s970_s10 + $0x80] sm:$0xff]  ;;  %v301_v7 = vld [vmem:[%s970_s10 + $0x88] sm:$0xff]  ;;  %v302_v11 = vld [vmem:[%s970_s10 + $0x90] sm:$0xff]  ;;  %v883_v39 = vpack.c.bf16 %v532_v32, %v531_v28 }
  0x12   : > { %v284_v8 = vld [vmem:[%s970_s10] sm:$0xff]  ;;  %v843_v9 = vpack.c.bf16 %v301_v7, %v300_v6  ;;  %v285_v10 = vld [vmem:[%s970_s10 + $0x8] sm:$0xff]  ;;  %v303_v12 = vld [vmem:[%s970_s10 + $0x98] sm:$0xff] }
  0x13   : > { %v845_v13 = vpack.c.bf16 %v285_v10, %v284_v8  ;;  %v847_v14 = vpack.c.bf16 %v303_v12, %v302_v11  ;;  %v286_v15 = vld [vmem:[%s970_s10 + $0x10] sm:$0xff]  ;;  %v287_v16 = vld [vmem:[%s970_s10 + $0x18] sm:$0xff]  ;;  %v304_v17 = vld [vmem:[%s970_s10 + $0xa0] sm:$0xff] }
  0x14   : > { %844 = vmatprep.subr.bf16.mxu0 %v843_v9  ;;  %v305_v18 = vld [vmem:[%s970_s10 + $0xa8] sm:$0xff]  ;;  %v849_v19 = vpack.c.bf16 %v287_v16, %v286_v15  ;;  %v288_v21 = vld [vmem:[%s970_s10 + $0x20] sm:$0xff]  ;;  %v306_v23 = vld [vmem:[%s970_s10 + $0xb0] sm:$0xff]  ;;  %554 = vperm.xlu1 %898, %v536_v52  }
  0x15   : > { %846 = vmatpush3.bf16.msra.mxu0 %v845_v13  ;;  %v851_v20 = vpack.c.bf16 %v305_v18, %v304_v17  ;;  %v289_v22 = vld [vmem:[%s970_s10 + $0x28] sm:$0xff]  ;;  %v307_v24 = vld [vmem:[%s970_s10 + $0xb8] sm:$0xff]  ;;  %v316_v25 = vld [vmem:[%s970_s10 + $0x100] sm:$0xff]  ;;  %549 = vperm.xlu0 %897, %v535_v61  }
  0x16   : > { %848 = vmatprep.subr.bf16.mxu0 %v847_v14  ;;  %v317_v26 = vld [vmem:[%s970_s10 + $0x108] sm:$0xff]  ;;  %v853_v29 = vpack.c.bf16 %v289_v22, %v288_v21  ;;  %v318_v30 = vld [vmem:[%s970_s10 + $0x110] sm:$0xff]  ;;  %v319_v31 = vld [vmem:[%s970_s10 + $0x118] sm:$0xff]  ;;  %v855_v33 = vpack.c.bf16 %v307_v24, %v306_v23 }
  0x17   : > { %v875_v27 = vpack.c.bf16 %v317_v26, %v316_v25  ;;  %v290_v34 = vld [vmem:[%s970_s10 + $0x30] sm:$0xff]  ;;  %v291_v35 = vld [vmem:[%s970_s10 + $0x38] sm:$0xff]  ;;  %v879_v36 = vpack.c.bf16 %v319_v31, %v318_v30  ;;  %v308_v37 = vld [vmem:[%s970_s10 + $0xc0] sm:$0xff] }
  0x18   : > { %v309_v38 = vld [vmem:[%s970_s10 + $0xc8] sm:$0xff]  ;;  %v857_v40 = vpack.c.bf16 %v291_v35, %v290_v34  ;;  %v292_v44 = vld [vmem:[%s970_s10 + $0x40] sm:$0xff]  ;;  %v310_v46 = vld [vmem:[%s970_s10 + $0xd0] sm:$0xff] }
  0x19   : > { %850 = vmatpush3.bf16.msra.mxu0 %v849_v19  ;;  %876 = vmatprep.subr.bf16.mxu1 %v875_v27  ;;  %v859_v43 = vpack.c.bf16 %v309_v38, %v308_v37  ;;  %v293_v45 = vld [vmem:[%s970_s10 + $0x48] sm:$0xff]  ;;  %v311_v47 = vld [vmem:[%s970_s10 + $0xd8] sm:$0xff]  ;;  %v294_v54 = vld [vmem:[%s970_s10 + $0x50] sm:$0xff] }
  0x1a   : > { %852 = vmatprep.subr.bf16.mxu0 %v851_v20  ;;  %878 = vmatpush3.bf16.msra.mxu1 %v875_v27  ;;  %v861_v50 = vpack.c.bf16 %v293_v45, %v292_v44  ;;  %v863_v53 = vpack.c.bf16 %v311_v47, %v310_v46  ;;  %v295_v55 = vld [vmem:[%s970_s10 + $0x58] sm:$0xff]  ;;  %v312_v56 = vld [vmem:[%s970_s10 + $0xe0] sm:$0xff]  ;;  %v313_v57 = vld [vmem:[%s970_s10 + $0xe8] sm:$0xff] }
  0x1b   : > { %880 = vmatprep.subr.bf16.mxu1 %v879_v36  ;;  %v865_v60 = vpack.c.bf16 %v295_v55, %v294_v54  ;;  %v867_v62 = vpack.c.bf16 %v313_v57, %v312_v56  ;;  %v296_v63 = vld [vmem:[%s970_s10 + $0x60] sm:$0xff]  ;;  %v297_v0 = vld [vmem:[%s970_s10 + $0x68] sm:$0xff]  ;;  %v314_v1 = vld [vmem:[%s970_s10 + $0xf0] sm:$0xff] }
  0x1c   : > { %v315_v2 = vld [vmem:[%s970_s10 + $0xf8] sm:$0xff]  ;;  %v869_v5 = vpack.c.bf16 %v297_v0, %v296_v63  ;;  %v298_v7 = vld [vmem:[%s970_s10 + $0x70] sm:$0xff]  ;;  %v272_v11 = vld [vmem:[%s1091_s1] sm:$0xff] }
  0x1d   : > { %854 = vmatpush3.bf16.msra.mxu0 %v853_v29  ;;  %v871_v6 = vpack.c.bf16 %v315_v2, %v314_v1  ;;  %v299_v8 = vld [vmem:[%s970_s10 + $0x78] sm:$0xff]  ;;  %v276_v12 = vld [vmem:[%s1091_s1 + $0x20] sm:$0xff]  ;;  %v278_v15 = vld [vmem:[%s1091_s1 + $0x30] sm:$0xff] }
  0x1e   : > { %856 = vmatprep.subr.bf16.mxu0 %v855_v33  ;;  %882 = vmatpush3.bf16.msra.mxu1 %v879_v36  ;;  %v530_v9 = vld [vmem:[%s1094_s4 + $0x18] sm:$0xff]  ;;  %v873_v10 = vpack.c.bf16 %v299_v8, %v298_v7  ;;  %v282_v16 = vld [vmem:[%s1091_s1 + $0x50] sm:$0xff]  ;;  %v281_v17 = vld [vmem:[%s1091_s1 + $0x48] sm:$0xff] }
  0x1f   : > { %884 = vmatprep.subr.bf16.mxu1 %v883_v39  ;;  %v275_v13 = vld [vmem:[%s1091_s1 + $0x18] sm:$0xff] }
  0x20   : > { %v279_v14 = vld [vmem:[%s1091_s1 + $0x38] sm:$0xff] }
  0x21   : > { %858 = vmatpush3.bf16.msra.mxu0 %v857_v40  ;;  %828 = vmatmul.mubr.msk.f32.vlgmr.msra.gmra.mrb[0].mxu1 %vm344_vm0, %v277_v48 }
  0x22   : > { %860 = vmatprep.subr.bf16.mxu0 %v859_v43  ;;  %830 = vmatprep.mubr.msk.f32.mxu1 %vm344_vm0, %v280_v49 }
  0x23   : > { %886 = vmatpush3.bf16.msra.mxu1 %v883_v39 }
  0x25   : > { %862 = vmatpush3.bf16.msra.mxu0 %v861_v50  ;;  %831 = vmatmul.mubr.msk.f32.gmra.mrb[2].mxu1 %vm344_vm0, %v283_v58 }
  0x26   : > { %864 = vmatprep.subr.bf16.mxu0 %v863_v53  ;;  %837 = vmatprep.mubr.msk.f32.mxu1 %vm557_vm1, %v527_v59 }
  0x29   : > { %866 = vmatpush3.bf16.msra.mxu0 %v865_v60  ;;  %838 = vmatmul.mubr.msk.f32.vlgmr.msra.gmra.mrb[4].mxu1 %vm557_vm1, %v528_v3 }
  0x2a   : > { %868 = vmatprep.subr.bf16.mxu0 %v867_v62  ;;  %840 = vmatprep.mubr.msk.f32.mxu1 %vm557_vm1, %v529_v4 }
  0x2d   : > { %870 = vmatpush3.bf16.msra.mxu0 %v869_v5  ;;  %841 = vmatmul.mubr.msk.f32.gmra.mrb[6].mxu1 %vm557_vm1, %v530_v9 }
  0x2e   : > { %872 = vmatprep.subr.bf16.mxu0 %v871_v6 }
  0x31   : > { %874 = vmatpush3.bf16.msra.mxu0 %v873_v10 }
  0x34   : > { %422 = vmatmul.mubr.f32.vlgmr.msra.gmra.mrb[0].mxu0 %v272_v11 }
  0x35   : > { %426 = vmatprep.mubr.f32.mxu0 %v276_v12 }
  0x38   : > { %427 = vmatmul.mubr.f32.gmra.mrb[2].mxu0 %v275_v13 }
  0x39   : > { %431 = vmatprep.mubr.f32.mxu0 %v279_v14 }
  0x3c   : > { %432 = vmatmul.mubr.f32.gmra.mrb[4].mxu0 %v278_v15 }
  0x3d   : > { %436 = vmatprep.mubr.f32.mxu0 %v282_v16 }
  0x40   : > { %437 = vmatmul.mubr.f32.gmra.mrb[6].mxu0 %v281_v17 }
  0x87   : > { %v327_v22 = vpop.permute.xlu0 %326  ;;  %v337_v25 = vpop.permute.xlu1 %336 }
  0x8b   : > { %v332_v27 = vpop.permute.xlu0 %331  ;;  %v342_v29 = vpop.permute.xlu1 %341 }
  0x8f   : > { %v540_v31 = vpop.permute.xlu0 %539  ;;  %v545_v41 = vpop.permute.xlu1 %544 }
  0x93   : > { %v555_v56 = vpop.permute.xlu1 %554 }
  0x94   : > { %v550_v46 = vpop.permute.xlu0 %549 }
  0xf4   : > { %v829_v18 = vpop.f32.mrb[0].mxu1 }
  0xf5   : > { %v508_v19 = vpop.f32.mrb[1].mxu1 }
  0xf8   : > { %v832_v20 = vpop.f32.mrb[2].mxu1 }
  0xf9   : > { %v518_v21 = vpop.f32.mrb[3].mxu1 }
  0xfc   : > { %v839_v23 = vpop.f32.mrb[4].mxu1 }
  0xfd   : > { %v636_v24 = vpop.f32.mrb[5].mxu1  ;;  %v642_v42 = vadd.f32 %v839_v23, %v545_v41 }
  0xfe   : > { %v637_v34 = vadd.f32 %v636_v24, %v540_v31 }
  0xff   : > { %v660_v51 = vmax.f32 %v642_v42, 0.0 }
 0x100   : > { %v842_v26 = vpop.f32.mrb[6].mxu1  ;;  %v659_v39 = vmax.f32 %v637_v34, 0.0 }
 0x101   : > { %v646_v28 = vpop.f32.mrb[7].mxu1  ;;  %v652_v61 = vadd.f32 %v842_v26, %v555_v56 }
 0x102   : > { %v647_v53 = vadd.f32 %v646_v28, %v550_v46 }
 0x103   : > { %v662_v3 = vmax.f32 %v652_v61, 0.0 }
 0x104   : > { %v661_v62 = vmax.f32 %v647_v53, 0.0 }
 0x107   : > { %v793_v30 = vpop.f32.mrb[0].mxu0 }
 0x108   : > { %v794_v32 = vpop.f32.mrb[1].mxu0 }
 0x109   : > { %v795_v33 = vadd.f32 %v794_v32, %v793_v30 }
 0x10b   : > { %v424_v35 = vadd.f32 %v795_v33, %v327_v22  ;;  %v796_v36 = vpop.f32.mrb[2].mxu0 }
 0x10c   : > { %v797_v37 = vpop.f32.mrb[3].mxu0 }
 0x10d   : > { %v509_v38 = vadd.f32 %v508_v19, %v424_v35  ;;  %v798_v40 = vadd.f32 %v797_v37, %v796_v36 }
 0x10f   : > { %v655_v43 = vmax.f32 %v509_v38, 0.0  ;;  %v429_v44 = vadd.f32 %v798_v40, %v332_v27  ;;  %v799_v45 = vpop.f32.mrb[4].mxu0 }
 0x110   : > { %v800_v47 = vpop.f32.mrb[5].mxu0 }
 0x111   : > { %v663_v48 = vadd.f32 %v659_v39, %v655_v43  ;;  %v514_v49 = vadd.f32 %v829_v18, %v429_v44  ;;  %v801_v50 = vadd.f32 %v800_v47, %v799_v45 }
 0x113   : > { %668 = vst.msk [vmem:[%s271_s15] sm:$0xff] %vm667_vm2, %v663_v48  ;;  %v656_v52 = vmax.f32 %v514_v49, 0.0  ;;  %v434_v54 = vadd.f32 %v801_v50, %v337_v25  ;;  %v802_v55 = vpop.f32.mrb[6].mxu0 }
 0x114   : > { %v803_v57 = vpop.f32.mrb[7].mxu0 }
 0x115   : > { %v664_v58 = vadd.f32 %v660_v51, %v656_v52  ;;  %v519_v59 = vadd.f32 %v518_v21, %v434_v54  ;;  %v804_v60 = vadd.f32 %v803_v57, %v802_v55 }
 0x117   : > { %669 = vst.msk [vmem:[%s271_s15 + $0x8] sm:$0xff] %vm667_vm2, %v664_v58  ;;  %v657_v63 = vmax.f32 %v519_v59, 0.0  ;;  %v439_v0 = vadd.f32 %v804_v60, %v342_v29 }
 0x119   : > { %v665_v1 = vadd.f32 %v661_v62, %v657_v63  ;;  %v524_v2 = vadd.f32 %v832_v20, %v439_v0 }
 0x11b   : > { %670 = vst.msk [vmem:[%s271_s15 + $0x10] sm:$0xff] %vm667_vm2, %v665_v1  ;;  %v658_v4 = vmax.f32 %v524_v2, 0.0 }
 0x11d   : > { %v666_v5 = vadd.f32 %v662_v3, %v658_v4 }
 0x11f   : > { %671 = vst.msk [vmem:[%s271_s15 + $0x18] sm:$0xff] %vm667_vm2, %v666_v5 }
 0x120 PF: > { %s16_s21 = sadd.s32 1, %s905_s21  }
 0x121   : > { %p13_p4 = scmp.ge.s32.totalorder %s16_s21, 4  }
 0x123   :  { %15 = sbr.rel (!%p13_p4) target bundleno = 1 (0x1), region = 77 }

// kernel: _lambda_.24
= control target key start
LH: loop header
LB: loop body
LE: loop exit
PB: predicated region body
PF: predicated region fallthrough
CT: control target
= control target key end

     0   :  { %s790_s12 = smov 0   ;;  %s971_s0 = inlined_call_operand.vmem [shape: f32[2,288,16], index: 0, kind: input, shape index: {}]   ;;  %s972_s1 = inlined_call_operand.vmem [shape: f32[64,288], index: 1, kind: input, shape index: {}]   ;;  %s973_s2 = inlined_call_operand.vmem [shape: f32[64,1], index: 2, kind: input, shape index: {}]   ;;  %s974_s3 = inlined_call_operand.vmem [shape: f32[2,64,16], index: 3, kind: output, shape index: {}]  }
   0x1 LB: > { %s586_s13 = sadd.s32 4294967295, %s767_s12   ;;  %p590_p0 = scmp.ge.s32.totalorder %s767_s12, 1  ;;  %s767_s12 = sphi %s790_s12, %s13_s12  }
   0x2   : > { %p137_p1 = scmp.lt.s32.totalorder %s767_s12, 3 }
   0x4   : > { %p138_p2 = pnand %p590_p0, %p137_p1 }
   0x5   : > { %p161_p3 = scmp.lt.s32.totalorder (!%p138_p2), %s586_s13, 1  ;;  %v172_v0 = vld [vmem:[%s972_s1 + $0x8] sm:$0xff] (!%p138_p2)  ;;  %v190_v1 = vld [vmem:[%s972_s1 + $0x98] sm:$0xff] (!%p138_p2)  ;;  %v769_v2 = vmov (!%p138_p2), 0   ;;  %v231_v32 = vld [vmem:[%s973_s2] sm:$0xff] (!%p138_p2)  ;;  %vm279_vm0 = vcmask (!%p138_p2), 261120  }
   0x6   : > { %141 = sbr.rel (%p138_p2) target bundleno = 294 (0x126), region = 32  ;;  %368 = vmatprep.mubr.f32.mxu0 (!%p138_p2), %v172_v0  ;;  %398 = vmatprep.mubr.f32.mxu1 (!%p138_p2), %v190_v1  ;;  %v233_v33 = vld [vmem:[%s973_s2 + $0x10] sm:$0xff] (!%p138_p2)  ;;  %v232_v36 = vld [vmem:[%s973_s2 + $0x8] sm:$0xff] (!%p138_p2)  ;;  %v234_v37 = vld [vmem:[%s973_s2 + $0x18] sm:$0xff] (!%p138_p2)  ;;  %vm522_vm1 = vcmask (!%p138_p2), 130048  }
   0x7   : > { %759 = vset.pattern.permute.xlu0 (!%p138_p2), %v769_v2  ;;  %760 = vset.pattern.permute.xlu1 (!%p138_p2), %v769_v2  ;;  %v235_v44 = vld [vmem:[%s973_s2 + $0x20] sm:$0xff] (!%p138_p2)  ;;  %v236_v45 = vld [vmem:[%s973_s2 + $0x28] sm:$0xff] (!%p138_p2)  ;;  %v237_v52 = vld [vmem:[%s973_s2 + $0x30] sm:$0xff] (!%p138_p2) }
   0x8   : > { %241 = vperm.xlu0 (!%p138_p2), %759, %v231_v32   ;;  %251 = vperm.xlu1 (!%p138_p2), %760, %v233_v33   ;;  %v238_v53 = vld [vmem:[%s973_s2 + $0x38] sm:$0xff] (!%p138_p2)  ;;  %v171_v0 = vld [vmem:[%s972_s1] sm:$0xff] (!%p138_p2)  ;;  %v189_v1 = vld [vmem:[%s972_s1 + $0x90] sm:$0xff] (!%p138_p2) }
   0x9   : > { %v175_v2 = vld [vmem:[%s972_s1 + $0x20] sm:$0xff] (!%p138_p2) }
   0xc   : > { %246 = vperm.xlu0 (!%p138_p2), %759, %v232_v36   ;;  %256 = vperm.xlu1 (!%p138_p2), %760, %v234_v37  }
   0xd   : > { %s976_s13 = smov (!%p161_p3, %s586_s13), 1 }
   0xe   : > { %s749_s18 = smul.u32 288, %s976_s13  ;;  %s604_s5 = sshll.u32 %s976_s13, 6 }
   0xf   : > { %s950_s8 = scalar_lea.vmem %s974_s3, %s604_s5 }
  0x10   : > { %s810_s21 = scalar_lea.vmem %s971_s0, %s749_s18  ;;  %261 = vperm.xlu0 %759, %v235_v44   ;;  %266 = vperm.xlu1 %760, %v236_v45  }
  0x11   : > { %v211_v3 = vld [vmem:[%s810_s21 + $0x80] sm:$0xff]  ;;  %v212_v4 = vld [vmem:[%s810_s21 + $0x88] sm:$0xff]  ;;  %v213_v8 = vld [vmem:[%s810_s21 + $0x90] sm:$0xff] }
  0x12   : > { %v195_v5 = vld [vmem:[%s810_s21] sm:$0xff]  ;;  %v693_v6 = vpack.c.bf16 %v212_v4, %v211_v3  ;;  %v196_v7 = vld [vmem:[%s810_s21 + $0x8] sm:$0xff]  ;;  %v214_v9 = vld [vmem:[%s810_s21 + $0x98] sm:$0xff] }
  0x13   : > { %v695_v10 = vpack.c.bf16 %v196_v7, %v195_v5  ;;  %v697_v11 = vpack.c.bf16 %v214_v9, %v213_v8  ;;  %v197_v12 = vld [vmem:[%s810_s21 + $0x10] sm:$0xff]  ;;  %v198_v13 = vld [vmem:[%s810_s21 + $0x18] sm:$0xff]  ;;  %v215_v14 = vld [vmem:[%s810_s21 + $0xa0] sm:$0xff] }
  0x14   : > { %694 = vmatprep.subr.bf16.mxu0 %v693_v6  ;;  %733 = vmatprep.subr.bf16.mxu1 %v693_v6  ;;  %v216_v15 = vld [vmem:[%s810_s21 + $0xa8] sm:$0xff]  ;;  %v699_v16 = vpack.c.bf16 %v198_v13, %v197_v12  ;;  %v199_v18 = vld [vmem:[%s810_s21 + $0x20] sm:$0xff]  ;;  %v217_v20 = vld [vmem:[%s810_s21 + $0xb0] sm:$0xff] }
  0x15   : > { %696 = vmatpush3.bf16.msra.mxu0 %v695_v10  ;;  %741 = vmatpush3.bf16.msra.mxu1 %v695_v10  ;;  %v701_v17 = vpack.c.bf16 %v216_v15, %v215_v14  ;;  %v200_v19 = vld [vmem:[%s810_s21 + $0x28] sm:$0xff]  ;;  %v218_v21 = vld [vmem:[%s810_s21 + $0xb8] sm:$0xff]  ;;  %v201_v24 = vld [vmem:[%s810_s21 + $0x30] sm:$0xff] }
  0x16   : > { %698 = vmatprep.subr.bf16.mxu0 %v697_v11  ;;  %734 = vmatprep.subr.bf16.mxu1 %v697_v11  ;;  %v703_v22 = vpack.c.bf16 %v200_v19, %v199_v18  ;;  %v705_v23 = vpack.c.bf16 %v218_v21, %v217_v20  ;;  %v202_v25 = vld [vmem:[%s810_s21 + $0x38] sm:$0xff]  ;;  %v219_v26 = vld [vmem:[%s810_s21 + $0xc0] sm:$0xff]  ;;  %v220_v27 = vld [vmem:[%s810_s21 + $0xc8] sm:$0xff] }
  0x17   : > { %v707_v28 = vpack.c.bf16 %v202_v25, %v201_v24  ;;  %v203_v29 = vld [vmem:[%s810_s21 + $0x40] sm:$0xff]  ;;  %v709_v30 = vpack.c.bf16 %v220_v27, %v219_v26  ;;  %v204_v31 = vld [vmem:[%s810_s21 + $0x48] sm:$0xff]  ;;  %v221_v34 = vld [vmem:[%s810_s21 + $0xd0] sm:$0xff]  ;;  %271 = vperm.xlu0 %759, %v237_v52   ;;  %276 = vperm.xlu1 %760, %v238_v53  }
  0x18   : > { %v222_v35 = vld [vmem:[%s810_s21 + $0xd8] sm:$0xff]  ;;  %v711_v38 = vpack.c.bf16 %v204_v31, %v203_v29  ;;  %v205_v40 = vld [vmem:[%s810_s21 + $0x50] sm:$0xff]  ;;  %v223_v42 = vld [vmem:[%s810_s21 + $0xe0] sm:$0xff] }
  0x19   : > { %700 = vmatpush3.bf16.msra.mxu0 %v699_v16  ;;  %742 = vmatpush3.bf16.msra.mxu1 %v699_v16  ;;  %v713_v39 = vpack.c.bf16 %v222_v35, %v221_v34  ;;  %v206_v41 = vld [vmem:[%s810_s21 + $0x58] sm:$0xff]  ;;  %v224_v43 = vld [vmem:[%s810_s21 + $0xe8] sm:$0xff]  ;;  %v207_v48 = vld [vmem:[%s810_s21 + $0x60] sm:$0xff] }
  0x1a   : > { %702 = vmatprep.subr.bf16.mxu0 %v701_v17  ;;  %735 = vmatprep.subr.bf16.mxu1 %v701_v17  ;;  %v715_v46 = vpack.c.bf16 %v206_v41, %v205_v40  ;;  %v717_v47 = vpack.c.bf16 %v224_v43, %v223_v42  ;;  %v208_v49 = vld [vmem:[%s810_s21 + $0x68] sm:$0xff]  ;;  %v225_v50 = vld [vmem:[%s810_s21 + $0xf0] sm:$0xff]  ;;  %v226_v51 = vld [vmem:[%s810_s21 + $0xf8] sm:$0xff] }
  0x1b   : > { %v719_v54 = vpack.c.bf16 %v208_v49, %v207_v48  ;;  %v721_v55 = vpack.c.bf16 %v226_v51, %v225_v50  ;;  %v209_v56 = vld [vmem:[%s810_s21 + $0x70] sm:$0xff]  ;;  %v210_v57 = vld [vmem:[%s810_s21 + $0x78] sm:$0xff]  ;;  %v227_v58 = vld [vmem:[%s810_s21 + $0x100] sm:$0xff] }
  0x1c   : > { %v228_v59 = vld [vmem:[%s810_s21 + $0x108] sm:$0xff]  ;;  %v723_v60 = vpack.c.bf16 %v210_v57, %v209_v56  ;;  %v229_v62 = vld [vmem:[%s810_s21 + $0x110] sm:$0xff]  ;;  %v230_v63 = vld [vmem:[%s810_s21 + $0x118] sm:$0xff] }
  0x1d   : > { %704 = vmatpush3.bf16.msra.mxu0 %v703_v22  ;;  %743 = vmatpush3.bf16.msra.mxu1 %v703_v22  ;;  %v725_v61 = vpack.c.bf16 %v228_v59, %v227_v58  ;;  %v729_v3 = vpack.c.bf16 %v230_v63, %v229_v62  ;;  %v193_v4 = vld [vmem:[%s972_s1 + $0xb0] sm:$0xff]  ;;  %v174_v5 = vld [vmem:[%s972_s1 + $0x18] sm:$0xff]  ;;  %v192_v6 = vld [vmem:[%s972_s1 + $0xa8] sm:$0xff] }
  0x1e   : > { %706 = vmatprep.subr.bf16.mxu0 %v705_v23  ;;  %736 = vmatprep.subr.bf16.mxu1 %v705_v23  ;;  %v178_v7 = vld [vmem:[%s972_s1 + $0x38] sm:$0xff]  ;;  %v173_v8 = vld [vmem:[%s972_s1 + $0x10] sm:$0xff]  ;;  %v176_v10 = vld [vmem:[%s972_s1 + $0x28] sm:$0xff] }
  0x1f   : > { %v177_v9 = vld [vmem:[%s972_s1 + $0x30] sm:$0xff]  ;;  %v179_v12 = vld [vmem:[%s972_s1 + $0x40] sm:$0xff]  ;;  %v180_v13 = vld [vmem:[%s972_s1 + $0x48] sm:$0xff] }
  0x20   : > { %v181_v11 = vld [vmem:[%s972_s1 + $0x50] sm:$0xff]  ;;  %v182_v14 = vld [vmem:[%s972_s1 + $0x58] sm:$0xff]  ;;  %v184_v15 = vld [vmem:[%s972_s1 + $0x68] sm:$0xff] }
  0x21   : > { %708 = vmatpush3.bf16.msra.mxu0 %v707_v28  ;;  %744 = vmatpush3.bf16.msra.mxu1 %v707_v28  ;;  %v185_v16 = vld [vmem:[%s972_s1 + $0x70] sm:$0xff]  ;;  %v183_v17 = vld [vmem:[%s972_s1 + $0x60] sm:$0xff]  ;;  %v188_v18 = vld [vmem:[%s972_s1 + $0x88] sm:$0xff] }
  0x22   : > { %710 = vmatprep.subr.bf16.mxu0 %v709_v30  ;;  %737 = vmatprep.subr.bf16.mxu1 %v709_v30  ;;  %v187_v19 = vld [vmem:[%s972_s1 + $0x80] sm:$0xff]  ;;  %v186_v21 = vld [vmem:[%s972_s1 + $0x78] sm:$0xff] }
  0x23   : > { %v191_v20 = vld [vmem:[%s972_s1 + $0xa0] sm:$0xff]  ;;  %v194_v22 = vld [vmem:[%s972_s1 + $0xb8] sm:$0xff] }
  0x25   : > { %712 = vmatpush3.bf16.msra.mxu0 %v711_v38  ;;  %745 = vmatpush3.bf16.msra.mxu1 %v711_v38 }
  0x26   : > { %714 = vmatprep.subr.bf16.mxu0 %v713_v39  ;;  %738 = vmatprep.subr.bf16.mxu1 %v713_v39 }
  0x29   : > { %716 = vmatpush3.bf16.msra.mxu0 %v715_v46  ;;  %746 = vmatpush3.bf16.msra.mxu1 %v715_v46 }
  0x2a   : > { %718 = vmatprep.subr.bf16.mxu0 %v717_v47  ;;  %739 = vmatprep.subr.bf16.mxu1 %v717_v47 }
  0x2d   : > { %720 = vmatpush3.bf16.msra.mxu0 %v719_v54  ;;  %747 = vmatpush3.bf16.msra.mxu1 %v719_v54 }
  0x2e   : > { %722 = vmatprep.subr.bf16.mxu0 %v721_v55  ;;  %740 = vmatprep.subr.bf16.mxu1 %v721_v55 }
  0x31   : > { %724 = vmatpush3.bf16.msra.mxu0 %v723_v60  ;;  %748 = vmatpush3.bf16.msra.mxu1 %v723_v60 }
  0x32   : > { %726 = vmatprep.subr.bf16.mxu1 %v725_v61 }
  0x34   : > { %369 = vmatmul.mubr.f32.vlgmr.msra.gmra.mrb[0].mxu0 %v171_v0  ;;  %399 = vmatmul.mubr.f32.vlgmr.msra.gmra.mrb[0].mxu1 %v189_v1 }
  0x35   : > { %728 = vmatpush3.bf16.msra.mxu1 %v725_v61  ;;  %373 = vmatprep.mubr.f32.mxu0 %v175_v2 }
  0x36   : > { %403 = vmatprep.mubr.f32.mxu1 %v193_v4  ;;  %730 = vmatprep.subr.bf16.mxu1 %v729_v3 }
  0x38   : > { %374 = vmatmul.mubr.f32.gmra.mrb[2].mxu0 %v174_v5  ;;  %404 = vmatmul.mubr.f32.gmra.mrb[2].mxu1 %v192_v6 }
  0x39   : > { %732 = vmatpush3.bf16.msra.mxu1 %v729_v3  ;;  %378 = vmatprep.mubr.f32.mxu0 %v178_v7 }
  0x3a   : > { %681 = vmatprep.mubr.msk.f32.mxu1 %vm279_vm0, %v173_v8 }
  0x3c   : > { %379 = vmatmul.mubr.f32.gmra.mrb[4].mxu0 %v177_v9  ;;  %682 = vmatmul.mubr.msk.f32.vlgmr.msra.gmra.mrb[4].mxu1 %vm279_vm0, %v176_v10 }
  0x3d   : > { %383 = vmatprep.mubr.f32.mxu0 %v181_v11  ;;  %684 = vmatprep.mubr.msk.f32.mxu1 %vm279_vm0, %v179_v12 }
  0x40   : > { %384 = vmatmul.mubr.f32.gmra.mrb[6].mxu0 %v180_v13  ;;  %685 = vmatmul.mubr.msk.f32.gmra.mrb[6].mxu1 %vm279_vm0, %v182_v14 }
  0x41   : > { %388 = vmatprep.mubr.f32.mxu0 %v184_v15  ;;  %687 = vmatprep.mubr.msk.f32.mxu1 %vm279_vm0, %v185_v16 }
  0x44   : > { %389 = vmatmul.mubr.f32.gmra.mrb[8].mxu0 %v183_v17  ;;  %688 = vmatmul.mubr.msk.f32.gmra.mrb[8].mxu1 %vm279_vm0, %v188_v18 }
  0x45   : > { %393 = vmatprep.mubr.f32.mxu0 %v187_v19  ;;  %690 = vmatprep.mubr.msk.f32.mxu1 %vm279_vm0, %v191_v20 }
  0x48   : > { %394 = vmatmul.mubr.f32.gmra.mrb[10].mxu0 %v186_v21  ;;  %691 = vmatmul.mubr.msk.f32.gmra.mrb[10].mxu1 %vm279_vm0, %v194_v22 }
  0x87   : > { %v242_v23 = vpop.permute.xlu0 %241  ;;  %v252_v24 = vpop.permute.xlu1 %251 }
  0x8b   : > { %v247_v25 = vpop.permute.xlu0 %246  ;;  %v257_v26 = vpop.permute.xlu1 %256 }
  0x8f   : > { %v262_v39 = vpop.permute.xlu0 %261  ;;  %v267_v40 = vpop.permute.xlu1 %266 }
  0x96   : > { %v272_v59 = vpop.permute.xlu0 %271  ;;  %v277_v60 = vpop.permute.xlu1 %276 }
 0x107   : > { %v637_v27 = vpop.f32.mrb[0].mxu0  ;;  %v655_v28 = vpop.f32.mrb[0].mxu1 }
 0x108   : > { %v638_v29 = vpop.f32.mrb[1].mxu0  ;;  %v656_v30 = vpop.f32.mrb[1].mxu1 }
 0x109   : > { %v639_v31 = vadd.f32 %v638_v29, %v637_v27  ;;  %v657_v32 = vadd.f32 %v656_v30, %v655_v28 }
 0x10b   : > { %v640_v33 = vpop.f32.mrb[2].mxu0  ;;  %v658_v34 = vpop.f32.mrb[2].mxu1  ;;  %v371_v44 = vadd.f32 %v639_v31, %v242_v23  ;;  %v401_v6 = vadd.f32 %v657_v32, %v272_v59 }
 0x10c   : > { %v641_v35 = vpop.f32.mrb[3].mxu0  ;;  %v659_v36 = vpop.f32.mrb[3].mxu1 }
 0x10d   : > { %v642_v37 = vadd.f32 %v641_v35, %v640_v33  ;;  %v660_v38 = vadd.f32 %v659_v36, %v658_v34 }
 0x10f   : > { %v643_v41 = vpop.f32.mrb[4].mxu0  ;;  %v376_v42 = vadd.f32 %v642_v37, %v247_v25  ;;  %v683_v43 = vpop.f32.mrb[4].mxu1  ;;  %v406_v5 = vadd.f32 %v660_v38, %v277_v60 }
 0x110   : > { %v644_v45 = vpop.f32.mrb[5].mxu0  ;;  %v475_v46 = vpop.f32.mrb[5].mxu1 }
 0x111   : > { %v481_v47 = vadd.f32 %v683_v43, %v376_v42  ;;  %v645_v48 = vadd.f32 %v644_v45, %v643_v41  ;;  %v476_v49 = vadd.f32 %v475_v46, %v371_v44 }
 0x113   : > { %v515_v50 = vmax.f32 %v481_v47, 0.0  ;;  %v514_v51 = vmax.f32 %v476_v49, 0.0  ;;  %v646_v52 = vpop.f32.mrb[6].mxu0  ;;  %v686_v53 = vpop.f32.mrb[6].mxu1  ;;  %v381_v54 = vadd.f32 %v645_v48, %v252_v24 }
 0x114   : > { %v647_v55 = vpop.f32.mrb[7].mxu0  ;;  %v485_v56 = vpop.f32.mrb[7].mxu1 }
 0x115   : > { %524 = vst.msk [vmem:[%s950_s8 + $0x8] sm:$0xff] %vm522_vm1, %v515_v50  ;;  %523 = vst.msk [vmem:[%s950_s8] sm:$0xff] %vm522_vm1, %v514_v51  ;;  %v648_v57 = vadd.f32 %v647_v55, %v646_v52  ;;  %v486_v58 = vadd.f32 %v485_v56, %v381_v54 }
 0x117   : > { %v386_v61 = vadd.f32 %v648_v57, %v257_v26  ;;  %v516_v62 = vmax.f32 %v486_v58, 0.0  ;;  %v649_v63 = vpop.f32.mrb[8].mxu0  ;;  %v689_v0 = vpop.f32.mrb[8].mxu1 }
 0x118   : > { %v650_v1 = vpop.f32.mrb[9].mxu0  ;;  %v495_v2 = vpop.f32.mrb[9].mxu1 }
 0x119   : > { %v491_v3 = vadd.f32 %v686_v53, %v386_v61  ;;  %525 = vst.msk [vmem:[%s950_s8 + $0x10] sm:$0xff] %vm522_vm1, %v516_v62  ;;  %v651_v4 = vadd.f32 %v650_v1, %v649_v63 }
 0x11b   : > { %v517_v7 = vmax.f32 %v491_v3, 0.0  ;;  %v391_v8 = vadd.f32 %v651_v4, %v262_v39  ;;  %v652_v9 = vpop.f32.mrb[10].mxu0  ;;  %v692_v10 = vpop.f32.mrb[10].mxu1 }
 0x11c   : > { %v511_v11 = vadd.f32 %v692_v10, %v406_v5  ;;  %v653_v12 = vpop.f32.mrb[11].mxu0  ;;  %v505_v13 = vpop.f32.mrb[11].mxu1 }
 0x11d   : > { %526 = vst.msk [vmem:[%s950_s8 + $0x18] sm:$0xff] %vm522_vm1, %v517_v7  ;;  %v496_v14 = vadd.f32 %v495_v2, %v391_v8  ;;  %v654_v15 = vadd.f32 %v653_v12, %v652_v9  ;;  %v506_v16 = vadd.f32 %v505_v13, %v401_v6 }
 0x11e   : > { %v521_v17 = vmax.f32 %v511_v11, 0.0 }
 0x11f   : > { %v518_v18 = vmax.f32 %v496_v14, 0.0  ;;  %v396_v19 = vadd.f32 %v654_v15, %v267_v40  ;;  %v520_v20 = vmax.f32 %v506_v16, 0.0 }
 0x120   : > { %530 = vst.msk [vmem:[%s950_s8 + $0x38] sm:$0xff] %vm522_vm1, %v521_v17 }
 0x121   : > { %527 = vst.msk [vmem:[%s950_s8 + $0x20] sm:$0xff] %vm522_vm1, %v518_v18  ;;  %v501_v21 = vadd.f32 %v689_v0, %v396_v19  ;;  %529 = vst.msk [vmem:[%s950_s8 + $0x30] sm:$0xff] %vm522_vm1, %v520_v20 }
 0x123   : > { %v519_v22 = vmax.f32 %v501_v21, 0.0 }
 0x125   : > { %528 = vst.msk [vmem:[%s950_s8 + $0x28] sm:$0xff] %vm522_vm1, %v519_v22 }
 0x126 PF: > { %s13_s12 = sadd.s32 1, %s767_s12  }
 0x127   : > { %p10_p4 = scmp.ge.s32.totalorder %s13_s12, 4  }
 0x129   :  { %12 = sbr.rel (!%p10_p4) target bundleno = 1 (0x1), region = 62 }

// kernel: _lambda_.25
= control target key start
LH: loop header
LB: loop body
LE: loop exit
PB: predicated region body
PF: predicated region fallthrough
CT: control target
= control target key end

     0   :  { %s1424_s21 = smov 0   ;;  %s1761_s0 = inlined_call_operand.vmem [shape: f32[2,576,16], index: 0, kind: input, shape index: {}]   ;;  %s1762_s1 = inlined_call_operand.vmem [shape: f32[64,576], index: 1, kind: input, shape index: {}]   ;;  %s1763_s2 = inlined_call_operand.vmem [shape: f32[64,1], index: 2, kind: input, shape index: {}]   ;;  %s1764_s3 = inlined_call_operand.vmem [shape: f32[2,32,16], index: 3, kind: input, shape index: {}]   ;;  %s1765_s4 = inlined_call_operand.vmem [shape: f32[64,32], index: 4, kind: input, shape index: {}]   ;;  %s1766_s5 = inlined_call_operand.vmem [shape: f32[64,1], index: 5, kind: input, shape index: {}]   ;;  %s1767_s6 = inlined_call_operand.vmem [shape: f32[2,64,16], index: 6, kind: output, shape index: {}]  }
   0x1 LB: > { %s1062_s22 = sadd.s32 4294967295, %s1386_s21   ;;  %p1066_p0 = scmp.ge.s32.totalorder %s1386_s21, 1  ;;  %s1386_s21 = sphi %s1424_s21, %s16_s21  }
   0x2   : > { %p222_p1 = scmp.lt.s32.totalorder %s1386_s21, 3 }
   0x4   : > { %p223_p2 = pnand %p1066_p0, %p222_p1 }
   0x5   : > { %p257_p3 = scmp.lt.s32.totalorder (!%p223_p2), %s1062_s22, 1  ;;  %v273_v0 = vld [vmem:[%s1762_s1 + $0x8] sm:$0xff] (!%p223_p2)  ;;  %v275_v1 = vld [vmem:[%s1762_s1 + $0x18] sm:$0xff] (!%p223_p2)  ;;  %v1388_v2 = vmov (!%p223_p2), 0   ;;  %vm432_vm0 = vcmask (!%p223_p2), 523264   ;;  %vm832_vm1 = vcmask (!%p223_p2), 261120  }
   0x6   : > { %226 = sbr.rel (%p223_p2) target bundleno = 318 (0x13e), region = 44  ;;  %521 = vmatprep.mubr.f32.mxu0 (!%p223_p2), %v273_v0  ;;  %626 = vmatprep.mubr.f32.mxu1 (!%p223_p2), %v275_v1  ;;  %vm986_vm2 = vcmask (!%p223_p2), 130048  }
   0x7   : > { %1379 = vset.pattern.permute.xlu1 (!%p223_p2), %v1388_v2  ;;  %1378 = vset.pattern.permute.xlu0 (!%p223_p2), %v1388_v2 }
   0xd   : > { %s1769_s22 = smov (!%p257_p3, %s1062_s22), 1 }
   0xe   : > { %s1368_s27 = smul.u32 576, %s1769_s22  ;;  %s1090_s7 = sshll.u32 %s1769_s22, 5 }
   0xf   : > { %s266_s10 = scalar_lea.vmem %s1764_s3, %s1090_s7 }
  0x10   : > { %s1444_s30 = scalar_lea.vmem %s1761_s0, %s1368_s27  ;;  %s1091_s27 = sshll.u32 %s1769_s22, 6 }
  0x11   : > { %v328_v3 = vld [vmem:[%s1444_s30 + $0x80] sm:$0xff]  ;;  %v329_v4 = vld [vmem:[%s1444_s30 + $0x88] sm:$0xff]  ;;  %v330_v14 = vld [vmem:[%s1444_s30 + $0x90] sm:$0xff]  ;;  %s1737_s7 = scalar_lea.vmem %s1767_s6, %s1091_s27 }
  0x12   : > { %v360_v5 = vld [vmem:[%s1444_s30 + $0x180] sm:$0xff]  ;;  %v1280_v6 = vpack.c.bf16 %v329_v4, %v328_v3  ;;  %v361_v7 = vld [vmem:[%s1444_s30 + $0x188] sm:$0xff]  ;;  %v331_v16 = vld [vmem:[%s1444_s30 + $0x98] sm:$0xff] }
  0x13   : > { %v312_v8 = vld [vmem:[%s1444_s30] sm:$0xff]  ;;  %v313_v9 = vld [vmem:[%s1444_s30 + $0x8] sm:$0xff]  ;;  %v1312_v10 = vpack.c.bf16 %v361_v7, %v360_v5  ;;  %v362_v17 = vld [vmem:[%s1444_s30 + $0x190] sm:$0xff]  ;;  %v1284_v19 = vpack.c.bf16 %v331_v16, %v330_v14 }
  0x14   : > { %v1282_v11 = vpack.c.bf16 %v313_v9, %v312_v8  ;;  %v344_v12 = vld [vmem:[%s1444_s30 + $0x100] sm:$0xff]  ;;  %v345_v13 = vld [vmem:[%s1444_s30 + $0x108] sm:$0xff]  ;;  %1281 = vmatprep.subr.bf16.mxu0 %v1280_v6  ;;  %v363_v18 = vld [vmem:[%s1444_s30 + $0x198] sm:$0xff] }
  0x15   : > { %v1314_v15 = vpack.c.bf16 %v345_v13, %v344_v12  ;;  %1313 = vmatprep.subr.bf16.mxu1 %v1312_v10  ;;  %v1316_v20 = vpack.c.bf16 %v363_v18, %v362_v17  ;;  %v314_v21 = vld [vmem:[%s1444_s30 + $0x10] sm:$0xff]  ;;  %v315_v22 = vld [vmem:[%s1444_s30 + $0x18] sm:$0xff]  ;;  %v332_v26 = vld [vmem:[%s1444_s30 + $0xa0] sm:$0xff] }
  0x16   : > { %1283 = vmatpush3.bf16.msra.mxu0 %v1282_v11  ;;  %v346_v23 = vld [vmem:[%s1444_s30 + $0x110] sm:$0xff]  ;;  %v1286_v24 = vpack.c.bf16 %v315_v22, %v314_v21  ;;  %v347_v25 = vld [vmem:[%s1444_s30 + $0x118] sm:$0xff]  ;;  %v333_v27 = vld [vmem:[%s1444_s30 + $0xa8] sm:$0xff] }
  0x17   : > { %1315 = vmatpush3.bf16.msra.mxu1 %v1314_v15  ;;  %1285 = vmatprep.subr.bf16.mxu0 %v1284_v19  ;;  %v1318_v28 = vpack.c.bf16 %v347_v25, %v346_v23  ;;  %v1288_v29 = vpack.c.bf16 %v333_v27, %v332_v26  ;;  %v364_v30 = vld [vmem:[%s1444_s30 + $0x1a0] sm:$0xff]  ;;  %v365_v31 = vld [vmem:[%s1444_s30 + $0x1a8] sm:$0xff]  ;;  %v334_v38 = vld [vmem:[%s1444_s30 + $0xb0] sm:$0xff] }
  0x18   : > { %1317 = vmatprep.subr.bf16.mxu1 %v1316_v20  ;;  %v316_v32 = vld [vmem:[%s1444_s30 + $0x20] sm:$0xff]  ;;  %v1320_v33 = vpack.c.bf16 %v365_v31, %v364_v30  ;;  %v317_v34 = vld [vmem:[%s1444_s30 + $0x28] sm:$0xff]  ;;  %v335_v39 = vld [vmem:[%s1444_s30 + $0xb8] sm:$0xff] }
  0x19   : > { %v348_v35 = vld [vmem:[%s1444_s30 + $0x120] sm:$0xff]  ;;  %v349_v36 = vld [vmem:[%s1444_s30 + $0x128] sm:$0xff]  ;;  %v1290_v37 = vpack.c.bf16 %v317_v34, %v316_v32  ;;  %v366_v40 = vld [vmem:[%s1444_s30 + $0x1b0] sm:$0xff]  ;;  %v1292_v42 = vpack.c.bf16 %v335_v39, %v334_v38 }
  0x1a   : > { %1287 = vmatpush3.bf16.msra.mxu0 %v1286_v24  ;;  %v1322_v41 = vpack.c.bf16 %v349_v36, %v348_v35  ;;  %v367_v43 = vld [vmem:[%s1444_s30 + $0x1b8] sm:$0xff]  ;;  %v318_v44 = vld [vmem:[%s1444_s30 + $0x30] sm:$0xff]  ;;  %v336_v49 = vld [vmem:[%s1444_s30 + $0xc0] sm:$0xff] }
  0x1b   : > { %1319 = vmatpush3.bf16.msra.mxu1 %v1318_v28  ;;  %1289 = vmatprep.subr.bf16.mxu0 %v1288_v29  ;;  %v319_v45 = vld [vmem:[%s1444_s30 + $0x38] sm:$0xff]  ;;  %v1324_v46 = vpack.c.bf16 %v367_v43, %v366_v40  ;;  %v350_v47 = vld [vmem:[%s1444_s30 + $0x130] sm:$0xff]  ;;  %v337_v50 = vld [vmem:[%s1444_s30 + $0xc8] sm:$0xff] }
  0x1c   : > { %1321 = vmatprep.subr.bf16.mxu1 %v1320_v33  ;;  %v351_v48 = vld [vmem:[%s1444_s30 + $0x138] sm:$0xff]  ;;  %v368_v51 = vld [vmem:[%s1444_s30 + $0x1c0] sm:$0xff]  ;;  %v369_v52 = vld [vmem:[%s1444_s30 + $0x1c8] sm:$0xff]  ;;  %v1294_v53 = vpack.c.bf16 %v319_v45, %v318_v44  ;;  %v1296_v55 = vpack.c.bf16 %v337_v50, %v336_v49 }
  0x1d   : > { %v1326_v54 = vpack.c.bf16 %v351_v48, %v350_v47  ;;  %v320_v56 = vld [vmem:[%s1444_s30 + $0x40] sm:$0xff]  ;;  %v321_v57 = vld [vmem:[%s1444_s30 + $0x48] sm:$0xff]  ;;  %v1328_v59 = vpack.c.bf16 %v369_v52, %v368_v51  ;;  %v338_v61 = vld [vmem:[%s1444_s30 + $0xd0] sm:$0xff] }
  0x1e   : > { %1291 = vmatpush3.bf16.msra.mxu0 %v1290_v37  ;;  %v352_v58 = vld [vmem:[%s1444_s30 + $0x140] sm:$0xff]  ;;  %v353_v60 = vld [vmem:[%s1444_s30 + $0x148] sm:$0xff]  ;;  %v339_v62 = vld [vmem:[%s1444_s30 + $0xd8] sm:$0xff]  ;;  %v1298_v1 = vpack.c.bf16 %v321_v57, %v320_v56 }
  0x1f   : > { %1323 = vmatpush3.bf16.msra.mxu1 %v1322_v41  ;;  %1293 = vmatprep.subr.bf16.mxu0 %v1292_v42  ;;  %v370_v63 = vld [vmem:[%s1444_s30 + $0x1d0] sm:$0xff]  ;;  %v371_v0 = vld [vmem:[%s1444_s30 + $0x1d8] sm:$0xff]  ;;  %v1330_v2 = vpack.c.bf16 %v353_v60, %v352_v58  ;;  %v1300_v3 = vpack.c.bf16 %v339_v62, %v338_v61  ;;  %v340_v9 = vld [vmem:[%s1444_s30 + $0xe0] sm:$0xff] }
  0x20   : > { %1325 = vmatprep.subr.bf16.mxu1 %v1324_v46  ;;  %v322_v4 = vld [vmem:[%s1444_s30 + $0x50] sm:$0xff]  ;;  %v323_v5 = vld [vmem:[%s1444_s30 + $0x58] sm:$0xff]  ;;  %v1332_v7 = vpack.c.bf16 %v371_v0, %v370_v63  ;;  %v341_v10 = vld [vmem:[%s1444_s30 + $0xe8] sm:$0xff] }
  0x21   : > { %v354_v6 = vld [vmem:[%s1444_s30 + $0x150] sm:$0xff]  ;;  %v355_v8 = vld [vmem:[%s1444_s30 + $0x158] sm:$0xff]  ;;  %v372_v11 = vld [vmem:[%s1444_s30 + $0x1e0] sm:$0xff]  ;;  %v1302_v13 = vpack.c.bf16 %v323_v5, %v322_v4  ;;  %v1304_v15 = vpack.c.bf16 %v341_v10, %v340_v9 }
  0x22   : > { %1295 = vmatpush3.bf16.msra.mxu0 %v1294_v53  ;;  %v373_v12 = vld [vmem:[%s1444_s30 + $0x1e8] sm:$0xff]  ;;  %v1334_v14 = vpack.c.bf16 %v355_v8, %v354_v6  ;;  %v324_v16 = vld [vmem:[%s1444_s30 + $0x60] sm:$0xff]  ;;  %v342_v21 = vld [vmem:[%s1444_s30 + $0xf0] sm:$0xff] }
  0x23   : > { %1327 = vmatpush3.bf16.msra.mxu1 %v1326_v54  ;;  %1297 = vmatprep.subr.bf16.mxu0 %v1296_v55  ;;  %v325_v17 = vld [vmem:[%s1444_s30 + $0x68] sm:$0xff]  ;;  %v356_v18 = vld [vmem:[%s1444_s30 + $0x160] sm:$0xff]  ;;  %v1336_v19 = vpack.c.bf16 %v373_v12, %v372_v11  ;;  %v343_v22 = vld [vmem:[%s1444_s30 + $0xf8] sm:$0xff] }
  0x24   : > { %1329 = vmatprep.subr.bf16.mxu1 %v1328_v59  ;;  %v357_v20 = vld [vmem:[%s1444_s30 + $0x168] sm:$0xff]  ;;  %v374_v23 = vld [vmem:[%s1444_s30 + $0x1f0] sm:$0xff]  ;;  %v375_v24 = vld [vmem:[%s1444_s30 + $0x1f8] sm:$0xff]  ;;  %v1306_v25 = vpack.c.bf16 %v325_v17, %v324_v16  ;;  %v1308_v27 = vpack.c.bf16 %v343_v22, %v342_v21 }
  0x25   : > { %v1338_v26 = vpack.c.bf16 %v357_v20, %v356_v18  ;;  %v326_v28 = vld [vmem:[%s1444_s30 + $0x70] sm:$0xff]  ;;  %v327_v29 = vld [vmem:[%s1444_s30 + $0x78] sm:$0xff]  ;;  %v1340_v31 = vpack.c.bf16 %v375_v24, %v374_v23  ;;  %v376_v33 = vld [vmem:[%s1444_s30 + $0x200] sm:$0xff] }
  0x26   : > { %1299 = vmatpush3.bf16.msra.mxu0 %v1298_v1  ;;  %v358_v30 = vld [vmem:[%s1444_s30 + $0x170] sm:$0xff]  ;;  %v359_v32 = vld [vmem:[%s1444_s30 + $0x178] sm:$0xff]  ;;  %v377_v34 = vld [vmem:[%s1444_s30 + $0x208] sm:$0xff]  ;;  %v1310_v37 = vpack.c.bf16 %v327_v29, %v326_v28 }
  0x27   : > { %1331 = vmatpush3.bf16.msra.mxu1 %v1330_v2  ;;  %1301 = vmatprep.subr.bf16.mxu0 %v1300_v3  ;;  %v780_v35 = vld [vmem:[%s266_s10] sm:$0xff]  ;;  %v781_v36 = vld [vmem:[%s266_s10 + $0x8] sm:$0xff]  ;;  %v1342_v38 = vpack.c.bf16 %v359_v32, %v358_v30  ;;  %v1344_v39 = vpack.c.bf16 %v377_v34, %v376_v33  ;;  %v378_v41 = vld [vmem:[%s1444_s30 + $0x210] sm:$0xff] }
  0x28   : > { %1333 = vmatprep.subr.bf16.mxu1 %v1332_v7  ;;  %v1360_v40 = vpack.c.bf16 %v781_v36, %v780_v35  ;;  %v379_v42 = vld [vmem:[%s1444_s30 + $0x218] sm:$0xff]  ;;  %v272_v43 = vld [vmem:[%s1762_s1] sm:$0xff]  ;;  %v782_v44 = vld [vmem:[%s266_s10 + $0x10] sm:$0xff] }
  0x29   : > { %v783_v45 = vld [vmem:[%s266_s10 + $0x18] sm:$0xff]  ;;  %v274_v46 = vld [vmem:[%s1762_s1 + $0x10] sm:$0xff]  ;;  %v1348_v48 = vpack.c.bf16 %v379_v42, %v378_v41  ;;  %v280_v50 = vld [vmem:[%s1762_s1 + $0x40] sm:$0xff] }
  0x2a   : > { %1303 = vmatpush3.bf16.msra.mxu0 %v1302_v13  ;;  %v278_v47 = vld [vmem:[%s1762_s1 + $0x30] sm:$0xff]  ;;  %v380_v51 = vld [vmem:[%s1444_s30 + $0x220] sm:$0xff]  ;;  %v381_v52 = vld [vmem:[%s1444_s30 + $0x228] sm:$0xff]  ;;  %v1364_v53 = vpack.c.bf16 %v783_v45, %v782_v44 }
  0x2b   : > { %1335 = vmatpush3.bf16.msra.mxu1 %v1334_v14  ;;  %1305 = vmatprep.subr.bf16.mxu0 %v1304_v15  ;;  %v386_v49 = vld [vmem:[%s1763_s2 + $0x10] sm:$0xff]  ;;  %v277_v54 = vld [vmem:[%s1762_s1 + $0x28] sm:$0xff]  ;;  %v279_v55 = vld [vmem:[%s1762_s1 + $0x38] sm:$0xff]  ;;  %v1352_v58 = vpack.c.bf16 %v381_v52, %v380_v51 }
  0x2c   : > { %1337 = vmatprep.subr.bf16.mxu1 %v1336_v19  ;;  %404 = vperm.xlu1 %1379, %v386_v49   ;;  %v283_v56 = vld [vmem:[%s1762_s1 + $0x58] sm:$0xff]  ;;  %v285_v57 = vld [vmem:[%s1762_s1 + $0x68] sm:$0xff]  ;;  %v382_v59 = vld [vmem:[%s1444_s30 + $0x230] sm:$0xff] }
  0x2d   : > { %v383_v60 = vld [vmem:[%s1444_s30 + $0x238] sm:$0xff]  ;;  %v282_v61 = vld [vmem:[%s1762_s1 + $0x50] sm:$0xff]  ;;  %v384_v62 = vld [vmem:[%s1763_s2] sm:$0xff] }
  0x2e   : > { %1307 = vmatpush3.bf16.msra.mxu0 %v1306_v25  ;;  %v284_v63 = vld [vmem:[%s1762_s1 + $0x60] sm:$0xff]  ;;  %v290_v1 = vld [vmem:[%s1762_s1 + $0x90] sm:$0xff]  ;;  %v1356_v2 = vpack.c.bf16 %v383_v60, %v382_v59  ;;  %394 = vperm.xlu0 %1378, %v384_v62   ;;  %v387_v3 = vld [vmem:[%s1763_s2 + $0x18] sm:$0xff] }
  0x2f   : > { %1339 = vmatpush3.bf16.msra.mxu1 %v1338_v26  ;;  %1309 = vmatprep.subr.bf16.mxu0 %v1308_v27  ;;  %v288_v0 = vld [vmem:[%s1762_s1 + $0x80] sm:$0xff]  ;;  %v287_v4 = vld [vmem:[%s1762_s1 + $0x78] sm:$0xff]  ;;  %v385_v5 = vld [vmem:[%s1763_s2 + $0x8] sm:$0xff] }
  0x30   : > { %1341 = vmatprep.subr.bf16.mxu1 %v1340_v31  ;;  %v289_v6 = vld [vmem:[%s1762_s1 + $0x88] sm:$0xff]  ;;  %v295_v8 = vld [vmem:[%s1762_s1 + $0xb8] sm:$0xff]  ;;  %409 = vperm.xlu1 %1379, %v387_v3   ;;  %v292_v10 = vld [vmem:[%s1762_s1 + $0xa0] sm:$0xff] }
  0x31   : > { %v293_v7 = vld [vmem:[%s1762_s1 + $0xa8] sm:$0xff]  ;;  %v388_v11 = vld [vmem:[%s1763_s2 + $0x20] sm:$0xff]  ;;  %v294_v12 = vld [vmem:[%s1762_s1 + $0xb0] sm:$0xff] }
  0x32   : > { %1311 = vmatpush3.bf16.msra.mxu0 %v1310_v37  ;;  %399 = vperm.xlu0 %1378, %v385_v5   ;;  %v389_v9 = vld [vmem:[%s1763_s2 + $0x28] sm:$0xff]  ;;  %v298_v13 = vld [vmem:[%s1762_s1 + $0xd0] sm:$0xff]  ;;  %v300_v14 = vld [vmem:[%s1762_s1 + $0xe0] sm:$0xff] }
  0x33   : > { %1343 = vmatpush3.bf16.msra.mxu1 %v1342_v38  ;;  %1345 = vmatprep.subr.bf16.mxu0 %v1344_v39  ;;  %v391_v15 = vld [vmem:[%s1763_s2 + $0x38] sm:$0xff]  ;;  %v297_v16 = vld [vmem:[%s1762_s1 + $0xc8] sm:$0xff]  ;;  %v390_v17 = vld [vmem:[%s1763_s2 + $0x30] sm:$0xff] }
  0x34   : > { %1361 = vmatprep.subr.bf16.mxu1 %v1360_v40  ;;  %419 = vperm.xlu1 %1379, %v389_v9   ;;  %v299_v18 = vld [vmem:[%s1762_s1 + $0xd8] sm:$0xff]  ;;  %v305_v20 = vld [vmem:[%s1762_s1 + $0x108] sm:$0xff]  ;;  %v302_v22 = vld [vmem:[%s1762_s1 + $0xf0] sm:$0xff] }
  0x35   : > { %522 = vmatmul.mubr.f32.vlgmr.msra.gmra.mrb[0].mxu0 %v272_v43  ;;  %v303_v19 = vld [vmem:[%s1762_s1 + $0xf8] sm:$0xff]  ;;  %v785_v21 = vld [vmem:[%s1766_s5 + $0x8] sm:$0xff]  ;;  %v784_v23 = vld [vmem:[%s1766_s5] sm:$0xff] }
  0x36   : > { %627 = vmatmul.mubr.f32.vlgmr.msra.gmra.mrb[0].mxu1 %v274_v46  ;;  %1347 = vmatpush3.bf16.msra.mxu0 %v1344_v39  ;;  %v304_v24 = vld [vmem:[%s1762_s1 + $0x100] sm:$0xff]  ;;  %v310_v26 = vld [vmem:[%s1762_s1 + $0x130] sm:$0xff]  ;;  %v787_v27 = vld [vmem:[%s1766_s5 + $0x18] sm:$0xff] }
  0x37   : > { %1363 = vmatpush3.bf16.msra.mxu1 %v1360_v40  ;;  %526 = vmatprep.mubr.f32.mxu0 %v278_v47  ;;  %v308_v25 = vld [vmem:[%s1762_s1 + $0x120] sm:$0xff]  ;;  %v307_v28 = vld [vmem:[%s1762_s1 + $0x118] sm:$0xff]  ;;  %v786_v29 = vld [vmem:[%s1766_s5 + $0x10] sm:$0xff] }
  0x38   : > { %631 = vmatprep.mubr.f32.mxu1 %v280_v50  ;;  %1349 = vmatprep.subr.bf16.mxu0 %v1348_v48  ;;  %v309_v30 = vld [vmem:[%s1762_s1 + $0x128] sm:$0xff]  ;;  %v276_v31 = vld [vmem:[%s1762_s1 + $0x20] sm:$0xff]  ;;  %v286_v37 = vld [vmem:[%s1762_s1 + $0x70] sm:$0xff] }
  0x39   : > { %527 = vmatmul.mubr.f32.gmra.mrb[2].mxu0 %v277_v54  ;;  %1365 = vmatprep.subr.bf16.mxu1 %v1364_v53  ;;  %v772_v32 = vld [vmem:[%s1765_s4] sm:$0xff]  ;;  %v789_v33 = vld [vmem:[%s1766_s5 + $0x28] sm:$0xff]  ;;  %v774_v38 = vld [vmem:[%s1765_s4 + $0x10] sm:$0xff] }
  0x3a   : > { %632 = vmatmul.mubr.f32.gmra.mrb[2].mxu1 %v279_v55  ;;  %531 = vmatprep.mubr.f32.mxu0 %v283_v56  ;;  %v281_v34 = vld [vmem:[%s1762_s1 + $0x48] sm:$0xff]  ;;  %v788_v35 = vld [vmem:[%s1766_s5 + $0x20] sm:$0xff]  ;;  %v791_v39 = vld [vmem:[%s1766_s5 + $0x38] sm:$0xff] }
  0x3b   : > { %636 = vmatprep.mubr.f32.mxu1 %v285_v57  ;;  %1351 = vmatpush3.bf16.msra.mxu0 %v1348_v48  ;;  %v773_v36 = vld [vmem:[%s1765_s4 + $0x8] sm:$0xff]  ;;  %v291_v40 = vld [vmem:[%s1762_s1 + $0x98] sm:$0xff]  ;;  %v790_v41 = vld [vmem:[%s1766_s5 + $0x30] sm:$0xff] }
  0x3c   : > { %1353 = vmatprep.subr.bf16.mxu0 %v1352_v58  ;;  %1367 = vmatpush3.bf16.msra.mxu1 %v1364_v53  ;;  %v775_v42 = vld [vmem:[%s1765_s4 + $0x18] sm:$0xff]  ;;  %v296_v43 = vld [vmem:[%s1762_s1 + $0xc0] sm:$0xff]  ;;  %v301_v45 = vld [vmem:[%s1762_s1 + $0xe8] sm:$0xff] }
  0x3d   : > { %532 = vmatmul.mubr.f32.gmra.mrb[4].mxu0 %v282_v61  ;;  %414 = vperm.xlu0 %1378, %v388_v11   ;;  %v776_v44 = vld [vmem:[%s1765_s4 + $0x20] sm:$0xff]  ;;  %v777_v46 = vld [vmem:[%s1765_s4 + $0x28] sm:$0xff]  ;;  %v306_v47 = vld [vmem:[%s1762_s1 + $0x110] sm:$0xff] }
  0x3e   : > { %637 = vmatmul.mubr.f32.gmra.mrb[4].mxu1 %v284_v63  ;;  %536 = vmatprep.mubr.f32.mxu0 %v288_v0  ;;  %v778_v48 = vld [vmem:[%s1765_s4 + $0x30] sm:$0xff]  ;;  %v311_v49 = vld [vmem:[%s1762_s1 + $0x138] sm:$0xff] }
  0x3f   : > { %641 = vmatprep.mubr.f32.mxu1 %v290_v1  ;;  %1355 = vmatpush3.bf16.msra.mxu0 %v1352_v58  ;;  %v779_v50 = vld [vmem:[%s1765_s4 + $0x38] sm:$0xff] }
  0x40   : > { %1357 = vmatprep.subr.bf16.mxu0 %v1356_v2  ;;  %429 = vperm.xlu1 %1379, %v391_v15  }
  0x41   : > { %537 = vmatmul.mubr.f32.gmra.mrb[6].mxu0 %v287_v4  ;;  %424 = vperm.xlu0 %1378, %v390_v17  }
  0x42   : > { %642 = vmatmul.mubr.f32.gmra.mrb[6].mxu1 %v289_v6  ;;  %541 = vmatprep.mubr.f32.mxu0 %v293_v7 }
  0x43   : > { %646 = vmatprep.mubr.f32.mxu1 %v295_v8  ;;  %1359 = vmatpush3.bf16.msra.mxu0 %v1356_v2 }
  0x44   : > { %799 = vperm.xlu1 %1379, %v785_v21  }
  0x45   : > { %542 = vmatmul.mubr.f32.gmra.mrb[8].mxu0 %v292_v10  ;;  %794 = vperm.xlu0 %1378, %v784_v23  }
  0x46   : > { %647 = vmatmul.mubr.f32.gmra.mrb[8].mxu1 %v294_v12  ;;  %546 = vmatprep.mubr.f32.mxu0 %v298_v13 }
  0x47   : > { %651 = vmatprep.mubr.f32.mxu1 %v300_v14 }
  0x48   : > { %809 = vperm.xlu1 %1379, %v787_v27  }
  0x49   : > { %547 = vmatmul.mubr.f32.gmra.mrb[10].mxu0 %v297_v16  ;;  %804 = vperm.xlu0 %1378, %v786_v29  }
  0x4a   : > { %652 = vmatmul.mubr.f32.gmra.mrb[10].mxu1 %v299_v18  ;;  %551 = vmatprep.mubr.f32.mxu0 %v303_v19 }
  0x4b   : > { %656 = vmatprep.mubr.f32.mxu1 %v305_v20 }
  0x4c   : > { %819 = vperm.xlu1 %1379, %v789_v33  }
  0x4d   : > { %552 = vmatmul.mubr.f32.gmra.mrb[12].mxu0 %v302_v22  ;;  %814 = vperm.xlu0 %1378, %v788_v35  }
  0x4e   : > { %657 = vmatmul.mubr.f32.gmra.mrb[12].mxu1 %v304_v24  ;;  %556 = vmatprep.mubr.f32.mxu0 %v308_v25 }
  0x4f   : > { %661 = vmatprep.mubr.f32.mxu1 %v310_v26 }
  0x50   : > { %829 = vperm.xlu1 %1379, %v791_v39  }
  0x51   : > { %557 = vmatmul.mubr.f32.gmra.mrb[14].mxu0 %v307_v28  ;;  %824 = vperm.xlu0 %1378, %v790_v41  }
  0x52   : > { %662 = vmatmul.mubr.f32.gmra.mrb[14].mxu1 %v309_v30  ;;  %1248 = vmatprep.mubr.msk.f32.mxu0 %vm432_vm0, %v276_v31 }
  0x53   : > { %1268 = vmatprep.mubr.msk.f32.mxu1 %vm832_vm1, %v772_v32 }
  0x55   : > { %1249 = vmatmul.mubr.msk.f32.vlgmr.msra.gmra.mrb[16].mxu0 %vm432_vm0, %v281_v34 }
  0x56   : > { %1269 = vmatmul.mubr.msk.f32.vlgmr.msra.gmra.mrb[16].mxu1 %vm832_vm1, %v773_v36  ;;  %1251 = vmatprep.mubr.msk.f32.mxu0 %vm432_vm0, %v286_v37 }
  0x57   : > { %1271 = vmatprep.mubr.msk.f32.mxu1 %vm832_vm1, %v774_v38 }
  0x59   : > { %1252 = vmatmul.mubr.msk.f32.gmra.mrb[18].mxu0 %vm432_vm0, %v291_v40 }
  0x5a   : > { %1272 = vmatmul.mubr.msk.f32.gmra.mrb[18].mxu1 %vm832_vm1, %v775_v42  ;;  %1254 = vmatprep.mubr.msk.f32.mxu0 %vm432_vm0, %v296_v43 }
  0x5b   : > { %1274 = vmatprep.mubr.msk.f32.mxu1 %vm832_vm1, %v776_v44 }
  0x5d   : > { %1255 = vmatmul.mubr.msk.f32.gmra.mrb[20].mxu0 %vm432_vm0, %v301_v45 }
  0x5e   : > { %1275 = vmatmul.mubr.msk.f32.gmra.mrb[20].mxu1 %vm832_vm1, %v777_v46  ;;  %1257 = vmatprep.mubr.msk.f32.mxu0 %vm432_vm0, %v306_v47 }
  0x5f   : > { %1277 = vmatprep.mubr.msk.f32.mxu1 %vm832_vm1, %v778_v48 }
  0x61   : > { %1258 = vmatmul.mubr.msk.f32.gmra.mrb[22].mxu0 %vm432_vm0, %v311_v49 }
  0x62   : > { %1278 = vmatmul.mubr.msk.f32.gmra.mrb[22].mxu1 %vm832_vm1, %v779_v50 }
  0xab   : > { %v405_v55 = vpop.permute.xlu1 %404 }
  0xad   : > { %v395_v51 = vpop.permute.xlu0 %394 }
  0xaf   : > { %v410_v4 = vpop.permute.xlu1 %409 }
  0xb1   : > { %v400_v2 = vpop.permute.xlu0 %399 }
  0xb3   : > { %v420_v17 = vpop.permute.xlu1 %419 }
  0xbc   : > { %v415_v22 = vpop.permute.xlu0 %414 }
  0xbf   : > { %v430_v31 = vpop.permute.xlu1 %429 }
  0xc0   : > { %v425_v36 = vpop.permute.xlu0 %424 }
  0xc3   : > { %v800_v45 = vpop.permute.xlu1 %799 }
  0xc4   : > { %v795_v50 = vpop.permute.xlu0 %794 }
 0x108   : > { %v1124_v52 = vpop.f32.mrb[0].mxu0 }
 0x109   : > { %v1180_v53 = vpop.f32.mrb[0].mxu1  ;;  %v1125_v54 = vpop.f32.mrb[1].mxu0 }
 0x10a   : > { %v1126_v56 = vadd.f32 %v1125_v54, %v1124_v52  ;;  %v1181_v57 = vpop.f32.mrb[1].mxu1 }
 0x10b   : > { %v1182_v58 = vadd.f32 %v1181_v57, %v1180_v53 }
 0x10c   : > { %v524_v59 = vadd.f32 %v1126_v56, %v395_v51  ;;  %v1127_v60 = vpop.f32.mrb[2].mxu0 }
 0x10d   : > { %v1183_v61 = vpop.f32.mrb[2].mxu1  ;;  %v1128_v62 = vpop.f32.mrb[3].mxu0 }
 0x10e   : > { %v1129_v63 = vadd.f32 %v1128_v62, %v1127_v60  ;;  %v1184_v0 = vpop.f32.mrb[3].mxu1  ;;  %v1724_v1 = vadd.f32 %v1182_v58, %v524_v59  ;;  %v810_v59 = vpop.permute.xlu1 %809 }
 0x10f   : > { %v1185_v3 = vadd.f32 %v1184_v0, %v1183_v61 }
 0x110   : > { %v529_v5 = vadd.f32 %v1129_v63, %v400_v2  ;;  %v1130_v6 = vpop.f32.mrb[4].mxu0  ;;  %v805_v2 = vpop.permute.xlu0 %804 }
 0x111   : > { %v1186_v7 = vpop.f32.mrb[4].mxu1  ;;  %v1131_v8 = vpop.f32.mrb[5].mxu0 }
 0x112   : > { %v1132_v9 = vadd.f32 %v1131_v8, %v1130_v6  ;;  %v1187_v10 = vpop.f32.mrb[5].mxu1  ;;  %v634_v11 = vadd.f32 %v1185_v3, %v529_v5 }
 0x113   : > { %v1188_v12 = vadd.f32 %v1187_v10, %v1186_v7 }
 0x114   : > { %v534_v13 = vadd.f32 %v1132_v9, %v405_v55  ;;  %v1133_v14 = vpop.f32.mrb[6].mxu0 }
 0x115   : > { %v1189_v15 = vpop.f32.mrb[6].mxu1  ;;  %v1134_v16 = vpop.f32.mrb[7].mxu0 }
 0x116   : > { %v1135_v18 = vadd.f32 %v1134_v16, %v1133_v14  ;;  %v1190_v19 = vpop.f32.mrb[7].mxu1  ;;  %v1726_v20 = vadd.f32 %v1188_v12, %v534_v13 }
 0x117   : > { %v1191_v21 = vadd.f32 %v1190_v19, %v1189_v15 }
 0x118   : > { %v539_v23 = vadd.f32 %v1135_v18, %v410_v4  ;;  %v1136_v24 = vpop.f32.mrb[8].mxu0 }
 0x119   : > { %v1192_v25 = vpop.f32.mrb[8].mxu1  ;;  %v1137_v26 = vpop.f32.mrb[9].mxu0 }
 0x11a   : > { %v1138_v27 = vadd.f32 %v1137_v26, %v1136_v24  ;;  %v1193_v28 = vpop.f32.mrb[9].mxu1  ;;  %v644_v29 = vadd.f32 %v1191_v21, %v539_v23  ;;  %v815_v24 = vpop.permute.xlu0 %814 }
 0x11b   : > { %v1194_v30 = vadd.f32 %v1193_v28, %v1192_v25 }
 0x11c   : > { %v544_v32 = vadd.f32 %v1138_v27, %v415_v22  ;;  %v1139_v33 = vpop.f32.mrb[10].mxu0 }
 0x11d   : > { %v1195_v34 = vpop.f32.mrb[10].mxu1  ;;  %v1140_v35 = vpop.f32.mrb[11].mxu0 }
 0x11e   : > { %v1141_v37 = vadd.f32 %v1140_v35, %v1139_v33  ;;  %v1196_v38 = vpop.f32.mrb[11].mxu1  ;;  %v1728_v39 = vadd.f32 %v1194_v30, %v544_v32 }
 0x11f   : > { %v1197_v40 = vadd.f32 %v1196_v38, %v1195_v34 }
 0x120   : > { %v549_v41 = vadd.f32 %v1141_v37, %v420_v17  ;;  %v1142_v42 = vpop.f32.mrb[12].mxu0 }
 0x121   : > { %v1198_v43 = vpop.f32.mrb[12].mxu1  ;;  %v1143_v44 = vpop.f32.mrb[13].mxu0 }
 0x122   : > { %v1144_v46 = vadd.f32 %v1143_v44, %v1142_v42  ;;  %v1199_v47 = vpop.f32.mrb[13].mxu1  ;;  %v654_v48 = vadd.f32 %v1197_v40, %v549_v41 }
 0x123   : > { %v1200_v49 = vadd.f32 %v1199_v47, %v1198_v43 }
 0x124   : > { %v554_v51 = vadd.f32 %v1144_v46, %v425_v36  ;;  %v1145_v52 = vpop.f32.mrb[14].mxu0 }
 0x125   : > { %v1201_v53 = vpop.f32.mrb[14].mxu1  ;;  %v1146_v54 = vpop.f32.mrb[15].mxu0 }
 0x126   : > { %v1147_v55 = vadd.f32 %v1146_v54, %v1145_v52  ;;  %v1202_v56 = vpop.f32.mrb[15].mxu1  ;;  %v1730_v57 = vadd.f32 %v1200_v49, %v554_v51 }
 0x127   : > { %v1203_v58 = vadd.f32 %v1202_v56, %v1201_v53 }
 0x128   : > { %v559_v60 = vadd.f32 %v1147_v55, %v430_v31  ;;  %v1250_v61 = vpop.f32.mrb[16].mxu0 }
 0x129   : > { %v739_v62 = vadd.f32 %v1250_v61, %v634_v11  ;;  %v1270_v63 = vpop.f32.mrb[16].mxu1  ;;  %v733_v0 = vpop.f32.mrb[17].mxu0 }
 0x12a   : > { %v929_v3 = vadd.f32 %v1270_v63, %v800_v45  ;;  %v734_v4 = vadd.f32 %v733_v0, %v1724_v1  ;;  %v923_v5 = vpop.f32.mrb[17].mxu1  ;;  %v664_v6 = vadd.f32 %v1203_v58, %v559_v60  ;;  %v820_v1 = vpop.permute.xlu1 %819 }
 0x12b   : > { %v963_v7 = vmax.f32 %v739_v62, 0.0  ;;  %v924_v8 = vadd.f32 %v923_v5, %v795_v50 }
 0x12c   : > { %v971_v9 = vmax.f32 %v929_v3, 0.0  ;;  %v962_v10 = vmax.f32 %v734_v4, 0.0  ;;  %v1253_v12 = vpop.f32.mrb[18].mxu0 }
 0x12d   : > { %v970_v11 = vmax.f32 %v924_v8, 0.0  ;;  %v749_v13 = vadd.f32 %v1253_v12, %v644_v29  ;;  %v1273_v14 = vpop.f32.mrb[18].mxu1  ;;  %v743_v15 = vpop.f32.mrb[19].mxu0 }
 0x12e   : > { %v979_v16 = vadd.f32 %v971_v9, %v963_v7  ;;  %v939_v17 = vadd.f32 %v1273_v14, %v810_v59  ;;  %v744_v18 = vadd.f32 %v743_v15, %v1726_v20  ;;  %v933_v19 = vpop.f32.mrb[19].mxu1  ;;  %v830_v38 = vpop.permute.xlu1 %829 }
 0x12f   : > { %v978_v21 = vadd.f32 %v970_v11, %v962_v10  ;;  %v965_v22 = vmax.f32 %v749_v13, 0.0  ;;  %v934_v23 = vadd.f32 %v933_v19, %v805_v2 }
 0x130   : > { %988 = vst.msk [vmem:[%s1737_s7 + $0x8] sm:$0xff] %vm986_vm2, %v979_v16  ;;  %v973_v25 = vmax.f32 %v939_v17, 0.0  ;;  %v964_v26 = vmax.f32 %v744_v18, 0.0  ;;  %v1256_v27 = vpop.f32.mrb[20].mxu0 }
 0x131   : > { %987 = vst.msk [vmem:[%s1737_s7] sm:$0xff] %vm986_vm2, %v978_v21  ;;  %v972_v28 = vmax.f32 %v934_v23, 0.0  ;;  %v759_v29 = vadd.f32 %v1256_v27, %v654_v48  ;;  %v1276_v30 = vpop.f32.mrb[20].mxu1  ;;  %v753_v31 = vpop.f32.mrb[21].mxu0 }
 0x132   : > { %v981_v32 = vadd.f32 %v973_v25, %v965_v22  ;;  %v949_v20 = vadd.f32 %v1276_v30, %v820_v1  ;;  %v754_v33 = vadd.f32 %v753_v31, %v1728_v39  ;;  %v943_v34 = vpop.f32.mrb[21].mxu1  ;;  %v825_v39 = vpop.permute.xlu0 %824 }
 0x133   : > { %v980_v35 = vadd.f32 %v972_v28, %v964_v26  ;;  %v967_v36 = vmax.f32 %v759_v29, 0.0  ;;  %v944_v37 = vadd.f32 %v943_v34, %v815_v24 }
 0x134   : > { %990 = vst.msk [vmem:[%s1737_s7 + $0x18] sm:$0xff] %vm986_vm2, %v981_v32  ;;  %v975_v40 = vmax.f32 %v949_v20, 0.0  ;;  %v966_v41 = vmax.f32 %v754_v33, 0.0  ;;  %v1259_v42 = vpop.f32.mrb[22].mxu0 }
 0x135   : > { %989 = vst.msk [vmem:[%s1737_s7 + $0x10] sm:$0xff] %vm986_vm2, %v980_v35  ;;  %v974_v43 = vmax.f32 %v944_v37, 0.0  ;;  %v769_v44 = vadd.f32 %v1259_v42, %v664_v6  ;;  %v1279_v45 = vpop.f32.mrb[22].mxu1  ;;  %v763_v46 = vpop.f32.mrb[23].mxu0 }
 0x136   : > { %v983_v47 = vadd.f32 %v975_v40, %v967_v36  ;;  %v959_v48 = vadd.f32 %v1279_v45, %v830_v38  ;;  %v764_v49 = vadd.f32 %v763_v46, %v1730_v57  ;;  %v953_v50 = vpop.f32.mrb[23].mxu1 }
 0x137   : > { %v982_v51 = vadd.f32 %v974_v43, %v966_v41  ;;  %v969_v52 = vmax.f32 %v769_v44, 0.0  ;;  %v954_v53 = vadd.f32 %v953_v50, %v825_v39 }
 0x138   : > { %992 = vst.msk [vmem:[%s1737_s7 + $0x28] sm:$0xff] %vm986_vm2, %v983_v47  ;;  %v977_v54 = vmax.f32 %v959_v48, 0.0  ;;  %v968_v55 = vmax.f32 %v764_v49, 0.0 }
 0x139   : > { %991 = vst.msk [vmem:[%s1737_s7 + $0x20] sm:$0xff] %vm986_vm2, %v982_v51  ;;  %v976_v56 = vmax.f32 %v954_v53, 0.0 }
 0x13a   : > { %v985_v58 = vadd.f32 %v977_v54, %v969_v52 }
 0x13b   : > { %v984_v59 = vadd.f32 %v976_v56, %v968_v55 }
 0x13c   : > { %994 = vst.msk [vmem:[%s1737_s7 + $0x38] sm:$0xff] %vm986_vm2, %v985_v58 }
 0x13d   : > { %993 = vst.msk [vmem:[%s1737_s7 + $0x30] sm:$0xff] %vm986_vm2, %v984_v59 }
 0x13e PF: > { %s16_s21 = sadd.s32 1, %s1386_s21  }
 0x13f   : > { %p13_p4 = scmp.ge.s32.totalorder %s16_s21, 4  }
 0x141   :  { %15 = sbr.rel (!%p13_p4) target bundleno = 1 (0x1), region = 77 }

// kernel: _lambda_.27
= control target key start
LH: loop header
LB: loop body
LE: loop exit
PB: predicated region body
PF: predicated region fallthrough
CT: control target
= control target key end

     0   :  { %s1781_s24 = smov 0   ;;  %s2353_s0 = inlined_call_operand.vmem [shape: f32[2,9,64,16], index: 0, kind: input, shape index: {}]   ;;  %s2354_s1 = inlined_call_operand.vmem [shape: f32[9,64,1], index: 1, kind: input, shape index: {}]   ;;  %s2355_s2 = inlined_call_operand.vmem [shape: f32[64,64], index: 2, kind: input, shape index: {}]   ;;  %s2356_s3 = inlined_call_operand.vmem [shape: f32[2,64,16], index: 3, kind: input, shape index: {}]   ;;  %s2357_s4 = inlined_call_operand.vmem [shape: f32[64,1], index: 4, kind: input, shape index: {}]   ;;  %s2358_s5 = inlined_call_operand.vmem [shape: f32[64,1], index: 5, kind: input, shape index: {}]   ;;  %s2359_s6 = inlined_call_operand.vmem [shape: f32[64,64], index: 6, kind: input, shape index: {}]   ;;  %s2360_s7 = inlined_call_operand.vmem [shape: f32[2,64,16], index: 7, kind: output, shape index: {}]  }
   0x1 LB: > { %s1442_s25 = sadd.s32 4294967295, %s1738_s24   ;;  %p1446_p0 = scmp.ge.s32.totalorder %s1738_s24, 1  ;;  %s1738_s24 = sphi %s1781_s24, %s17_s24  }
   0x2   : > { %p247_p1 = scmp.lt.s32.totalorder %s1738_s24, 3 }
   0x4   : > { %p248_p2 = pnand %p1446_p0, %p247_p1 }
   0x5   : > { %v1460_v0 = vld [vmem:[%s2354_s1 + $0x40] sm:$0xff] (!%p248_p2)  ;;  %v1740_v2 = vmov (!%p248_p2), 0   ;;  %v1461_v3 = vld [vmem:[%s2354_s1 + $0x48] sm:$0xff] (!%p248_p2)  ;;  %v310_v7 = vld [vmem:[%s2354_s1 + $0x18] sm:$0xff] (!%p248_p2)  ;;  %p284_p3 = scmp.lt.s32.totalorder (!%p248_p2), %s1442_s25, 1  ;;  %vm971_vm0 = vcmask (!%p248_p2), 523264  }
   0x6   : > { %251 = sbr.rel (%p248_p2) target bundleno = 752 (0x2f0), region = 48  ;;  %v307_v1 = vld [vmem:[%s2354_s1] sm:$0xff] (!%p248_p2)  ;;  %1731 = vset.pattern.permute.xlu1 (!%p248_p2), %v1740_v2  ;;  %1730 = vset.pattern.permute.xlu0 (!%p248_p2), %v1740_v2  ;;  %v308_v4 = vld [vmem:[%s2354_s1 + $0x8] sm:$0xff] (!%p248_p2)  ;;  %v309_v8 = vld [vmem:[%s2354_s1 + $0x10] sm:$0xff] (!%p248_p2)  ;;  %vm1366_vm1 = vcmask (!%p248_p2), 130048  }
   0x7   : > { %383 = vperm.xlu1 (!%p248_p2), %1731, %v1460_v0   ;;  %317 = vperm.xlu0 (!%p248_p2), %1730, %v307_v1   ;;  %v1477_v5 = vld [vmem:[%s2354_s1 + $0x88] sm:$0xff] (!%p248_p2)  ;;  %v1476_v6 = vld [vmem:[%s2354_s1 + $0x80] sm:$0xff] (!%p248_p2)  ;;  %v1463_v9 = vld [vmem:[%s2354_s1 + $0x58] sm:$0xff] (!%p248_p2) }
   0x8   : > { %v1462_v10 = vld [vmem:[%s2354_s1 + $0x50] sm:$0xff] (!%p248_p2)  ;;  %v1493_v11 = vld [vmem:[%s2354_s1 + $0xc8] sm:$0xff] (!%p248_p2)  ;;  %v1492_v12 = vld [vmem:[%s2354_s1 + $0xc0] sm:$0xff] (!%p248_p2) }
   0x9   : > { %v1479_v13 = vld [vmem:[%s2354_s1 + $0x98] sm:$0xff] (!%p248_p2)  ;;  %v1478_v14 = vld [vmem:[%s2354_s1 + $0x90] sm:$0xff] (!%p248_p2)  ;;  %v1509_v15 = vld [vmem:[%s2354_s1 + $0x108] sm:$0xff] (!%p248_p2) }
   0xa   : > { %v1508_v16 = vld [vmem:[%s2354_s1 + $0x100] sm:$0xff] (!%p248_p2)  ;;  %v312_v17 = vld [vmem:[%s2354_s1 + $0x28] sm:$0xff] (!%p248_p2)  ;;  %v1495_v21 = vld [vmem:[%s2354_s1 + $0xd8] sm:$0xff] (!%p248_p2) }
   0xb   : > { %388 = vperm.xlu1 (!%p248_p2), %1731, %v1461_v3   ;;  %322 = vperm.xlu0 (!%p248_p2), %1730, %v308_v4   ;;  %v311_v18 = vld [vmem:[%s2354_s1 + $0x20] sm:$0xff] (!%p248_p2)  ;;  %v1465_v19 = vld [vmem:[%s2354_s1 + $0x68] sm:$0xff] (!%p248_p2)  ;;  %v1494_v22 = vld [vmem:[%s2354_s1 + $0xd0] sm:$0xff] (!%p248_p2) }
   0xc   : > { %v1464_v20 = vld [vmem:[%s2354_s1 + $0x60] sm:$0xff] (!%p248_p2)  ;;  %v1525_v23 = vld [vmem:[%s2354_s1 + $0x148] sm:$0xff] (!%p248_p2)  ;;  %v1511_v27 = vld [vmem:[%s2354_s1 + $0x118] sm:$0xff] (!%p248_p2) }
   0xd   : > { %v1524_v24 = vld [vmem:[%s2354_s1 + $0x140] sm:$0xff]  ;;  %v1481_v25 = vld [vmem:[%s2354_s1 + $0xa8] sm:$0xff]  ;;  %v1510_v28 = vld [vmem:[%s2354_s1 + $0x110] sm:$0xff]  ;;  %s2362_s25 = smov (!%p284_p3, %s1442_s25), 1 }
   0xe   : > { %v1480_v26 = vld [vmem:[%s2354_s1 + $0xa0] sm:$0xff]  ;;  %v1541_v29 = vld [vmem:[%s2354_s1 + $0x188] sm:$0xff]  ;;  %v314_v31 = vld [vmem:[%s2354_s1 + $0x38] sm:$0xff]  ;;  %s1720_s22 = smul.u32 576, %s2362_s25  ;;  %s1598_s14 = sshll.u32 %s2362_s25, 6 }
   0xf   : > { %462 = vperm.xlu1 %1731, %v1477_v5   ;;  %457 = vperm.xlu0 %1730, %v1476_v6   ;;  %v1540_v30 = vld [vmem:[%s2354_s1 + $0x180] sm:$0xff]  ;;  %v313_v32 = vld [vmem:[%s2354_s1 + $0x30] sm:$0xff]  ;;  %v1467_v33 = vld [vmem:[%s2354_s1 + $0x78] sm:$0xff]  ;;  %s2275_s17 = scalar_lea.vmem %s2356_s3, %s1598_s14  ;;  %s298_s13 = scalar_lea.vmem %s2360_s7, %s1598_s14 }
  0x10   : > { %v1466_v34 = vld [vmem:[%s2354_s1 + $0x70] sm:$0xff]  ;;  %v1497_v35 = vld [vmem:[%s2354_s1 + $0xe8] sm:$0xff]  ;;  %v1496_v36 = vld [vmem:[%s2354_s1 + $0xe0] sm:$0xff]  ;;  %s1991_s8 = scalar_lea.vmem %s2353_s0, %s1720_s22 }
  0x11   : > { %v1527_v37 = vld [vmem:[%s2354_s1 + $0x158] sm:$0xff]  ;;  %v1526_v38 = vld [vmem:[%s2354_s1 + $0x150] sm:$0xff]  ;;  %v1557_v39 = vld [vmem:[%s2354_s1 + $0x1c8] sm:$0xff] }
  0x12   : > { %v1556_v40 = vld [vmem:[%s2354_s1 + $0x1c0] sm:$0xff]  ;;  %v1483_v41 = vld [vmem:[%s2354_s1 + $0xb8] sm:$0xff]  ;;  %v1482_v42 = vld [vmem:[%s2354_s1 + $0xb0] sm:$0xff] }
  0x13   : > { %332 = vperm.xlu1 %1731, %v310_v7   ;;  %327 = vperm.xlu0 %1730, %v309_v8   ;;  %v1513_v43 = vld [vmem:[%s2354_s1 + $0x128] sm:$0xff]  ;;  %v1512_v44 = vld [vmem:[%s2354_s1 + $0x120] sm:$0xff]  ;;  %v1543_v45 = vld [vmem:[%s2354_s1 + $0x198] sm:$0xff] }
  0x14   : > { %v1542_v46 = vld [vmem:[%s2354_s1 + $0x190] sm:$0xff]  ;;  %v1573_v47 = vld [vmem:[%s2354_s1 + $0x208] sm:$0xff]  ;;  %v1572_v48 = vld [vmem:[%s2354_s1 + $0x200] sm:$0xff] }
  0x15   : > { %v1499_v49 = vld [vmem:[%s2354_s1 + $0xf8] sm:$0xff]  ;;  %v1498_v50 = vld [vmem:[%s2354_s1 + $0xf0] sm:$0xff]  ;;  %v1529_v51 = vld [vmem:[%s2354_s1 + $0x168] sm:$0xff] }
  0x16   : > { %v1528_v52 = vld [vmem:[%s2354_s1 + $0x160] sm:$0xff]  ;;  %v1559_v53 = vld [vmem:[%s2354_s1 + $0x1d8] sm:$0xff]  ;;  %v1558_v54 = vld [vmem:[%s2354_s1 + $0x1d0] sm:$0xff] }
  0x17   : > { %398 = vperm.xlu1 %1731, %v1463_v9   ;;  %393 = vperm.xlu0 %1730, %v1462_v10   ;;  %v1515_v55 = vld [vmem:[%s2354_s1 + $0x138] sm:$0xff]  ;;  %v1514_v56 = vld [vmem:[%s2354_s1 + $0x130] sm:$0xff]  ;;  %v1545_v57 = vld [vmem:[%s2354_s1 + $0x1a8] sm:$0xff] }
  0x18   : > { %v1544_v58 = vld [vmem:[%s2354_s1 + $0x1a0] sm:$0xff]  ;;  %v1575_v59 = vld [vmem:[%s2354_s1 + $0x218] sm:$0xff]  ;;  %v1574_v60 = vld [vmem:[%s2354_s1 + $0x210] sm:$0xff] }
  0x19   : > { %v1531_v61 = vld [vmem:[%s2354_s1 + $0x178] sm:$0xff]  ;;  %v1530_v62 = vld [vmem:[%s2354_s1 + $0x170] sm:$0xff]  ;;  %v1561_v63 = vld [vmem:[%s2354_s1 + $0x1e8] sm:$0xff] }
  0x1a   : > { %v1560_v0 = vld [vmem:[%s2354_s1 + $0x1e0] sm:$0xff]  ;;  %v1547_v3 = vld [vmem:[%s2354_s1 + $0x1b8] sm:$0xff]  ;;  %v1546_v4 = vld [vmem:[%s2354_s1 + $0x1b0] sm:$0xff] }
  0x1b   : > { %536 = vperm.xlu1 %1731, %v1493_v11   ;;  %531 = vperm.xlu0 %1730, %v1492_v12   ;;  %v1452_v1 = vld [vmem:[%s1991_s8 + $0x40] sm:$0xff]  ;;  %v1453_v9 = vld [vmem:[%s1991_s8 + $0x48] sm:$0xff] }
  0x1c   : > { %v299_v2 = vld [vmem:[%s1991_s8] sm:$0xff]  ;;  %v300_v10 = vld [vmem:[%s1991_s8 + $0x8] sm:$0xff] }
  0x1d   : > { %v1577_v11 = vld [vmem:[%s2354_s1 + $0x228] sm:$0xff]  ;;  %v1576_v12 = vld [vmem:[%s2354_s1 + $0x220] sm:$0xff] }
  0x1f   : > { %472 = vperm.xlu1 %1731, %v1479_v13   ;;  %467 = vperm.xlu0 %1730, %v1478_v14  }
  0x23   : > { %610 = vperm.xlu1 %1731, %v1509_v15   ;;  %605 = vperm.xlu0 %1730, %v1508_v16  }
  0x27   : > { %342 = vperm.xlu1 %1731, %v312_v17   ;;  %337 = vperm.xlu0 %1730, %v311_v18   ;;  %v1469_v18 = vld [vmem:[%s1991_s8 + $0x88] sm:$0xff] }
  0x2b   : > { %408 = vperm.xlu1 %1731, %v1465_v19   ;;  %403 = vperm.xlu0 %1730, %v1464_v20   ;;  %v1468_v19 = vld [vmem:[%s1991_s8 + $0x80] sm:$0xff]  ;;  %v1563_v20 = vld [vmem:[%s2354_s1 + $0x1f8] sm:$0xff] }
  0x2f   : > { %546 = vperm.xlu1 %1731, %v1495_v21   ;;  %541 = vperm.xlu0 %1730, %v1494_v22   ;;  %v1562_v21 = vld [vmem:[%s2354_s1 + $0x1f0] sm:$0xff] }
  0x33   : > { %684 = vperm.xlu1 %1731, %v1525_v23   ;;  %679 = vperm.xlu0 %1730, %v1524_v24  }
  0x37   : > { %482 = vperm.xlu1 %1731, %v1481_v25   ;;  %477 = vperm.xlu0 %1730, %v1480_v26  }
  0x3b   : > { %620 = vperm.xlu1 %1731, %v1511_v27   ;;  %615 = vperm.xlu0 %1730, %v1510_v28   ;;  %v1579_v27 = vld [vmem:[%s2354_s1 + $0x238] sm:$0xff]  ;;  %v1578_v28 = vld [vmem:[%s2354_s1 + $0x230] sm:$0xff] }
  0x3f   : > { %758 = vperm.xlu1 %1731, %v1541_v29   ;;  %753 = vperm.xlu0 %1730, %v1540_v30  }
  0x43   : > { %352 = vperm.xlu1 %1731, %v314_v31   ;;  %347 = vperm.xlu0 %1730, %v313_v32  }
  0x47   : > { %418 = vperm.xlu1 %1731, %v1467_v33   ;;  %413 = vperm.xlu0 %1730, %v1466_v34   ;;  %v302_v33 = vld [vmem:[%s1991_s8 + $0x18] sm:$0xff]  ;;  %v301_v34 = vld [vmem:[%s1991_s8 + $0x10] sm:$0xff] }
  0x4b   : > { %556 = vperm.xlu1 %1731, %v1497_v35   ;;  %551 = vperm.xlu0 %1730, %v1496_v36   ;;  %v1455_v35 = vld [vmem:[%s1991_s8 + $0x58] sm:$0xff]  ;;  %v1454_v36 = vld [vmem:[%s1991_s8 + $0x50] sm:$0xff] }
  0x4f   : > { %694 = vperm.xlu1 %1731, %v1527_v37   ;;  %689 = vperm.xlu0 %1730, %v1526_v38   ;;  %v1102_v37 = vld [vmem:[%s2357_s4 + $0x8] sm:$0xff]  ;;  %v1101_v38 = vld [vmem:[%s2357_s4] sm:$0xff] }
  0x53   : > { %832 = vperm.xlu1 %1731, %v1557_v39   ;;  %827 = vperm.xlu0 %1730, %v1556_v40  }
  0x57   : > { %492 = vperm.xlu1 %1731, %v1483_v41   ;;  %487 = vperm.xlu0 %1730, %v1482_v42  }
  0x5b   : > { %630 = vperm.xlu1 %1731, %v1513_v43   ;;  %625 = vperm.xlu0 %1730, %v1512_v44  }
  0x5f   : > { %768 = vperm.xlu1 %1731, %v1543_v45   ;;  %763 = vperm.xlu0 %1730, %v1542_v46   ;;  %v1158_v45 = vld [vmem:[%s2358_s5 + $0x8] sm:$0xff]  ;;  %v1157_v46 = vld [vmem:[%s2358_s5] sm:$0xff] }
  0x63   : > { %906 = vperm.xlu1 %1731, %v1573_v47   ;;  %901 = vperm.xlu0 %1730, %v1572_v48  }
  0x67   : > { %566 = vperm.xlu1 %1731, %v1499_v49   ;;  %561 = vperm.xlu0 %1730, %v1498_v50  }
  0x6b   : > { %704 = vperm.xlu1 %1731, %v1529_v51   ;;  %699 = vperm.xlu0 %1730, %v1528_v52   ;;  %v955_v51 = vld [vmem:[%s2355_s2] sm:$0xff]  ;;  %v1471_v52 = vld [vmem:[%s1991_s8 + $0x98] sm:$0xff] }
  0x6c   : > { %1648 = vmatprep.mubr.msk.f32.mxu0 %vm971_vm0, %v955_v51 }
  0x6f   : > { %842 = vperm.xlu1 %1731, %v1559_v53   ;;  %837 = vperm.xlu0 %1730, %v1558_v54   ;;  %v1470_v53 = vld [vmem:[%s1991_s8 + $0x90] sm:$0xff]  ;;  %v1104_v54 = vld [vmem:[%s2357_s4 + $0x18] sm:$0xff] }
  0x73   : > { %640 = vperm.xlu1 %1731, %v1515_v55   ;;  %635 = vperm.xlu0 %1730, %v1514_v56   ;;  %v1103_v55 = vld [vmem:[%s2357_s4 + $0x10] sm:$0xff] }
  0x77   : > { %778 = vperm.xlu1 %1731, %v1545_v57   ;;  %773 = vperm.xlu0 %1730, %v1544_v58  }
  0x7b   : > { %916 = vperm.xlu1 %1731, %v1575_v59   ;;  %911 = vperm.xlu0 %1730, %v1574_v60   ;;  %v1160_v60 = vld [vmem:[%s2358_s5 + $0x18] sm:$0xff] }
  0x7f   : > { %714 = vperm.xlu1 %1731, %v1531_v61   ;;  %709 = vperm.xlu0 %1730, %v1530_v62   ;;  %v1159_v61 = vld [vmem:[%s2358_s5 + $0x10] sm:$0xff] }
  0x83   : > { %852 = vperm.xlu1 %1731, %v1561_v63   ;;  %847 = vperm.xlu0 %1730, %v1560_v0  }
  0x86   : > { %v384_v5 = vpop.permute.xlu1 %383  ;;  %v318_v6 = vpop.permute.xlu0 %317 }
  0x87   : > { %v421_v7 = vmul.f32 %v1452_v1, %v384_v5  ;;  %v355_v8 = vmul.f32 %v318_v6, %v299_v2  ;;  %788 = vperm.xlu1 %1731, %v1547_v3   ;;  %783 = vperm.xlu0 %1730, %v1546_v4   ;;  %v1106_v2 = vld [vmem:[%s2357_s4 + $0x28] sm:$0xff]  ;;  %v1105_v3 = vld [vmem:[%s2357_s4 + $0x20] sm:$0xff] }
  0x88   : > { %v304_v6 = vld [vmem:[%s1991_s8 + $0x28] sm:$0xff] }
  0x89   : > { %v429_v13 = vadd.f32 %v421_v7, %v355_v8  ;;  %v303_v7 = vld [vmem:[%s1991_s8 + $0x20] sm:$0xff]  ;;  %v1457_v8 = vld [vmem:[%s1991_s8 + $0x68] sm:$0xff] }
  0x8a   : > { %v389_v14 = vpop.permute.xlu1 %388  ;;  %v323_v15 = vpop.permute.xlu0 %322 }
  0x8b   : > { %v422_v16 = vmul.f32 %v1453_v9, %v389_v14  ;;  %v356_v17 = vmul.f32 %v323_v15, %v300_v10  ;;  %926 = vperm.xlu1 %1731, %v1577_v11   ;;  %921 = vperm.xlu0 %1730, %v1576_v12   ;;  %v1456_v9 = vld [vmem:[%s1991_s8 + $0x60] sm:$0xff]  ;;  %v1162_v10 = vld [vmem:[%s2358_s5 + $0x28] sm:$0xff] }
  0x8c   : > { %v1161_v11 = vld [vmem:[%s2358_s5 + $0x20] sm:$0xff] }
  0x8d   : > { %v430_v22 = vadd.f32 %v422_v16, %v356_v17 }
  0x8e   : > { %v463_v23 = vpop.permute.xlu1 %462  ;;  %v458_v24 = vpop.permute.xlu0 %457 }
  0x8f   : > { %v496_v25 = vmul.f32 %v1469_v18, %v463_v23  ;;  %v495_v26 = vmul.f32 %v1468_v19, %v458_v24  ;;  %862 = vperm.xlu1 %1731, %v1563_v20   ;;  %857 = vperm.xlu0 %1730, %v1562_v21   ;;  %v1487_v18 = vld [vmem:[%s1991_s8 + $0xd8] sm:$0xff]  ;;  %v1486_v19 = vld [vmem:[%s1991_s8 + $0xd0] sm:$0xff] }
  0x90   : > { %v1108_v20 = vld [vmem:[%s2357_s4 + $0x38] sm:$0xff]  ;;  %v1107_v21 = vld [vmem:[%s2357_s4 + $0x30] sm:$0xff] }
  0x91   : > { %v2023_v29 = vadd.f32 %v496_v25, %v430_v22  ;;  %v2025_v30 = vadd.f32 %v495_v26, %v429_v13 }
  0x92   : > { %v333_v31 = vpop.permute.xlu1 %332  ;;  %v328_v32 = vpop.permute.xlu0 %327 }
  0x93   : > { %936 = vperm.xlu1 %1731, %v1579_v27   ;;  %931 = vperm.xlu0 %1730, %v1578_v28   ;;  %v358_v39 = vmul.f32 %v333_v31, %v302_v33  ;;  %v357_v42 = vmul.f32 %v328_v32, %v301_v34  ;;  %v1164_v28 = vld [vmem:[%s2358_s5 + $0x38] sm:$0xff]  ;;  %v1163_v31 = vld [vmem:[%s2358_s5 + $0x30] sm:$0xff] }
  0x96   : > { %v399_v40 = vpop.permute.xlu1 %398  ;;  %v394_v41 = vpop.permute.xlu0 %393 }
  0x97   : > { %v424_v43 = vmul.f32 %v1455_v35, %v399_v40  ;;  %v423_v44 = vmul.f32 %v1454_v36, %v394_v41  ;;  %1116 = vperm.xlu1 %1731, %v1102_v37   ;;  %1111 = vperm.xlu0 %1730, %v1101_v38   ;;  %v1473_v36 = vld [vmem:[%s1991_s8 + $0xa8] sm:$0xff]  ;;  %v1472_v37 = vld [vmem:[%s1991_s8 + $0xa0] sm:$0xff] }
  0x99   : > { %v432_v47 = vadd.f32 %v424_v43, %v358_v39  ;;  %v431_v48 = vadd.f32 %v423_v44, %v357_v42 }
  0x9a   : > { %v2043_v49 = vpop.permute.xlu1 %536  ;;  %v2045_v50 = vpop.permute.xlu0 %531 }
  0x9b   : > { %1172 = vperm.xlu1 %1731, %v1158_v45   ;;  %1167 = vperm.xlu0 %1730, %v1157_v46  }
  0x9e   : > { %v473_v56 = vpop.permute.xlu1 %472  ;;  %v468_v57 = vpop.permute.xlu0 %467 }
  0x9f   : > { %v498_v58 = vmul.f32 %v1471_v52, %v473_v56  ;;  %v497_v59 = vmul.f32 %v1470_v53, %v468_v57  ;;  %1126 = vperm.xlu1 %1731, %v1104_v54   ;;  %1121 = vperm.xlu0 %1730, %v1103_v55  }
  0xa1   : > { %v506_v62 = vadd.f32 %v498_v58, %v432_v47  ;;  %v505_v63 = vadd.f32 %v497_v59, %v431_v48 }
  0xa2   : > { %v2065_v0 = vpop.permute.xlu1 %610  ;;  %v2067_v1 = vpop.permute.xlu0 %605 }
  0xa3   : > { %1182 = vperm.xlu1 %1731, %v1160_v60   ;;  %1177 = vperm.xlu0 %1730, %v1159_v61   ;;  %v1485_v60 = vld [vmem:[%s1991_s8 + $0xc8] sm:$0xff]  ;;  %v1484_v61 = vld [vmem:[%s1991_s8 + $0xc0] sm:$0xff] }
  0xa6   : > { %v343_v4 = vpop.permute.xlu1 %342  ;;  %v338_v5 = vpop.permute.xlu0 %337 }
  0xa7   : > { %1136 = vperm.xlu1 %1731, %v1106_v2   ;;  %1131 = vperm.xlu0 %1730, %v1105_v3   ;;  %v360_v12 = vmul.f32 %v343_v4, %v304_v6  ;;  %v359_v15 = vmul.f32 %v338_v5, %v303_v7  ;;  %v570_v4 = vmul.f32 %v1485_v60, %v2043_v49  ;;  %v1517_v6 = vld [vmem:[%s1991_s8 + $0x148] sm:$0xff]  ;;  %v1516_v7 = vld [vmem:[%s1991_s8 + $0x140] sm:$0xff]  ;;  %v1502_v60 = vld [vmem:[%s1991_s8 + $0x110] sm:$0xff] }
  0xa8   : > { %v569_v5 = vmul.f32 %v1484_v61, %v2045_v50 }
  0xaa   : > { %v409_v13 = vpop.permute.xlu1 %408  ;;  %v404_v14 = vpop.permute.xlu0 %403 }
  0xab   : > { %v426_v16 = vmul.f32 %v1457_v8, %v409_v13  ;;  %v425_v17 = vmul.f32 %v1456_v9, %v404_v14  ;;  %1192 = vperm.xlu1 %1731, %v1162_v10   ;;  %1187 = vperm.xlu0 %1730, %v1161_v11   ;;  %v1533_v10 = vld [vmem:[%s1991_s8 + $0x188] sm:$0xff]  ;;  %v1532_v11 = vld [vmem:[%s1991_s8 + $0x180] sm:$0xff]  ;;  %v578_v14 = vadd.f32 %v570_v4, %v2023_v29  ;;  %v1518_v4 = vld [vmem:[%s1991_s8 + $0x150] sm:$0xff] }
  0xac   : > { %v1564_v29 = vld [vmem:[%s1991_s8 + $0x200] sm:$0xff] }
  0xad   : > { %v434_v22 = vadd.f32 %v426_v16, %v360_v12  ;;  %v433_v23 = vadd.f32 %v425_v17, %v359_v15  ;;  %v577_v15 = vadd.f32 %v569_v5, %v2025_v30  ;;  %v1549_v16 = vld [vmem:[%s1991_s8 + $0x1c8] sm:$0xff]  ;;  %v1548_v17 = vld [vmem:[%s1991_s8 + $0x1c0] sm:$0xff] }
  0xae   : > { %v547_v24 = vpop.permute.xlu1 %546  ;;  %v542_v25 = vpop.permute.xlu0 %541 }
  0xaf   : > { %v572_v26 = vmul.f32 %v1487_v18, %v547_v24  ;;  %v571_v27 = vmul.f32 %v1486_v19, %v542_v25  ;;  %1146 = vperm.xlu1 %1731, %v1108_v20   ;;  %1141 = vperm.xlu0 %1730, %v1107_v21  }
  0xb1   : > { %v2099_v32 = vadd.f32 %v572_v26, %v506_v62  ;;  %v2101_v33 = vadd.f32 %v571_v27, %v505_v63  ;;  %v1501_v62 = vld [vmem:[%s1991_s8 + $0x108] sm:$0xff]  ;;  %v1500_v63 = vld [vmem:[%s1991_s8 + $0x100] sm:$0xff] }
  0xb2   : > { %v685_v34 = vpop.permute.xlu1 %684  ;;  %v680_v35 = vpop.permute.xlu0 %679  ;;  %v644_v8 = vmul.f32 %v1501_v62, %v2065_v0  ;;  %v643_v9 = vmul.f32 %v1500_v63, %v2067_v1  ;;  %v1565_v26 = vld [vmem:[%s1991_s8 + $0x208] sm:$0xff]  ;;  %v1519_v63 = vld [vmem:[%s1991_s8 + $0x158] sm:$0xff] }
  0xb3   : > { %1202 = vperm.xlu1 %1731, %v1164_v28   ;;  %1197 = vperm.xlu0 %1730, %v1163_v31   ;;  %v718_v49 = vmul.f32 %v1517_v6, %v685_v34  ;;  %v717_v50 = vmul.f32 %v1516_v7, %v680_v35  ;;  %v1535_v7 = vld [vmem:[%s1991_s8 + $0x198] sm:$0xff] }
  0xb4   : > { %v652_v18 = vadd.f32 %v644_v8, %v578_v14  ;;  %v651_v0 = vadd.f32 %v643_v9, %v577_v15  ;;  %v1534_v8 = vld [vmem:[%s1991_s8 + $0x190] sm:$0xff]  ;;  %v1551_v15 = vld [vmem:[%s1991_s8 + $0x1d8] sm:$0xff] }
  0xb6   : > { %v483_v38 = vpop.permute.xlu1 %482  ;;  %v478_v39 = vpop.permute.xlu0 %477 }
  0xb7   : > { %v500_v40 = vmul.f32 %v1473_v36, %v483_v38  ;;  %v499_v41 = vmul.f32 %v1472_v37, %v478_v39 }
  0xb9   : > { %v2105_v42 = vadd.f32 %v500_v40, %v434_v22  ;;  %v2107_v43 = vadd.f32 %v499_v41, %v433_v23  ;;  %v726_v22 = vadd.f32 %v718_v49, %v652_v18  ;;  %v725_v23 = vadd.f32 %v717_v50, %v651_v0  ;;  %v1550_v49 = vld [vmem:[%s1991_s8 + $0x1d0] sm:$0xff] }
  0xba   : > { %v2109_v44 = vpop.permute.xlu1 %620  ;;  %v2111_v45 = vpop.permute.xlu0 %615 }
  0xbb   : > { %v645_v6 = vmul.f32 %v1502_v60, %v2111_v45  ;;  %v306_v60 = vld [vmem:[%s1991_s8 + $0x38] sm:$0xff] }
  0xbe   : > { %v759_v46 = vpop.permute.xlu1 %758  ;;  %v754_v47 = vpop.permute.xlu0 %753 }
  0xbf   : > { %v792_v19 = vmul.f32 %v1533_v10, %v759_v46  ;;  %v791_v1 = vmul.f32 %v1532_v11, %v754_v47 }
  0xc1   : > { %v800_v27 = vadd.f32 %v792_v19, %v726_v22  ;;  %v799_v28 = vadd.f32 %v791_v1, %v725_v23 }
  0xc2   : > { %v2113_v48 = vpop.permute.xlu1 %352  ;;  %v2115_v51 = vpop.permute.xlu0 %347 }
  0xc6   : > { %v2117_v52 = vpop.permute.xlu1 %418  ;;  %v2119_v53 = vpop.permute.xlu0 %413 }
  0xca   : > { %v2121_v54 = vpop.permute.xlu1 %556  ;;  %v2123_v55 = vpop.permute.xlu0 %551 }
  0xce   : > { %v2125_v56 = vpop.permute.xlu1 %694  ;;  %v2127_v57 = vpop.permute.xlu0 %689 }
  0xcf   : > { %v720_v11 = vmul.f32 %v1519_v63, %v2125_v56  ;;  %v719_v14 = vmul.f32 %v1518_v4, %v2127_v57  ;;  %v1567_v56 = vld [vmem:[%s1991_s8 + $0x218] sm:$0xff]  ;;  %v1566_v57 = vld [vmem:[%s1991_s8 + $0x210] sm:$0xff] }
  0xd0   : > { %v305_v63 = vld [vmem:[%s1991_s8 + $0x30] sm:$0xff]  ;;  %v1475_v4 = vld [vmem:[%s1991_s8 + $0xb8] sm:$0xff] }
  0xd2   : > { %v833_v58 = vpop.permute.xlu1 %832  ;;  %v828_v59 = vpop.permute.xlu0 %827 }
  0xd3   : > { %v866_v24 = vmul.f32 %v1549_v16, %v833_v58  ;;  %v865_v25 = vmul.f32 %v1548_v17, %v828_v59  ;;  %v1503_v59 = vld [vmem:[%s1991_s8 + $0x118] sm:$0xff] }
  0xd4   : > { %v646_v5 = vmul.f32 %v1503_v59, %v2109_v44  ;;  %v653_v44 = vadd.f32 %v645_v6, %v2101_v33 }
  0xd5   : > { %v874_v34 = vadd.f32 %v866_v24, %v800_v27  ;;  %v873_v35 = vadd.f32 %v865_v25, %v799_v28  ;;  %v1488_v27 = vld [vmem:[%s1991_s8 + $0xe0] sm:$0xff] }
  0xd6   : > { %v2133_v2 = vpop.permute.xlu1 %492  ;;  %v2135_v3 = vpop.permute.xlu0 %487  ;;  %v654_v50 = vadd.f32 %v646_v5, %v2099_v32  ;;  %v727_v19 = vadd.f32 %v719_v14, %v653_v44  ;;  %v1474_v5 = vld [vmem:[%s1991_s8 + $0xb0] sm:$0xff] }
  0xd8   : > { %v728_v0 = vadd.f32 %v720_v11, %v654_v50  ;;  %v1536_v11 = vld [vmem:[%s1991_s8 + $0x1a0] sm:$0xff]  ;;  %v1491_v50 = vld [vmem:[%s1991_s8 + $0xf8] sm:$0xff] }
  0xda   : > { %v2145_v12 = vpop.permute.xlu1 %630  ;;  %v2147_v13 = vpop.permute.xlu0 %625 }
  0xde   : > { %v769_v20 = vpop.permute.xlu1 %768  ;;  %v764_v21 = vpop.permute.xlu0 %763 }
  0xdf   : > { %v794_v16 = vmul.f32 %v1535_v7, %v769_v20  ;;  %v793_v45 = vmul.f32 %v1534_v8, %v764_v21 }
  0xe1   : > { %v802_v23 = vadd.f32 %v794_v16, %v728_v0  ;;  %v801_v24 = vadd.f32 %v793_v45, %v727_v19  ;;  %v361_v16 = vmul.f32 %v2115_v51, %v305_v63  ;;  %v502_v45 = vmul.f32 %v1475_v4, %v2133_v2  ;;  %v1553_v19 = vld [vmem:[%s1991_s8 + $0x1e8] sm:$0xff]  ;;  %v1555_v4 = vld [vmem:[%s1991_s8 + $0x1f8] sm:$0xff] }
  0xe2   : > { %v907_v30 = vpop.permute.xlu1 %906  ;;  %v902_v31 = vpop.permute.xlu0 %901  ;;  %v501_v0 = vmul.f32 %v1474_v5, %v2135_v3  ;;  %v1554_v5 = vld [vmem:[%s1991_s8 + $0x1f0] sm:$0xff] }
  0xe3   : > { %v940_v36 = vmul.f32 %v1565_v26, %v907_v30  ;;  %v939_v37 = vmul.f32 %v1564_v29, %v902_v31  ;;  %v1489_v29 = vld [vmem:[%s1991_s8 + $0xe8] sm:$0xff] }
  0xe4   : > { %v1505_v31 = vld [vmem:[%s1991_s8 + $0x128] sm:$0xff] }
  0xe5   : > { %v948_v38 = vadd.f32 %v940_v36, %v874_v34  ;;  %v947_v39 = vadd.f32 %v939_v37, %v873_v35  ;;  %v1504_v34 = vld [vmem:[%s1991_s8 + $0x120] sm:$0xff]  ;;  %v1459_v37 = vld [vmem:[%s1991_s8 + $0x78] sm:$0xff]  ;;  %v648_v6 = vmul.f32 %v1505_v31, %v2145_v12 }
  0xe6   : > { %v2155_v40 = vpop.permute.xlu1 %566  ;;  %v2157_v41 = vpop.permute.xlu0 %561  ;;  %v647_v7 = vmul.f32 %v1504_v34, %v2147_v13  ;;  %v428_v8 = vmul.f32 %v1459_v37, %v2117_v52  ;;  %v1490_v13 = vld [vmem:[%s1991_s8 + $0xf0] sm:$0xff] }
  0xe7   : > { %v1688_v46 = vpack.c.bf16 %v948_v38, %v947_v39  ;;  %v1458_v38 = vld [vmem:[%s1991_s8 + $0x70] sm:$0xff]  ;;  %v574_v39 = vmul.f32 %v1489_v29, %v2121_v54  ;;  %v575_v51 = vmul.f32 %v1490_v13, %v2157_v41 }
  0xe8   : > { %v427_v54 = vmul.f32 %v1458_v38, %v2119_v53  ;;  %v362_v53 = vmul.f32 %v2113_v48, %v306_v60  ;;  %v576_v48 = vmul.f32 %v1491_v50, %v2155_v40  ;;  %v1568_v40 = vld [vmem:[%s1991_s8 + $0x220] sm:$0xff]  ;;  %v1539_v38 = vld [vmem:[%s1991_s8 + $0x1b8] sm:$0xff]  ;;  %v1570_v50 = vld [vmem:[%s1991_s8 + $0x230] sm:$0xff] }
  0xe9   : > { %1689 = vmatprep.subr.bf16.mxu0 %v1688_v46 }
  0xea   : > { %v2159_v47 = vpop.permute.xlu1 %704  ;;  %v2161_v58 = vpop.permute.xlu0 %699  ;;  %1691 = vmatpush3.bf16.msra.mxu0 %v1688_v46  ;;  %v573_v46 = vmul.f32 %v1488_v27, %v2123_v55  ;;  %v1537_v55 = vld [vmem:[%s1991_s8 + $0x1a8] sm:$0xff] }
  0xeb   : > { %v1569_v27 = vld [vmem:[%s1991_s8 + $0x228] sm:$0xff] }
  0xec   : > { %v581_v12 = vadd.f32 %v573_v46, %v2107_v43 }
  0xee   : > { %v843_v61 = vpop.permute.xlu1 %842  ;;  %v838_v62 = vpop.permute.xlu0 %837  ;;  %v655_v43 = vadd.f32 %v647_v7, %v581_v12  ;;  %v1571_v12 = vld [vmem:[%s1991_s8 + $0x238] sm:$0xff] }
  0xef   : > { %v868_v1 = vmul.f32 %v1551_v15, %v843_v61  ;;  %v867_v22 = vmul.f32 %v1550_v49, %v838_v62  ;;  %v1521_v61 = vld [vmem:[%s1991_s8 + $0x168] sm:$0xff]  ;;  %v1520_v62 = vld [vmem:[%s1991_s8 + $0x160] sm:$0xff]  ;;  %v582_v49 = vadd.f32 %v574_v39, %v2105_v42  ;;  %v1538_v39 = vld [vmem:[%s1991_s8 + $0x1b0] sm:$0xff] }
  0xf0   : > { %v722_v44 = vmul.f32 %v1521_v61, %v2159_v47  ;;  %v721_v52 = vmul.f32 %v1520_v62, %v2161_v58  ;;  %v435_v58 = vadd.f32 %v427_v54, %v361_v16 }
  0xf1   : > { %v876_v20 = vadd.f32 %v868_v1, %v802_v23  ;;  %v875_v21 = vadd.f32 %v867_v22, %v801_v24  ;;  %v1552_v1 = vld [vmem:[%s1991_s8 + $0x1e0] sm:$0xff]  ;;  %v656_v42 = vadd.f32 %v648_v6, %v582_v49  ;;  %v1507_v22 = vld [vmem:[%s1991_s8 + $0x138] sm:$0xff]  ;;  %v436_v23 = vadd.f32 %v428_v8, %v362_v53 }
  0xf2   : > { %v2171_v9 = vpop.permute.xlu1 %640  ;;  %v2173_v10 = vpop.permute.xlu0 %635 }
  0xf3   : > { %v730_v24 = vadd.f32 %v722_v44, %v656_v42 }
  0xf6   : > { %v779_v17 = vpop.permute.xlu1 %778  ;;  %v774_v18 = vpop.permute.xlu0 %773 }
  0xf7   : > { %v795_v47 = vmul.f32 %v1536_v11, %v774_v18  ;;  %v509_v18 = vadd.f32 %v501_v0, %v435_v58  ;;  %v961_v58 = vld [vmem:[%s2355_s2 + $0x30] sm:$0xff] }
  0xf9   : > { %v583_v31 = vadd.f32 %v575_v51, %v509_v18  ;;  %v1213_v51 = vld [vmem:[%s2359_s6] sm:$0xff]  ;;  %v964_v18 = vld [vmem:[%s2275_s17 + $0x8] sm:$0xff] }
  0xfa   : > { %v917_v32 = vpop.permute.xlu1 %916  ;;  %v912_v33 = vpop.permute.xlu0 %911  ;;  %1676 = vmatprep.mubr.msk.f32.mxu1 %vm971_vm0, %v1213_v51  ;;  %v1217_v51 = vld [vmem:[%s2359_s6 + $0x20] sm:$0xff] }
  0xfb   : > { %v942_v25 = vmul.f32 %v1567_v56, %v917_v32  ;;  %v941_v26 = vmul.f32 %v1566_v57, %v912_v33  ;;  %v1506_v56 = vld [vmem:[%s1991_s8 + $0x130] sm:$0xff]  ;;  %v796_v57 = vmul.f32 %v1537_v55, %v779_v17  ;;  %v729_v32 = vadd.f32 %v721_v52, %v655_v43  ;;  %v1523_v33 = vld [vmem:[%s1991_s8 + $0x178] sm:$0xff] }
  0xfc   : > { %v510_v17 = vadd.f32 %v502_v45, %v436_v23  ;;  %v649_v29 = vmul.f32 %v1506_v56, %v2173_v10  ;;  %v957_v56 = vld [vmem:[%s2355_s2 + $0x10] sm:$0xff]  ;;  %v960_v23 = vld [vmem:[%s2355_s2 + $0x28] sm:$0xff] }
  0xfd   : > { %v950_v28 = vadd.f32 %v942_v25, %v876_v20  ;;  %v949_v30 = vadd.f32 %v941_v26, %v875_v21  ;;  %v1522_v20 = vld [vmem:[%s1991_s8 + $0x170] sm:$0xff]  ;;  %v650_v26 = vmul.f32 %v1507_v22, %v2171_v9  ;;  %v803_v41 = vadd.f32 %v795_v47, %v729_v32  ;;  %v956_v22 = vld [vmem:[%s2355_s2 + $0x8] sm:$0xff]  ;;  %v959_v47 = vld [vmem:[%s2355_s2 + $0x20] sm:$0xff] }
  0xfe   : > { %v2187_v35 = vpop.permute.xlu1 %714  ;;  %v2189_v36 = vpop.permute.xlu0 %709  ;;  %v657_v63 = vadd.f32 %v649_v29, %v583_v31  ;;  %v963_v29 = vld [vmem:[%s2275_s17] sm:$0xff] }
  0xff   : > { %v1692_v59 = vpack.c.bf16 %v950_v28, %v949_v30  ;;  %v804_v28 = vadd.f32 %v796_v57, %v730_v24  ;;  %v584_v30 = vadd.f32 %v576_v48, %v510_v17  ;;  %v724_v34 = vmul.f32 %v1523_v33, %v2187_v35  ;;  %v958_v57 = vld [vmem:[%s2355_s2 + $0x18] sm:$0xff] }
 0x100   : > { %v723_v37 = vmul.f32 %v1522_v20, %v2189_v36  ;;  %v962_v48 = vld [vmem:[%s2355_s2 + $0x38] sm:$0xff] }
 0x101   : > { %1693 = vmatprep.subr.bf16.mxu0 %v1692_v59  ;;  %v658_v62 = vadd.f32 %v650_v26, %v584_v30  ;;  %v966_v30 = vld [vmem:[%s2275_s17 + $0x18] sm:$0xff] }
 0x102   : > { %v853_v14 = vpop.permute.xlu1 %852  ;;  %v848_v15 = vpop.permute.xlu0 %847  ;;  %1695 = vmatpush3.bf16.msra.mxu0 %v1692_v59  ;;  %v731_v11 = vadd.f32 %v723_v37, %v657_v63 }
 0x103   : > { %v870_v21 = vmul.f32 %v1553_v19, %v853_v14  ;;  %v869_v25 = vmul.f32 %v1552_v1, %v848_v15  ;;  %v732_v54 = vadd.f32 %v724_v34, %v658_v62  ;;  %v965_v34 = vld [vmem:[%s2275_s17 + $0x10] sm:$0xff] }
 0x105   : > { %v878_v60 = vadd.f32 %v870_v21, %v804_v28  ;;  %v877_v9 = vadd.f32 %v869_v25, %v803_v41 }
 0x106   : > { %v789_v2 = vpop.permute.xlu1 %788  ;;  %v784_v3 = vpop.permute.xlu0 %783 }
 0x107   : > { %v798_v6 = vmul.f32 %v1539_v38, %v789_v2  ;;  %v797_v7 = vmul.f32 %v1538_v39, %v784_v3 }
 0x109   : > { %v806_v13 = vadd.f32 %v798_v6, %v732_v54  ;;  %v805_v44 = vadd.f32 %v797_v7, %v731_v11 }
 0x10a   : > { %v927_v46 = vpop.permute.xlu1 %926  ;;  %v922_v59 = vpop.permute.xlu0 %921 }
 0x10b   : > { %v944_v61 = vmul.f32 %v1569_v27, %v927_v46  ;;  %v943_v10 = vmul.f32 %v1568_v40, %v922_v59 }
 0x10d   : > { %v952_v8 = vadd.f32 %v944_v61, %v878_v60  ;;  %v951_v35 = vadd.f32 %v943_v10, %v877_v9  ;;  %v968_v10 = vld [vmem:[%s2275_s17 + $0x28] sm:$0xff] }
 0x10e   : > { %v863_v36 = vpop.permute.xlu1 %862  ;;  %v858_v55 = vpop.permute.xlu0 %857 }
 0x10f   : > { %v872_v14 = vmul.f32 %v1555_v4, %v863_v36  ;;  %v871_v15 = vmul.f32 %v1554_v5, %v858_v55  ;;  %v1696_v49 = vpack.c.bf16 %v952_v8, %v951_v35  ;;  %v967_v4 = vld [vmem:[%s2275_s17 + $0x20] sm:$0xff] }
 0x111   : > { %1697 = vmatprep.subr.bf16.mxu0 %v1696_v49  ;;  %v880_v16 = vadd.f32 %v872_v14, %v806_v13  ;;  %v879_v45 = vadd.f32 %v871_v15, %v805_v44  ;;  %v970_v14 = vld [vmem:[%s2275_s17 + $0x38] sm:$0xff] }
 0x112   : > { %v937_v52 = vpop.permute.xlu1 %936  ;;  %v932_v53 = vpop.permute.xlu0 %931  ;;  %1699 = vmatpush3.bf16.msra.mxu0 %v1696_v49 }
 0x113   : > { %v946_v0 = vmul.f32 %v1571_v12, %v937_v52  ;;  %v945_v19 = vmul.f32 %v1570_v50, %v932_v53  ;;  %v969_v12 = vld [vmem:[%s2275_s17 + $0x30] sm:$0xff] }
 0x115   : > { %v954_v1 = vadd.f32 %v946_v0, %v880_v16  ;;  %v953_v42 = vadd.f32 %v945_v19, %v879_v45 }
 0x116   : > { %v1117_v2 = vpop.permute.xlu1 %1116  ;;  %v1112_v3 = vpop.permute.xlu0 %1111 }
 0x117   : > { %v1700_v43 = vpack.c.bf16 %v954_v1, %v953_v42 }
 0x119   : > { %1701 = vmatprep.subr.bf16.mxu0 %v1700_v43 }
 0x11a   : > { %1703 = vmatpush3.bf16.msra.mxu0 %v1700_v43  ;;  %v1173_v24 = vpop.permute.xlu1 %1172  ;;  %v1168_v32 = vpop.permute.xlu0 %1167 }
 0x11d   : > { %1649 = vmatmul.mubr.msk.f32.vlgmr.msra.gmra.mrb[0].mxu0 %vm971_vm0, %v956_v22 }
 0x11e   : > { %1651 = vmatprep.mubr.msk.f32.mxu0 %vm971_vm0, %v957_v56  ;;  %v1127_v33 = vpop.permute.xlu1 %1126  ;;  %v1122_v20 = vpop.permute.xlu0 %1121 }
 0x121   : > { %1652 = vmatmul.mubr.msk.f32.gmra.mrb[2].mxu0 %vm971_vm0, %v958_v57 }
 0x122   : > { %1654 = vmatprep.mubr.msk.f32.mxu0 %vm971_vm0, %v959_v47  ;;  %v1183_v21 = vpop.permute.xlu1 %1182  ;;  %v1178_v25 = vpop.permute.xlu0 %1177 }
 0x125   : > { %1655 = vmatmul.mubr.msk.f32.gmra.mrb[4].mxu0 %vm971_vm0, %v960_v23  ;;  %v1214_v23 = vld [vmem:[%s2359_s6 + $0x8] sm:$0xff] }
 0x126   : > { %1657 = vmatprep.mubr.msk.f32.mxu0 %vm971_vm0, %v961_v58  ;;  %v1137_v17 = vpop.permute.xlu1 %1136  ;;  %v1132_v26 = vpop.permute.xlu0 %1131  ;;  %v1215_v58 = vld [vmem:[%s2359_s6 + $0x10] sm:$0xff] }
 0x129   : > { %1658 = vmatmul.mubr.msk.f32.gmra.mrb[6].mxu0 %vm971_vm0, %v962_v48  ;;  %v1216_v48 = vld [vmem:[%s2359_s6 + $0x18] sm:$0xff] }
 0x12a   : > { %v1193_v37 = vpop.permute.xlu1 %1192  ;;  %v1188_v46 = vpop.permute.xlu0 %1187 }
 0x12e   : > { %v1147_v36 = vpop.permute.xlu1 %1146  ;;  %v1142_v15 = vpop.permute.xlu0 %1141 }
 0x132   : > { %v1203_v1 = vpop.permute.xlu1 %1202  ;;  %v1198_v22 = vpop.permute.xlu0 %1197 }
 0x1f0   : > { %v1650_v27 = vpop.f32.mrb[0].mxu0 }
 0x1f1   : > { %v2279_v40 = vadd.f32 %v1650_v27, %v964_v18  ;;  %v1062_v28 = vpop.f32.mrb[1].mxu0 }
 0x1f2   : > { %v2281_v41 = vadd.f32 %v1062_v28, %v963_v29 }
 0x1f3   : > { %v1150_v31 = vmul.f32 %v1117_v2, %v2279_v40  ;;  %v1218_v2 = vld [vmem:[%s2359_s6 + $0x28] sm:$0xff] }
 0x1f4   : > { %v1149_v38 = vmul.f32 %v1112_v3, %v2281_v41  ;;  %v1653_v39 = vpop.f32.mrb[2].mxu0  ;;  %v1219_v3 = vld [vmem:[%s2359_s6 + $0x30] sm:$0xff] }
 0x1f5   : > { %v2287_v59 = vadd.f32 %v1653_v39, %v966_v30  ;;  %v1072_v60 = vpop.f32.mrb[3].mxu0  ;;  %v1206_v9 = vadd.f32 %v1173_v24, %v1150_v31  ;;  %v1220_v24 = vld [vmem:[%s2359_s6 + $0x38] sm:$0xff] }
 0x1f6   : > { %v2289_v61 = vadd.f32 %v1072_v60, %v965_v34  ;;  %v1205_v62 = vadd.f32 %v1168_v32, %v1149_v38 }
 0x1f7   : > { %v1152_v63 = vmul.f32 %v1127_v33, %v2287_v59 }
 0x1f8   : > { %v1151_v5 = vmul.f32 %v1122_v20, %v2289_v61  ;;  %v1656_v6 = vpop.f32.mrb[4].mxu0  ;;  %v1704_v7 = vpack.c.bf16 %v1206_v9, %v1205_v62 }
 0x1f9   : > { %v1208_v8 = vadd.f32 %v1183_v21, %v1152_v63  ;;  %v2295_v35 = vadd.f32 %v1656_v6, %v968_v10  ;;  %v1082_v54 = vpop.f32.mrb[5].mxu0 }
 0x1fa   : > { %v1207_v55 = vadd.f32 %v1178_v25, %v1151_v5  ;;  %v2297_v11 = vadd.f32 %v1082_v54, %v967_v4  ;;  %1705 = vmatprep.subr.bf16.mxu1 %v1704_v7 }
 0x1fb   : > { %v1154_v49 = vmul.f32 %v1137_v17, %v2295_v35  ;;  %1707 = vmatpush3.bf16.msra.mxu1 %v1704_v7 }
 0x1fc   : > { %v1153_v50 = vmul.f32 %v1132_v26, %v2297_v11  ;;  %v1659_v13 = vpop.f32.mrb[6].mxu0  ;;  %v1708_v44 = vpack.c.bf16 %v1208_v8, %v1207_v55 }
 0x1fd   : > { %v1210_v52 = vadd.f32 %v1193_v37, %v1154_v49  ;;  %v1098_v53 = vadd.f32 %v1659_v13, %v970_v14  ;;  %v1092_v16 = vpop.f32.mrb[7].mxu0 }
 0x1fe   : > { %v1209_v45 = vadd.f32 %v1188_v46, %v1153_v50  ;;  %v1093_v0 = vadd.f32 %v1092_v16, %v969_v12  ;;  %1709 = vmatprep.subr.bf16.mxu1 %v1708_v44 }
 0x1ff   : > { %v1156_v19 = vmul.f32 %v1147_v36, %v1098_v53  ;;  %1711 = vmatpush3.bf16.msra.mxu1 %v1708_v44 }
 0x200   : > { %v1155_v42 = vmul.f32 %v1142_v15, %v1093_v0  ;;  %v1712_v43 = vpack.c.bf16 %v1210_v52, %v1209_v45 }
 0x201   : > { %v1212_v56 = vadd.f32 %v1203_v1, %v1156_v19 }
 0x202   : > { %v1211_v57 = vadd.f32 %v1198_v22, %v1155_v42  ;;  %1713 = vmatprep.subr.bf16.mxu1 %v1712_v43 }
 0x203   : > { %1715 = vmatpush3.bf16.msra.mxu1 %v1712_v43 }
 0x204   : > { %v1716_v47 = vpack.c.bf16 %v1212_v56, %v1211_v57 }
 0x206   : > { %1717 = vmatprep.subr.bf16.mxu1 %v1716_v47 }
 0x207   : > { %1719 = vmatpush3.bf16.msra.mxu1 %v1716_v47 }
 0x20a   : > { %1677 = vmatmul.mubr.msk.f32.vlgmr.msra.gmra.mrb[0].mxu1 %vm971_vm0, %v1214_v23 }
 0x20b   : > { %1679 = vmatprep.mubr.msk.f32.mxu1 %vm971_vm0, %v1215_v58 }
 0x20e   : > { %1680 = vmatmul.mubr.msk.f32.gmra.mrb[2].mxu1 %vm971_vm0, %v1216_v48 }
 0x20f   : > { %1682 = vmatprep.mubr.msk.f32.mxu1 %vm971_vm0, %v1217_v51 }
 0x212   : > { %1683 = vmatmul.mubr.msk.f32.gmra.mrb[4].mxu1 %vm971_vm0, %v1218_v2 }
 0x213   : > { %1685 = vmatprep.mubr.msk.f32.mxu1 %vm971_vm0, %v1219_v3 }
 0x216   : > { %1686 = vmatmul.mubr.msk.f32.gmra.mrb[6].mxu1 %vm971_vm0, %v1220_v24 }
 0x2dd   : > { %v1678_v32 = vpop.f32.mrb[0].mxu1 }
 0x2de   : > { %v1351_v33 = vmax.f32 %v1678_v32, 0.0  ;;  %v1311_v20 = vpop.f32.mrb[1].mxu1 }
 0x2df   : > { %v1350_v21 = vmax.f32 %v1311_v20, 0.0 }
 0x2e0   : > { %v1359_v25 = vadd.f32 %v1351_v33, %v2279_v40 }
 0x2e1   : > { %v1358_v17 = vadd.f32 %v1350_v21, %v2281_v41  ;;  %v1681_v18 = vpop.f32.mrb[2].mxu1 }
 0x2e2   : > { %1368 = vst.msk [vmem:[%s298_s13 + $0x8] sm:$0xff] %vm1366_vm1, %v1359_v25  ;;  %v1353_v26 = vmax.f32 %v1681_v18, 0.0  ;;  %v1321_v29 = vpop.f32.mrb[3].mxu1 }
 0x2e3   : > { %1367 = vst.msk [vmem:[%s298_s13] sm:$0xff] %vm1366_vm1, %v1358_v17  ;;  %v1352_v27 = vmax.f32 %v1321_v29, 0.0 }
 0x2e4   : > { %v1361_v28 = vadd.f32 %v1353_v26, %v2287_v59 }
 0x2e5   : > { %v1360_v30 = vadd.f32 %v1352_v27, %v2289_v61  ;;  %v1684_v31 = vpop.f32.mrb[4].mxu1 }
 0x2e6   : > { %1370 = vst.msk [vmem:[%s298_s13 + $0x18] sm:$0xff] %vm1366_vm1, %v1361_v28  ;;  %v1355_v34 = vmax.f32 %v1684_v31, 0.0  ;;  %v1331_v37 = vpop.f32.mrb[5].mxu1 }
 0x2e7   : > { %1369 = vst.msk [vmem:[%s298_s13 + $0x10] sm:$0xff] %vm1366_vm1, %v1360_v30  ;;  %v1354_v40 = vmax.f32 %v1331_v37, 0.0 }
 0x2e8   : > { %v1363_v41 = vadd.f32 %v1355_v34, %v2295_v35 }
 0x2e9   : > { %v1362_v38 = vadd.f32 %v1354_v40, %v2297_v11  ;;  %v1687_v39 = vpop.f32.mrb[6].mxu1 }
 0x2ea   : > { %1372 = vst.msk [vmem:[%s298_s13 + $0x28] sm:$0xff] %vm1366_vm1, %v1363_v41  ;;  %v1357_v46 = vmax.f32 %v1687_v39, 0.0  ;;  %v1341_v60 = vpop.f32.mrb[7].mxu1 }
 0x2eb   : > { %1371 = vst.msk [vmem:[%s298_s13 + $0x20] sm:$0xff] %vm1366_vm1, %v1362_v38  ;;  %v1356_v59 = vmax.f32 %v1341_v60, 0.0 }
 0x2ec   : > { %v1365_v9 = vadd.f32 %v1357_v46, %v1098_v53 }
 0x2ed   : > { %v1364_v61 = vadd.f32 %v1356_v59, %v1093_v0 }
 0x2ee   : > { %1374 = vst.msk [vmem:[%s298_s13 + $0x38] sm:$0xff] %vm1366_vm1, %v1365_v9 }
 0x2ef   : > { %1373 = vst.msk [vmem:[%s298_s13 + $0x30] sm:$0xff] %vm1366_vm1, %v1364_v61 }
 0x2f0 PF: > { %s17_s24 = sadd.s32 1, %s1738_s24  }
 0x2f1   : > { %p14_p4 = scmp.ge.s32.totalorder %s17_s24, 4  }
 0x2f3   :  { %16 = sbr.rel (!%p14_p4) target bundleno = 1 (0x1), region = 97 }

// kernel: _lambda_.26
= control target key start
LH: loop header
LB: loop body
LE: loop exit
PB: predicated region body
PF: predicated region fallthrough
CT: control target
= control target key end

     0   :  { %s2919_s15 = smov 0   ;;  %s3552_s0 = inlined_call_operand.vmem [shape: f32[2,9,64,16], index: 0, kind: input, shape index: {}]   ;;  %s3553_s1 = inlined_call_operand.vmem [shape: f32[9,64,1], index: 1, kind: input, shape index: {}]   ;;  %s3554_s2 = inlined_call_operand.vmem [shape: f32[192,64], index: 2, kind: input, shape index: {}]   ;;  %s3555_s3 = inlined_call_operand.vmem [shape: f32[16,4], index: 3, kind: input, shape index: {}]   ;;  %s3556_s4 = inlined_call_operand.vmem [shape: f32[2,64,16], index: 4, kind: output, shape index: {}]  }
   0x1 LB: > { %s2349_s16 = sadd.s32 4294967295, %s2891_s15   ;;  %p2353_p0 = scmp.ge.s32.totalorder %s2891_s15, 1  ;;  %s2891_s15 = sphi %s2919_s15, %s14_s15  }
   0x2   : > { %p162_p1 = scmp.lt.s32.totalorder %s2891_s15, 3 }
   0x4   : > { %p163_p2 = pnand %p2353_p0, %p162_p1 }
   0x5   : > { %v2365_v0 = vld [vmem:[%s3553_s1 + $0x40] sm:$0xff] (!%p163_p2)  ;;  %v2893_v2 = vmov (!%p163_p2), 0   ;;  %v2366_v3 = vld [vmem:[%s3553_s1 + $0x48] sm:$0xff] (!%p163_p2)  ;;  %v209_v7 = vld [vmem:[%s3553_s1 + $0x18] sm:$0xff] (!%p163_p2)  ;;  %p188_p3 = scmp.lt.s32.totalorder (!%p163_p2), %s2349_s16, 1  ;;  %vm878_vm0 = vcmask (!%p163_p2), 523264  }
   0x6   : > { %166 = sbr.rel (%p163_p2) target bundleno = 2610 (0xa32), region = 36  ;;  %v206_v1 = vld [vmem:[%s3553_s1] sm:$0xff] (!%p163_p2)  ;;  %2852 = vset.pattern.permute.xlu1 (!%p163_p2), %v2893_v2  ;;  %2851 = vset.pattern.permute.xlu0 (!%p163_p2), %v2893_v2  ;;  %v207_v4 = vld [vmem:[%s3553_s1 + $0x8] sm:$0xff] (!%p163_p2)  ;;  %v208_v8 = vld [vmem:[%s3553_s1 + $0x10] sm:$0xff] (!%p163_p2)  ;;  %vm1138_vm1 = vcmask (!%p163_p2), 130048   ;;  %vm1510_vm2 = vcmask (!%p163_p2), 31744  }
   0x7   : > { %282 = vperm.xlu1 (!%p163_p2), %2852, %v2365_v0   ;;  %216 = vperm.xlu0 (!%p163_p2), %2851, %v206_v1   ;;  %v2382_v5 = vld [vmem:[%s3553_s1 + $0x88] sm:$0xff] (!%p163_p2)  ;;  %v2381_v6 = vld [vmem:[%s3553_s1 + $0x80] sm:$0xff] (!%p163_p2)  ;;  %v2368_v9 = vld [vmem:[%s3553_s1 + $0x58] sm:$0xff] (!%p163_p2) }
   0x8   : > { %v2367_v10 = vld [vmem:[%s3553_s1 + $0x50] sm:$0xff] (!%p163_p2)  ;;  %v2398_v11 = vld [vmem:[%s3553_s1 + $0xc8] sm:$0xff] (!%p163_p2)  ;;  %v2397_v12 = vld [vmem:[%s3553_s1 + $0xc0] sm:$0xff] (!%p163_p2) }
   0x9   : > { %v2384_v13 = vld [vmem:[%s3553_s1 + $0x98] sm:$0xff] (!%p163_p2)  ;;  %v2383_v14 = vld [vmem:[%s3553_s1 + $0x90] sm:$0xff] (!%p163_p2)  ;;  %v2414_v15 = vld [vmem:[%s3553_s1 + $0x108] sm:$0xff] (!%p163_p2) }
   0xa   : > { %v2413_v16 = vld [vmem:[%s3553_s1 + $0x100] sm:$0xff] (!%p163_p2)  ;;  %v211_v17 = vld [vmem:[%s3553_s1 + $0x28] sm:$0xff] (!%p163_p2)  ;;  %v2400_v21 = vld [vmem:[%s3553_s1 + $0xd8] sm:$0xff] (!%p163_p2) }
   0xb   : > { %287 = vperm.xlu1 (!%p163_p2), %2852, %v2366_v3   ;;  %221 = vperm.xlu0 (!%p163_p2), %2851, %v207_v4   ;;  %v210_v18 = vld [vmem:[%s3553_s1 + $0x20] sm:$0xff] (!%p163_p2)  ;;  %v2370_v19 = vld [vmem:[%s3553_s1 + $0x68] sm:$0xff] (!%p163_p2)  ;;  %v2399_v22 = vld [vmem:[%s3553_s1 + $0xd0] sm:$0xff] (!%p163_p2) }
   0xc   : > { %v2369_v20 = vld [vmem:[%s3553_s1 + $0x60] sm:$0xff] (!%p163_p2)  ;;  %v2430_v23 = vld [vmem:[%s3553_s1 + $0x148] sm:$0xff] (!%p163_p2)  ;;  %v2416_v27 = vld [vmem:[%s3553_s1 + $0x118] sm:$0xff] (!%p163_p2) }
   0xd   : > { %v2429_v24 = vld [vmem:[%s3553_s1 + $0x140] sm:$0xff]  ;;  %v2386_v25 = vld [vmem:[%s3553_s1 + $0xa8] sm:$0xff]  ;;  %v2415_v28 = vld [vmem:[%s3553_s1 + $0x110] sm:$0xff]  ;;  %s3560_s16 = smov (!%p188_p3, %s2349_s16), 1 }
   0xe   : > { %v2385_v26 = vld [vmem:[%s3553_s1 + $0xa0] sm:$0xff]  ;;  %v2446_v29 = vld [vmem:[%s3553_s1 + $0x188] sm:$0xff]  ;;  %v213_v31 = vld [vmem:[%s3553_s1 + $0x38] sm:$0xff]  ;;  %s2840_s25 = smul.u32 576, %s3560_s16 }
   0xf   : > { %361 = vperm.xlu1 %2852, %v2382_v5   ;;  %356 = vperm.xlu0 %2851, %v2381_v6   ;;  %v2445_v30 = vld [vmem:[%s3553_s1 + $0x180] sm:$0xff]  ;;  %v212_v32 = vld [vmem:[%s3553_s1 + $0x30] sm:$0xff]  ;;  %v2372_v33 = vld [vmem:[%s3553_s1 + $0x78] sm:$0xff] }
  0x10   : > { %v2371_v34 = vld [vmem:[%s3553_s1 + $0x70] sm:$0xff]  ;;  %v2402_v35 = vld [vmem:[%s3553_s1 + $0xe8] sm:$0xff]  ;;  %v2401_v36 = vld [vmem:[%s3553_s1 + $0xe0] sm:$0xff]  ;;  %s3129_s28 = scalar_lea.vmem %s3552_s0, %s2840_s25  ;;  %s2551_s25 = sshll.u32 %s3560_s16, 6 }
  0x11   : > { %v2432_v37 = vld [vmem:[%s3553_s1 + $0x158] sm:$0xff]  ;;  %v2431_v38 = vld [vmem:[%s3553_s1 + $0x150] sm:$0xff]  ;;  %v2462_v39 = vld [vmem:[%s3553_s1 + $0x1c8] sm:$0xff] }
  0x12   : > { %v2461_v40 = vld [vmem:[%s3553_s1 + $0x1c0] sm:$0xff]  ;;  %v2388_v41 = vld [vmem:[%s3553_s1 + $0xb8] sm:$0xff]  ;;  %v2387_v42 = vld [vmem:[%s3553_s1 + $0xb0] sm:$0xff] }
  0x13   : > { %231 = vperm.xlu1 %2852, %v209_v7   ;;  %226 = vperm.xlu0 %2851, %v208_v8   ;;  %v2418_v43 = vld [vmem:[%s3553_s1 + $0x128] sm:$0xff]  ;;  %v2417_v44 = vld [vmem:[%s3553_s1 + $0x120] sm:$0xff]  ;;  %v2448_v45 = vld [vmem:[%s3553_s1 + $0x198] sm:$0xff] }
  0x14   : > { %v2447_v46 = vld [vmem:[%s3553_s1 + $0x190] sm:$0xff]  ;;  %v2478_v47 = vld [vmem:[%s3553_s1 + $0x208] sm:$0xff]  ;;  %v2477_v48 = vld [vmem:[%s3553_s1 + $0x200] sm:$0xff] }
  0x15   : > { %v2404_v49 = vld [vmem:[%s3553_s1 + $0xf8] sm:$0xff]  ;;  %v2403_v50 = vld [vmem:[%s3553_s1 + $0xf0] sm:$0xff]  ;;  %v2434_v51 = vld [vmem:[%s3553_s1 + $0x168] sm:$0xff] }
  0x16   : > { %v2433_v52 = vld [vmem:[%s3553_s1 + $0x160] sm:$0xff]  ;;  %v2464_v53 = vld [vmem:[%s3553_s1 + $0x1d8] sm:$0xff]  ;;  %v2463_v54 = vld [vmem:[%s3553_s1 + $0x1d0] sm:$0xff] }
  0x17   : > { %297 = vperm.xlu1 %2852, %v2368_v9   ;;  %292 = vperm.xlu0 %2851, %v2367_v10   ;;  %v2420_v55 = vld [vmem:[%s3553_s1 + $0x138] sm:$0xff]  ;;  %v2419_v56 = vld [vmem:[%s3553_s1 + $0x130] sm:$0xff]  ;;  %v2450_v57 = vld [vmem:[%s3553_s1 + $0x1a8] sm:$0xff] }
  0x18   : > { %v2449_v58 = vld [vmem:[%s3553_s1 + $0x1a0] sm:$0xff]  ;;  %v2480_v59 = vld [vmem:[%s3553_s1 + $0x218] sm:$0xff]  ;;  %v2479_v60 = vld [vmem:[%s3553_s1 + $0x210] sm:$0xff] }
  0x19   : > { %v2436_v61 = vld [vmem:[%s3553_s1 + $0x178] sm:$0xff]  ;;  %v2435_v62 = vld [vmem:[%s3553_s1 + $0x170] sm:$0xff]  ;;  %v2466_v63 = vld [vmem:[%s3553_s1 + $0x1e8] sm:$0xff] }
  0x1a   : > { %v2465_v0 = vld [vmem:[%s3553_s1 + $0x1e0] sm:$0xff]  ;;  %v2452_v1 = vld [vmem:[%s3553_s1 + $0x1b8] sm:$0xff]  ;;  %v2451_v2 = vld [vmem:[%s3553_s1 + $0x1b0] sm:$0xff] }
  0x1b   : > { %435 = vperm.xlu1 %2852, %v2398_v11   ;;  %430 = vperm.xlu0 %2851, %v2397_v12   ;;  %v2357_v5 = vld [vmem:[%s3129_s28 + $0x40] sm:$0xff]  ;;  %v2358_v7 = vld [vmem:[%s3129_s28 + $0x48] sm:$0xff]  ;;  %vm3473_vm3 = vmpackc.low %vm1510_vm2, %vm1510_vm2 }
  0x1c   : > { %v198_v6 = vld [vmem:[%s3129_s28] sm:$0xff]  ;;  %v199_v8 = vld [vmem:[%s3129_s28 + $0x8] sm:$0xff] }
  0x1d   : > { %v2482_v9 = vld [vmem:[%s3553_s1 + $0x228] sm:$0xff]  ;;  %v2481_v10 = vld [vmem:[%s3553_s1 + $0x220] sm:$0xff] }
  0x1f   : > { %371 = vperm.xlu1 %2852, %v2384_v13   ;;  %366 = vperm.xlu0 %2851, %v2383_v14  }
  0x23   : > { %509 = vperm.xlu1 %2852, %v2414_v15   ;;  %504 = vperm.xlu0 %2851, %v2413_v16  }
  0x27   : > { %241 = vperm.xlu1 %2852, %v211_v17   ;;  %236 = vperm.xlu0 %2851, %v210_v18   ;;  %v2374_v17 = vld [vmem:[%s3129_s28 + $0x88] sm:$0xff]  ;;  %v2373_v18 = vld [vmem:[%s3129_s28 + $0x80] sm:$0xff] }
  0x2b   : > { %307 = vperm.xlu1 %2852, %v2370_v19   ;;  %302 = vperm.xlu0 %2851, %v2369_v20   ;;  %v2468_v19 = vld [vmem:[%s3553_s1 + $0x1f8] sm:$0xff]  ;;  %v2467_v20 = vld [vmem:[%s3553_s1 + $0x1f0] sm:$0xff] }
  0x2f   : > { %445 = vperm.xlu1 %2852, %v2400_v21   ;;  %440 = vperm.xlu0 %2851, %v2399_v22  }
  0x33   : > { %583 = vperm.xlu1 %2852, %v2430_v23   ;;  %578 = vperm.xlu0 %2851, %v2429_v24  }
  0x37   : > { %381 = vperm.xlu1 %2852, %v2386_v25   ;;  %376 = vperm.xlu0 %2851, %v2385_v26  }
  0x3b   : > { %519 = vperm.xlu1 %2852, %v2416_v27   ;;  %514 = vperm.xlu0 %2851, %v2415_v28   ;;  %v2484_v27 = vld [vmem:[%s3553_s1 + $0x238] sm:$0xff]  ;;  %v2483_v28 = vld [vmem:[%s3553_s1 + $0x230] sm:$0xff] }
  0x3f   : > { %657 = vperm.xlu1 %2852, %v2446_v29   ;;  %652 = vperm.xlu0 %2851, %v2445_v30  }
  0x43   : > { %251 = vperm.xlu1 %2852, %v213_v31   ;;  %246 = vperm.xlu0 %2851, %v212_v32  }
  0x47   : > { %317 = vperm.xlu1 %2852, %v2372_v33   ;;  %312 = vperm.xlu0 %2851, %v2371_v34   ;;  %v201_v33 = vld [vmem:[%s3129_s28 + $0x18] sm:$0xff]  ;;  %v200_v34 = vld [vmem:[%s3129_s28 + $0x10] sm:$0xff] }
  0x4b   : > { %455 = vperm.xlu1 %2852, %v2402_v35   ;;  %450 = vperm.xlu0 %2851, %v2401_v36   ;;  %v2360_v35 = vld [vmem:[%s3129_s28 + $0x58] sm:$0xff]  ;;  %v2359_v36 = vld [vmem:[%s3129_s28 + $0x50] sm:$0xff] }
  0x4f   : > { %593 = vperm.xlu1 %2852, %v2432_v37   ;;  %588 = vperm.xlu0 %2851, %v2431_v38  }
  0x53   : > { %731 = vperm.xlu1 %2852, %v2462_v39   ;;  %726 = vperm.xlu0 %2851, %v2461_v40  }
  0x57   : > { %391 = vperm.xlu1 %2852, %v2388_v41   ;;  %386 = vperm.xlu0 %2851, %v2387_v42  }
  0x5b   : > { %529 = vperm.xlu1 %2852, %v2418_v43   ;;  %524 = vperm.xlu0 %2851, %v2417_v44  }
  0x5f   : > { %667 = vperm.xlu1 %2852, %v2448_v45   ;;  %662 = vperm.xlu0 %2851, %v2447_v46  }
  0x63   : > { %805 = vperm.xlu1 %2852, %v2478_v47   ;;  %800 = vperm.xlu0 %2851, %v2477_v48   ;;  %v854_v47 = vld [vmem:[%s3554_s2] sm:$0xff]  ;;  %v2376_v48 = vld [vmem:[%s3129_s28 + $0x98] sm:$0xff] }
  0x64   : > { %2652 = vmatprep.mubr.msk.f32.mxu0 %vm878_vm0, %v854_v47  ;;  %v2405_v47 = vld [vmem:[%s3129_s28 + $0x100] sm:$0xff] }
  0x67   : > { %465 = vperm.xlu1 %2852, %v2404_v49   ;;  %460 = vperm.xlu0 %2851, %v2403_v50   ;;  %v2375_v49 = vld [vmem:[%s3129_s28 + $0x90] sm:$0xff] }
  0x6b   : > { %603 = vperm.xlu1 %2852, %v2434_v51   ;;  %598 = vperm.xlu0 %2851, %v2433_v52  }
  0x6f   : > { %741 = vperm.xlu1 %2852, %v2464_v53   ;;  %736 = vperm.xlu0 %2851, %v2463_v54  }
  0x73   : > { %539 = vperm.xlu1 %2852, %v2420_v55   ;;  %534 = vperm.xlu0 %2851, %v2419_v56  }
  0x77   : > { %677 = vperm.xlu1 %2852, %v2450_v57   ;;  %672 = vperm.xlu0 %2851, %v2449_v58  }
  0x7b   : > { %815 = vperm.xlu1 %2852, %v2480_v59   ;;  %810 = vperm.xlu0 %2851, %v2479_v60   ;;  %v203_v60 = vld [vmem:[%s3129_s28 + $0x28] sm:$0xff] }
  0x7f   : > { %613 = vperm.xlu1 %2852, %v2436_v61   ;;  %608 = vperm.xlu0 %2851, %v2435_v62   ;;  %v202_v61 = vld [vmem:[%s3129_s28 + $0x20] sm:$0xff]  ;;  %v2362_v62 = vld [vmem:[%s3129_s28 + $0x68] sm:$0xff] }
  0x83   : > { %751 = vperm.xlu1 %2852, %v2466_v63   ;;  %746 = vperm.xlu0 %2851, %v2465_v0   ;;  %v2361_v63 = vld [vmem:[%s3129_s28 + $0x60] sm:$0xff] }
  0x86   : > { %v283_v3 = vpop.permute.xlu1 %282  ;;  %v217_v4 = vpop.permute.xlu0 %216 }
  0x87   : > { %687 = vperm.xlu1 %2852, %v2452_v1   ;;  %682 = vperm.xlu0 %2851, %v2451_v2   ;;  %v320_v11 = vmul.f32 %v2357_v5, %v283_v3  ;;  %v254_v14 = vmul.f32 %v217_v4, %v198_v6  ;;  %v2392_v6 = vld [vmem:[%s3129_s28 + $0xd8] sm:$0xff] }
  0x89   : > { %v328_v24 = vadd.f32 %v320_v11, %v254_v14 }
  0x8a   : > { %v288_v12 = vpop.permute.xlu1 %287  ;;  %v222_v13 = vpop.permute.xlu0 %221 }
  0x8b   : > { %v321_v15 = vmul.f32 %v2358_v7, %v288_v12  ;;  %v255_v16 = vmul.f32 %v222_v13, %v199_v8  ;;  %825 = vperm.xlu1 %2852, %v2482_v9   ;;  %820 = vperm.xlu0 %2851, %v2481_v10   ;;  %v2391_v7 = vld [vmem:[%s3129_s28 + $0xd0] sm:$0xff] }
  0x8d   : > { %v329_v21 = vadd.f32 %v321_v15, %v255_v16 }
  0x8e   : > { %v362_v22 = vpop.permute.xlu1 %361  ;;  %v357_v23 = vpop.permute.xlu0 %356 }
  0x8f   : > { %v395_v25 = vmul.f32 %v2374_v17, %v362_v22  ;;  %v394_v26 = vmul.f32 %v2373_v18, %v357_v23  ;;  %761 = vperm.xlu1 %2852, %v2468_v19   ;;  %756 = vperm.xlu0 %2851, %v2467_v20   ;;  %v2378_v18 = vld [vmem:[%s3129_s28 + $0xa8] sm:$0xff]  ;;  %v2377_v19 = vld [vmem:[%s3129_s28 + $0xa0] sm:$0xff] }
  0x91   : > { %v3161_v29 = vadd.f32 %v395_v25, %v329_v21  ;;  %v3163_v30 = vadd.f32 %v394_v26, %v328_v24 }
  0x92   : > { %v232_v31 = vpop.permute.xlu1 %231  ;;  %v227_v32 = vpop.permute.xlu0 %226 }
  0x93   : > { %835 = vperm.xlu1 %2852, %v2484_v27   ;;  %830 = vperm.xlu0 %2851, %v2483_v28   ;;  %v257_v39 = vmul.f32 %v232_v31, %v201_v33  ;;  %v256_v40 = vmul.f32 %v227_v32, %v200_v34 }
  0x96   : > { %v298_v37 = vpop.permute.xlu1 %297  ;;  %v293_v38 = vpop.permute.xlu0 %292 }
  0x97   : > { %v323_v41 = vmul.f32 %v2360_v35, %v298_v37  ;;  %v322_v42 = vmul.f32 %v2359_v36, %v293_v38 }
  0x99   : > { %v331_v43 = vadd.f32 %v323_v41, %v257_v39  ;;  %v330_v44 = vadd.f32 %v322_v42, %v256_v40  ;;  %v2390_v42 = vld [vmem:[%s3129_s28 + $0xc8] sm:$0xff] }
  0x9a   : > { %v3169_v45 = vpop.permute.xlu1 %435  ;;  %v3171_v46 = vpop.permute.xlu0 %430 }
  0x9e   : > { %v372_v50 = vpop.permute.xlu1 %371  ;;  %v367_v51 = vpop.permute.xlu0 %366 }
  0x9f   : > { %v397_v52 = vmul.f32 %v2376_v48, %v372_v50  ;;  %v396_v53 = vmul.f32 %v2375_v49, %v367_v51  ;;  %v469_v50 = vmul.f32 %v2390_v42, %v3169_v45  ;;  %v2407_v42 = vld [vmem:[%s3129_s28 + $0x110] sm:$0xff] }
  0xa1   : > { %v405_v54 = vadd.f32 %v397_v52, %v331_v43  ;;  %v404_v55 = vadd.f32 %v396_v53, %v330_v44  ;;  %v2389_v43 = vld [vmem:[%s3129_s28 + $0xc0] sm:$0xff]  ;;  %v2406_v44 = vld [vmem:[%s3129_s28 + $0x108] sm:$0xff] }
  0xa2   : > { %v510_v56 = vpop.permute.xlu1 %509  ;;  %v505_v57 = vpop.permute.xlu0 %504  ;;  %v468_v51 = vmul.f32 %v2389_v43, %v3171_v46  ;;  %v2422_v52 = vld [vmem:[%s3129_s28 + $0x148] sm:$0xff]  ;;  %v2421_v53 = vld [vmem:[%s3129_s28 + $0x140] sm:$0xff] }
  0xa3   : > { %v2453_v46 = vld [vmem:[%s3129_s28 + $0x1c0] sm:$0xff] }
  0xa6   : > { %v242_v58 = vpop.permute.xlu1 %241  ;;  %v237_v59 = vpop.permute.xlu0 %236 }
  0xa7   : > { %v259_v2 = vmul.f32 %v242_v58, %v203_v60  ;;  %v258_v3 = vmul.f32 %v237_v59, %v202_v61  ;;  %v2438_v58 = vld [vmem:[%s3129_s28 + $0x188] sm:$0xff]  ;;  %v2437_v59 = vld [vmem:[%s3129_s28 + $0x180] sm:$0xff] }
  0xaa   : > { %v308_v0 = vpop.permute.xlu1 %307  ;;  %v303_v1 = vpop.permute.xlu0 %302 }
  0xab   : > { %v325_v4 = vmul.f32 %v2362_v62, %v308_v0  ;;  %v324_v5 = vmul.f32 %v2361_v63, %v303_v1  ;;  %v477_v62 = vadd.f32 %v469_v50, %v3161_v29  ;;  %v476_v63 = vadd.f32 %v468_v51, %v3163_v30  ;;  %v2454_v1 = vld [vmem:[%s3129_s28 + $0x1c8] sm:$0xff]  ;;  %v2469_v29 = vld [vmem:[%s3129_s28 + $0x200] sm:$0xff]  ;;  %v2423_v50 = vld [vmem:[%s3129_s28 + $0x150] sm:$0xff] }
  0xad   : > { %v333_v8 = vadd.f32 %v325_v4, %v259_v2  ;;  %v332_v9 = vadd.f32 %v324_v5, %v258_v3 }
  0xae   : > { %v446_v10 = vpop.permute.xlu1 %445  ;;  %v441_v11 = vpop.permute.xlu0 %440 }
  0xaf   : > { %v471_v12 = vmul.f32 %v2392_v6, %v446_v10  ;;  %v470_v13 = vmul.f32 %v2391_v7, %v441_v11  ;;  %v2470_v10 = vld [vmem:[%s3129_s28 + $0x208] sm:$0xff] }
  0xb1   : > { %v3185_v14 = vadd.f32 %v471_v12, %v405_v54  ;;  %v3187_v15 = vadd.f32 %v470_v13, %v404_v55  ;;  %v543_v54 = vmul.f32 %v2406_v44, %v510_v56  ;;  %v542_v55 = vmul.f32 %v2405_v47, %v505_v57  ;;  %v2424_v47 = vld [vmem:[%s3129_s28 + $0x158] sm:$0xff] }
  0xb2   : > { %v584_v16 = vpop.permute.xlu1 %583  ;;  %v579_v17 = vpop.permute.xlu0 %578 }
  0xb3   : > { %v617_v0 = vmul.f32 %v2422_v52, %v584_v16  ;;  %v616_v45 = vmul.f32 %v2421_v53, %v579_v17  ;;  %v551_v2 = vadd.f32 %v543_v54, %v477_v62  ;;  %v550_v3 = vadd.f32 %v542_v55, %v476_v63  ;;  %v2440_v53 = vld [vmem:[%s3129_s28 + $0x198] sm:$0xff]  ;;  %v2439_v54 = vld [vmem:[%s3129_s28 + $0x190] sm:$0xff] }
  0xb4   : > { %v2456_v63 = vld [vmem:[%s3129_s28 + $0x1d8] sm:$0xff] }
  0xb5   : > { %v625_v6 = vadd.f32 %v617_v0, %v551_v2  ;;  %v624_v7 = vadd.f32 %v616_v45, %v550_v3  ;;  %v2455_v0 = vld [vmem:[%s3129_s28 + $0x1d0] sm:$0xff] }
  0xb6   : > { %v382_v20 = vpop.permute.xlu1 %381  ;;  %v377_v21 = vpop.permute.xlu0 %376 }
  0xb7   : > { %v399_v22 = vmul.f32 %v2378_v18, %v382_v20  ;;  %v398_v23 = vmul.f32 %v2377_v19, %v377_v21 }
  0xb9   : > { %v3191_v24 = vadd.f32 %v399_v22, %v333_v8  ;;  %v3193_v25 = vadd.f32 %v398_v23, %v332_v9 }
  0xba   : > { %v3195_v26 = vpop.permute.xlu1 %519  ;;  %v3197_v27 = vpop.permute.xlu0 %514 }
  0xbb   : > { %v544_v52 = vmul.f32 %v2407_v42, %v3197_v27  ;;  %v205_v42 = vld [vmem:[%s3129_s28 + $0x38] sm:$0xff] }
  0xbe   : > { %v658_v28 = vpop.permute.xlu1 %657  ;;  %v653_v31 = vpop.permute.xlu0 %652 }
  0xbf   : > { %v691_v56 = vmul.f32 %v2438_v58, %v658_v28  ;;  %v690_v57 = vmul.f32 %v2437_v59, %v653_v31 }
  0xc1   : > { %v699_v11 = vadd.f32 %v691_v56, %v625_v6  ;;  %v698_v12 = vadd.f32 %v690_v57, %v624_v7 }
  0xc2   : > { %v3199_v32 = vpop.permute.xlu1 %251  ;;  %v3201_v33 = vpop.permute.xlu0 %246 }
  0xc6   : > { %v3203_v34 = vpop.permute.xlu1 %317  ;;  %v3205_v35 = vpop.permute.xlu0 %312 }
  0xca   : > { %v3207_v36 = vpop.permute.xlu1 %455  ;;  %v3209_v37 = vpop.permute.xlu0 %450 }
  0xce   : > { %v3211_v38 = vpop.permute.xlu1 %593  ;;  %v3213_v39 = vpop.permute.xlu0 %588 }
  0xcf   : > { %v619_v59 = vmul.f32 %v2424_v47, %v3211_v38  ;;  %v618_v62 = vmul.f32 %v2423_v50, %v3213_v39  ;;  %v2472_v38 = vld [vmem:[%s3129_s28 + $0x218] sm:$0xff]  ;;  %v2471_v39 = vld [vmem:[%s3129_s28 + $0x210] sm:$0xff] }
  0xd0   : > { %v204_v47 = vld [vmem:[%s3129_s28 + $0x30] sm:$0xff]  ;;  %v2380_v50 = vld [vmem:[%s3129_s28 + $0xb8] sm:$0xff] }
  0xd2   : > { %v732_v40 = vpop.permute.xlu1 %731  ;;  %v727_v41 = vpop.permute.xlu0 %726 }
  0xd3   : > { %v765_v8 = vmul.f32 %v2454_v1, %v732_v40  ;;  %v764_v9 = vmul.f32 %v2453_v46, %v727_v41  ;;  %v2408_v41 = vld [vmem:[%s3129_s28 + $0x118] sm:$0xff] }
  0xd4   : > { %v545_v51 = vmul.f32 %v2408_v41, %v3195_v26  ;;  %v552_v26 = vadd.f32 %v544_v52, %v3187_v15 }
  0xd5   : > { %v773_v16 = vadd.f32 %v765_v8, %v699_v11  ;;  %v772_v17 = vadd.f32 %v764_v9, %v698_v12  ;;  %v2393_v11 = vld [vmem:[%s3129_s28 + $0xe0] sm:$0xff] }
  0xd6   : > { %v3219_v48 = vpop.permute.xlu1 %391  ;;  %v3221_v49 = vpop.permute.xlu0 %386  ;;  %v553_v45 = vadd.f32 %v545_v51, %v3185_v14  ;;  %v626_v56 = vadd.f32 %v618_v62, %v552_v26  ;;  %v2379_v51 = vld [vmem:[%s3129_s28 + $0xb0] sm:$0xff] }
  0xd8   : > { %v627_v3 = vadd.f32 %v619_v59, %v553_v45  ;;  %v2441_v59 = vld [vmem:[%s3129_s28 + $0x1a0] sm:$0xff]  ;;  %v2396_v45 = vld [vmem:[%s3129_s28 + $0xf8] sm:$0xff] }
  0xda   : > { %v3229_v60 = vpop.permute.xlu1 %529  ;;  %v3231_v61 = vpop.permute.xlu0 %524 }
  0xde   : > { %v668_v4 = vpop.permute.xlu1 %667  ;;  %v663_v5 = vpop.permute.xlu0 %662 }
  0xdf   : > { %v693_v1 = vmul.f32 %v2440_v53, %v668_v4  ;;  %v692_v27 = vmul.f32 %v2439_v54, %v663_v5 }
  0xe1   : > { %v701_v7 = vadd.f32 %v693_v1, %v627_v3  ;;  %v700_v8 = vadd.f32 %v692_v27, %v626_v56  ;;  %v260_v1 = vmul.f32 %v3201_v33, %v204_v47  ;;  %v401_v27 = vmul.f32 %v2380_v50, %v3219_v48  ;;  %v2458_v56 = vld [vmem:[%s3129_s28 + $0x1e8] sm:$0xff]  ;;  %v2460_v50 = vld [vmem:[%s3129_s28 + $0x1f8] sm:$0xff] }
  0xe2   : > { %v806_v30 = vpop.permute.xlu1 %805  ;;  %v801_v13 = vpop.permute.xlu0 %800  ;;  %v400_v3 = vmul.f32 %v2379_v51, %v3221_v49  ;;  %v2459_v51 = vld [vmem:[%s3129_s28 + $0x1f0] sm:$0xff] }
  0xe3   : > { %v839_v18 = vmul.f32 %v2470_v10, %v806_v30  ;;  %v838_v19 = vmul.f32 %v2469_v29, %v801_v13  ;;  %v2394_v29 = vld [vmem:[%s3129_s28 + $0xe8] sm:$0xff] }
  0xe4   : > { %v2410_v13 = vld [vmem:[%s3129_s28 + $0x128] sm:$0xff] }
  0xe5   : > { %v847_v20 = vadd.f32 %v839_v18, %v773_v16  ;;  %v846_v21 = vadd.f32 %v838_v19, %v772_v17  ;;  %v2409_v16 = vld [vmem:[%s3129_s28 + $0x120] sm:$0xff]  ;;  %v2364_v19 = vld [vmem:[%s3129_s28 + $0x78] sm:$0xff]  ;;  %v547_v52 = vmul.f32 %v2410_v13, %v3229_v60 }
  0xe6   : > { %v3239_v22 = vpop.permute.xlu1 %465  ;;  %v3241_v23 = vpop.permute.xlu0 %460  ;;  %v546_v53 = vmul.f32 %v2409_v16, %v3231_v61  ;;  %v327_v54 = vmul.f32 %v2364_v19, %v3203_v34  ;;  %v2395_v61 = vld [vmem:[%s3129_s28 + $0xf0] sm:$0xff] }
  0xe7   : > { %v2776_v28 = vpack.c.bf16 %v847_v20, %v846_v21  ;;  %v2363_v20 = vld [vmem:[%s3129_s28 + $0x70] sm:$0xff]  ;;  %v473_v21 = vmul.f32 %v2394_v29, %v3207_v36  ;;  %v474_v33 = vmul.f32 %v2395_v61, %v3241_v23 }
  0xe8   : > { %v326_v36 = vmul.f32 %v2363_v20, %v3205_v35  ;;  %v261_v35 = vmul.f32 %v3199_v32, %v205_v42  ;;  %v475_v32 = vmul.f32 %v2396_v45, %v3239_v22  ;;  %v2473_v22 = vld [vmem:[%s3129_s28 + $0x220] sm:$0xff]  ;;  %v2444_v20 = vld [vmem:[%s3129_s28 + $0x1b8] sm:$0xff]  ;;  %v2475_v45 = vld [vmem:[%s3129_s28 + $0x230] sm:$0xff] }
  0xe9   : > { %2777 = vmatprep.subr.bf16.mxu0 %v2776_v28 }
  0xea   : > { %v3243_v31 = vpop.permute.xlu1 %603  ;;  %v3245_v40 = vpop.permute.xlu0 %598  ;;  %2779 = vmatpush3.bf16.msra.mxu0 %v2776_v28  ;;  %v472_v28 = vmul.f32 %v2393_v11, %v3209_v37  ;;  %v2442_v37 = vld [vmem:[%s3129_s28 + $0x1a8] sm:$0xff] }
  0xeb   : > { %v2474_v11 = vld [vmem:[%s3129_s28 + $0x228] sm:$0xff] }
  0xec   : > { %v480_v60 = vadd.f32 %v472_v28, %v3193_v25 }
  0xee   : > { %v742_v43 = vpop.permute.xlu1 %741  ;;  %v737_v44 = vpop.permute.xlu0 %736  ;;  %v554_v25 = vadd.f32 %v546_v53, %v480_v60  ;;  %v2476_v60 = vld [vmem:[%s3129_s28 + $0x238] sm:$0xff] }
  0xef   : > { %v767_v57 = vmul.f32 %v2456_v63, %v742_v43  ;;  %v766_v6 = vmul.f32 %v2455_v0, %v737_v44  ;;  %v2426_v43 = vld [vmem:[%s3129_s28 + $0x168] sm:$0xff]  ;;  %v2425_v44 = vld [vmem:[%s3129_s28 + $0x160] sm:$0xff]  ;;  %v481_v0 = vadd.f32 %v473_v21, %v3191_v24  ;;  %v2443_v21 = vld [vmem:[%s3129_s28 + $0x1b0] sm:$0xff] }
  0xf0   : > { %v621_v26 = vmul.f32 %v2426_v43, %v3243_v31  ;;  %v620_v34 = vmul.f32 %v2425_v44, %v3245_v40  ;;  %v334_v40 = vadd.f32 %v326_v36, %v260_v1 }
  0xf1   : > { %v775_v4 = vadd.f32 %v767_v57, %v701_v7  ;;  %v774_v5 = vadd.f32 %v766_v6, %v700_v8  ;;  %v2457_v57 = vld [vmem:[%s3129_s28 + $0x1e0] sm:$0xff]  ;;  %v555_v24 = vadd.f32 %v547_v52, %v481_v0  ;;  %v2412_v6 = vld [vmem:[%s3129_s28 + $0x138] sm:$0xff]  ;;  %v335_v7 = vadd.f32 %v327_v54, %v261_v35 }
  0xf2   : > { %v3255_v55 = vpop.permute.xlu1 %539  ;;  %v3257_v58 = vpop.permute.xlu0 %534 }
  0xf3   : > { %v629_v8 = vadd.f32 %v621_v26, %v555_v24 }
  0xf6   : > { %v678_v46 = vpop.permute.xlu1 %677  ;;  %v673_v2 = vpop.permute.xlu0 %672 }
  0xf7   : > { %v694_v31 = vmul.f32 %v2441_v59, %v673_v2  ;;  %v408_v2 = vadd.f32 %v400_v3, %v334_v40  ;;  %v860_v40 = vld [vmem:[%s3554_s2 + $0x30] sm:$0xff] }
  0xf9   : > { %v482_v13 = vadd.f32 %v474_v33, %v408_v2  ;;  %v862_v33 = vld [vmem:[%s3554_s2 + $0x40] sm:$0xff]  ;;  %v872_v2 = vld [vmem:[%s3554_s2 + $0x90] sm:$0xff] }
  0xfa   : > { %v816_v14 = vpop.permute.xlu1 %815  ;;  %v811_v15 = vpop.permute.xlu0 %810 }
  0xfb   : > { %v841_v9 = vmul.f32 %v2472_v38, %v816_v14  ;;  %v840_v10 = vmul.f32 %v2471_v39, %v811_v15  ;;  %v2411_v38 = vld [vmem:[%s3129_s28 + $0x130] sm:$0xff]  ;;  %v695_v39 = vmul.f32 %v2442_v37, %v678_v46  ;;  %v628_v14 = vadd.f32 %v620_v34, %v554_v25  ;;  %v2428_v15 = vld [vmem:[%s3129_s28 + $0x178] sm:$0xff] }
  0xfc   : > { %v409_v46 = vadd.f32 %v401_v27, %v335_v7  ;;  %v548_v29 = vmul.f32 %v2411_v38, %v3257_v58  ;;  %v856_v38 = vld [vmem:[%s3554_s2 + $0x10] sm:$0xff]  ;;  %v859_v7 = vld [vmem:[%s3554_s2 + $0x28] sm:$0xff] }
  0xfd   : > { %v849_v12 = vadd.f32 %v841_v9, %v775_v4  ;;  %v848_v30 = vadd.f32 %v840_v10, %v774_v5  ;;  %v2427_v4 = vld [vmem:[%s3129_s28 + $0x170] sm:$0xff]  ;;  %v549_v10 = vmul.f32 %v2412_v6, %v3255_v55  ;;  %v702_v23 = vadd.f32 %v694_v31, %v628_v14  ;;  %v855_v6 = vld [vmem:[%s3554_s2 + $0x8] sm:$0xff]  ;;  %v858_v31 = vld [vmem:[%s3554_s2 + $0x20] sm:$0xff]  ;;  %s3489_s28 = scalar_lea.vmem %s3556_s4, %s2551_s25 }
  0xfe   : > { %v3271_v17 = vpop.permute.xlu1 %613  ;;  %v3273_v18 = vpop.permute.xlu0 %608  ;;  %v556_v47 = vadd.f32 %v548_v29, %v482_v13  ;;  %v866_v14 = vld [vmem:[%s3554_s2 + $0x60] sm:$0xff]  ;;  %v877_v13 = vld [vmem:[%s3554_s2 + $0xb8] sm:$0xff] }
  0xff   : > { %v2780_v41 = vpack.c.bf16 %v849_v12, %v848_v30  ;;  %v703_v12 = vadd.f32 %v695_v39, %v629_v8  ;;  %v483_v30 = vadd.f32 %v475_v32, %v409_v46  ;;  %v623_v16 = vmul.f32 %v2428_v15, %v3271_v17  ;;  %v857_v39 = vld [vmem:[%s3554_s2 + $0x18] sm:$0xff]  ;;  %v867_v15 = vld [vmem:[%s3554_s2 + $0x68] sm:$0xff]  ;;  %v874_v29 = vld [vmem:[%s3554_s2 + $0xa0] sm:$0xff] }
 0x100   : > { %v622_v19 = vmul.f32 %v2427_v4, %v3273_v18  ;;  %v861_v32 = vld [vmem:[%s3554_s2 + $0x38] sm:$0xff]  ;;  %v868_v4 = vld [vmem:[%s3554_s2 + $0x70] sm:$0xff]  ;;  %v871_v46 = vld [vmem:[%s3554_s2 + $0x88] sm:$0xff] }
 0x101   : > { %2781 = vmatprep.subr.bf16.mxu0 %v2780_v41  ;;  %v557_v44 = vadd.f32 %v549_v10, %v483_v30  ;;  %v865_v8 = vld [vmem:[%s3554_s2 + $0x58] sm:$0xff]  ;;  %v876_v30 = vld [vmem:[%s3554_s2 + $0xb0] sm:$0xff] }
 0x102   : > { %v752_v62 = vpop.permute.xlu1 %751  ;;  %v747_v63 = vpop.permute.xlu0 %746  ;;  %2783 = vmatpush3.bf16.msra.mxu0 %v2780_v41  ;;  %v630_v59 = vadd.f32 %v622_v19, %v556_v47  ;;  %v873_v10 = vld [vmem:[%s3554_s2 + $0x98] sm:$0xff] }
 0x103   : > { %v769_v5 = vmul.f32 %v2458_v56, %v752_v62  ;;  %v768_v9 = vmul.f32 %v2457_v57, %v747_v63  ;;  %v631_v36 = vadd.f32 %v623_v16, %v557_v44 }
 0x105   : > { %v777_v42 = vadd.f32 %v769_v5, %v703_v12  ;;  %v776_v55 = vadd.f32 %v768_v9, %v702_v23  ;;  %v869_v5 = vld [vmem:[%s3554_s2 + $0x78] sm:$0xff]  ;;  %v870_v9 = vld [vmem:[%s3554_s2 + $0x80] sm:$0xff]  ;;  %v1137_v12 = vld [vmem:[%s3555_s3 + $0x8] sm:$0xff] }
 0x106   : > { %v688_v48 = vpop.permute.xlu1 %687  ;;  %v683_v49 = vpop.permute.xlu0 %682 }
 0x107   : > { %v697_v52 = vmul.f32 %v2444_v20, %v688_v48  ;;  %v696_v53 = vmul.f32 %v2443_v21, %v683_v49  ;;  %v863_v48 = vld [vmem:[%s3554_s2 + $0x48] sm:$0xff]  ;;  %v864_v49 = vld [vmem:[%s3554_s2 + $0x50] sm:$0xff] }
 0x109   : > { %v705_v61 = vadd.f32 %v697_v52, %v631_v36  ;;  %v704_v26 = vadd.f32 %v696_v53, %v630_v59 }
 0x10a   : > { %v826_v28 = vpop.permute.xlu1 %825  ;;  %v821_v41 = vpop.permute.xlu0 %820 }
 0x10b   : > { %v843_v43 = vmul.f32 %v2474_v11, %v826_v28  ;;  %v842_v58 = vmul.f32 %v2473_v22, %v821_v41  ;;  %v875_v11 = vld [vmem:[%s3554_s2 + $0xa8] sm:$0xff]  ;;  %v1136_v22 = vld [vmem:[%s3555_s3] sm:$0xff] }
 0x10c   : > { %v2792_v23 = vpack.c.bf16 %v1137_v12, %v1136_v22 }
 0x10d   : > { %v851_v54 = vadd.f32 %v843_v43, %v777_v42  ;;  %v850_v17 = vadd.f32 %v842_v58, %v776_v55 }
 0x10e   : > { %v762_v18 = vpop.permute.xlu1 %761  ;;  %v757_v37 = vpop.permute.xlu0 %756  ;;  %2793 = vmatprep.subr.bf16.mxu1 %v2792_v23 }
 0x10f   : > { %v771_v62 = vmul.f32 %v2460_v50, %v762_v18  ;;  %v770_v63 = vmul.f32 %v2459_v51, %v757_v37  ;;  %v2784_v0 = vpack.c.bf16 %v851_v54, %v850_v17  ;;  %2795 = vmatpush3.bf16.msra.mxu1 %v2792_v23 }
 0x110   : > { %2797 = vmatprep.subr.bf16.mxu1 %v2792_v23 }
 0x111   : > { %2785 = vmatprep.subr.bf16.mxu0 %v2784_v0  ;;  %v779_v1 = vadd.f32 %v771_v62, %v705_v61  ;;  %v778_v27 = vadd.f32 %v770_v63, %v704_v26 }
 0x112   : > { %v836_v34 = vpop.permute.xlu1 %835  ;;  %v831_v35 = vpop.permute.xlu0 %830  ;;  %2787 = vmatpush3.bf16.msra.mxu0 %v2784_v0 }
 0x113   : > { %v845_v3 = vmul.f32 %v2476_v60, %v836_v34  ;;  %v844_v56 = vmul.f32 %v2475_v45, %v831_v35 }
 0x115   : > { %v853_v57 = vadd.f32 %v845_v3, %v779_v1  ;;  %v852_v24 = vadd.f32 %v844_v56, %v778_v27 }
 0x117   : > { %v2788_v25 = vpack.c.bf16 %v853_v57, %v852_v24 }
 0x119   : > { %2789 = vmatprep.subr.bf16.mxu0 %v2788_v25 }
 0x11a   : > { %2791 = vmatpush3.bf16.msra.mxu0 %v2788_v25 }
 0x11d   : > { %2653 = vmatmul.mubr.msk.f32.vlgmr.msra.gmra.mrb[0].mxu0 %vm878_vm0, %v855_v6 }
 0x11e   : > { %2655 = vmatprep.mubr.msk.f32.mxu0 %vm878_vm0, %v856_v38 }
 0x121   : > { %2656 = vmatmul.mubr.msk.f32.gmra.mrb[2].mxu0 %vm878_vm0, %v857_v39 }
 0x122   : > { %2658 = vmatprep.mubr.msk.f32.mxu0 %vm878_vm0, %v858_v31 }
 0x125   : > { %2659 = vmatmul.mubr.msk.f32.gmra.mrb[4].mxu0 %vm878_vm0, %v859_v7 }
 0x126   : > { %2661 = vmatprep.mubr.msk.f32.mxu0 %vm878_vm0, %v860_v40 }
 0x129   : > { %2662 = vmatmul.mubr.msk.f32.gmra.mrb[6].mxu0 %vm878_vm0, %v861_v32 }
 0x12a   : > { %2664 = vmatprep.mubr.msk.f32.mxu0 %vm878_vm0, %v862_v33 }
 0x12d   : > { %2665 = vmatmul.mubr.msk.f32.gmra.mrb[8].mxu0 %vm878_vm0, %v863_v48 }
 0x12e   : > { %2667 = vmatprep.mubr.msk.f32.mxu0 %vm878_vm0, %v864_v49 }
 0x131   : > { %2668 = vmatmul.mubr.msk.f32.gmra.mrb[10].mxu0 %vm878_vm0, %v865_v8 }
 0x132   : > { %2670 = vmatprep.mubr.msk.f32.mxu0 %vm878_vm0, %v866_v14 }
 0x135   : > { %2671 = vmatmul.mubr.msk.f32.gmra.mrb[12].mxu0 %vm878_vm0, %v867_v15 }
 0x136   : > { %2673 = vmatprep.mubr.msk.f32.mxu0 %vm878_vm0, %v868_v4 }
 0x139   : > { %2674 = vmatmul.mubr.msk.f32.gmra.mrb[14].mxu0 %vm878_vm0, %v869_v5 }
 0x13a   : > { %2676 = vmatprep.mubr.msk.f32.mxu0 %vm878_vm0, %v870_v9 }
 0x13d   : > { %2677 = vmatmul.mubr.msk.f32.gmra.mrb[16].mxu0 %vm878_vm0, %v871_v46 }
 0x13e   : > { %2679 = vmatprep.mubr.msk.f32.mxu0 %vm878_vm0, %v872_v2 }
 0x141   : > { %2680 = vmatmul.mubr.msk.f32.gmra.mrb[18].mxu0 %vm878_vm0, %v873_v10 }
 0x142   : > { %2682 = vmatprep.mubr.msk.f32.mxu0 %vm878_vm0, %v874_v29 }
 0x145   : > { %2683 = vmatmul.mubr.msk.f32.gmra.mrb[20].mxu0 %vm878_vm0, %v875_v11 }
 0x146   : > { %2685 = vmatprep.mubr.msk.f32.mxu0 %vm878_vm0, %v876_v30 }
 0x149   : > { %2686 = vmatmul.mubr.msk.f32.gmra.mrb[22].mxu0 %vm878_vm0, %v877_v13 }
 0x1f0   : > { %v2654_v16 = vpop.f32.mrb[0].mxu0 }
 0x1f1   : > { %v1017_v19 = vpop.f32.mrb[1].mxu0 }
 0x1f2   : > { %1397 = vxpose.xlu0.b32.start [1/2] (short) (narrow) %v1017_v19, 16 }
 0x1f4   : > { %v3419_v20 = vpop.f32.mrb[2].mxu0 }
 0x1f5   : > { %v3421_v21 = vpop.f32.mrb[3].mxu0 }
 0x1f6   : > { %1398 = vxpose.xlu0.b32.end [2/2] (short) (narrow) %v2654_v16, 16 }
 0x1f8   : > { %v3423_v28 = vpop.f32.mrb[4].mxu0 }
 0x1f9   : > { %v3425_v41 = vpop.f32.mrb[5].mxu0 }
 0x1fc   : > { %v3427_v42 = vpop.f32.mrb[6].mxu0 }
 0x1fd   : > { %v3429_v55 = vpop.f32.mrb[7].mxu0 }
 0x200   : > { %v2666_v43 = vpop.f32.mrb[8].mxu0 }
 0x201   : > { %v1057_v58 = vpop.f32.mrb[9].mxu0 }
 0x202   : > { %2692 = vmatprep.mubr.msk.f32.mxu1 %vm1138_vm1, %v1057_v58 }
 0x203   : > { %2693 = vmatmul.mubr.msk.f32.vlgmr.msra.gmra.mrb[0].mxu1 %vm1138_vm1, %v2666_v43 }
 0x204   : > { %v2669_v44 = vpop.f32.mrb[10].mxu0  ;;  %2799 = vmatpush3.bf16.msra.mxu1 %v2792_v23 }
 0x205   : > { %v1067_v47 = vpop.f32.mrb[11].mxu0 }
 0x206   : > { %2695 = vmatprep.mubr.msk.f32.mxu1 %vm1138_vm1, %v1067_v47 }
 0x207   : > { %2696 = vmatmul.mubr.msk.f32.gmra.mrb[2].mxu1 %vm1138_vm1, %v2669_v44 }
 0x208   : > { %v2672_v50 = vpop.f32.mrb[12].mxu0 }
 0x209   : > { %v1077_v51 = vpop.f32.mrb[13].mxu0 }
 0x20a   : > { %2698 = vmatprep.mubr.msk.f32.mxu1 %vm1138_vm1, %v1077_v51 }
 0x20b   : > { %2699 = vmatmul.mubr.msk.f32.gmra.mrb[4].mxu1 %vm1138_vm1, %v2672_v50 }
 0x20c   : > { %v2675_v52 = vpop.f32.mrb[14].mxu0 }
 0x20d   : > { %v1087_v53 = vpop.f32.mrb[15].mxu0 }
 0x20e   : > { %2701 = vmatprep.mubr.msk.f32.mxu1 %vm1138_vm1, %v1087_v53 }
 0x20f   : > { %2702 = vmatmul.mubr.msk.f32.gmra.mrb[6].mxu1 %vm1138_vm1, %v2675_v52 }
 0x210   : > { %v2678_v54 = vpop.f32.mrb[16].mxu0 }
 0x211   : > { %v1097_v17 = vpop.f32.mrb[17].mxu0 }
 0x212   : > { %2708 = vmatprep.mubr.msk.f32.mxu1 %vm1138_vm1, %v1097_v17 }
 0x213   : > { %2709 = vmatmul.mubr.msk.f32.vlgmr.msra.gmra.mrb[8].mxu1 %vm1138_vm1, %v2678_v54 }
 0x214   : > { %v2681_v36 = vpop.f32.mrb[18].mxu0 }
 0x215   : > { %v1107_v18 = vpop.f32.mrb[19].mxu0 }
 0x216   : > { %2711 = vmatprep.mubr.msk.f32.mxu1 %vm1138_vm1, %v1107_v18 }
 0x217   : > { %2712 = vmatmul.mubr.msk.f32.gmra.mrb[10].mxu1 %vm1138_vm1, %v2681_v36 }
 0x218   : > { %v2684_v37 = vpop.f32.mrb[20].mxu0 }
 0x219   : > { %v1117_v59 = vpop.f32.mrb[21].mxu0 }
 0x21a   : > { %2714 = vmatprep.mubr.msk.f32.mxu1 %vm1138_vm1, %v1117_v59 }
 0x21b   : > { %2715 = vmatmul.mubr.msk.f32.gmra.mrb[12].mxu1 %vm1138_vm1, %v2684_v37 }
 0x21c   : > { %v2687_v62 = vpop.f32.mrb[22].mxu0 }
 0x21d   : > { %v1127_v63 = vpop.f32.mrb[23].mxu0 }
 0x21e   : > { %2717 = vmatprep.mubr.msk.f32.mxu1 %vm1138_vm1, %v1127_v63 }
 0x21f   : > { %2718 = vmatmul.mubr.msk.f32.gmra.mrb[14].mxu1 %vm1138_vm1, %v2687_v62 }
 0x272   : > { %v1413_v0 = vpop.trf.xlu0 }
 0x273   : > { %2724 = vmatprep.mubr.msk.f32.mxu1 %vm1138_vm1, %v1413_v0 }
 0x276   : > { %v1414_v34 = vpop.trf.xlu0 }
 0x2d6   : > { %v2694_v60 = vpop.f32.mrb[0].mxu1 }
 0x2d7   : > { %v1229_v45 = vpop.f32.mrb[1].mxu1 }
 0x2d8   : > { %v2800_v61 = vpack.c.bf16 %v2694_v60, %v1229_v45 }
 0x2da   : > { %2801 = vmatprep.subr.bf16.mxu1 %v2800_v61  ;;  %v2697_v26 = vpop.f32.mrb[2].mxu1 }
 0x2db   : > { %2803 = vmatpush3.bf16.msra.mxu1 %v2800_v61  ;;  %v1239_v35 = vpop.f32.mrb[3].mxu1 }
 0x2dc   : > { %v2810_v1 = vpack.c.bf16 %v2697_v26, %v1239_v35 }
 0x2de   : > { %2725 = vmatmul.mubr.msk.f32.vlgmr.msra.gmra.mrb[16].mxu1 %vm1138_vm1, %v1414_v34  ;;  %v2700_v27 = vpop.f32.mrb[4].mxu1 }
 0x2df   : > { %v1249_v3 = vpop.f32.mrb[5].mxu1 }
 0x2e0   : > { %v3449_v56 = vpack.c.bf16 %v2700_v27, %v1249_v3 }
 0x2e2   : > { %v2703_v57 = vpop.f32.mrb[6].mxu1 }
 0x2e3   : > { %v1259_v24 = vpop.f32.mrb[7].mxu1 }
 0x2e4   : > { %v3451_v25 = vpack.c.bf16 %v2703_v57, %v1259_v24 }
 0x2e6   : > { %v2710_v6 = vpop.f32.mrb[8].mxu1 }
 0x2e7   : > { %v1358_v38 = vpop.f32.mrb[9].mxu1 }
 0x2e8   : > { %2731 = vmatprep.mubr.msk.f32.mxu1 %vm1510_vm2, %v1358_v38 }
 0x2ea   : > { %v3454_v39 = vpop.f32.mrb[10].mxu1 }
 0x2eb   : > { %v1368_v31 = vpop.f32.mrb[11].mxu1 }
 0x2ee   : > { %v3456_v7 = vpop.f32.mrb[12].mxu1 }
 0x2ef   : > { %v1378_v40 = vpop.f32.mrb[13].mxu1 }
 0x2f0   : > { %2759 = vmatprep.mubr.msk.f32.mxu0 %vm1510_vm2, %v1378_v40 }
 0x2f2   : > { %v3459_v32 = vpop.f32.mrb[14].mxu1 }
 0x2f3   : > { %v3461_v33 = vpop.f32.mrb[15].mxu1 }
 0x3b1   : > { %v2726_v48 = vpop.f32.mrb[16].mxu1 }
 0x3b2   : > { %v1501_v49 = vpop.f32.mrb[17].mxu1  ;;  %v1514_v8 = vsel %vm1510_vm2, %v2726_v48, -inf }
 0x3b3   : > { %1515 = vmax.xlane.f32.xlu0 %v1514_v8  ;;  %v1511_v14 = vsel %vm1510_vm2, %v1501_v49, -inf }
 0x3b4   : > { %1512 = vmax.xlane.f32.xlu1 %v1511_v14 }
 0x440   : > { %v1516_v15 = vpop.xlane.xlu0 %1515 }
 0x441   : > { %v1518_v4 = vsub.f32 %v2726_v48, %v1516_v15  ;;  %v1513_v5 = vpop.xlane.xlu1 %1512 }
 0x442   : > { %v1517_v9 = vsub.f32 %v1501_v49, %v1513_v5 }
 0x443   : > { %v1521_v46 = vmul.f32 1.442695, %v1518_v4 }
 0x444   : > { %v1519_v2 = vmul.f32 1.442695, %v1517_v9 }
 0x446   : > { %2853 = vpow2.f32 %v1519_v2 }
 0x447   : > { %2855 = vpow2.f32 %v1521_v46 }
 0x450   : > { %v2854_v10 = vpop.eup %2853 }
 0x451   : > { %v1523_v29 = vsel %vm1510_vm2, %v2854_v10, 0.0  ;;  %v2856_v11 = vpop.eup %2855 }
 0x452   : > { %1524 = vadd.xlane.f32.xlu1 %v1523_v29  ;;  %v1526_v22 = vsel %vm1510_vm2, %v2856_v11, 0.0 }
 0x456   : > { %1527 = vadd.xlane.f32.xlu1 %v1526_v22 }
 0x489   : > { %1620 = vxpose.xlu1.b32.start [1/2] (short) (narrow) %v3421_v21, 16 }
 0x48d   : > { %1621 = vxpose.xlu1.b32.end [2/2] (short) (narrow) %v3419_v20, 16 }
 0x491   : > { %2064 = vxpose.xlu1.b32.start [1/2] (short) (narrow) %v3429_v55, 16 }
 0x495   : > { %2065 = vxpose.xlu1.b32.end [2/2] (short) (narrow) %v3427_v42, 16 }
 0x4df   : > { %v1525_v12 = vpop.xlane.xlu1 %1524 }
 0x4e0   : > { %2857 = vrcp.f32 %v1525_v12 }
 0x4e3   : > { %v1528_v23 = vpop.xlane.xlu1 %1527 }
 0x4e4   : > { %2859 = vrcp.f32 %v1528_v23 }
 0x4ea   : > { %v2858_v30 = vpop.eup %2857 }
 0x4eb   : > { %v1531_v16 = vmul.f32 %v2858_v30, %v2854_v10 }
 0x4ee   : > { %v2860_v13 = vpop.eup %2859 }
 0x4ef   : > { %v1532_v19 = vmul.f32 %v2860_v13, %v2856_v11 }
 0x4f1   : > { %v2804_v20 = vpack.c.bf16 %v1532_v19, %v1531_v16 }
 0x4f3   : > { %2806 = vmatprep.subr.msk.bf16.mxu1 %vm3473_vm3, %v2804_v20 }
 0x4f4   : > { %2809 = vmatpush3.bf16.xpose.msk.msra.mxu1 %vm3473_vm3, %v2804_v20 }
 0x4f5   : > { %2811 = vmatprep.subr.bf16.mxu1 %v2810_v1 }
 0x4fb   : > { %2732 = vmatmul.mubr.msk.f32.vlgmr.msra.gmra.mrb[18].mxu1 %vm1510_vm2, %v2710_v6 }
 0x4fc   : > { %2813 = vmatpush3.bf16.msra.mxu1 %v2810_v1 }
 0x509   : > { %v1636_v21 = vpop.trf.xlu1 }
 0x50a   : > { %2738 = vmatprep.mubr.msk.f32.mxu1 %vm1138_vm1, %v1636_v21 }
 0x50d   : > { %v1637_v42 = vpop.trf.xlu1 }
 0x50e   : > { %2739 = vmatmul.mubr.msk.f32.vlgmr.msra.gmra.mrb[20].mxu1 %vm1138_vm1, %v1637_v42 }
 0x50f   : > { %2745 = vmatprep.mubr.msk.f32.mxu1 %vm1510_vm2, %v1368_v31 }
 0x5ce   : > { %v2733_v55 = vpop.f32.mrb[18].mxu1 }
 0x5cf   : > { %2287 = vst.msk [vmem:[%s3489_s28 + $0x8] sm:$0xff] %vm1138_vm1, %v2733_v55  ;;  %v1611_v58 = vpop.f32.mrb[19].mxu1 }
 0x5d0   : > { %2286 = vst.msk [vmem:[%s3489_s28] sm:$0xff] %vm1138_vm1, %v1611_v58 }
 0x5e1   : > { %v2740_v44 = vpop.f32.mrb[20].mxu1 }
 0x5e2   : > { %v1724_v47 = vpop.f32.mrb[21].mxu1  ;;  %v1736_v51 = vsel %vm1510_vm2, %v2740_v44, -inf }
 0x5e3   : > { %v1733_v50 = vsel %vm1510_vm2, %v1724_v47, -inf }
 0x5e4   : > { %1734 = vmax.xlane.f32.xlu0 %v1733_v50 }
 0x5e8   : > { %1737 = vmax.xlane.f32.xlu0 %v1736_v51 }
 0x671   : > { %v1735_v52 = vpop.xlane.xlu0 %1734 }
 0x672   : > { %v1739_v53 = vsub.f32 %v1724_v47, %v1735_v52 }
 0x674   : > { %v1741_v54 = vmul.f32 1.442695, %v1739_v53 }
 0x675   : > { %v1738_v17 = vpop.xlane.xlu0 %1737 }
 0x676   : > { %2861 = vpow2.f32 %v1741_v54  ;;  %v1740_v36 = vsub.f32 %v2740_v44, %v1738_v17 }
 0x678   : > { %v1743_v18 = vmul.f32 1.442695, %v1740_v36 }
 0x67a   : > { %2863 = vpow2.f32 %v1743_v18 }
 0x680   : > { %v2862_v37 = vpop.eup %2861 }
 0x681   : > { %v1745_v59 = vsel %vm1510_vm2, %v2862_v37, 0.0 }
 0x682   : > { %1746 = vadd.xlane.f32.xlu0 %v1745_v59 }
 0x684   : > { %v2864_v62 = vpop.eup %2863 }
 0x685   : > { %v1748_v63 = vsel %vm1510_vm2, %v2864_v62, 0.0 }
 0x686   : > { %1749 = vadd.xlane.f32.xlu0 %v1748_v63 }
 0x6b3   : > { %1842 = vxpose.xlu0.b32.start [1/2] (short) (narrow) %v3425_v41, 16  ;;  %v2080_v41 = vpop.trf.xlu1 }
 0x6b7   : > { %1843 = vxpose.xlu0.b32.end [2/2] (short) (narrow) %v3423_v28, 16  ;;  %v2081_v27 = vpop.trf.xlu1 }
 0x70f   : > { %v1747_v0 = vpop.xlane.xlu0 %1746 }
 0x710   : > { %2865 = vrcp.f32 %v1747_v0 }
 0x713   : > { %v1750_v60 = vpop.xlane.xlu0 %1749 }
 0x714   : > { %2867 = vrcp.f32 %v1750_v60 }
 0x71a   : > { %v2866_v45 = vpop.eup %2865 }
 0x71b   : > { %v1753_v26 = vmul.f32 %v2866_v45, %v2862_v37 }
 0x71e   : > { %v2868_v61 = vpop.eup %2867 }
 0x71f   : > { %v1754_v34 = vmul.f32 %v2868_v61, %v2864_v62 }
 0x721   : > { %v2814_v35 = vpack.c.bf16 %v1754_v34, %v1753_v26 }
 0x723   : > { %2816 = vmatprep.subr.msk.bf16.mxu1 %vm3473_vm3, %v2814_v35 }
 0x724   : > { %2819 = vmatpush3.bf16.xpose.msk.msra.mxu1 %vm3473_vm3, %v2814_v35 }
 0x725   : > { %2821 = vmatprep.subr.bf16.mxu1 %v3449_v56 }
 0x72b   : > { %2746 = vmatmul.mubr.msk.f32.vlgmr.msra.gmra.mrb[22].mxu1 %vm1510_vm2, %v3454_v39 }
 0x72c   : > { %2823 = vmatpush3.bf16.msra.mxu1 %v3449_v56 }
 0x72d   : > { %2831 = vmatprep.subr.bf16.mxu1 %v3451_v25 }
 0x733   : > { %v1858_v28 = vpop.trf.xlu0 }
 0x734   : > { %2752 = vmatprep.mubr.msk.f32.mxu1 %vm1138_vm1, %v1858_v28 }
 0x737   : > { %v1859_v1 = vpop.trf.xlu0 }
 0x738   : > { %2753 = vmatmul.mubr.msk.f32.vlgmr.msra.gmra.mrb[24].mxu1 %vm1138_vm1, %v1859_v1 }
 0x739   : > { %2833 = vmatpush3.bf16.msra.mxu1 %v3451_v25  ;;  %2766 = vmatprep.mubr.msk.f32.mxu1 %vm1138_vm1, %v2080_v41 }
 0x73c   : > { %2767 = vmatmul.mubr.msk.f32.vlgmr.msra.gmra.mrb[26].mxu1 %vm1138_vm1, %v2081_v27 }
 0x7fe   : > { %v2747_v3 = vpop.f32.mrb[22].mxu1 }
 0x7ff   : > { %2289 = vst.msk [vmem:[%s3489_s28 + $0x18] sm:$0xff] %vm1138_vm1, %v2747_v3  ;;  %v1833_v56 = vpop.f32.mrb[23].mxu1 }
 0x800   : > { %2288 = vst.msk [vmem:[%s3489_s28 + $0x10] sm:$0xff] %vm1138_vm1, %v1833_v56 }
 0x80b   : > { %v2754_v57 = vpop.f32.mrb[24].mxu1 }
 0x80c   : > { %v1946_v24 = vpop.f32.mrb[25].mxu1  ;;  %v1958_v6 = vsel %vm1510_vm2, %v2754_v57, -inf }
 0x80d   : > { %1959 = vmax.xlane.f32.xlu0 %v1958_v6  ;;  %v1955_v38 = vsel %vm1510_vm2, %v1946_v24, -inf }
 0x80e   : > { %1956 = vmax.xlane.f32.xlu1 %v1955_v38 }
 0x80f   : > { %v2768_v25 = vpop.f32.mrb[26].mxu1 }
 0x810   : > { %v2168_v39 = vpop.f32.mrb[27].mxu1  ;;  %v2180_v40 = vsel %vm1510_vm2, %v2768_v25, -inf }
 0x811   : > { %v2177_v31 = vsel %vm1510_vm2, %v2168_v39, -inf }
 0x812   : > { %2178 = vmax.xlane.f32.xlu1 %v2177_v31 }
 0x816   : > { %2181 = vmax.xlane.f32.xlu1 %v2180_v40 }
 0x89a   : > { %v1960_v48 = vpop.xlane.xlu0 %1959 }
 0x89b   : > { %v1962_v49 = vsub.f32 %v2754_v57, %v1960_v48  ;;  %v1957_v8 = vpop.xlane.xlu1 %1956 }
 0x89c   : > { %v1961_v14 = vsub.f32 %v1946_v24, %v1957_v8 }
 0x89d   : > { %v1965_v15 = vmul.f32 1.442695, %v1962_v49 }
 0x89e   : > { %v1963_v4 = vmul.f32 1.442695, %v1961_v14 }
 0x89f   : > { %2869 = vpow2.f32 %v1965_v15  ;;  %v2179_v5 = vpop.xlane.xlu1 %2178 }
 0x8a0   : > { %v2183_v9 = vsub.f32 %v2168_v39, %v2179_v5  ;;  %2871 = vpow2.f32 %v1963_v4 }
 0x8a2   : > { %v2185_v46 = vmul.f32 1.442695, %v2183_v9 }
 0x8a3   : > { %v2182_v2 = vpop.xlane.xlu1 %2181 }
 0x8a4   : > { %v2184_v10 = vsub.f32 %v2768_v25, %v2182_v2  ;;  %2873 = vpow2.f32 %v2185_v46 }
 0x8a6   : > { %v2187_v29 = vmul.f32 1.442695, %v2184_v10 }
 0x8a8   : > { %2875 = vpow2.f32 %v2187_v29 }
 0x8a9   : > { %v2870_v11 = vpop.eup %2869 }
 0x8aa   : > { %v1970_v22 = vsel %vm1510_vm2, %v2870_v11, 0.0  ;;  %v2872_v12 = vpop.eup %2871 }
 0x8ab   : > { %1971 = vadd.xlane.f32.xlu1 %v1970_v22  ;;  %v1967_v23 = vsel %vm1510_vm2, %v2872_v12, 0.0 }
 0x8ae   : > { %v2874_v30 = vpop.eup %2873 }
 0x8af   : > { %1968 = vadd.xlane.f32.xlu1 %v1967_v23  ;;  %v2189_v13 = vsel %vm1510_vm2, %v2874_v30, 0.0 }
 0x8b2   : > { %v2876_v16 = vpop.eup %2875 }
 0x8b3   : > { %2190 = vadd.xlane.f32.xlu1 %v2189_v13  ;;  %v2192_v19 = vsel %vm1510_vm2, %v2876_v16, 0.0 }
 0x8b7   : > { %2193 = vadd.xlane.f32.xlu1 %v2192_v19 }
 0x938   : > { %v1972_v20 = vpop.xlane.xlu1 %1971 }
 0x939   : > { %2877 = vrcp.f32 %v1972_v20 }
 0x93c   : > { %v1969_v21 = vpop.xlane.xlu1 %1968 }
 0x93d   : > { %2879 = vrcp.f32 %v1969_v21 }
 0x940   : > { %v2191_v42 = vpop.xlane.xlu1 %2190 }
 0x941   : > { %2881 = vrcp.f32 %v2191_v42 }
 0x943   : > { %v2878_v58 = vpop.eup %2877 }
 0x944   : > { %v2194_v55 = vpop.xlane.xlu1 %2193  ;;  %v1976_v50 = vmul.f32 %v2878_v58, %v2870_v11 }
 0x945   : > { %2883 = vrcp.f32 %v2194_v55 }
 0x947   : > { %v2880_v44 = vpop.eup %2879 }
 0x948   : > { %v1975_v47 = vmul.f32 %v2880_v44, %v2872_v12 }
 0x94a   : > { %v2824_v51 = vpack.c.bf16 %v1976_v50, %v1975_v47 }
 0x94b   : > { %v2882_v52 = vpop.eup %2881 }
 0x94c   : > { %2826 = vmatprep.subr.msk.bf16.mxu0 %vm3473_vm3, %v2824_v51  ;;  %v2197_v54 = vmul.f32 %v2882_v52, %v2874_v30 }
 0x94d   : > { %2829 = vmatpush3.bf16.xpose.msk.msra.mxu0 %vm3473_vm3, %v2824_v51 }
 0x94f   : > { %v2884_v53 = vpop.eup %2883 }
 0x950   : > { %v2198_v17 = vmul.f32 %v2884_v53, %v2876_v16 }
 0x952   : > { %v2834_v36 = vpack.c.bf16 %v2198_v17, %v2197_v54 }
 0x954   : > { %2760 = vmatmul.mubr.msk.f32.vlgmr.msra.gmra.mrb[24].mxu0 %vm1510_vm2, %v3456_v7  ;;  %2836 = vmatprep.subr.msk.bf16.mxu0 %vm3473_vm3, %v2834_v36 }
 0x955   : > { %2839 = vmatpush3.bf16.xpose.msk.msra.mxu0 %vm3473_vm3, %v2834_v36  ;;  %2773 = vmatprep.mubr.msk.f32.mxu0 %vm1510_vm2, %v3461_v33 }
 0x95c   : > { %2774 = vmatmul.mubr.msk.f32.vlgmr.msra.gmra.mrb[26].mxu0 %vm1510_vm2, %v3459_v32 }
 0xa27   : > { %v2761_v18 = vpop.f32.mrb[24].mxu0 }
 0xa28   : > { %2291 = vst.msk [vmem:[%s3489_s28 + $0x28] sm:$0xff] %vm1138_vm1, %v2761_v18  ;;  %v2055_v37 = vpop.f32.mrb[25].mxu0 }
 0xa29   : > { %2290 = vst.msk [vmem:[%s3489_s28 + $0x20] sm:$0xff] %vm1138_vm1, %v2055_v37 }
 0xa2f   : > { %v2775_v59 = vpop.f32.mrb[26].mxu0 }
 0xa30   : > { %2293 = vst.msk [vmem:[%s3489_s28 + $0x38] sm:$0xff] %vm1138_vm1, %v2775_v59  ;;  %v2277_v7 = vpop.f32.mrb[27].mxu0 }
 0xa31   : > { %2292 = vst.msk [vmem:[%s3489_s28 + $0x30] sm:$0xff] %vm1138_vm1, %v2277_v7 }
 0xa32 PF: > { %s14_s15 = sadd.s32 1, %s2891_s15  }
 0xa33   : > { %p11_p4 = scmp.ge.s32.totalorder %s14_s15, 4  }
 0xa35   :  { %13 = sbr.rel (!%p11_p4) target bundleno = 1 (0x1), region = 82 }

</bundles_post_ra>
